<compile_context>
chip_gen: v7x
topology: tpu7x:2x2x1
jax: 0.10.0
libtpu: 0.0.40
codegen_flags: <defaults>
</compile_context>

<pallas_src>
import functools

import numpy as np
import jax
import jax.numpy as jnp
from jax import lax
from jax.experimental import pallas as pl
from jax.experimental.pallas import tpu as pltpu

_LANE, _SUBLANE = 128, 8


def _elbo_kernel(rc,
                 gamma_log_ref,            # SMEM (1,1) f32
                 xc_ref,                   # VMEM (TM, D+Dy) f32  [X | b-2y] row tile
                 wm_ref,                   # VMEM (TM, K)   bf16  W_mean row tile
                 wu_ref,                   # VMEM (D, K)    f32   resident
                 off_ref,                  # VMEM (1, K)    f32   resident
                 ww_ref,                   # VMEM (K, K)    bf16  resident
                 xh_ref,                   # VMEM (Dy, D)   f32   resident (X[:Dy])
                 o_ref,                    # VMEM (1, 8, 128) f32 per-split partial
                 wu_s_ref,                 # scratch (D, K)  bf16 sqrt(2*gamma)*Wu
                 v_acc_ref,                # scratch (Dy, K) f32  (b-2y).T @ W_mean
                 t2v_ref):                 # scratch (1, K)  f32  per-column t2 partials
    i = pl.program_id(1)
    n_steps = pl.num_programs(1)
    tm = xc_ref.shape[0]
    d = wu_ref.shape[0]
    k = wu_ref.shape[1]
    dy = xh_ref.shape[0]
    rff_scale = np.float32(np.sqrt(2.0 / k))
    n_chunks = tm // rc

    @pl.when(i == 0)
    def _init():
        gamma = jnp.exp(gamma_log_ref[0, 0])
        wu_s_ref[...] = (wu_ref[...] * jnp.sqrt(2.0 * gamma)).astype(jnp.bfloat16)
        v_acc_ref[...] = jnp.zeros_like(v_acc_ref)
        t2v_ref[...] = jnp.zeros_like(t2v_ref)

    def chunk(c, carry):
        r0 = pl.multiple_of(c * rc, rc)
        xc = xc_ref[pl.ds(r0, rc), :]                        # (rc, d+dy) f32
        x_c = xc[:, :d].astype(jnp.bfloat16)                 # (rc, d)
        cvec = xc[:, d:]                                     # (rc, dy) f32 = b - 2y
        proj = jnp.dot(x_c, wu_s_ref[...],
                       preferred_element_type=jnp.float32)   # (rc, k)
        z = jnp.cos(proj + off_ref[...]) * rff_scale         # (rc, k) f32
        zw = jnp.dot(z.astype(jnp.bfloat16), ww_ref[...],
                     preferred_element_type=jnp.float32)     # (rc, k)
        t2v_ref[...] += jnp.sum(zw * z, axis=0, keepdims=True)

        wm_c = wm_ref[pl.ds(r0, rc), :].astype(jnp.float32)  # (rc, k)
        if dy == 1:
            # VPU broadcast-multiply + sublane reduce (avoids a degenerate
            # (1,rc)@(rc,k) MXU matmul that thrashes MXU weight loads).
            v_acc_ref[...] += jnp.sum(cvec * wm_c, axis=0, keepdims=True)
        elif dy <= 8:
            for dd in range(dy):
                v_acc_ref[dd:dd + 1, :] += jnp.sum(
                    cvec[:, dd:dd + 1] * wm_c, axis=0, keepdims=True)
        else:
            v_acc_ref[...] += lax.dot_general(
                cvec, wm_c, (((0,), (0,)), ((), ())),
                preferred_element_type=jnp.float32)
        return carry

    lax.fori_loop(0, n_chunks, chunk, 0, unroll=True)

    @pl.when(i == n_steps - 1)
    def _finalize():
        # Z[:Dy] recomputed locally from the resident X head rows: each
        # parallel split is fully independent (megacore-safe).
        zh = jnp.cos(
            jnp.dot(xh_ref[...].astype(jnp.bfloat16), wu_s_ref[...],
                    preferred_element_type=jnp.float32) + off_ref[...]) * rff_scale
        partial = jnp.sum(v_acc_ref[...] * zh) + jnp.sum(t2v_ref[...])
        o_ref[...] = jnp.zeros(o_ref.shape, jnp.float32) + partial


def _pad_bytes(rows, cols, itemsize):
    r = -(-rows // _SUBLANE) * _SUBLANE
    c = -(-cols // _LANE) * _LANE
    return r * c * itemsize


def _vmem_budget_bytes():
    # Generation-aware cap: ~3/4 of physical per-core VMEM
    # (v7x 64 MiB -> 48 MiB, v5e/v6e 128 MiB -> 96-100 MiB).
    try:
        cap = int(getattr(pltpu.get_tpu_info(), "vmem_capacity_bytes",
                          128 * 1024 * 1024))
    except Exception:
        cap = 64 * 1024 * 1024  # conservative (v7x per-TensorCore)
    return min((cap * 3) // 4, 100 * 1024 * 1024)


def _plan_grid(N, D, K, Dy, budget):
    """Pick (n_split, steps_per_split, TM, RC, est_bytes) under a VMEM budget.

    n_split is a leading "parallel" grid axis (feeds both TensorCores on v7x,
    sequential/harmless on v5e/v6e).  TM rows are streamed per grid step and
    processed in RC-row sub-chunks inside the kernel.
    """
    def rc_for(tm):
        if tm % 256 == 0 and K <= 1024:
            return 256
        if tm % 128 == 0:
            return 128
        return tm

    def est(tm, rcv):
        resident = 2 * (_pad_bytes(D, K, 4) + _pad_bytes(1, K, 4)
                        + _pad_bytes(K, K, 2) + _pad_bytes(Dy, D, 4))
        scratch = (_pad_bytes(D, K, 2) + _pad_bytes(Dy, K, 4)
                   + _pad_bytes(1, K, 4) + 2 * _pad_bytes(8, 128, 4))
        stream = 2 * (_pad_bytes(tm, D + Dy, 4) + _pad_bytes(tm, K, 2))
        temps = 6 * _pad_bytes(rcv, K, 4)
        return resident + scratch + stream + temps

    fallback = None
    for n_split in (2, 1):
        if N % n_split:
            continue
        rows = N // n_split
        start = (min(rows, 2048) // 128) * 128
        for tm in range(start, 0, -128):
            if rows % tm:
                continue
            rcv = rc_for(tm)
            if est(tm, rcv) <= budget:
                return n_split, rows // tm, tm, rcv, est(tm, rcv)
            fallback = (n_split, rows // tm, tm, rcv, est(tm, rcv))
    if fallback is not None:
        return fallback
    # TODO(synk): pad + mask row tiles for large N with no 128-multiple divisor;
    # for now fall back to a single full-N tile.
    rcv = N if N % 128 else 128
    return 1, 1, N, rcv, est(N, rcv)


def rff_elbo(gamma_log, tau, X, Wu_sel, offset_sel, y, W_mean, WW, b):
    """0.5 * tau * (-2*trace1 + trace2 + trace3) == -L of RFF_optimizer.forward()."""
    X = jnp.asarray(X, jnp.float32)
    y = jnp.asarray(y, jnp.float32).reshape(X.shape[0], -1)
    b = jnp.asarray(b, jnp.float32).reshape(X.shape[0], -1)
    Wu_sel = jnp.asarray(Wu_sel, jnp.float32)
    off2d = jnp.asarray(offset_sel, jnp.float32).reshape(1, -1)
    # Dominant HBM stream + MXU operands in bf16 (store upstream in bf16 where
    # possible; then these casts are no-ops).
    W_mean_b = jnp.asarray(W_mean, jnp.bfloat16)
    WW_b = jnp.asarray(WW, jnp.bfloat16)

    N, D = X.shape
    K = Wu_sel.shape[1]
    Dy = y.shape[1]
    assert b.shape[1] == Dy, "kernel folds (b - 2y); needs Dy == Db"
    assert W_mean_b.shape == (N, K) and WW_b.shape == (K, K)
    assert D + Dy <= _LANE, "X and (b-2y) are packed into one lane-tile"

    # Pack X and (b - 2y) into one stream: the extra Dy columns share the same
    # 128-lane VMEM tile as X, so they are free (no extra DMA / VMEM).
    xc = jnp.concatenate([X, b - 2.0 * y], axis=1)           # (N, D+Dy) f32
    x_head = X[:Dy, :]                                        # rows feeding Z[:Dy]

    budget = _vmem_budget_bytes()
    n_split, steps, TM, RC, est = _plan_grid(N, D, K, Dy, budget)
    vmem_limit = int(min(max(int(1.5 * est), 16 * 1024 * 1024), budget))

    cost = pl.CostEstimate(
        flops=int(N * (2 * D * K + 2 * K * K + 2 * Dy * K + 4 * K)),
        transcendentals=int((N + n_split * Dy) * K),
        bytes_accessed=int(4 * N * (D + Dy) + 2 * N * K + 4 * D * K + 4 * K
                           + 2 * K * K + 4 * Dy * D + 4 * n_split * 8 * 128),
    )

    def build(single_buffer_residents):
        def res_spec(shape):
            if single_buffer_residents:
                return pl.BlockSpec(shape, lambda *_: (0,) * len(shape),
                                    pipeline_mode=pl.Buffered(1))
            return pl.BlockSpec(shape, lambda *_: (0,) * len(shape))

        in_specs = [
            pl.BlockSpec(memory_space=pltpu.MemorySpace.SMEM),             # gamma_log
            pl.BlockSpec((TM, D + Dy), lambda s, i: (s * steps + i, 0)),   # [X | b-2y]
            pl.BlockSpec((TM, K), lambda s, i: (s * steps + i, 0)),        # W_mean
            res_spec((D, K)),                                              # Wu
            res_spec((1, K)),                                              # offset
            res_spec((K, K)),                                              # WW
            res_spec((Dy, D)),                                             # X[:Dy]
        ]
        return pl.pallas_call(
            functools.partial(_elbo_kernel, RC),
            out_shape=jax.ShapeDtypeStruct((n_split, 8, 128), jnp.float32),
            grid=(n_split, steps),
            in_specs=in_specs,
            out_specs=pl.BlockSpec((1, 8, 128), lambda s, i: (s, 0, 0)),
            scratch_shapes=[pltpu.VMEM((D, K), jnp.bfloat16),
                            pltpu.VMEM((Dy, K), jnp.float32),
                            pltpu.VMEM((1, K), jnp.float32)],
            compiler_params=pltpu.CompilerParams(
                dimension_semantics=("parallel", "arbitrary"),
                vmem_limit_bytes=vmem_limit),
            cost_estimate=cost,
        )

    args = (jnp.asarray(gamma_log, jnp.float32).reshape(1, 1),
            xc, W_mean_b, Wu_sel, off2d, WW_b, x_head)
    try:
        parts = build(True)(*args)
    except Exception:
        # Fallback for Pallas versions without single-buffer pipeline hints.
        parts = build(False)(*args)

    return 0.5 * jnp.asarray(tau, jnp.float32) * jnp.sum(parts[:, 0, 0])


if __name__ == "__main__":
    # Small shapes consistent with the module: N data points, D features,
    # K = n_components random Fourier features, y/b are Nx1.
    N, D, K, Dy = 256, 8, 128, 1

    key = jax.random.PRNGKey(0)
    ks = jax.random.split(key, 8)

    # Deterministic "module state" (mirrors __init__ / sgd_step arguments).
    X = jax.random.normal(ks[0], (N, D), jnp.float32)
    y = jax.random.normal(ks[1], (N, Dy), jnp.float32)
    Wu = jax.random.normal(ks[2], (D, K), jnp.float32)                       # random_weights_unscaled_
    offset = jax.random.uniform(ks[3], (K,), jnp.float32, 0.0, 2.0 * np.pi)  # random_offset_
    W_mean = jax.random.normal(ks[4], (N, K), jnp.float32)
    WW = jax.random.normal(ks[5], (K, K), jnp.float32)
    b = jax.random.normal(ks[6], (N, Dy), jnp.float32)
    tau = jnp.float32(0.7)
    gamma_log = jnp.asarray(np.log(1.0), jnp.float32)                        # the nn.Parameter

    input_idx = jax.random.permutation(ks[7], K)
    # glue: column gather of the selected components (parameter setup, not hot path)
    Wu_sel = jnp.take(Wu, input_idx[:K], axis=1)
    offset_sel = jnp.take(offset, input_idx[:K])

    out = jax.block_until_ready(
        rff_elbo(gamma_log, tau, X, Wu_sel, offset_sel, y, W_mean, WW, b)
    )

    rff_scale = np.float32(np.sqrt(2.0 / K))
    w_scale = jnp.sqrt(2.0 * jnp.exp(gamma_log))

    with jax.default_matmul_precision("float32"):
        # (1) plain-f32 reference of the exact torch forward (full N x N A).
        Zf = jnp.cos(X @ (w_scale * Wu_sel) + offset_sel[None, :]) * rff_scale
        A = W_mean @ Zf.T
        t1 = jnp.trace(y.T @ A)
        t2 = jnp.trace(WW @ (Zf.T @ Zf))
        t3 = jnp.trace(b.T @ A)
        ref_f32 = 0.5 * tau * (-2.0 * t1 + t2 + t3)

        # (2) "matched" reference with the same bf16 casts the kernel uses.
        wu_sb = (Wu_sel * w_scale).astype(jnp.bfloat16)
        projm = jnp.dot(X.astype(jnp.bfloat16), wu_sb,
                        preferred_element_type=jnp.float32)
        Zm = jnp.cos(projm + offset_sel[None, :]) * rff_scale
        zw_m = jnp.dot(Zm.astype(jnp.bfloat16), WW.astype(jnp.bfloat16),
                       preferred_element_type=jnp.float32)
        t2m = jnp.sum(zw_m * Zm)
        Wm_b = W_mean.astype(jnp.bfloat16).astype(jnp.float32)
        vacc_m = jnp.dot((b - 2.0 * y).T, Wm_b, preferred_element_type=jnp.float32)
        t13m = jnp.sum(vacc_m * Zm[:Dy, :])
        ref_match = 0.5 * tau * (t13m + t2m)

    out_np = np.asarray(out)
    ref_np = np.asarray(ref_f32)
    refm_np = np.asarray(ref_match)

    # Tight check vs the bf16-matched reference (same arithmetic as the kernel).
    assert np.allclose(out_np, refm_np, rtol=5e-3, atol=5e-2), (out_np, refm_np)
    # Loose check vs the pure-f32 reference (expected bf16 drift ~<1-3%).
    assert np.allclose(out_np, ref_np, rtol=5e-2, atol=2.0), (out_np, ref_np)
    print("KERNEL_OK")
</pallas_src>

<mosaic_0001>
module attributes {stable_mosaic.version = 11 : i64} {
  func.func @_elbo_kernel(%arg0: i32, %arg1: i32, %arg2: memref<1x1xf32, #tpu.memory_space<smem>>, %arg3: memref<128x9xf32, #tpu.memory_space<vmem>>, %arg4: memref<128x128xbf16, #tpu.memory_space<vmem>>, %arg5: memref<8x128xf32, #tpu.memory_space<vmem>>, %arg6: memref<1x128xf32, #tpu.memory_space<vmem>>, %arg7: memref<128x128xbf16, #tpu.memory_space<vmem>>, %arg8: memref<1x8xf32, #tpu.memory_space<vmem>>, %arg9: memref<1x8x128xf32, #tpu.memory_space<vmem>>, %arg10: memref<8x128xbf16, #tpu.memory_space<vmem>>, %arg11: memref<1x128xf32, #tpu.memory_space<vmem>>, %arg12: memref<1x128xf32, #tpu.memory_space<vmem>>) attributes {dimension_semantics = [#tpu.dimension_semantics<parallel>, #tpu.dimension_semantics<arbitrary>], iteration_bounds = array<i64: 2, 1>, scalar_prefetch = 0 : i64, scratch_operands = 3 : i64, tpu.core_type = #tpu.core_type<tc>, window_params = [{transform_indices = @transform_0, window_bounds = array<i64: 1, 1>}, {transform_indices = @transform_1, window_bounds = array<i64: 128, 9>}, {transform_indices = @transform_2, window_bounds = array<i64: 128, 128>}, {pipeline_mode = #tpu.pipeline_mode<synchronous>, transform_indices = @transform_3, window_bounds = array<i64: 8, 128>}, {pipeline_mode = #tpu.pipeline_mode<synchronous>, transform_indices = @transform_4, window_bounds = array<i64: 1, 128>}, {pipeline_mode = #tpu.pipeline_mode<synchronous>, transform_indices = @transform_5, window_bounds = array<i64: 128, 128>}, {pipeline_mode = #tpu.pipeline_mode<synchronous>, transform_indices = @transform_6, window_bounds = array<i64: 1, 8>}, {transform_indices = @transform_7, window_bounds = array<i64: 1, 8, 128>}]} {
    %c0_i32 = arith.constant 0 : i32
    %0 = arith.cmpi eq, %arg1, %c0_i32 : i32
    %1 = arith.extui %0 : i1 to i32
    %c0_i32_0 = arith.constant 0 : i32
    %2 = arith.cmpi ne, %1, %c0_i32_0 : i32
    scf.if %2 {
      %c0_23 = arith.constant 0 : index
      %c0_24 = arith.constant 0 : index
      %40 = memref.load %arg2[%c0_23, %c0_24] : memref<1x1xf32, #tpu.memory_space<smem>>
      %41 = math.exp %40 : f32
      %c0_25 = arith.constant 0 : index
      %c0_26 = arith.constant 0 : index
      %42 = vector.load %arg5[%c0_25, %c0_26] : memref<8x128xf32, #tpu.memory_space<vmem>>, vector<8x128xf32>
      %cst_27 = arith.constant 2.000000e+00 : f32
      %43 = arith.mulf %cst_27, %41 : f32
      %44 = math.sqrt %43 : f32
      %45 = vector.broadcast %44 : f32 to vector<8x128xf32>
      %46 = arith.mulf %42, %45 : vector<8x128xf32>
      %47 = arith.truncf %46 : vector<8x128xf32> to vector<8x128xbf16>
      %c0_28 = arith.constant 0 : index
      %c0_29 = arith.constant 0 : index
      %48 = vector.load %arg10[%c0_28, %c0_29] : memref<8x128xbf16, #tpu.memory_space<vmem>>, vector<8x128xbf16>
      tpu.vector_store %arg10[%c0_28, %c0_29], %47 {strides = array<i32>} : memref<8x128xbf16, #tpu.memory_space<vmem>>, vector<8x128xbf16>,
      %cst_30 = arith.constant 0.000000e+00 : f32
      %49 = vector.broadcast %cst_30 : f32 to vector<1x128xf32>
      %c0_31 = arith.constant 0 : index
      %c0_32 = arith.constant 0 : index
      %50 = vector.load %arg11[%c0_31, %c0_32] : memref<1x128xf32, #tpu.memory_space<vmem>>, vector<1x128xf32>
      tpu.vector_store %arg11[%c0_31, %c0_32], %49 {strides = array<i32>} : memref<1x128xf32, #tpu.memory_space<vmem>>, vector<1x128xf32>,
      %cst_33 = arith.constant 0.000000e+00 : f32
      %51 = vector.broadcast %cst_33 : f32 to vector<1x128xf32>
      %c0_34 = arith.constant 0 : index
      %c0_35 = arith.constant 0 : index
      %52 = vector.load %arg12[%c0_34, %c0_35] : memref<1x128xf32, #tpu.memory_space<vmem>>, vector<1x128xf32>
      tpu.vector_store %arg12[%c0_34, %c0_35], %51 {strides = array<i32>} : memref<1x128xf32, #tpu.memory_space<vmem>>, vector<1x128xf32>,
    } else {
    }
    %c0_i32_1 = arith.constant 0 : i32
    %c128_i32 = arith.constant 128 : i32
    %3 = arith.muli %c0_i32_1, %c128_i32 : i32
    %4 = tpu.assume_multiple %3, 128 : i32
    %5 = arith.index_cast %4 : i32 to index
    %c0 = arith.constant 0 : index
    %6 = vector.load %arg3[%5, %c0] : memref<128x9xf32, #tpu.memory_space<vmem>>, vector<128x9xf32>
    %7 = vector.extract_strided_slice %6 {offsets = [0, 0], sizes = [128, 8], strides = [1, 1]} : vector<128x9xf32> to vector<128x8xf32>
    %8 = arith.truncf %7 : vector<128x8xf32> to vector<128x8xbf16>
    %9 = vector.extract_strided_slice %6 {offsets = [0, 8], sizes = [128, 1], strides = [1, 1]} : vector<128x9xf32> to vector<128x1xf32>
    %c0_2 = arith.constant 0 : index
    %c0_3 = arith.constant 0 : index
    %10 = vector.load %arg10[%c0_2, %c0_3] : memref<8x128xbf16, #tpu.memory_space<vmem>>, vector<8x128xbf16>
    %cst = arith.constant dense<0.000000e+00> : vector<128x128xf32>
    %11 = tpu.matmul %8, %10, %cst {dimension_numbers = #tpu.dot_dimension_numbers<[1], [0], [0], [1], [0, 0, 1, 1], [], []>} : vector<128x8xbf16>, vector<8x128xbf16>, vector<128x128xf32> -> vector<128x128xf32>
    %c0_4 = arith.constant 0 : index
    %c0_5 = arith.constant 0 : index
    %12 = vector.load %arg6[%c0_4, %c0_5] : memref<1x128xf32, #tpu.memory_space<vmem>>, vector<1x128xf32>
    %13 = vector.broadcast %12 : vector<1x128xf32> to vector<128x128xf32>
    %14 = arith.addf %11, %13 : vector<128x128xf32>
    %15 = math.cos %14 : vector<128x128xf32>
    %cst_6 = arith.constant 1.250000e-01 : f32
    %16 = vector.broadcast %cst_6 : f32 to vector<128x128xf32>
    %17 = arith.mulf %15, %16 : vector<128x128xf32>
    %18 = arith.truncf %17 : vector<128x128xf32> to vector<128x128xbf16>
    %c0_7 = arith.constant 0 : index
    %c0_8 = arith.constant 0 : index
    %19 = vector.load %arg7[%c0_7, %c0_8] : memref<128x128xbf16, #tpu.memory_space<vmem>>, vector<128x128xbf16>
    %cst_9 = arith.constant dense<0.000000e+00> : vector<128x128xf32>
    %20 = tpu.matmul %18, %19, %cst_9 {dimension_numbers = #tpu.dot_dimension_numbers<[1], [0], [0], [1], [0, 0, 1, 1], [], []>} : vector<128x128xbf16>, vector<128x128xbf16>, vector<128x128xf32> -> vector<128x128xf32>
    %c0_10 = arith.constant 0 : index
    %c0_11 = arith.constant 0 : index
    %21 = vector.load %arg12[%c0_10, %c0_11] : memref<1x128xf32, #tpu.memory_space<vmem>>, vector<1x128xf32>
    %22 = arith.mulf %20, %17 : vector<128x128xf32>
    %cst_12 = arith.constant dense<0.000000e+00> : vector<128xf32>
    %23 = vector.multi_reduction <add>, %22, %cst_12 [0] : vector<128x128xf32> to vector<128xf32>
    %24 = vector.shape_cast %23 : vector<128xf32> to vector<1x128xf32>
    %25 = arith.addf %21, %24 : vector<1x128xf32>
    %c0_13 = arith.constant 0 : index
    %c0_14 = arith.constant 0 : index
    %26 = vector.load %arg12[%c0_13, %c0_14] : memref<1x128xf32, #tpu.memory_space<vmem>>, vector<1x128xf32>
    tpu.vector_store %arg12[%c0_13, %c0_14], %25 {strides = array<i32>} : memref<1x128xf32, #tpu.memory_space<vmem>>, vector<1x128xf32>,
    %27 = arith.index_cast %4 : i32 to index
    %c0_15 = arith.constant 0 : index
    %28 = vector.load %arg4[%27, %c0_15] : memref<128x128xbf16, #tpu.memory_space<vmem>>, vector<128x128xbf16>
    %29 = arith.extf %28 : vector<128x128xbf16> to vector<128x128xf32>
    %c0_16 = arith.constant 0 : index
    %c0_17 = arith.constant 0 : index
    %30 = vector.load %arg11[%c0_16, %c0_17] : memref<1x128xf32, #tpu.memory_space<vmem>>, vector<1x128xf32>
    %31 = vector.broadcast %9 : vector<128x1xf32> to vector<128x128xf32>
    %32 = arith.mulf %31, %29 : vector<128x128xf32>
    %cst_18 = arith.constant dense<0.000000e+00> : vector<128xf32>
    %33 = vector.multi_reduction <add>, %32, %cst_18 [0] : vector<128x128xf32> to vector<128xf32>
    %34 = vector.shape_cast %33 : vector<128xf32> to vector<1x128xf32>
    %35 = arith.addf %30, %34 : vector<1x128xf32>
    %c0_19 = arith.constant 0 : index
    %c0_20 = arith.constant 0 : index
    %36 = vector.load %arg11[%c0_19, %c0_20] : memref<1x128xf32, #tpu.memory_space<vmem>>, vector<1x128xf32>
    tpu.vector_store %arg11[%c0_19, %c0_20], %35 {strides = array<i32>} : memref<1x128xf32, #tpu.memory_space<vmem>>, vector<1x128xf32>,
    %c1_i32 = arith.constant 1 : i32
    %c0_i32_21 = arith.constant 0 : i32
    %37 = arith.cmpi eq, %arg1, %c0_i32_21 : i32
    %38 = arith.extui %37 : i1 to i32
    %c0_i32_22 = arith.constant 0 : i32
    %39 = arith.cmpi ne, %38, %c0_i32_22 : i32
    scf.if %39 {
      %c0_23 = arith.constant 0 : index
      %c0_24 = arith.constant 0 : index
      %40 = vector.load %arg8[%c0_23, %c0_24] : memref<1x8xf32, #tpu.memory_space<vmem>>, vector<1x8xf32>
      %41 = arith.truncf %40 : vector<1x8xf32> to vector<1x8xbf16>
      %c0_25 = arith.constant 0 : index
      %c0_26 = arith.constant 0 : index
      %42 = vector.load %arg10[%c0_25, %c0_26] : memref<8x128xbf16, #tpu.memory_space<vmem>>, vector<8x128xbf16>
      %cst_27 = arith.constant dense<0.000000e+00> : vector<1x128xf32>
      %43 = tpu.matmul %41, %42, %cst_27 {dimension_numbers = #tpu.dot_dimension_numbers<[1], [0], [0], [1], [0, 0, 1, 1], [], []>} : vector<1x8xbf16>, vector<8x128xbf16>, vector<1x128xf32> -> vector<1x128xf32>
      %c0_28 = arith.constant 0 : index
      %c0_29 = arith.constant 0 : index
      %44 = vector.load %arg6[%c0_28, %c0_29] : memref<1x128xf32, #tpu.memory_space<vmem>>, vector<1x128xf32>
      %45 = arith.addf %43, %44 : vector<1x128xf32>
      %46 = math.cos %45 : vector<1x128xf32>
      %cst_30 = arith.constant 1.250000e-01 : f32
      %47 = vector.broadcast %cst_30 : f32 to vector<1x128xf32>
      %48 = arith.mulf %46, %47 : vector<1x128xf32>
      %c0_31 = arith.constant 0 : index
      %c0_32 = arith.constant 0 : index
      %49 = vector.load %arg11[%c0_31, %c0_32] : memref<1x128xf32, #tpu.memory_space<vmem>>, vector<1x128xf32>
      %50 = arith.mulf %49, %48 : vector<1x128xf32>
      %51 = vector.shape_cast %50 : vector<1x128xf32> to vector<1x1x128xf32>
      %cst_33 = arith.constant dense<0.000000e+00> : vector<1xf32>
      %52 = vector.multi_reduction <add>, %51, %cst_33 [1, 2] : vector<1x1x128xf32> to vector<1xf32>
      %53 = vector.shape_cast %52 : vector<1xf32> to vector<1x1x1xf32>
      %54 = vector.extract %53[0, 0, 0] : f32 from vector<1x1x1xf32>
      %c0_34 = arith.constant 0 : index
      %c0_35 = arith.constant 0 : index
      %55 = vector.load %arg12[%c0_34, %c0_35] : memref<1x128xf32, #tpu.memory_space<vmem>>, vector<1x128xf32>
      %56 = vector.shape_cast %55 : vector<1x128xf32> to vector<1x1x128xf32>
      %cst_36 = arith.constant dense<0.000000e+00> : vector<1xf32>
      %57 = vector.multi_reduction <add>, %56, %cst_36 [1, 2] : vector<1x1x128xf32> to vector<1xf32>
      %58 = vector.shape_cast %57 : vector<1xf32> to vector<1x1x1xf32>
      %59 = vector.extract %58[0, 0, 0] : f32 from vector<1x1x1xf32>
      %60 = arith.addf %54, %59 : f32
      %cst_37 = arith.constant 0.000000e+00 : f32
      %61 = vector.broadcast %cst_37 : f32 to vector<1x8x128xf32>
      %62 = vector.broadcast %60 : f32 to vector<1x8x128xf32>
      %63 = arith.addf %61, %62 : vector<1x8x128xf32>
      %c0_38 = arith.constant 0 : index
      %c0_39 = arith.constant 0 : index
      %c0_40 = arith.constant 0 : index
      %64 = vector.load %arg9[%c0_38, %c0_39, %c0_40] : memref<1x8x128xf32, #tpu.memory_space<vmem>>, vector<1x8x128xf32>
      tpu.vector_store %arg9[%c0_38, %c0_39, %c0_40], %63 {strides = array<i32>} : memref<1x8x128xf32, #tpu.memory_space<vmem>>, vector<1x8x128xf32>,
    } else {
    }
    return
  }
  func.func @transform_0(%arg0: i32, %arg1: i32) -> (i32, i32) {
    %c0_i32 = arith.constant 0 : i32
    %c0_i32_0 = arith.constant 0 : i32
    %c0_i32_1 = arith.constant 0 : i32
    return %c0_i32, %c0_i32_0 : i32, i32
  }
  func.func @transform_1(%arg0: i32, %arg1: i32) -> (i32, i32) {
    %c1_i32 = arith.constant 1 : i32
    %0 = arith.muli %arg0, %c1_i32 : i32
    %1 = arith.addi %0, %arg1 : i32
    %c0_i32 = arith.constant 0 : i32
    %c0_i32_0 = arith.constant 0 : i32
    return %1, %c0_i32 : i32, i32
  }
  func.func @transform_2(%arg0: i32, %arg1: i32) -> (i32, i32) {
    %c1_i32 = arith.constant 1 : i32
    %0 = arith.muli %arg0, %c1_i32 : i32
    %1 = arith.addi %0, %arg1 : i32
    %c0_i32 = arith.constant 0 : i32
    %c0_i32_0 = arith.constant 0 : i32
    return %1, %c0_i32 : i32, i32
  }
  func.func @transform_3(%arg0: i32, %arg1: i32) -> (i32, i32) {
    %c0_i32 = arith.constant 0 : i32
    %c0_i32_0 = arith.constant 0 : i32
    %c0_i32_1 = arith.constant 0 : i32
    return %c0_i32, %c0_i32_0 : i32, i32
  }
  func.func @transform_4(%arg0: i32, %arg1: i32) -> (i32, i32) {
    %c0_i32 = arith.constant 0 : i32
    %c0_i32_0 = arith.constant 0 : i32
    %c0_i32_1 = arith.constant 0 : i32
    return %c0_i32, %c0_i32_0 : i32, i32
  }
  func.func @transform_5(%arg0: i32, %arg1: i32) -> (i32, i32) {
    %c0_i32 = arith.constant 0 : i32
    %c0_i32_0 = arith.constant 0 : i32
    %c0_i32_1 = arith.constant 0 : i32
    return %c0_i32, %c0_i32_0 : i32, i32
  }
  func.func @transform_6(%arg0: i32, %arg1: i32) -> (i32, i32) {
    %c0_i32 = arith.constant 0 : i32
    %c0_i32_0 = arith.constant 0 : i32
    %c0_i32_1 = arith.constant 0 : i32
    return %c0_i32, %c0_i32_0 : i32, i32
  }
  func.func @transform_7(%arg0: i32, %arg1: i32) -> (i32, i32, i32) {
    %c0_i32 = arith.constant 0 : i32
    %c0_i32_0 = arith.constant 0 : i32
    %c0_i32_1 = arith.constant 0 : i32
    return %arg0, %c0_i32, %c0_i32_0 : i32, i32, i32
  }
}

module attributes {stable_mosaic.version = 11 : i64} {
  func.func @_elbo_kernel(%arg0: i32, %arg1: i32, %arg2: memref<1x1xf32, #tpu.memory_space<smem>>, %arg3: memref<128x9xf32, #tpu.memory_space<vmem>>, %arg4: memref<128x128xbf16, #tpu.memory_space<vmem>>, %arg5: memref<8x128xf32, #tpu.memory_space<vmem>>, %arg6: memref<1x128xf32, #tpu.memory_space<vmem>>, %arg7: memref<128x128xbf16, #tpu.memory_space<vmem>>, %arg8: memref<1x8xf32, #tpu.memory_space<vmem>>, %arg9: memref<1x8x128xf32, #tpu.memory_space<vmem>>, %arg10: memref<8x128xbf16, #tpu.memory_space<vmem>>, %arg11: memref<1x128xf32, #tpu.memory_space<vmem>>, %arg12: memref<1x128xf32, #tpu.memory_space<vmem>>) attributes {dimension_semantics = [#tpu.dimension_semantics<parallel>, #tpu.dimension_semantics<arbitrary>], iteration_bounds = array<i64: 2, 1>, scalar_prefetch = 0 : i64, scratch_operands = 3 : i64, tpu.core_type = #tpu.core_type<tc>, window_params = [{transform_indices = @transform_0, window_bounds = array<i64: 1, 1>}, {transform_indices = @transform_1, window_bounds = array<i64: 128, 9>}, {transform_indices = @transform_2, window_bounds = array<i64: 128, 128>}, {pipeline_mode = #tpu.pipeline_mode<synchronous>, transform_indices = @transform_3, window_bounds = array<i64: 8, 128>}, {pipeline_mode = #tpu.pipeline_mode<synchronous>, transform_indices = @transform_4, window_bounds = array<i64: 1, 128>}, {pipeline_mode = #tpu.pipeline_mode<synchronous>, transform_indices = @transform_5, window_bounds = array<i64: 128, 128>}, {pipeline_mode = #tpu.pipeline_mode<synchronous>, transform_indices = @transform_6, window_bounds = array<i64: 1, 8>}, {transform_indices = @transform_7, window_bounds = array<i64: 1, 8, 128>}]} {
    %c0_i32 = arith.constant 0 : i32
    %0 = arith.cmpi eq, %arg1, %c0_i32 : i32
    %1 = arith.extui %0 : i1 to i32
    %c0_i32_0 = arith.constant 0 : i32
    %2 = arith.cmpi ne, %1, %c0_i32_0 : i32
    scf.if %2 {
      %c0_23 = arith.constant 0 : index
      %c0_24 = arith.constant 0 : index
      %40 = memref.load %arg2[%c0_23, %c0_24] : memref<1x1xf32, #tpu.memory_space<smem>>
      %41 = math.exp %40 : f32
      %c0_25 = arith.constant 0 : index
      %c0_26 = arith.constant 0 : index
      %42 = vector.load %arg5[%c0_25, %c0_26] : memref<8x128xf32, #tpu.memory_space<vmem>>, vector<8x128xf32>
      %cst_27 = arith.constant 2.000000e+00 : f32
      %43 = arith.mulf %cst_27, %41 : f32
      %44 = math.sqrt %43 : f32
      %45 = vector.broadcast %44 : f32 to vector<8x128xf32>
      %46 = arith.mulf %42, %45 : vector<8x128xf32>
      %47 = arith.truncf %46 : vector<8x128xf32> to vector<8x128xbf16>
      %c0_28 = arith.constant 0 : index
      %c0_29 = arith.constant 0 : index
      %48 = vector.load %arg10[%c0_28, %c0_29] : memref<8x128xbf16, #tpu.memory_space<vmem>>, vector<8x128xbf16>
      tpu.vector_store %arg10[%c0_28, %c0_29], %47 {strides = array<i32>} : memref<8x128xbf16, #tpu.memory_space<vmem>>, vector<8x128xbf16>,
      %cst_30 = arith.constant 0.000000e+00 : f32
      %49 = vector.broadcast %cst_30 : f32 to vector<1x128xf32>
      %c0_31 = arith.constant 0 : index
      %c0_32 = arith.constant 0 : index
      %50 = vector.load %arg11[%c0_31, %c0_32] : memref<1x128xf32, #tpu.memory_space<vmem>>, vector<1x128xf32>
      tpu.vector_store %arg11[%c0_31, %c0_32], %49 {strides = array<i32>} : memref<1x128xf32, #tpu.memory_space<vmem>>, vector<1x128xf32>,
      %cst_33 = arith.constant 0.000000e+00 : f32
      %51 = vector.broadcast %cst_33 : f32 to vector<1x128xf32>
      %c0_34 = arith.constant 0 : index
      %c0_35 = arith.constant 0 : index
      %52 = vector.load %arg12[%c0_34, %c0_35] : memref<1x128xf32, #tpu.memory_space<vmem>>, vector<1x128xf32>
      tpu.vector_store %arg12[%c0_34, %c0_35], %51 {strides = array<i32>} : memref<1x128xf32, #tpu.memory_space<vmem>>, vector<1x128xf32>,
    } else {
    }
    %c0_i32_1 = arith.constant 0 : i32
    %c128_i32 = arith.constant 128 : i32
    %3 = arith.muli %c0_i32_1, %c128_i32 : i32
    %4 = tpu.assume_multiple %3, 128 : i32
    %5 = arith.index_cast %4 : i32 to index
    %c0 = arith.constant 0 : index
    %6 = vector.load %arg3[%5, %c0] : memref<128x9xf32, #tpu.memory_space<vmem>>, vector<128x9xf32>
    %7 = vector.extract_strided_slice %6 {offsets = [0, 0], sizes = [128, 8], strides = [1, 1]} : vector<128x9xf32> to vector<128x8xf32>
    %8 = arith.truncf %7 : vector<128x8xf32> to vector<128x8xbf16>
    %9 = vector.extract_strided_slice %6 {offsets = [0, 8], sizes = [128, 1], strides = [1, 1]} : vector<128x9xf32> to vector<128x1xf32>
    %c0_2 = arith.constant 0 : index
    %c0_3 = arith.constant 0 : index
    %10 = vector.load %arg10[%c0_2, %c0_3] : memref<8x128xbf16, #tpu.memory_space<vmem>>, vector<8x128xbf16>
    %cst = arith.constant dense<0.000000e+00> : vector<128x128xf32>
    %11 = tpu.matmul %8, %10, %cst {dimension_numbers = #tpu.dot_dimension_numbers<[1], [0], [0], [1], [0, 0, 1, 1], [], []>} : vector<128x8xbf16>, vector<8x128xbf16>, vector<128x128xf32> -> vector<128x128xf32>
    %c0_4 = arith.constant 0 : index
    %c0_5 = arith.constant 0 : index
    %12 = vector.load %arg6[%c0_4, %c0_5] : memref<1x128xf32, #tpu.memory_space<vmem>>, vector<1x128xf32>
    %13 = vector.broadcast %12 : vector<1x128xf32> to vector<128x128xf32>
    %14 = arith.addf %11, %13 : vector<128x128xf32>
    %15 = math.cos %14 : vector<128x128xf32>
    %cst_6 = arith.constant 1.250000e-01 : f32
    %16 = vector.broadcast %cst_6 : f32 to vector<128x128xf32>
    %17 = arith.mulf %15, %16 : vector<128x128xf32>
    %18 = arith.truncf %17 : vector<128x128xf32> to vector<128x128xbf16>
    %c0_7 = arith.constant 0 : index
    %c0_8 = arith.constant 0 : index
    %19 = vector.load %arg7[%c0_7, %c0_8] : memref<128x128xbf16, #tpu.memory_space<vmem>>, vector<128x128xbf16>
    %cst_9 = arith.constant dense<0.000000e+00> : vector<128x128xf32>
    %20 = tpu.matmul %18, %19, %cst_9 {dimension_numbers = #tpu.dot_dimension_numbers<[1], [0], [0], [1], [0, 0, 1, 1], [], []>} : vector<128x128xbf16>, vector<128x128xbf16>, vector<128x128xf32> -> vector<128x128xf32>
    %c0_10 = arith.constant 0 : index
    %c0_11 = arith.constant 0 : index
    %21 = vector.load %arg12[%c0_10, %c0_11] : memref<1x128xf32, #tpu.memory_space<vmem>>, vector<1x128xf32>
    %22 = arith.mulf %20, %17 : vector<128x128xf32>
    %cst_12 = arith.constant dense<0.000000e+00> : vector<128xf32>
    %23 = vector.multi_reduction <add>, %22, %cst_12 [0] : vector<128x128xf32> to vector<128xf32>
    %24 = vector.shape_cast %23 : vector<128xf32> to vector<1x128xf32>
    %25 = arith.addf %21, %24 : vector<1x128xf32>
    %c0_13 = arith.constant 0 : index
    %c0_14 = arith.constant 0 : index
    %26 = vector.load %arg12[%c0_13, %c0_14] : memref<1x128xf32, #tpu.memory_space<vmem>>, vector<1x128xf32>
    tpu.vector_store %arg12[%c0_13, %c0_14], %25 {strides = array<i32>} : memref<1x128xf32, #tpu.memory_space<vmem>>, vector<1x128xf32>,
    %27 = arith.index_cast %4 : i32 to index
    %c0_15 = arith.constant 0 : index
    %28 = vector.load %arg4[%27, %c0_15] : memref<128x128xbf16, #tpu.memory_space<vmem>>, vector<128x128xbf16>
    %29 = arith.extf %28 : vector<128x128xbf16> to vector<128x128xf32>
    %c0_16 = arith.constant 0 : index
    %c0_17 = arith.constant 0 : index
    %30 = vector.load %arg11[%c0_16, %c0_17] : memref<1x128xf32, #tpu.memory_space<vmem>>, vector<1x128xf32>
    %31 = vector.broadcast %9 : vector<128x1xf32> to vector<128x128xf32>
    %32 = arith.mulf %31, %29 : vector<128x128xf32>
    %cst_18 = arith.constant dense<0.000000e+00> : vector<128xf32>
    %33 = vector.multi_reduction <add>, %32, %cst_18 [0] : vector<128x128xf32> to vector<128xf32>
    %34 = vector.shape_cast %33 : vector<128xf32> to vector<1x128xf32>
    %35 = arith.addf %30, %34 : vector<1x128xf32>
    %c0_19 = arith.constant 0 : index
    %c0_20 = arith.constant 0 : index
    %36 = vector.load %arg11[%c0_19, %c0_20] : memref<1x128xf32, #tpu.memory_space<vmem>>, vector<1x128xf32>
    tpu.vector_store %arg11[%c0_19, %c0_20], %35 {strides = array<i32>} : memref<1x128xf32, #tpu.memory_space<vmem>>, vector<1x128xf32>,
    %c1_i32 = arith.constant 1 : i32
    %c0_i32_21 = arith.constant 0 : i32
    %37 = arith.cmpi eq, %arg1, %c0_i32_21 : i32
    %38 = arith.extui %37 : i1 to i32
    %c0_i32_22 = arith.constant 0 : i32
    %39 = arith.cmpi ne, %38, %c0_i32_22 : i32
    scf.if %39 {
      %c0_23 = arith.constant 0 : index
      %c0_24 = arith.constant 0 : index
      %40 = vector.load %arg8[%c0_23, %c0_24] : memref<1x8xf32, #tpu.memory_space<vmem>>, vector<1x8xf32>
      %41 = arith.truncf %40 : vector<1x8xf32> to vector<1x8xbf16>
      %c0_25 = arith.constant 0 : index
      %c0_26 = arith.constant 0 : index
      %42 = vector.load %arg10[%c0_25, %c0_26] : memref<8x128xbf16, #tpu.memory_space<vmem>>, vector<8x128xbf16>
      %cst_27 = arith.constant dense<0.000000e+00> : vector<1x128xf32>
      %43 = tpu.matmul %41, %42, %cst_27 {dimension_numbers = #tpu.dot_dimension_numbers<[1], [0], [0], [1], [0, 0, 1, 1], [], []>} : vector<1x8xbf16>, vector<8x128xbf16>, vector<1x128xf32> -> vector<1x128xf32>
      %c0_28 = arith.constant 0 : index
      %c0_29 = arith.constant 0 : index
      %44 = vector.load %arg6[%c0_28, %c0_29] : memref<1x128xf32, #tpu.memory_space<vmem>>, vector<1x128xf32>
      %45 = arith.addf %43, %44 : vector<1x128xf32>
      %46 = math.cos %45 : vector<1x128xf32>
      %cst_30 = arith.constant 1.250000e-01 : f32
      %47 = vector.broadcast %cst_30 : f32 to vector<1x128xf32>
      %48 = arith.mulf %46, %47 : vector<1x128xf32>
      %c0_31 = arith.constant 0 : index
      %c0_32 = arith.constant 0 : index
      %49 = vector.load %arg11[%c0_31, %c0_32] : memref<1x128xf32, #tpu.memory_space<vmem>>, vector<1x128xf32>
      %50 = arith.mulf %49, %48 : vector<1x128xf32>
      %51 = vector.shape_cast %50 : vector<1x128xf32> to vector<1x1x128xf32>
      %cst_33 = arith.constant dense<0.000000e+00> : vector<1xf32>
      %52 = vector.multi_reduction <add>, %51, %cst_33 [1, 2] : vector<1x1x128xf32> to vector<1xf32>
      %53 = vector.shape_cast %52 : vector<1xf32> to vector<1x1x1xf32>
      %54 = vector.extract %53[0, 0, 0] : f32 from vector<1x1x1xf32>
      %c0_34 = arith.constant 0 : index
      %c0_35 = arith.constant 0 : index
      %55 = vector.load %arg12[%c0_34, %c0_35] : memref<1x128xf32, #tpu.memory_space<vmem>>, vector<1x128xf32>
      %56 = vector.shape_cast %55 : vector<1x128xf32> to vector<1x1x128xf32>
      %cst_36 = arith.constant dense<0.000000e+00> : vector<1xf32>
      %57 = vector.multi_reduction <add>, %56, %cst_36 [1, 2] : vector<1x1x128xf32> to vector<1xf32>
      %58 = vector.shape_cast %57 : vector<1xf32> to vector<1x1x1xf32>
      %59 = vector.extract %58[0, 0, 0] : f32 from vector<1x1x1xf32>
      %60 = arith.addf %54, %59 : f32
      %cst_37 = arith.constant 0.000000e+00 : f32
      %61 = vector.broadcast %cst_37 : f32 to vector<1x8x128xf32>
      %62 = vector.broadcast %60 : f32 to vector<1x8x128xf32>
      %63 = arith.addf %61, %62 : vector<1x8x128xf32>
      %c0_38 = arith.constant 0 : index
      %c0_39 = arith.constant 0 : index
      %c0_40 = arith.constant 0 : index
      %64 = vector.load %arg9[%c0_38, %c0_39, %c0_40] : memref<1x8x128xf32, #tpu.memory_space<vmem>>, vector<1x8x128xf32>
      tpu.vector_store %arg9[%c0_38, %c0_39, %c0_40], %63 {strides = array<i32>} : memref<1x8x128xf32, #tpu.memory_space<vmem>>, vector<1x8x128xf32>,
    } else {
    }
    return
  }
  func.func @transform_0(%arg0: i32, %arg1: i32) -> (i32, i32) {
    %c0_i32 = arith.constant 0 : i32
    %c0_i32_0 = arith.constant 0 : i32
    %c0_i32_1 = arith.constant 0 : i32
    return %c0_i32, %c0_i32_0 : i32, i32
  }
  func.func @transform_1(%arg0: i32, %arg1: i32) -> (i32, i32) {
    %c1_i32 = arith.constant 1 : i32
    %0 = arith.muli %arg0, %c1_i32 : i32
    %1 = arith.addi %0, %arg1 : i32
    %c0_i32 = arith.constant 0 : i32
    %c0_i32_0 = arith.constant 0 : i32
    return %1, %c0_i32 : i32, i32
  }
  func.func @transform_2(%arg0: i32, %arg1: i32) -> (i32, i32) {
    %c1_i32 = arith.constant 1 : i32
    %0 = arith.muli %arg0, %c1_i32 : i32
    %1 = arith.addi %0, %arg1 : i32
    %c0_i32 = arith.constant 0 : i32
    %c0_i32_0 = arith.constant 0 : i32
    return %1, %c0_i32 : i32, i32
  }
  func.func @transform_3(%arg0: i32, %arg1: i32) -> (i32, i32) {
    %c0_i32 = arith.constant 0 : i32
    %c0_i32_0 = arith.constant 0 : i32
    %c0_i32_1 = arith.constant 0 : i32
    return %c0_i32, %c0_i32_0 : i32, i32
  }
  func.func @transform_4(%arg0: i32, %arg1: i32) -> (i32, i32) {
    %c0_i32 = arith.constant 0 : i32
    %c0_i32_0 = arith.constant 0 : i32
    %c0_i32_1 = arith.constant 0 : i32
    return %c0_i32, %c0_i32_0 : i32, i32
  }
  func.func @transform_5(%arg0: i32, %arg1: i32) -> (i32, i32) {
    %c0_i32 = arith.constant 0 : i32
    %c0_i32_0 = arith.constant 0 : i32
    %c0_i32_1 = arith.constant 0 : i32
    return %c0_i32, %c0_i32_0 : i32, i32
  }
  func.func @transform_6(%arg0: i32, %arg1: i32) -> (i32, i32) {
    %c0_i32 = arith.constant 0 : i32
    %c0_i32_0 = arith.constant 0 : i32
    %c0_i32_1 = arith.constant 0 : i32
    return %c0_i32, %c0_i32_0 : i32, i32
  }
  func.func @transform_7(%arg0: i32, %arg1: i32) -> (i32, i32, i32) {
    %c0_i32 = arith.constant 0 : i32
    %c0_i32_0 = arith.constant 0 : i32
    %c0_i32_1 = arith.constant 0 : i32
    return %arg0, %c0_i32, %c0_i32_0 : i32, i32, i32
  }
}

</mosaic_0001>

<bundles_post_ra>
// kernel: tpu_custom_call.1
= control target key start
LH: loop header
LB: loop body
LE: loop exit
PB: predicated region body
PF: predicated region fallthrough
CT: control target
= control target key end

     0   :  { %s5319_s0 = inlined_call_operand.<no memory space> [shape: f32[1,1], index: 0, kind: input, shape index: {}]   ;;  %s5320_s1 = inlined_call_operand.vmem [shape: f32[256,9], index: 1, kind: input, shape index: {}]   ;;  %s5321_s2 = inlined_call_operand.vmem [shape: bf16[256,128], index: 2, kind: input, shape index: {}]   ;;  %s5322_s3 = inlined_call_operand.vmem [shape: f32[8,128], index: 3, kind: input, shape index: {}]   ;;  %s5323_s4 = inlined_call_operand.vmem [shape: f32[1,128], index: 4, kind: input, shape index: {}]   ;;  %s5324_s5 = inlined_call_operand.vmem [shape: bf16[128,128], index: 5, kind: input, shape index: {}]   ;;  %s5325_s6 = inlined_call_operand.vmem [shape: f32[1,8], index: 6, kind: input, shape index: {}]   ;;  %s5326_s7 = inlined_call_operand.hbm [shape: f32[2,8,128], index: 7, kind: output, shape index: {}]  }
   0x1   :  { %12 = sst [smem:[#allocation5]] %s5319_s0 }
   0x2   :  { %13 = vsyncpa [#allocation7], 0 }
   0x3   :  { %15 = vsyncpa [#allocation7 + $0x1], 0  ;;  %s3428_s26 = smov 0   ;;  %s3430_s27 = smov 0  }
   0x4   :  { %s3432_s28 = smov 0   ;;  %s3434_s29 = smov 0  }
   0x5   :  { %s3436_s30 = smov 0   ;;  %s3438_s8 = smov 0  }
   0x6 LB: > { %s2816_s0 = sadd.s32 4294967295, %s3373_s8   ;;  %s2817_s9 = sadd.s32 4294967294, %s3373_s8   ;;  %s3373_s8 = sphi %s3438_s8, %s21_s8   ;;  %s3369_s30 = sphi %s3436_s30, %s5525_s30   ;;  %s3365_s29 = sphi %s3434_s29, %s5524_s29   ;;  %s3361_s28 = sphi %s3432_s28, %s5523_s28   ;;  %s3357_s27 = sphi %s3430_s27, %s5522_s27   ;;  %s3353_s26 = sphi %s3428_s26, %s5521_s26  }
   0x7   : > { %s33_s10 = sadd.s32 1, %s3369_s30  ;;  %s201_s11 = sadd.s32 1, %s3361_s28 }
   0x8   : > { %p35_p0 = scmp.ge.s32.totalorder %s33_s10, 2  ;;  %p211_p1 = scmp.ne.s32.totalorder %s3361_s28, %s3357_s27 }
   0x9   : > { %p212_p2 = scmp.eq.s32.totalorder %s2816_s0, 1  ;;  %p217_p3 = scmp.ne.s32.totalorder %s3357_s27, %s3353_s26 }
   0xa   : > { %s5527_s10 = smov (%p35_p0, %s33_s10), 0  ;;  %p218_p5 = scmp.eq.s32.totalorder %s2817_s9, 1 }
   0xb   : > { %p3468_p4 = por %p212_p2, %p211_p1  ;;  %s198_s13 = ssub.s32 %s3369_s30, %s5527_s10 }
   0xc   : > { %p2820_p6 = scmp.ge.s32.totalorder %s3373_s8, 1  ;;  %p199_p7 = scmp.eq.s32.totalorder %s198_s13, 0 }
   0xd   : > { %p3475_p8 = por %p218_p5, %p217_p3  ;;  %p273_p9 = scmp.lt.s32.totalorder %s3373_s8, 3 }
   0xe   : > { %s3481_s15 = scalar_select %p199_p7, %s3361_s28, %s201_s11  }
   0xf   : > { %p274_p10 = pnand %p2820_p6, %p273_p9 }
  0x11   : > { %277 = sbr.rel (%p274_p10) target bundleno = 1277 (0x4fd), region = 48 }
  0x18   : > { %s333_s16 = sld [smem:[#allocation5]]  ;;  %s2822_s17 = sshll.u32 %s3365_s29, 4  ;;  %vm5370_vm0 = vcmask 64512   ;;  %v338_v12 = vld [vmem:[%s5322_s3] sm:$0xff]  ;;  %vm412_vm3 = vcmask 1043456  }
  0x19   : > { %p314_p11 = scmp.lt.s32.totalorder %s2822_s17, 31  ;;  %v3524_v39 = vld [vmem:[%s5323_s4] ss:$0 sm:$0xff]  ;;  %s2913_s20 = sshll.u32 %s3365_s29, 7 }
  0x1a   : > { %s5272_s13 = scalar_lea.hbm %s5326_s7, %s2913_s20  ;;  %s3384_s29 = smov [#allocation6]  }
  0x1b   : > { %s5529_s17 = smov (!%p314_p11, %s2822_s17), 31 }
  0x1c   : > { %s2823_s18 = sshll.u32 %s5529_s17, 3  ;;  %s2825_s9 = sshll.u32 %s5529_s17, 2 }
  0x1d   : > { %s3490_s21 = scalar_lea.vmem %s5320_s1, %s2823_s18  ;;  %s309_s18 = sand.u32 1, %s3357_s27  }
  0x1e   : > { %v334_v0 = vstv %s333_s16  ;;  %v355_v3 = vld [vmem:[%s3490_s21] sm:$0xff]  ;;  %v356_v4 = vld [vmem:[%s3490_s21 + $0x8] sm:$0xff]  ;;  %v357_v16 = vld [vmem:[%s3490_s21 + $0x10] sm:$0xff]  ;;  %s5203_s16 = scalar_lea.vmem %s5321_s2, %s2825_s9  ;;  %s2821_s19 = sshll.u32 %s309_s18, 3 }
  0x1f   : > { %v335_v1 = vmul.f32 1.442695, %v334_v0  ;;  %v371_v5 = vpack.c.bf16 %v356_v4, %v355_v3  ;;  %v358_v17 = vld [vmem:[%s3490_s21 + $0x18] sm:$0xff]  ;;  %v359_v18 = vld [vmem:[%s3490_s21 + $0x20] sm:$0xff]  ;;  %v360_v19 = vld [vmem:[%s3490_s21 + $0x28] sm:$0xff] }
  0x20   : > { %v372_v22 = vpack.c.bf16 %v358_v17, %v357_v16  ;;  %v373_v23 = vpack.c.bf16 %v360_v19, %v359_v18  ;;  %v361_v24 = vld [vmem:[%s3490_s21 + $0x30] sm:$0xff]  ;;  %v362_v25 = vld [vmem:[%s3490_s21 + $0x38] sm:$0xff]  ;;  %v363_v26 = vld [vmem:[%s3490_s21 + $0x40] sm:$0xff]  ;;  %v5335_v19 = vmov 2475754826  }
  0x21   : > { %3205 = vpow2.f32 %v335_v1  ;;  %2984 = vmatprep.mubr.msk.bf16.mxu0 %vm5370_vm0, %v371_v5  ;;  %v364_v27 = vld [vmem:[%s3490_s21 + $0x48] sm:$0xff]  ;;  %v374_v28 = vpack.c.bf16 %v362_v25, %v361_v24  ;;  %v365_v30 = vld [vmem:[%s3490_s21 + $0x50] sm:$0xff]  ;;  %v366_v31 = vld [vmem:[%s3490_s21 + $0x58] sm:$0xff]  ;;  %v5339_v25 = vmov 920167782  }
  0x22   : > { %v375_v29 = vpack.c.bf16 %v364_v27, %v363_v26  ;;  %v367_v32 = vld [vmem:[%s3490_s21 + $0x60] sm:$0xff]  ;;  %v368_v33 = vld [vmem:[%s3490_s21 + $0x68] sm:$0xff]  ;;  %v376_v34 = vpack.c.bf16 %v366_v31, %v365_v30  ;;  %v369_v36 = vld [vmem:[%s3490_s21 + $0x70] sm:$0xff] }
  0x23   : > { %v377_v35 = vpack.c.bf16 %v368_v33, %v367_v32  ;;  %v370_v37 = vld [vmem:[%s3490_s21 + $0x78] sm:$0xff]  ;;  %v5337_v32 = vmov 1326507024  }
  0x24   : > { %v378_v38 = vpack.c.bf16 %v370_v37, %v369_v36 }
  0x2b   : > { %v3206_v2 = vpop.eup %3205 }
  0x2c   : > { %3055 = vpush %v3206_v2 }
  0x5d   : > { %s3056_s22 = spop %3055 }
  0x5e   : > { %s339_s23 = smul.f32 2.0, %s3056_s22 }
  0x60   : > { %v340_v6 = vstv %s339_s23  ;;  %s311_s23 = scalar_lea.vmem [#allocation6], %s2821_s19 }
  0x61   : > { %3207 = vrsqrt.f32 %v340_v6  ;;  %vm343_vm1 = vcmp.eq.f32.partialorder %v340_v6, inf  ;;  %v346_v9 = vand.u32 2147483648, %v340_v6  ;;  %vm345_vm2 = vcmp.eq.f32.partialorder %v340_v6, 0.0  ;;  %s2737_s24 = sshll.u32 %s311_s23, 4  ;;  %s5274_s24 = int_to_ptr.vmem [resolvable:$true] %s2737_s24 }
  0x62   : > { %s3295_s17 = scalar_lea.vmem %s5274_s24, 128 }
  0x63   : > { %p3296_p12 = scmp.ne.s32.totalorder %s5274_s24, %s3295_s17 }
  0x65   : > { %p3297_p13 = pnand %p3296_p12, %p3468_p4 }
  0x67   : > { %p3298_p0 = pneg %p3297_p13 }
  0x6b   : > { %v3208_v7 = vpop.eup %3207 }
  0x6c   : > { %v342_v8 = vmul.f32 %v3208_v7, %v340_v6 }
  0x6e   : > { %v344_v10 = vsel %vm343_vm1, %v340_v6, %v342_v8 }
  0x6f   : > { %v347_v11 = vsel %vm345_vm2, %v346_v9, %v344_v10 }
  0x70   : > { %3057 = vpush %v347_v11 }
  0xa1   : > { %s3058_s0 = spop %3057 }
  0xa2   : > { %v349_v13 = vstv %s3058_s0 }
  0xa3   : > { %v350_v14 = vmul.f32 %v349_v13, %v338_v12 }
  0xa5   : > { %v351_v15 = vpack.c.bf16 %v350_v14, %v350_v14 }
  0xa7   : > { %352 = vst [vmem:[#allocation2] sm:$0xf] %v351_v15  ;;  %v5341_v15 = vmov 683565275  }
  0xae   : > { %v379_v20 = vld [vmem:[#allocation2] sm:$0xf] }
  0xaf   : > { %3054 = vmatprep.subr.msk.bf16.mxu0 %vm412_vm3, %v379_v20  ;;  %v414_v21 = vsel %vm412_vm3, %v379_v20, 0 }
  0xb0   : > { %2983 = vmatpush3.bf16.msra.mxu0 %v414_v21  ;;  %v5331_v21 = vmov 2131351028  }
  0xb3   : > { %2985 = vmatmul.mubr.msk.bf16.vlgmr.msra.gmra.mrb[0].mxu0 %vm5370_vm0, %v372_v22 }
  0xb4   : > { %2988 = vmatprep.mubr.msk.bf16.mxu0 %vm5370_vm0, %v373_v23  ;;  %v5333_v23 = vmov 2102212464  }
  0xbb   : > { %2989 = vmatmul.mubr.msk.bf16.gmra.mrb[4].mxu0 %vm5370_vm0, %v374_v28 }
  0xbc   : > { %2992 = vmatprep.mubr.msk.bf16.mxu0 %vm5370_vm0, %v375_v29 }
  0xc3   : > { %2993 = vmatmul.mubr.msk.bf16.gmra.mrb[8].mxu0 %vm5370_vm0, %v376_v34 }
  0xc4   : > { %2996 = vmatprep.mubr.msk.bf16.mxu0 %vm5370_vm0, %v377_v35 }
  0xcb   : > { %2997 = vmatmul.mubr.msk.bf16.gmra.mrb[12].mxu0 %vm5370_vm0, %v378_v38 }
 0x186   : > { %v2986_v40 = vpop.f32.mrb[0].mxu0 }
 0x187   : > { %v3527_v41 = vadd.f32 %v2986_v40, %v3524_v39  ;;  %v450_v42 = vpop.f32.mrb[1].mxu0 }
 0x188   : > { %v3530_v43 = vadd.f32 %v3524_v39, %v450_v42  ;;  %v2987_v44 = vpop.f32.mrb[2].mxu0 }
 0x189   : > { %v719_v45 = vand.u32 2147483647, %v3527_v41  ;;  %v722_v46 = vand.u32 2139095040, %v3527_v41  ;;  %v453_v47 = vpop.f32.mrb[3].mxu0  ;;  %v3537_v50 = vadd.f32 %v2987_v44, %v3524_v39 }
 0x18a   : > { %v513_v48 = vand.u32 2147483647, %v3530_v43  ;;  %v516_v49 = vand.u32 2139095040, %v3530_v43  ;;  %v3554_v9 = vadd.f32 %v3524_v39, %v453_v47 }
 0x18b   : > { %v723_v51 = vshrl.u32 %v722_v46, 23  ;;  %v726_v52 = vand.u32 8388607, %v719_v45  ;;  %v825_v56 = vand.u32 2139095040, %v3537_v50  ;;  %v822_v1 = vand.u32 2147483647, %v3537_v50 }
 0x18c   : > { %v517_v53 = vshrl.u32 %v516_v49, 23  ;;  %v520_v54 = vand.u32 8388607, %v513_v48 }
 0x18d   : > { %v2843_v55 = vadd.s32 4294967169, %v723_v51  ;;  %v826_v60 = vshrl.u32 %v825_v56, 23  ;;  %v727_v62 = vor.u32 8388608, %v726_v52  ;;  %v3562_v12 = vand.u32 8388607, %v822_v1 }
 0x18e   : > { %v2835_v57 = vadd.s32 4294967169, %v517_v53  ;;  %v3544_v58 = vpop.f32.mrb[4].mxu0  ;;  %v521_v63 = vor.u32 8388608, %v520_v54 }
 0x18f   : > { %v729_v59 = vadd.s32 1, %v2843_v55  ;;  %v3546_v61 = vpop.f32.mrb[5].mxu0  ;;  %v2847_v2 = vadd.s32 4294967169, %v826_v60  ;;  %v3556_v10 = vshll.u32 %v727_v62, 8 }
 0x190   : > { %v523_v0 = vadd.s32 1, %v2835_v57  ;;  %v3549_v3 = vpop.f32.mrb[6].mxu0  ;;  %v3558_v11 = vshll.u32 %v521_v63, 8 }
 0x191   : > { %vm730_vm4 = vcmp.gt.s32.totalorder %v729_v59, 0  ;;  %v3551_v5 = vpop.f32.mrb[7].mxu0  ;;  %v3564_v13 = vadd.s32 1, %v2847_v2 }
 0x192   : > { %v731_v4 = vsel %vm730_vm4, %v729_v59, 0  ;;  %vm524_vm5 = vcmp.gt.s32.totalorder %v523_v0, 0 }
 0x193   : > { %v732_v6 = vshrl.u32 %v731_v4, 5  ;;  %v733_v7 = vand.u32 31, %v731_v4  ;;  %v525_v8 = vsel %vm524_vm5, %v523_v0, 0  ;;  %vm833_vm15 = vcmp.gt.s32.totalorder %v3564_v13, 0 }
 0x194   : > { %v3567_v17 = vshrl.u32 %v525_v8, 5  ;;  %v527_v18 = vand.u32 31, %v525_v8 }
 0x195   : > { %v734_v14 = vsub.s32 32, %v733_v7  ;;  %v736_v16 = vshll.u32 %v5341_v15, %v733_v7  ;;  %v739_v20 = vshll.u32 %v5335_v19, %v733_v7  ;;  %v742_v22 = vshll.u32 %v5331_v21, %v733_v7 }
 0x196   : > { %v745_v24 = vshll.u32 %v5333_v23, %v733_v7  ;;  %v748_v26 = vshll.u32 %v5339_v25, %v733_v7  ;;  %vm751_vm6 = vcmp.lt.s32.totalorder %v732_v6, 1  ;;  %vm752_vm7 = vcmp.lt.s32.totalorder %v732_v6, 2  ;;  %v3579_v42 = vpop.f32.mrb[8].mxu0 }
 0x197   : > { %v737_v27 = vshrl.u32 %v5335_v19, %v734_v14  ;;  %v740_v28 = vshrl.u32 %v5331_v21, %v734_v14  ;;  %v743_v29 = vshrl.u32 %v5333_v23, %v734_v14  ;;  %v735_v30 = vshrl.u32 %v5341_v15, %v734_v14 }
 0x198   : > { %v746_v31 = vshrl.u32 %v5339_v25, %v734_v14  ;;  %v749_v33 = vshrl.u32 %v5337_v32, %v734_v14  ;;  %v528_v37 = vsub.s32 32, %v527_v18  ;;  %vm753_vm8 = vcmp.lt.s32.totalorder %v732_v6, 3 }
 0x199   : > { %v738_v34 = vor.u32 %v737_v27, %v736_v16  ;;  %v741_v35 = vor.u32 %v740_v28, %v739_v20  ;;  %v744_v36 = vor.u32 %v743_v29, %v742_v22  ;;  %vm754_vm9 = vcmp.lt.s32.totalorder %v732_v6, 4 }
 0x19a   : > { %v747_v38 = vor.u32 %v746_v31, %v745_v24  ;;  %v750_v40 = vor.u32 %v749_v33, %v748_v26  ;;  %v530_v54 = vshll.u32 %v5341_v15, %v527_v18  ;;  %v531_v57 = vshrl.u32 %v5335_v19, %v528_v37 }
 0x19b   : > { %v755_v44 = vsel %vm751_vm6, %v735_v30, %v738_v34  ;;  %v756_v46 = vsel %vm754_vm9, %v744_v36, 2102212464  ;;  %v759_v47 = vsel %vm751_vm6, %v738_v34, %v741_v35  ;;  %v763_v49 = vsel %vm751_vm6, %v741_v35, %v744_v36 }
 0x19c   : > { %v757_v51 = vsel %vm753_vm8, %v741_v35, %v756_v46  ;;  %v760_v52 = vsel %vm754_vm9, %v747_v38, 920167782  ;;  %v764_v53 = vsel %vm754_vm9, %v750_v40, 1326507024  ;;  %v533_v59 = vshll.u32 %v5335_v19, %v527_v18 }
 0x19d   : > { %v761_v55 = vsel %vm753_vm8, %v744_v36, %v760_v52  ;;  %v765_v56 = vsel %vm753_vm8, %v747_v38, %v764_v53  ;;  %v758_v60 = vsel %vm752_vm7, %v755_v44, %v757_v51  ;;  %v534_v0 = vshrl.u32 %v5331_v21, %v528_v37 }
 0x19e   : > { %v762_v62 = vsel %vm752_vm7, %v759_v47, %v761_v55  ;;  %v766_v63 = vsel %vm752_vm7, %v763_v49, %v765_v56  ;;  %v532_v14 = vor.u32 %v531_v57, %v530_v54  ;;  %v536_v20 = vshll.u32 %v5331_v21, %v527_v18 }
 0x19f   : > { %v3592_v2 = vmul.u32.u64.low %v3556_v10, %v766_v63  ;;  %v3593_v4 = vmul.u32.u64.high %v3556_v10, %v766_v63, %v3592_v2  ;;  %v3596_v7 = vmul.u32.u64.low %v3556_v10, %v762_v62  ;;  %v3597_v8 = vmul.u32.u64.high %v3556_v10, %v762_v62, %v3596_v7  ;;  %v3632_v62 = vpop.f32.mrb[9].mxu0 }
 0x1a0   : > { %v535_v16 = vor.u32 %v534_v0, %v533_v59  ;;  %v537_v22 = vshrl.u32 %v5333_v23, %v528_v37  ;;  %v529_v6 = vshrl.u32 %v5341_v15, %v528_v37  ;;  %v539_v24 = vshll.u32 %v5333_v23, %v527_v18 }
 0x1a1   : > { %v540_v26 = vshrl.u32 %v5339_v25, %v528_v37  ;;  %v543_v27 = vshrl.u32 %v5337_v32, %v528_v37  ;;  %v774_v28 = vmul.u32 %v3556_v10, %v758_v60  ;;  %v542_v30 = vshll.u32 %v5339_v25, %v527_v18 }
 0x1a2   : > { %v538_v29 = vor.u32 %v537_v22, %v536_v20  ;;  %vm545_vm10 = vcmp.lt.s32.totalorder %v3567_v17, 1  ;;  %vm776_vm11 = vc.u32 %v3593_v4, %v3596_v7  ;;  %v777_v31 = vadd.s32 1, %v3597_v8 }
 0x1a3   : > { %v541_v33 = vor.u32 %v540_v26, %v539_v24  ;;  %vm546_vm12 = vcmp.lt.s32.totalorder %v3567_v17, 2  ;;  %v544_v34 = vor.u32 %v543_v27, %v542_v30  ;;  %vm547_vm13 = vcmp.lt.s32.totalorder %v3567_v17, 3 }
 0x1a4   : > { %vm548_vm14 = vcmp.lt.s32.totalorder %v3567_v17, 4  ;;  %v553_v35 = vsel %vm545_vm10, %v532_v14, %v535_v16  ;;  %v778_v10 = vsel %vm776_vm11, %v777_v31, %v3597_v8  ;;  %v557_v37 = vsel %vm545_vm10, %v535_v16, %v538_v29 }
 0x1a5   : > { %v550_v36 = vsel %vm548_vm14, %v538_v29, 2102212464  ;;  %v554_v18 = vsel %vm548_vm14, %v541_v33, 920167782  ;;  %v779_v38 = vadd.s32 %v778_v10, %v774_v28  ;;  %v549_v40 = vsel %vm545_vm10, %v529_v6, %v532_v14 }
 0x1a6   : > { %v555_v44 = vsel %vm547_vm13, %v538_v29, %v554_v18  ;;  %v558_v46 = vsel %vm548_vm14, %v544_v34, 1326507024  ;;  %v551_v47 = vsel %vm547_vm13, %v535_v16, %v550_v36  ;;  %v834_v59 = vsel %vm833_vm15, %v3564_v13, 0 }
 0x1a7   : > { %v556_v49 = vsel %vm546_vm12, %v553_v35, %v555_v44  ;;  %v559_v51 = vsel %vm547_vm13, %v541_v33, %v558_v46  ;;  %v780_v52 = vadd.s32 536870912, %v779_v38  ;;  %v619_v60 = vand.u32 2139095040, %v3554_v9 }
 0x1a8   : > { %v560_v53 = vsel %vm546_vm12, %v557_v37, %v559_v51  ;;  %v3622_v54 = vmul.u32.u64.low %v3558_v11, %v556_v49  ;;  %v3623_v55 = vmul.u32.u64.high %v3558_v11, %v556_v49, %v3622_v54  ;;  %v552_v0 = vsel %vm546_vm12, %v549_v40, %v551_v47 }
 0x1a9   : > { %v3627_v56 = vmul.u32.u64.low %v3558_v11, %v560_v53  ;;  %v3628_v57 = vmul.u32.u64.high %v3558_v11, %v560_v53, %v3627_v56  ;;  %v3634_v63 = vshrl.u32 %v780_v52, 30  ;;  %v830_v2 = vor.u32 8388608, %v3562_v12 }
 0x1aa   : > { %v836_v8 = vand.u32 31, %v834_v59  ;;  %v571_v16 = vadd.s32 1, %v3623_v55  ;;  %v568_v22 = vmul.u32 %v3558_v11, %v552_v0  ;;  %v620_v13 = vshrl.u32 %v619_v60, 23 }
 0x1ab   : > { %v782_v14 = vshll.u32 %v3634_v63, 30  ;;  %vm570_vm1 = vc.u32 %v3628_v57, %v3622_v54  ;;  %v3647_v17 = vshll.u32 %v830_v2, 8  ;;  %v835_v12 = vshrl.u32 %v834_v59, 5 }
 0x1ac   : > { %v837_v20 = vsub.s32 32, %v836_v8  ;;  %v572_v24 = vsel %vm570_vm1, %v571_v16, %v3623_v55  ;;  %v839_v11 = vshll.u32 %v5341_v15, %v836_v8  ;;  %v842_v30 = vshll.u32 %v5335_v19, %v836_v8 }
 0x1ad   : > { %v3644_v6 = vsub.s32 %v779_v38, %v782_v14  ;;  %v573_v26 = vadd.s32 %v572_v24, %v568_v22  ;;  %v775_v33 = vadd.s32 %v3596_v7, %v3593_v4  ;;  %v845_v35 = vshll.u32 %v5331_v21, %v836_v8 }
 0x1ae   : > { %v840_v27 = vshrl.u32 %v5335_v19, %v837_v20  ;;  %v843_v28 = vshrl.u32 %v5331_v21, %v837_v20  ;;  %v846_v31 = vshrl.u32 %v5333_v23, %v837_v20  ;;  %v2839_v10 = vadd.s32 4294967169, %v620_v13 }
 0x1af   : > { %v785_v29 = vsub.s32 0, %v3644_v6  ;;  %v574_v34 = vadd.s32 536870912, %v573_v26  ;;  %v838_v18 = vshrl.u32 %v5341_v15, %v837_v20  ;;  %v848_v46 = vshll.u32 %v5333_v23, %v836_v8 }
 0x1b0   : > { %v841_v37 = vor.u32 %v840_v27, %v839_v11  ;;  %v844_v38 = vor.u32 %v843_v28, %v842_v30  ;;  %v847_v44 = vor.u32 %v846_v31, %v845_v35  ;;  %v849_v47 = vshrl.u32 %v5339_v25, %v837_v20 }
 0x1b1   : > { %v2844_v36 = vmin.u32 %v785_v29, %v3644_v6  ;;  %v3660_v40 = vshrl.u32 %v574_v34, 30  ;;  %v851_v4 = vshll.u32 %v5339_v25, %v836_v8  ;;  %v852_v7 = vshrl.u32 %v5337_v32, %v837_v20 }
 0x1b2   : > { %vm854_vm2 = vcmp.lt.s32.totalorder %v835_v12, 1  ;;  %v850_v52 = vor.u32 %v849_v47, %v848_v46  ;;  %vm855_vm4 = vcmp.lt.s32.totalorder %v835_v12, 2  ;;  %vm857_vm5 = vcmp.lt.s32.totalorder %v835_v12, 4 }
 0x1b3   : > { %v787_v49 = vclz %v2844_v36  ;;  %v576_v51 = vshll.u32 %v3660_v40, 30  ;;  %v853_v55 = vor.u32 %v852_v7, %v851_v4  ;;  %vm856_vm6 = vcmp.lt.s32.totalorder %v835_v12, 3 }
 0x1b4   : > { %v859_v56 = vsel %vm857_vm5, %v847_v44, 2102212464  ;;  %v858_v60 = vsel %vm854_vm2, %v838_v18, %v841_v37  ;;  %v862_v0 = vsel %vm854_vm2, %v841_v37, %v844_v38  ;;  %v863_v2 = vsel %vm857_vm5, %v850_v52, 920167782 }
 0x1b5   : > { %v2845_v53 = vadd.s32 4294967294, %v787_v49  ;;  %v3668_v59 = vsub.s32 %v573_v26, %v576_v51  ;;  %v860_v8 = vsel %vm856_vm6, %v844_v38, %v859_v56  ;;  %v864_v14 = vsel %vm856_vm6, %v847_v44, %v863_v2 }
 0x1b6   : > { %v866_v16 = vsel %vm854_vm2, %v844_v38, %v847_v44  ;;  %v865_v13 = vsel %vm855_vm4, %v862_v0, %v864_v14  ;;  %v867_v24 = vsel %vm857_vm5, %v853_v55, 1326507024  ;;  %v616_v44 = vand.u32 2147483647, %v3554_v9 }
 0x1b7   : > { %vm2846_vm7 = vcmp.lt.s32.totalorder %v2845_v53, 0  ;;  %v579_v22 = vsub.s32 0, %v3668_v59  ;;  %v868_v29 = vsel %vm856_vm6, %v850_v52, %v867_v24  ;;  %v626_v46 = vadd.s32 1, %v2839_v10 }
 0x1b8   : > { %v790_v20 = vsel %vm2846_vm7, 0, %v2845_v53  ;;  %v869_v30 = vsel %vm855_vm4, %v866_v16, %v868_v29  ;;  %v3684_v31 = vmul.u32.u64.low %v3647_v17, %v865_v13  ;;  %v3685_v34 = vmul.u32.u64.high %v3647_v17, %v865_v13, %v3684_v31 }
 0x1b9   : > { %v791_v26 = vsub.s32 32, %v790_v20  ;;  %v792_v27 = vshll.u32 %v3644_v6, %v790_v20  ;;  %v795_v28 = vsub.s32 4294967266, %v790_v20  ;;  %v2836_v11 = vmin.u32 %v579_v22, %v3668_v59  ;;  %v2543_v22 = vld [vmem:[#allocation2] sm:$0xf] }
 0x1ba   : > { %v3689_v18 = vmul.u32.u64.low %v3647_v17, %v869_v30  ;;  %v3690_v37 = vmul.u32.u64.high %v3647_v17, %v869_v30, %v3689_v18  ;;  %v861_v6 = vsel %vm855_vm4, %v858_v60, %v860_v8  ;;  %v805_v4 = vsub.s32 4, %v3634_v63 }
 0x1bb   : > { %v793_v35 = vshrl.u32 %v775_v33, %v791_v26  ;;  %v796_v36 = vadd.s32 127, %v795_v28  ;;  %v581_v38 = vclz %v2836_v11  ;;  %v880_v51 = vadd.s32 1, %v3685_v34  ;;  %v3696_v33 = vpop.f32.mrb[10].mxu0 }
 0x1bc   : > { %vm627_vm8 = vcmp.gt.s32.totalorder %v626_v46, 0  ;;  %vm721_vm9 = vcmp.lt.s32.totalorder %v3527_v41, 0  ;;  %v877_v53 = vmul.u32 %v3647_v17, %v861_v6  ;;  %vm879_vm10 = vc.u32 %v3690_v37, %v3684_v31 }
 0x1bd   : > { %v794_v47 = vor.u32 %v793_v35, %v792_v27  ;;  %v797_v49 = vshll.u32 %v796_v36, 23  ;;  %v2837_v7 = vadd.s32 4294967294, %v581_v38  ;;  %v881_v12 = vsel %vm879_vm10, %v880_v51, %v3685_v34 }
 0x1be   : > { %v623_v10 = vand.u32 8388607, %v616_v44  ;;  %v628_v55 = vsel %vm627_vm8, %v626_v46, 0  ;;  %v806_v0 = vsel %vm721_vm9, %v805_v4, %v3634_v63  ;;  %v882_v2 = vadd.s32 %v881_v12, %v877_v53 }
 0x1bf   : > { %v798_v52 = vor.u32 4788187, %v797_v49  ;;  %vm2838_vm11 = vcmp.lt.s32.totalorder %v2837_v7, 0  ;;  %v801_v60 = vcvt.s32.f32 %v794_v47  ;;  %v630_v8 = vand.u32 31, %v628_v55 }
 0x1c0   : > { %vm3710_vm12 = vcmp.le.f32.partialorder %v719_v45, 0.7853982  ;;  %v584_v16 = vsel %vm2838_vm11, 0, %v2837_v7  ;;  %v883_v20 = vadd.s32 536870912, %v882_v2  ;;  %v624_v24 = vor.u32 8388608, %v623_v10 }
 0x1c1   : > { %v799_v56 = vand.u32 2147483647, %v798_v52  ;;  %v808_v13 = vsel %vm3710_vm12, 0, %v806_v0  ;;  %v631_v63 = vsub.s32 32, %v630_v8  ;;  %v589_v28 = vsub.s32 4294967266, %v584_v16 }
 0x1c2   : > { %v3716_v27 = vshrl.u32 %v883_v20, 30  ;;  %v3720_v29 = vadd.f32 %v3544_v58, %v3524_v39  ;;  %v3723_v45 = vsel %vm412_vm3, %v2543_v22, 0  ;;  %v3727_v30 = vand.u32 3, %v808_v13 }
 0x1c3   : > { %v802_v14 = vmul.f32 %v801_v60, %v799_v56  ;;  %5402 = vst [vmem:[#allocation10_spill] sm:$0xff] %v3723_v45  ;;  %v569_v34 = vadd.s32 %v3622_v54, %v3628_v57  ;;  %v3735_v18 = vshrl.u32 %v628_v55, 5  ;;  %v3737_v58 = vshll.u32 %v624_v24, 8 }
 0x1c4   : > { %5401 = vst [vmem:[#allocation9_spill] sm:$0xff] %v3720_v29  ;;  %v885_v35 = vshll.u32 %v3716_v27, 30  ;;  %v1131_v38 = vand.u32 2147483647, %v3720_v29  ;;  %v585_v6 = vsub.s32 32, %v584_v16  ;;  %v637_v47 = vshrl.u32 %v5331_v21, %v631_v63 }
 0x1c5   : > { %v803_v26 = vxor.u32 2147483648, %v802_v14  ;;  %v590_v54 = vadd.s32 127, %v589_v28  ;;  %v634_v57 = vshrl.u32 %v5335_v19, %v631_v63  ;;  %v640_v49 = vshrl.u32 %v5333_v23, %v631_v63 }
 0x1c6   : > { %v3740_v46 = vsub.s32 %v882_v2, %v885_v35  ;;  %v636_v7 = vshll.u32 %v5335_v19, %v630_v8  ;;  %v639_v51 = vshll.u32 %v5331_v21, %v630_v8  ;;  %v643_v52 = vshrl.u32 %v5339_v25, %v631_v63 }
 0x1c7   : > { %v804_v11 = vsel %vm721_vm9, %v803_v26, %v802_v14  ;;  %v633_v53 = vshll.u32 %v5341_v15, %v630_v8  ;;  %v642_v12 = vshll.u32 %v5333_v23, %v630_v8  ;;  %v645_v10 = vshll.u32 %v5339_v25, %v630_v8 }
 0x1c8   : > { %v807_v36 = vsel %vm3710_vm12, %v3527_v41, %v804_v11  ;;  %v888_v4 = vsub.s32 0, %v3740_v46  ;;  %v646_v55 = vshrl.u32 %v5337_v32, %v631_v63  ;;  %vm817_vm3 = vcmp.eq.s32.totalorder %v3727_v30, 2 }
 0x1c9   : > { %3209 = vcosq.f32 %v807_v36  ;;  %v587_v56 = vshrl.u32 %v569_v34, %v585_v6  ;;  %v638_v0 = vor.u32 %v637_v47, %v636_v7  ;;  %v641_v2 = vor.u32 %v640_v49, %v639_v51 }
 0x1ca   : > { %3211 = vsinq.f32 %v807_v36  ;;  %v2848_v60 = vmin.u32 %v888_v4, %v3740_v46  ;;  %vm814_vm13 = vcmp.eq.s32.totalorder %v3727_v30, 0  ;;  %v635_v17 = vor.u32 %v634_v57, %v633_v53  ;;  %v3779_v36 = vpop.f32.mrb[11].mxu0 }
 0x1cb   : > { %v644_v14 = vor.u32 %v643_v52, %v642_v12  ;;  %v647_v20 = vor.u32 %v646_v55, %v645_v10  ;;  %v1134_v22 = vand.u32 2139095040, %v3720_v29  ;;  %vm813_vm14 = vcmp.lt.s32.totalorder %v3727_v30, 2 }
 0x1cc   : > { %v586_v8 = vshll.u32 %v3668_v59, %v584_v16  ;;  %v591_v13 = vshll.u32 %v590_v54, 23  ;;  %v890_v24 = vclz %v2848_v60  ;;  %vm651_vm15 = vcmp.lt.s32.totalorder %v3735_v18, 4 }
 0x1cd   : > { %vm811_vm1 = vweird.f32 %v3527_v41  ;;  %v878_v26 = vadd.s32 %v3684_v31, %v3690_v37  ;;  %vm648_vm2 = vcmp.lt.s32.totalorder %v3735_v18, 1  ;;  %vm649_vm4 = vcmp.lt.s32.totalorder %v3735_v18, 2 }
 0x1ce   : > { %v657_v28 = vsel %vm651_vm15, %v644_v14, 920167782  ;;  %v3767_v11 = vor.u32 %v587_v56, %v586_v8  ;;  %v2849_v34 = vadd.s32 4294967294, %v890_v24  ;;  %vm650_vm5 = vcmp.lt.s32.totalorder %v3735_v18, 3 }
 0x1cf   : > { %v660_v59 = vsel %vm648_vm2, %v638_v0, %v641_v2  ;;  %v632_v16 = vshrl.u32 %v5341_v15, %v631_v63  ;;  %v656_v31 = vsel %vm648_vm2, %v635_v17, %v638_v0  ;;  %v658_v37 = vsel %vm650_vm5, %v641_v2, %v657_v28 }
 0x1d0   : > { %v661_v35 = vsel %vm651_vm15, %v647_v20, 1326507024  ;;  %v3781_v47 = vor.u32 4788187, %v591_v13  ;;  %vm2850_vm6 = vcmp.lt.s32.totalorder %v2849_v34, 0  ;;  %v1135_v51 = vshrl.u32 %v1134_v22, 23 }
 0x1d1   : > { %v653_v54 = vsel %vm651_vm15, %v641_v2, 2102212464  ;;  %v662_v63 = vsel %vm650_vm5, %v644_v14, %v661_v35  ;;  %v893_v4 = vsel %vm2850_vm6, 0, %v2849_v34  ;;  %v659_v10 = vsel %vm649_vm4, %v656_v31, %v658_v37 }
 0x1d2   : > { %v663_v7 = vsel %vm649_vm4, %v660_v59, %v662_v63  ;;  %v894_v53 = vsub.s32 32, %v893_v4  ;;  %v898_v12 = vsub.s32 4294967266, %v893_v4  ;;  %v2859_v2 = vadd.s32 4294967169, %v1135_v51 }
 0x1d3   : > { %v3210_v6 = vpop.eup %3209  ;;  %v3794_v56 = vmul.u32.u64.low %v3737_v58, %v663_v7  ;;  %v3795_v60 = vmul.u32.u64.high %v3737_v58, %v663_v7, %v3794_v56  ;;  %v652_v22 = vsel %vm648_vm2, %v632_v16, %v635_v17  ;;  %v654_v8 = vsel %vm650_vm5, %v638_v0, %v653_v54 }
 0x1d4   : > { %v3212_v57 = vpop.eup %3211  ;;  %v818_v49 = vxor.u32 2147483648, %v3210_v6  ;;  %v899_v20 = vadd.s32 127, %v898_v12  ;;  %v3806_v24 = vmul.u32.u64.low %v3737_v58, %v659_v10  ;;  %v3807_v28 = vmul.u32.u64.high %v3737_v58, %v659_v10, %v3806_v24 }
 0x1d5   : > { %v815_v52 = vxor.u32 2147483648, %v3212_v57  ;;  %v1141_v34 = vadd.s32 1, %v2859_v2  ;;  %v896_v31 = vshrl.u32 %v878_v26, %v894_v53  ;;  %v1138_v17 = vand.u32 8388607, %v1131_v38 }
 0x1d6   : > { %v819_v55 = vsel %vm817_vm3, %v818_v49, %v3212_v57  ;;  %v900_v37 = vshll.u32 %v899_v20, 23  ;;  %v908_v0 = vsub.s32 4, %v3716_v27  ;;  %v655_v30 = vsel %vm649_vm4, %v652_v22, %v654_v8 }
 0x1d7   : > { %v816_v14 = vsel %vm814_vm13, %v3210_v6, %v815_v52  ;;  %vm1142_vm7 = vcmp.gt.s32.totalorder %v1141_v34, 0  ;;  %v3821_v16 = vadd.f32 %v3524_v39, %v3546_v61  ;;  %v595_v35 = vcvt.s32.f32 %v3767_v11 }
 0x1d8   : > { %v820_v13 = vsel %vm813_vm14, %v816_v14, %v819_v55  ;;  %v895_v41 = vshll.u32 %v3740_v46, %v893_v4  ;;  %vm673_vm8 = vc.u32 %v3795_v60, %v3806_v24  ;;  %v1143_v26 = vsel %vm1142_vm7, %v1141_v34, 0 }
 0x1d9   : > { %v3812_v59 = vsel %vm811_vm1, nan, %v820_v13  ;;  %v593_v6 = vand.u32 2147483647, %v3781_v47  ;;  %v901_v54 = vor.u32 4788187, %v900_v37  ;;  %v674_v63 = vadd.s32 1, %v3807_v28 }
 0x1da   : > { %5403 = vst [vmem:[#allocation11_spill] sm:$0xff] %v3812_v59  ;;  %v1145_v18 = vand.u32 31, %v1143_v26  ;;  %v897_v57 = vor.u32 %v896_v31, %v895_v41  ;;  %v671_v49 = vmul.u32 %v3737_v58, %v655_v30  ;;  %v1139_v7 = vor.u32 8388608, %v1138_v17 }
 0x1db   : > { %v5327_v61 = vand.u32 2147483647, %v3821_v16  ;;  %v675_v11 = vsel %vm673_vm8, %v674_v63, %v3807_v28  ;;  %v1144_v53 = vshrl.u32 %v1143_v26, 5  ;;  %v902_v10 = vand.u32 2147483647, %v901_v54 }
 0x1dc   : > { %v1146_v51 = vsub.s32 32, %v1145_v18  ;;  %v1148_v46 = vshll.u32 %v5341_v15, %v1145_v18  ;;  %v1151_v4 = vshll.u32 %v5335_v19, %v1145_v18  ;;  %v676_v52 = vadd.s32 %v675_v11, %v671_v49 }
 0x1dd   : > { %v1154_v47 = vshll.u32 %v5331_v21, %v1145_v18  ;;  %v1157_v12 = vshll.u32 %v5333_v23, %v1145_v18  ;;  %v904_v2 = vcvt.s32.f32 %v897_v57  ;;  %v1160_v22 = vshll.u32 %v5339_v25, %v1145_v18 }
 0x1de   : > { %v1149_v55 = vshrl.u32 %v5335_v19, %v1146_v51  ;;  %v1152_v58 = vshrl.u32 %v5331_v21, %v1146_v51  ;;  %v1155_v56 = vshrl.u32 %v5333_v23, %v1146_v51  ;;  %v677_v14 = vadd.s32 536870912, %v676_v52 }
 0x1df   : > { %v1158_v20 = vshrl.u32 %v5339_v25, %v1146_v51  ;;  %v1147_v8 = vshrl.u32 %v5341_v15, %v1146_v51  ;;  %v1161_v34 = vshrl.u32 %v5337_v32, %v1146_v51  ;;  %vm1163_vm9 = vcmp.lt.s32.totalorder %v1144_v53, 1 }
 0x1e0   : > { %v1150_v13 = vor.u32 %v1149_v55, %v1148_v46  ;;  %v1153_v28 = vor.u32 %v1152_v58, %v1151_v4  ;;  %v3843_v31 = vshrl.u32 %v677_v14, 30  ;;  %v1156_v37 = vor.u32 %v1155_v56, %v1154_v47 }
 0x1e1   : > { %v1159_v17 = vor.u32 %v1158_v20, %v1157_v12  ;;  %v905_v30 = vmul.f32 %v904_v2, %v902_v10  ;;  %v1162_v41 = vor.u32 %v1161_v34, %v1160_v22  ;;  %vm1165_vm10 = vcmp.lt.s32.totalorder %v1144_v53, 3 }
 0x1e2   : > { %v928_v26 = vand.u32 2139095040, %v3821_v16  ;;  %v679_v54 = vshll.u32 %v3843_v31, 30  ;;  %vm1164_vm11 = vcmp.lt.s32.totalorder %v1144_v53, 2  ;;  %vm1166_vm12 = vcmp.lt.s32.totalorder %v1144_v53, 4 }
 0x1e3   : > { %v1179_v63 = vshll.u32 %v1139_v7, 8  ;;  %v1167_v18 = vsel %vm1163_vm9, %v1147_v8, %v1150_v13  ;;  %v1168_v57 = vsel %vm1166_vm12, %v1156_v37, 2102212464  ;;  %v1171_v49 = vsel %vm1163_vm9, %v1150_v13, %v1153_v28  ;;  %v3863_v13 = vpop.f32.mrb[12].mxu0 }
 0x1e4   : > { %v1172_v11 = vsel %vm1166_vm12, %v1159_v17, 920167782  ;;  %v3849_v51 = vsub.s32 %v676_v52, %v679_v54  ;;  %v1169_v46 = vsel %vm1165_vm10, %v1153_v28, %v1168_v57  ;;  %v1175_v47 = vsel %vm1163_vm9, %v1153_v28, %v1156_v37 }
 0x1e5   : > { %v1173_v4 = vsel %vm1165_vm10, %v1156_v37, %v1172_v11  ;;  %v906_v12 = vxor.u32 2147483648, %v905_v30  ;;  %v1176_v55 = vsel %vm1166_vm12, %v1162_v41, 1326507024  ;;  %v929_v58 = vshrl.u32 %v928_v26, 23 }
 0x1e6   : > { %v1174_v10 = vsel %vm1164_vm11, %v1171_v49, %v1173_v4  ;;  %v682_v7 = vsub.s32 0, %v3849_v51  ;;  %v1177_v56 = vsel %vm1165_vm10, %v1159_v17, %v1176_v55  ;;  %v596_v52 = vmul.f32 %v595_v35, %v593_v6 }
 0x1e7   : > { %v3857_v2 = vmul.u32.u64.low %v1179_v63, %v1174_v10  ;;  %v3858_v14 = vmul.u32.u64.high %v1179_v63, %v1174_v10, %v3857_v2  ;;  %v1170_v20 = vsel %vm1164_vm11, %v1167_v18, %v1169_v46  ;;  %v1178_v22 = vsel %vm1164_vm11, %v1175_v47, %v1177_v56 }
 0x1e8   : > { %v2851_v8 = vadd.s32 4294967169, %v929_v58  ;;  %vm824_vm3 = vcmp.lt.s32.totalorder %v3537_v50, 0  ;;  %v2840_v28 = vmin.u32 %v682_v7, %v3849_v51  ;;  %v932_v35 = vand.u32 8388607, %v5327_v61 }
 0x1e9   : > { %v3867_v34 = vmul.u32.u64.low %v1179_v63, %v1178_v22  ;;  %v3868_v37 = vmul.u32.u64.high %v1179_v63, %v1178_v22, %v3867_v34  ;;  %v909_v17 = vsel %vm824_vm3, %v908_v0, %v3716_v27  ;;  %v3877_v53 = vadd.f32 %v3549_v3, %v3524_v39 }
 0x1ea   : > { %v935_v6 = vadd.s32 1, %v2851_v8  ;;  %v907_v41 = vsel %vm824_vm3, %v906_v12, %v905_v30  ;;  %v684_v26 = vclz %v2840_v28  ;;  %v1186_v54 = vmul.u32 %v1179_v63, %v1170_v20 }
 0x1eb   : > { %v1189_v18 = vadd.s32 1, %v3858_v14  ;;  %vm515_vm13 = vcmp.lt.s32.totalorder %v3530_v43, 0  ;;  %v597_v57 = vxor.u32 2147483648, %v596_v52  ;;  %vm823_vm14 = vcmp.le.f32.partialorder %v822_v1, 0.7853982 }
 0x1ec   : > { %vm936_vm15 = vcmp.gt.s32.totalorder %v935_v6, 0  ;;  %v911_v27 = vsel %vm823_vm14, 0, %v909_v17  ;;  %v2841_v0 = vadd.s32 4294967294, %v684_v26  ;;  %vm1188_vm1 = vc.u32 %v3868_v37, %v3857_v2 }
 0x1ed   : > { %v937_v49 = vsel %vm936_vm15, %v935_v6, 0  ;;  %v910_v3 = vsel %vm823_vm14, %v3537_v50, %v907_v41  ;;  %v1190_v30 = vsel %vm1188_vm1, %v1189_v18, %v3858_v14  ;;  %v933_v63 = vor.u32 8388608, %v932_v35 }
 0x1ee   : > { %v939_v11 = vand.u32 31, %v937_v49  ;;  %vm2842_vm2 = vcmp.lt.s32.totalorder %v2841_v0, 0  ;;  %v1191_v46 = vadd.s32 %v1190_v30, %v1186_v54  ;;  %v5328_v4 = vand.u32 2147483647, %v3877_v53 }
 0x1ef   : > { %v1237_v47 = vand.u32 2139095040, %v3877_v53  ;;  %v3891_v1 = vsel %vm515_vm13, %v597_v57, %v596_v52  ;;  %v3893_v12 = vand.u32 3, %v911_v27  ;;  %v3895_v10 = vsel %vm2842_vm2, 0, %v2841_v0 }
 0x1f0   : > { %v940_v55 = vsub.s32 32, %v939_v11  ;;  %3213 = vcosq.f32 %v910_v3  ;;  %v672_v58 = vadd.s32 %v3806_v24, %v3795_v60  ;;  %v692_v7 = vsub.s32 4294967266, %v3895_v10 }
 0x1f1   : > { %v942_v56 = vshll.u32 %v5341_v15, %v939_v11  ;;  %3215 = vsinq.f32 %v910_v3  ;;  %v1192_v14 = vadd.s32 536870912, %v1191_v46  ;;  %v3902_v22 = vshll.u32 %v933_v63, 8 }
 0x1f2   : > { %v943_v20 = vshrl.u32 %v5335_v19, %v940_v55  ;;  %v938_v52 = vshrl.u32 %v937_v49, 5  ;;  %v945_v8 = vshll.u32 %v5335_v19, %v939_v11  ;;  %v1238_v28 = vshrl.u32 %v1237_v47, 23 }
 0x1f3   : > { %v3907_v34 = vand.u32 8388607, %v5328_v4  ;;  %v693_v17 = vadd.s32 127, %v692_v7  ;;  %v3909_v60 = vshrl.u32 %v1192_v14, 30  ;;  %v946_v24 = vshrl.u32 %v5331_v21, %v940_v55  ;;  %v3923_v14 = vpop.f32.mrb[13].mxu0 }
 0x1f4   : > { %v948_v35 = vshll.u32 %v5331_v21, %v939_v11  ;;  %v941_v6 = vshrl.u32 %v5341_v15, %v940_v55  ;;  %v944_v41 = vor.u32 %v943_v20, %v942_v56  ;;  %v949_v26 = vshrl.u32 %v5333_v23, %v940_v55 }
 0x1f5   : > { %5404 = vst [vmem:[#allocation12_spill] sm:$0xff] %v3909_v60  ;;  %v951_v54 = vshll.u32 %v5333_v23, %v939_v11  ;;  %v1194_v18 = vshll.u32 %v3909_v60, 30  ;;  %v947_v57 = vor.u32 %v946_v24, %v945_v8  ;;  %v952_v27 = vshrl.u32 %v5339_v25, %v940_v55 }
 0x1f6   : > { %v954_v0 = vshll.u32 %v5339_v25, %v939_v11  ;;  %v688_v49 = vsub.s32 32, %v3895_v10  ;;  %v950_v3 = vor.u32 %v949_v26, %v948_v35  ;;  %v955_v30 = vshrl.u32 %v5337_v32, %v940_v55 }
 0x1f7   : > { %v2863_v63 = vadd.s32 4294967169, %v1238_v28  ;;  %v694_v47 = vshll.u32 %v693_v17, 23  ;;  %v3921_v7 = vsub.s32 %v1191_v46, %v1194_v18  ;;  %v953_v56 = vor.u32 %v952_v27, %v951_v54 }
 0x1f8   : > { %vm957_vm4 = vcmp.lt.s32.totalorder %v938_v52, 1  ;;  %v956_v20 = vor.u32 %v955_v30, %v954_v0  ;;  %vm958_vm5 = vcmp.lt.s32.totalorder %v938_v52, 2  ;;  %vm959_vm6 = vcmp.lt.s32.totalorder %v938_v52, 3 }
 0x1f9   : > { %vm960_vm7 = vcmp.lt.s32.totalorder %v938_v52, 4  ;;  %v1197_v8 = vsub.s32 0, %v3921_v7  ;;  %v961_v11 = vsel %vm957_vm4, %v941_v6, %v944_v41  ;;  %v965_v55 = vsel %vm957_vm4, %v944_v41, %v947_v57 }
 0x1fa   : > { %v962_v24 = vsel %vm960_vm7, %v950_v3, 2102212464  ;;  %v3214_v28 = vpop.eup %3213  ;;  %vm917_vm8 = vcmp.eq.s32.totalorder %v3893_v12, 0  ;;  %vm920_vm9 = vcmp.eq.s32.totalorder %v3893_v12, 2  ;;  %v690_v46 = vshrl.u32 %v672_v58, %v688_v49 }
 0x1fb   : > { %v963_v17 = vsel %vm959_vm6, %v947_v57, %v962_v24  ;;  %v966_v35 = vsel %vm960_vm7, %v953_v56, 920167782  ;;  %v969_v26 = vsel %vm957_vm4, %v947_v57, %v950_v3  ;;  %v3216_v54 = vpop.eup %3215  ;;  %v689_v6 = vshll.u32 %v3849_v51, %v3895_v10 }
 0x1fc   : > { %v2860_v18 = vmin.u32 %v1197_v8, %v3921_v7  ;;  %v967_v41 = vsel %vm959_vm6, %v950_v3, %v966_v35  ;;  %v970_v27 = vsel %vm960_vm7, %v956_v20, 1326507024  ;;  %v695_v0 = vor.u32 4788187, %v694_v47 }
 0x1fd   : > { %v964_v30 = vsel %vm958_vm5, %v961_v11, %v963_v17  ;;  %v968_v58 = vsel %vm958_vm5, %v965_v55, %v967_v41  ;;  %v971_v49 = vsel %vm959_vm6, %v953_v56, %v970_v27  ;;  %v691_v51 = vor.u32 %v690_v46, %v689_v6 }
 0x1fe   : > { %v1199_v24 = vclz %v2860_v18  ;;  %v972_v57 = vsel %vm958_vm5, %v969_v26, %v971_v49  ;;  %v3944_v61 = vmul.u32.u64.low %v3902_v22, %v968_v58  ;;  %v3945_v4 = vmul.u32.u64.high %v3902_v22, %v968_v58, %v3944_v61 }
 0x1ff   : > { %v3949_v10 = vmul.u32.u64.low %v3902_v22, %v972_v57  ;;  %v3950_v3 = vmul.u32.u64.high %v3902_v22, %v972_v57, %v3949_v10  ;;  %v3954_v47 = vadd.f32 %v3524_v39, %v3551_v5  ;;  %v918_v20 = vxor.u32 2147483648, %v3216_v54 }
 0x200   : > { %v921_v8 = vxor.u32 2147483648, %v3214_v28  ;;  %v2861_v56 = vadd.s32 4294967294, %v1199_v24  ;;  %v1244_v11 = vadd.s32 1, %v2863_v63  ;;  %v696_v52 = vand.u32 2147483647, %v695_v0 }
 0x201   : > { %v1187_v55 = vadd.s32 %v3857_v2, %v3868_v37  ;;  %v980_v17 = vmul.u32 %v3902_v22, %v964_v30  ;;  %v5329_v46 = vand.u32 2147483647, %v3954_v47  ;;  %v983_v35 = vadd.s32 1, %v3945_v4 }
 0x202   : > { %vm2862_vm10 = vcmp.lt.s32.totalorder %v2861_v56, 0  ;;  %v1242_v26 = vor.u32 8388608, %v3907_v34  ;;  %vm1245_vm11 = vcmp.gt.s32.totalorder %v1244_v11, 0  ;;  %v698_v39 = vcvt.s32.f32 %v691_v51 }
 0x203   : > { %v1202_v5 = vsel %vm2862_vm10, 0, %v2861_v56  ;;  %vm982_vm12 = vc.u32 %v3950_v3, %v3944_v61  ;;  %v1246_v63 = vsel %vm1245_vm11, %v1244_v11, 0  ;;  %v3966_v6 = vsel %vm917_vm8, %v3214_v28, %v918_v20 }
 0x204   : > { %v3970_v2 = vsel %vm920_vm9, %v921_v8, %v3216_v54  ;;  %v1207_v37 = vsub.s32 4294967266, %v1202_v5  ;;  %v984_v22 = vsel %vm982_vm12, %v983_v35, %v3945_v4  ;;  %v3973_v18 = vmul.f32 %v698_v39, %v696_v52 }
 0x205   : > { %v1203_v34 = vsub.s32 32, %v1202_v5  ;;  %v985_v41 = vadd.s32 %v984_v22, %v980_v17  ;;  %v1248_v27 = vand.u32 31, %v1246_v63  ;;  %v1204_v0 = vshll.u32 %v3921_v7, %v1202_v5 }
 0x206   : > { %v1208_v30 = vadd.s32 127, %v1207_v37  ;;  %v3976_v58 = vshll.u32 %v1242_v26, 8  ;;  %v1031_v28 = vand.u32 2139095040, %v3954_v47  ;;  %v1247_v4 = vshrl.u32 %v1246_v63, 5 }
 0x207   : > { %v986_v49 = vadd.s32 536870912, %v985_v41  ;;  %v1249_v24 = vsub.s32 32, %v1248_v27  ;;  %v1251_v54 = vshll.u32 %v5341_v15, %v1248_v27  ;;  %v1254_v57 = vshll.u32 %v5335_v19, %v1248_v27 }
 0x208   : > { %v1209_v51 = vshll.u32 %v1208_v30, 23  ;;  %v1257_v10 = vshll.u32 %v5331_v21, %v1248_v27  ;;  %v1260_v20 = vshll.u32 %v5333_v23, %v1248_v27  ;;  %v1205_v8 = vshrl.u32 %v1187_v55, %v1203_v34 }
 0x209   : > { %v3983_v56 = vshrl.u32 %v986_v49, 30  ;;  %v1252_v7 = vshrl.u32 %v5335_v19, %v1249_v24  ;;  %v1255_v11 = vshrl.u32 %v5331_v21, %v1249_v24  ;;  %v1258_v17 = vshrl.u32 %v5333_v23, %v1249_v24 }
 0x20a   : > { %v1210_v52 = vor.u32 4788187, %v1209_v51  ;;  %v1261_v35 = vshrl.u32 %v5339_v25, %v1249_v24  ;;  %v1032_v26 = vshrl.u32 %v1031_v28, 23  ;;  %v1263_v37 = vshll.u32 %v5339_v25, %v1248_v27 }
 0x20b   : > { %5405 = vst [vmem:[#allocation13_spill] sm:$0xff] %v3983_v56  ;;  %v988_v39 = vshll.u32 %v3983_v56, 30  ;;  %v1253_v5 = vor.u32 %v1252_v7, %v1251_v54  ;;  %v1256_v63 = vor.u32 %v1255_v11, %v1254_v57  ;;  %v1250_v55 = vshrl.u32 %v5341_v15, %v1249_v24 }
 0x20c   : > { %v1259_v22 = vor.u32 %v1258_v17, %v1257_v10  ;;  %v1262_v34 = vor.u32 %v1261_v35, %v1260_v20  ;;  %v1264_v30 = vshrl.u32 %v5337_v32, %v1249_v24  ;;  %vm3995_vm3 = vcmp.le.f32.partialorder %v513_v48, 0.7853982 }
 0x20d   : > { %v1206_v51 = vor.u32 %v1205_v8, %v1204_v0  ;;  %v3999_v28 = vsub.s32 %v985_v41, %v988_v39  ;;  %vm1266_vm14 = vcmp.lt.s32.totalorder %v1247_v4, 1  ;;  %vm1268_vm15 = vcmp.lt.s32.totalorder %v1247_v4, 3  ;;  %v4004_v0 = vpop.f32.mrb[14].mxu0 }
 0x20e   : > { %v1211_v54 = vand.u32 2147483647, %v1210_v52  ;;  %v1265_v57 = vor.u32 %v1264_v30, %v1263_v37  ;;  %vm1267_vm1 = vcmp.lt.s32.totalorder %v1247_v4, 2  ;;  %vm1269_vm2 = vcmp.lt.s32.totalorder %v1247_v4, 4 }
 0x20f   : > { %v991_v27 = vsub.s32 0, %v3999_v28  ;;  %v1271_v10 = vsel %vm1269_vm2, %v1259_v22, 2102212464  ;;  %v1274_v20 = vsel %vm1266_vm14, %v1253_v5, %v1256_v63  ;;  %v1275_v24 = vsel %vm1269_vm2, %v1262_v34, 920167782 }
 0x210   : > { %v1270_v7 = vsel %vm1266_vm14, %v1250_v55, %v1253_v5  ;;  %v1272_v48 = vsel %vm1268_vm15, %v1256_v63, %v1271_v10  ;;  %v1276_v11 = vsel %vm1268_vm15, %v1259_v22, %v1275_v24  ;;  %v1278_v17 = vsel %vm1266_vm14, %v1256_v63, %v1259_v22 }
 0x211   : > { %vm914_vm4 = vweird.f32 %v3537_v50  ;;  %v1213_v41 = vcvt.s32.f32 %v1206_v51  ;;  %v2852_v8 = vmin.u32 %v991_v27, %v3999_v28  ;;  %v1277_v52 = vsel %vm1267_vm1, %v1274_v20, %v1276_v11 }
 0x212   : > { %v1279_v35 = vsel %vm1269_vm2, %v1265_v57, 1326507024  ;;  %v700_v39 = vxor.u32 2147483648, %v3973_v18  ;;  %v4012_v5 = vmul.u32.u64.low %v3976_v58, %v1277_v52  ;;  %v4013_v55 = vmul.u32.u64.high %v3976_v58, %v1277_v52, %v4012_v5 }
 0x213   : > { %v1280_v37 = vsel %vm1268_vm15, %v1262_v34, %v1279_v35  ;;  %v1214_v63 = vmul.f32 %v1213_v41, %v1211_v54  ;;  %v993_v22 = vclz %v2852_v8  ;;  %v1273_v30 = vsel %vm1267_vm1, %v1270_v7, %v1272_v48  ;;  %v4044_v48 = vld [vmem:[%s5323_s4] ss:$0 sm:$0xff] }
 0x214   : > { %v1281_v51 = vsel %vm1267_vm1, %v1278_v17, %v1280_v37  ;;  %v2855_v57 = vadd.s32 4294967169, %v1032_v26  ;;  %v1035_v20 = vand.u32 8388607, %v5329_v46  ;;  %vm916_vm5 = vcmp.lt.s32.totalorder %v3893_v12, 2 }
 0x215   : > { %v4019_v27 = vmul.u32.u64.low %v3976_v58, %v1281_v51  ;;  %v4020_v10 = vmul.u32.u64.high %v3976_v58, %v1281_v51, %v4019_v27  ;;  %vm4027_vm6 = vcmp.le.f32.partialorder %v616_v44, 0.7853982  ;;  %v5408_v34 = vmov 0 }
 0x216   : > { %v5409_v34 = vsel %vm4027_vm6, 4294967295, %v5408_v34  ;;  %vm618_vm7 = vcmp.lt.s32.totalorder %v3554_v9, 0  ;;  %v2853_v4 = vadd.s32 4294967294, %v993_v22  ;;  %v601_v54 = vsel %vm3995_vm3, %v3530_v43, %v3891_v1 }
 0x217   : > { %5410 = vst [vmem:[#allocation14_spill] sm:$0xff] %v5409_v34  ;;  %v1289_v26 = vmul.u32 %v3976_v58, %v1273_v30  ;;  %v1292_v24 = vadd.s32 1, %v4013_v55  ;;  %v1038_v7 = vadd.s32 1, %v2855_v57  ;;  %v923_v12 = vsel %vm916_vm5, %v3966_v6, %v3970_v2 }
 0x218   : > { %vm5372_vm8 = vcmp.lt.s32.totalorder %v3720_v29, 0  ;;  %v1215_v44 = vxor.u32 2147483648, %v1214_v63  ;;  %v4048_v11 = vadd.f32 %v4044_v48, %v3579_v42  ;;  %v701_v1 = vsel %vm618_vm7, %v700_v39, %v3973_v18 }
 0x219   : > { %vm1291_vm9 = vc.u32 %v4020_v10, %v4012_v5  ;;  %v1036_v6 = vor.u32 8388608, %v1035_v20  ;;  %vm1039_vm10 = vcmp.gt.s32.totalorder %v1038_v7, 0  ;;  %3217 = vcosq.f32 %v601_v54 }
 0x21a   : > { %5411 = vst [vmem:[#allocation15_spill] sm:$0xff] %v4048_v11  ;;  %vm2854_vm11 = vcmp.lt.s32.totalorder %v2853_v4, 0  ;;  %v1293_v2 = vsel %vm1291_vm9, %v1292_v24, %v4013_v55  ;;  %v5330_v58 = vand.u32 2147483647, %v4048_v11  ;;  %3219 = vsinq.f32 %v601_v54 }
 0x21b   : > { %v4059_v42 = vsel %vm914_vm4, nan, %v923_v12  ;;  %v1294_v17 = vadd.s32 %v1293_v2, %v1289_v26  ;;  %v1040_v41 = vsel %vm1039_vm10, %v1038_v7, 0  ;;  %v4064_v18 = vsel %vm4027_vm6, %v3554_v9, %v701_v1 }
 0x21c   : > { %5412 = vst [vmem:[#allocation16_spill] sm:$0xff] %v4059_v42  ;;  %v4068_v8 = vsel %vm5372_vm8, %v1215_v44, %v1214_v63  ;;  %v981_v52 = vadd.s32 %v3944_v61, %v3950_v3  ;;  %v1042_v35 = vand.u32 31, %v1040_v41  ;;  %v4072_v39 = vsel %vm2854_vm11, 0, %v2853_v4 }
 0x21d   : > { %v1295_v50 = vadd.s32 536870912, %v1294_v17  ;;  %v4074_v37 = vshll.u32 %v1036_v6, 8  ;;  %v1546_v55 = vand.u32 2139095040, %v4048_v11  ;;  %v4080_v51 = vand.u32 8388607, %v5330_v58 }
 0x21e   : > { %v1043_v22 = vsub.s32 32, %v1042_v35  ;;  %v1045_v30 = vshll.u32 %v5341_v15, %v1042_v35  ;;  %v4084_v63 = vadd.f32 %v4044_v48, %v3632_v62  ;;  %v1048_v3 = vshll.u32 %v5335_v19, %v1042_v35 }
 0x21f   : > { %v4086_v61 = vshrl.u32 %v1295_v50, 30  ;;  %v1051_v27 = vshll.u32 %v5331_v21, %v1042_v35  ;;  %v1054_v57 = vshll.u32 %v5333_v23, %v1042_v35  ;;  %v997_v20 = vsub.s32 32, %v4072_v39 }
 0x220   : > { %v1041_v54 = vshrl.u32 %v1040_v41, 5  ;;  %v1046_v26 = vshrl.u32 %v5335_v19, %v1043_v22  ;;  %v1049_v62 = vshrl.u32 %v5331_v21, %v1043_v22  ;;  %v1052_v7 = vshrl.u32 %v5333_v23, %v1043_v22  ;;  %v4109_v23 = vpop.f32.mrb[15].mxu0 }
 0x221   : > { %5413 = vst [vmem:[#allocation17_spill] sm:$0xff] %v4086_v61  ;;  %v1297_v24 = vshll.u32 %v4086_v61, 30  ;;  %v1055_v12 = vshrl.u32 %v5339_v25, %v1043_v22  ;;  %v1057_v1 = vshll.u32 %v5339_v25, %v1042_v35  ;;  %v1058_v6 = vshrl.u32 %v5337_v32, %v1043_v22 }
 0x222   : > { %v1047_v44 = vor.u32 %v1046_v26, %v1045_v30  ;;  %v1547_v2 = vshrl.u32 %v1546_v55, 23  ;;  %vm4103_vm12 = vcmp.le.f32.partialorder %v1131_v38, 0.7853982  ;;  %v5414_v41 = vmov 0 }
 0x223   : > { %v5415_v41 = vsel %vm4103_vm12, 4294967295, %v5414_v41  ;;  %v4107_v50 = vsub.s32 %v1294_v17, %v1297_v24  ;;  %v1050_v46 = vor.u32 %v1049_v62, %v1048_v3  ;;  %v1053_v58 = vor.u32 %v1052_v7, %v1051_v27  ;;  %v4111_v19 = vpop.eup %3217 }
 0x224   : > { %5416 = vst [vmem:[#allocation18_spill] sm:$0xff] %v5415_v41  ;;  %v1056_v21 = vor.u32 %v1055_v12, %v1054_v57  ;;  %v1001_v35 = vsub.s32 4294967266, %v4072_v39  ;;  %v1044_v30 = vshrl.u32 %v5341_v15, %v1043_v22  ;;  %v1059_v55 = vor.u32 %v1058_v6, %v1057_v1  ;;  %v4115_v26 = vpop.eup %3219 }
 0x225   : > { %vm1060_vm14 = vcmp.lt.s32.totalorder %v1041_v54, 1  ;;  %v1300_v38 = vsub.s32 0, %v4107_v50  ;;  %vm1061_vm15 = vcmp.lt.s32.totalorder %v1041_v54, 2  ;;  %vm1062_vm1 = vcmp.lt.s32.totalorder %v1041_v54, 3 }
 0x226   : > { %vm1063_vm2 = vcmp.lt.s32.totalorder %v1041_v54, 4  ;;  %v1068_v3 = vsel %vm1060_vm14, %v1047_v44, %v1050_v46  ;;  %v2875_v57 = vadd.s32 4294967169, %v1547_v2  ;;  %v1072_v7 = vsel %vm1060_vm14, %v1050_v46, %v1053_v58 }
 0x227   : > { %v1065_v17 = vsel %vm1063_vm2, %v1053_v58, 2102212464  ;;  %v1069_v27 = vsel %vm1063_vm2, %v1056_v21, 920167782  ;;  %v2864_v24 = vmin.u32 %v1300_v38, %v4107_v50  ;;  %v1551_v12 = vor.u32 8388608, %v4080_v51 }
 0x228   : > { %v1070_v62 = vsel %vm1062_vm1, %v1053_v58, %v1069_v27  ;;  %v1064_v22 = vsel %vm1060_vm14, %v1044_v30, %v1047_v44  ;;  %v1066_v1 = vsel %vm1062_vm1, %v1050_v46, %v1065_v17  ;;  %v1073_v32 = vsel %vm1063_vm2, %v1059_v55, 1326507024 }
 0x229   : > { %v1071_v6 = vsel %vm1061_vm15, %v1068_v3, %v1070_v62  ;;  %v1302_v25 = vclz %v2864_v24  ;;  %v1074_v15 = vsel %vm1062_vm1, %v1056_v21, %v1073_v32  ;;  %v999_v60 = vshrl.u32 %v981_v52, %v997_v20 }
 0x22a   : > { %v4122_v4 = vmul.u32.u64.low %v4074_v37, %v1071_v6  ;;  %v4123_v61 = vmul.u32.u64.high %v4074_v37, %v1071_v6, %v4122_v4  ;;  %v4126_v2 = vadd.s32 127, %v1001_v35  ;;  %v1075_v38 = vsel %vm1061_vm15, %v1072_v7, %v1074_v15 }
 0x22b   : > { %v1553_v58 = vadd.s32 1, %v2875_v57  ;;  %v2865_v27 = vadd.s32 4294967294, %v1302_v25  ;;  %v1067_v51 = vsel %vm1061_vm15, %v1064_v22, %v1066_v1  ;;  %3221 = vcosq.f32 %v4064_v18 }
 0x22c   : > { %v4131_v46 = vmul.u32.u64.low %v4074_v37, %v1075_v38  ;;  %v4132_v44 = vmul.u32.u64.high %v4074_v37, %v1075_v38, %v4131_v46  ;;  %v4139_v21 = vsel %vm4103_vm12, %v3720_v29, %v4068_v8  ;;  %v1290_v32 = vadd.s32 %v4012_v5, %v4020_v10 }
 0x22d   : > { %vm1554_vm4 = vcmp.gt.s32.totalorder %v1553_v58, 0  ;;  %vm2866_vm5 = vcmp.lt.s32.totalorder %v2865_v27, 0  ;;  %v1086_v15 = vadd.s32 1, %v4123_v61  ;;  %v4144_v52 = vshll.u32 %v1551_v12, 8 }
 0x22e   : > { %v1555_v25 = vsel %vm1554_vm4, %v1553_v58, 0  ;;  %v1305_v20 = vsel %vm2866_vm5, 0, %v2865_v27  ;;  %v1083_v54 = vmul.u32 %v4074_v37, %v1067_v51  ;;  %v5417_v8 = vshll.u32 %v3999_v28, %v4072_v39 }
 0x22f   : > { %v1557_v35 = vand.u32 31, %v1555_v25  ;;  %v1003_v5 = vshll.u32 %v4126_v2, 23  ;;  %v1310_v10 = vsub.s32 4294967266, %v1305_v20  ;;  %v1340_v17 = vand.u32 2139095040, %v4084_v63 }
 0x230   : > { %v4151_v55 = vor.u32 %v999_v60, %v5417_v8  ;;  %v1306_v3 = vsub.s32 32, %v1305_v20  ;;  %vm1085_vm9 = vc.u32 %v4132_v44, %v4122_v4  ;;  %v5418_v24 = vmov 683565275  }
 0x231   : > { %v1558_v57 = vsub.s32 32, %v1557_v35  ;;  %v1560_v37 = vshll.u32 %v5418_v24, %v1557_v35  ;;  %v1311_v62 = vadd.s32 127, %v1310_v10  ;;  %v1087_v7 = vsel %vm1085_vm9, %v1086_v15, %v4123_v61 }
 0x232   : > { %v5419_v12 = vmov 2475754826   ;;  %v5420_v28 = vmov 2131351028   ;;  %v1088_v39 = vadd.s32 %v1087_v7, %v1083_v54  ;;  %v1556_v1 = vshrl.u32 %v1555_v25, 5 }
 0x233   : > { %v1563_v22 = vshll.u32 %v5419_v12, %v1557_v35  ;;  %v1566_v60 = vshll.u32 %v5420_v28, %v1557_v35  ;;  %v1561_v6 = vshrl.u32 %v5419_v12, %v1558_v57  ;;  %v1564_v2 = vshrl.u32 %v5420_v28, %v1558_v57 }
 0x234   : > { %v1307_v38 = vshll.u32 %v4107_v50, %v1305_v20  ;;  %v1312_v58 = vshll.u32 %v1311_v62, 23  ;;  %v5421_v27 = vmov 2102212464   ;;  %v1308_v8 = vshrl.u32 %v1290_v32, %v1306_v3 }
 0x235   : > { %v1567_v51 = vshrl.u32 %v5421_v27, %v1558_v57  ;;  %v1569_v46 = vshll.u32 %v5421_v27, %v1557_v35  ;;  %v1089_v10 = vadd.s32 536870912, %v1088_v39  ;;  %v1559_v61 = vshrl.u32 %v5418_v24, %v1558_v57  ;;  %v4169_v29 = vpop.eup %3221 }
 0x236   : > { %v5422_v15 = vmov 920167782   ;;  %v1562_v41 = vor.u32 %v1561_v6, %v1560_v37  ;;  %v1565_v54 = vor.u32 %v1564_v2, %v1563_v22  ;;  %5423 = vst [vmem:[#allocation19_spill] sm:$0xff] %v4169_v29  ;;  %v5425_v20 = vmov 1326507024  }
 0x237   : > { %v1570_v30 = vshrl.u32 %v5422_v15, %v1558_v57  ;;  %v1568_v25 = vor.u32 %v1567_v51, %v1566_v60  ;;  %v1572_v7 = vshll.u32 %v5422_v15, %v1557_v35  ;;  %v4171_v45 = vshrl.u32 %v1089_v10, 30 }
 0x238   : > { %v1573_v62 = vshrl.u32 %v5425_v20, %v1558_v57  ;;  %vm1575_vm10 = vcmp.lt.s32.totalorder %v1556_v1, 1  ;;  %v1313_v59 = vor.u32 4788187, %v1312_v58  ;;  %vm1577_vm11 = vcmp.lt.s32.totalorder %v1556_v1, 3 }
 0x239   : > { %5424 = vst [vmem:[#allocation20_spill] sm:$0xff] %v4171_v45  ;;  %v1571_v50 = vor.u32 %v1570_v30, %v1569_v46  ;;  %vm1578_vm14 = vcmp.lt.s32.totalorder %v1556_v1, 4  ;;  %v1341_v32 = vshrl.u32 %v1340_v17, 23  ;;  %v1091_v3 = vshll.u32 %v4171_v45, 30 }
 0x23a   : > { %v1574_v56 = vor.u32 %v1573_v62, %v1572_v7  ;;  %vm1576_vm15 = vcmp.lt.s32.totalorder %v1556_v1, 2  ;;  %v1580_v37 = vsel %vm1578_vm14, %v1568_v25, 2102212464  ;;  %v1309_v22 = vor.u32 %v1308_v8, %v1307_v38 }
 0x23b   : > { %v1579_v35 = vsel %vm1575_vm10, %v1559_v61, %v1562_v41  ;;  %v1583_v60 = vsel %vm1575_vm10, %v1562_v41, %v1565_v54  ;;  %v1584_v30 = vsel %vm1578_vm14, %v1571_v50, 920167782  ;;  %v4179_v6 = vsub.s32 %v1088_v39, %v1091_v3 }
 0x23c   : > { %v1581_v57 = vsel %vm1577_vm11, %v1565_v54, %v1580_v37  ;;  %v1585_v2 = vsel %vm1577_vm11, %v1568_v25, %v1584_v30  ;;  %v1587_v17 = vsel %vm1575_vm10, %v1565_v54, %v1568_v25  ;;  %v1004_v58 = vor.u32 4788187, %v1003_v5 }
 0x23d   : > { %v1314_v51 = vand.u32 2147483647, %v1313_v59  ;;  %v1586_v46 = vsel %vm1576_vm15, %v1583_v60, %v1585_v2  ;;  %v1588_v38 = vsel %vm1578_vm14, %v1574_v56, 1326507024  ;;  %v1094_v8 = vsub.s32 0, %v4179_v6 }
 0x23e   : > { %v1589_v41 = vsel %vm1577_vm11, %v1571_v50, %v1588_v38  ;;  %v4189_v10 = vmul.u32.u64.low %v4144_v52, %v1586_v46  ;;  %v4190_v39 = vmul.u32.u64.high %v4144_v52, %v1586_v46, %v4189_v10  ;;  %v1582_v61 = vsel %vm1576_vm15, %v1579_v35, %v1581_v57 }
 0x23f   : > { %v1590_v7 = vsel %vm1576_vm15, %v1587_v17, %v1589_v41  ;;  %v2867_v54 = vadd.s32 4294967169, %v1341_v32  ;;  %v5426_v59 = vand.u32 2147483647, %v4084_v63  ;;  %v1316_v25 = vcvt.s32.f32 %v1309_v22 }
 0x240   : > { %v2856_v56 = vmin.u32 %v1094_v8, %v4179_v6  ;;  %v4199_v62 = vmul.u32.u64.low %v4144_v52, %v1590_v7  ;;  %v4200_v3 = vmul.u32.u64.high %v4144_v52, %v1590_v7, %v4199_v62  ;;  %3223 = vsinq.f32 %v4064_v18 }
 0x241   : > { %v1344_v5 = vand.u32 8388607, %v5426_v59  ;;  %v1005_v50 = vand.u32 2147483647, %v1004_v58  ;;  %v1347_v37 = vadd.s32 1, %v2867_v54  ;;  %v4205_v35 = vadd.f32 %v4044_v48, %v3696_v33 }
 0x242   : > { %v4207_v1 = vmul.f32 %v1316_v25, %v1314_v51  ;;  %v1096_v32 = vclz %v2856_v56  ;;  %v1598_v60 = vmul.u32 %v4144_v52, %v1582_v61  ;;  %v1601_v22 = vadd.s32 1, %v4190_v39 }
 0x243   : > { %5427 = vst [vmem:[#allocation21_spill] sm:$0xff] %v4205_v35  ;;  %3225 = vcosq.f32 %v4139_v21  ;;  %v1007_v30 = vcvt.s32.f32 %v4151_v55  ;;  %v1345_v57 = vor.u32 8388608, %v1344_v5  ;;  %vm1348_vm1 = vcmp.gt.s32.totalorder %v1347_v37, 0 }
 0x244   : > { %v2857_v18 = vadd.s32 4294967294, %v1096_v32  ;;  %vm1600_vm2 = vc.u32 %v4200_v3, %v4189_v10  ;;  %v1349_v2 = vsel %vm1348_vm1, %v1347_v37, 0  ;;  %v5352_v33 = vand.u32 2147483647, %v4205_v35 }
 0x245   : > { %3227 = vsinq.f32 %v4139_v21  ;;  %v4217_v17 = vmul.f32 %v1007_v30, %v1005_v50  ;;  %v1602_v52 = vsel %vm1600_vm2, %v1601_v22, %v4190_v39  ;;  %v1351_v58 = vand.u32 31, %v1349_v2 }
 0x246   : > { %v1084_v55 = vadd.s32 %v4122_v4, %v4132_v44  ;;  %vm2858_vm4 = vcmp.lt.s32.totalorder %v2857_v18, 0  ;;  %v1603_v46 = vadd.s32 %v1602_v52, %v1598_v60  ;;  %v4223_v41 = vshll.u32 %v1345_v57, 8 }
 0x247   : > { %v1099_v38 = vsel %vm2858_vm4, 0, %v2857_v18  ;;  %v1352_v8 = vsub.s32 32, %v1351_v58  ;;  %v1649_v61 = vand.u32 2139095040, %v4205_v35  ;;  %v1354_v21 = vshll.u32 %v5418_v24, %v1351_v58 }
 0x248   : > { %v1604_v7 = vadd.s32 536870912, %v1603_v46  ;;  %v1357_v54 = vshll.u32 %v5419_v12, %v1351_v58  ;;  %v4230_v39 = vand.u32 8388607, %v5352_v33  ;;  %v1350_v59 = vshrl.u32 %v1349_v2, 5 }
 0x249   : > { %v1355_v4 = vshrl.u32 %v5419_v12, %v1352_v8  ;;  %v1358_v44 = vshrl.u32 %v5420_v28, %v1352_v8  ;;  %v1360_v5 = vshll.u32 %v5420_v28, %v1351_v58  ;;  %v1100_v25 = vsub.s32 32, %v1099_v38 }
 0x24a   : > { %v1104_v56 = vsub.s32 4294967266, %v1099_v38  ;;  %v4235_v62 = vshrl.u32 %v1604_v7, 30  ;;  %v1361_v50 = vshrl.u32 %v5421_v27, %v1352_v8  ;;  %v4238_v37 = vpop.eup %3223  ;;  %v1353_v32 = vshrl.u32 %v5418_v24, %v1352_v8 }
 0x24b   : > { %5429 = vst [vmem:[#allocation23_spill] sm:$0xff] %v4238_v37  ;;  %v1363_v60 = vshll.u32 %v5421_v27, %v1351_v58  ;;  %v1364_v22 = vshrl.u32 %v5422_v15, %v1352_v8  ;;  %v4245_v30 = vadd.f32 %v4044_v48, %v3779_v36  ;;  %v1356_v18 = vor.u32 %v1355_v4, %v1354_v21 }
 0x24c   : > { %5428 = vst [vmem:[#allocation22_spill] sm:$0xff] %v4235_v62  ;;  %v1606_v57 = vshll.u32 %v4235_v62, 30  ;;  %v1359_v2 = vor.u32 %v1358_v44, %v1357_v54  ;;  %v1362_v52 = vor.u32 %v1361_v50, %v1360_v5  ;;  %vm5371_vm5 = vcmp.lt.s32.totalorder %v3877_v53, 0 }
 0x24d   : > { %v4248_v7 = vpop.eup %3225  ;;  %v1365_v33 = vor.u32 %v1364_v22, %v1363_v60  ;;  %v1366_v51 = vshll.u32 %v5422_v15, %v1351_v58  ;;  %v1367_v45 = vshrl.u32 %v5425_v20, %v1352_v8  ;;  %vm1369_vm9 = vcmp.lt.s32.totalorder %v1350_v59, 1 }
 0x24e   : > { %v1102_v42 = vshrl.u32 %v1084_v55, %v1100_v25  ;;  %v1105_v29 = vadd.s32 127, %v1104_v56  ;;  %v4253_v34 = vsub.s32 %v1603_v46, %v1606_v57  ;;  %v1650_v36 = vshrl.u32 %v1649_v61, 23 }
 0x24f   : > { %v4255_v37 = vpop.eup %3227  ;;  %v1368_v21 = vor.u32 %v1367_v45, %v1366_v51  ;;  %vm1370_vm10 = vcmp.lt.s32.totalorder %v1350_v59, 2  ;;  %vm1371_vm11 = vcmp.lt.s32.totalorder %v1350_v59, 3  ;;  %vm1372_vm14 = vcmp.lt.s32.totalorder %v1350_v59, 4 }
 0x250   : > { %v1609_v54 = vsub.s32 0, %v4253_v34  ;;  %v1373_v4 = vsel %vm1369_vm9, %v1353_v32, %v1356_v18  ;;  %v1374_v44 = vsel %vm1372_vm14, %v1362_v52, 2102212464  ;;  %v1377_v58 = vsel %vm1369_vm9, %v1356_v18, %v1359_v2 }
 0x251   : > { %v1375_v8 = vsel %vm1371_vm11, %v1359_v2, %v1374_v44  ;;  %v1378_v55 = vsel %vm1372_vm14, %v1365_v33, 920167782  ;;  %v1381_v46 = vsel %vm1369_vm9, %v1359_v2, %v1362_v52  ;;  %v1382_v5 = vsel %vm1372_vm14, %v1368_v21, 1326507024 }
 0x252   : > { %v1101_v61 = vshll.u32 %v4179_v6, %v1099_v38  ;;  %v2876_v45 = vmin.u32 %v1609_v54, %v4253_v34  ;;  %v1379_v51 = vsel %vm1371_vm11, %v1362_v52, %v1378_v55  ;;  %v1654_v25 = vor.u32 8388608, %v4230_v39 }
 0x253   : > { %v1106_v56 = vshll.u32 %v1105_v29, 23  ;;  %v1380_v50 = vsel %vm1370_vm10, %v1377_v58, %v1379_v51  ;;  %v1383_v32 = vsel %vm1371_vm11, %v1365_v33, %v1382_v5  ;;  %v2879_v60 = vadd.s32 4294967169, %v1650_v36 }
 0x254   : > { %v4268_v22 = vor.u32 %v1102_v42, %v1101_v61  ;;  %v1611_v57 = vclz %v2876_v45  ;;  %v1376_v18 = vsel %vm1370_vm10, %v1373_v4, %v1375_v8  ;;  %v1384_v2 = vsel %vm1370_vm10, %v1381_v46, %v1383_v32 }
 0x255   : > { %v4273_v6 = vmul.u32.u64.low %v4223_v41, %v1384_v2  ;;  %v4274_v38 = vmul.u32.u64.high %v4223_v41, %v1384_v2, %v4273_v6  ;;  %v4277_v52 = vmul.u32.u64.low %v4223_v41, %v1380_v50  ;;  %v4278_v39 = vmul.u32.u64.high %v4223_v41, %v1380_v50, %v4277_v52  ;;  %v3197_v2 = vld [vmem:[%s5324_s5] sm:$0xff]  }
 0x256   : > { %v1009_v29 = vxor.u32 2147483648, %v4217_v17  ;;  %v5430_v42 = vxor.u32 2147483648, %v4207_v1  ;;  %v2877_v59 = vadd.s32 4294967294, %v1611_v57  ;;  %v1656_v36 = vadd.s32 1, %v2879_v60  ;;  %3000 = vmatprep.subr.bf16.mxu0 %v3197_v2  ;;  %3038 = vmatprep.subr.bf16.mxu1 %v3197_v2 }
 0x257   : > { %v4289_v21 = vor.u32 4788187, %v1106_v56  ;;  %v1599_v54 = vadd.s32 %v4189_v10, %v4200_v3  ;;  %v5358_v4 = vand.u32 2147483647, %v4245_v30  ;;  %v4296_v44 = vadd.f32 %v4044_v48, %v3863_v13  ;;  %3001 = vmatpush3.bf16.msra.mxu0 %v3197_v2  ;;  %3046 = vmatpush3.bf16.msra.mxu1 %v3197_v2 }
 0x258   : > { %v4287_v33 = vsel %vm5371_vm5, %v5430_v42, %v4207_v1  ;;  %v1110_v58 = vcvt.s32.f32 %v4268_v22  ;;  %vm2878_vm15 = vcmp.lt.s32.totalorder %v2877_v59, 0  ;;  %v1392_v8 = vmul.u32 %v4223_v41, %v1376_v18 }
 0x259   : > { %vm1657_vm1 = vcmp.gt.s32.totalorder %v1656_v36, 0  ;;  %v1614_v1 = vsel %vm2878_vm15, 0, %v2877_v59  ;;  %vm1394_vm2 = vc.u32 %v4274_v38, %v4277_v52  ;;  %v1395_v55 = vadd.s32 1, %v4278_v39 }
 0x25a   : > { %v4303_v46 = vshll.u32 %v1654_v25, 8  ;;  %v1615_v10 = vsub.s32 32, %v1614_v1  ;;  %v1616_v3 = vshll.u32 %v4253_v34, %v1614_v1  ;;  %v1619_v5 = vsub.s32 4294967266, %v1614_v1 }
 0x25b   : > { %v1658_v13 = vsel %vm1657_vm1, %v1656_v36, 0  ;;  %v1396_v61 = vsel %vm1394_vm2, %v1395_v55, %v4278_v39  ;;  %v1443_v51 = vand.u32 2139095040, %v4245_v30  ;;  %v4310_v41 = vand.u32 8388607, %v5358_v4  ;;  %v3198_v4 = vld [vmem:[%s5324_s5 + $0x8] sm:$0xff]  }
 0x25c   : > { %v1660_v45 = vand.u32 31, %v1658_v13  ;;  %v1617_v56 = vshrl.u32 %v1599_v54, %v1615_v10  ;;  %v1620_v50 = vadd.s32 127, %v1619_v5  ;;  %v1397_v32 = vadd.s32 %v1396_v61, %v1392_v8  ;;  %3002 = vmatprep.subr.bf16.mxu0 %v3198_v4  ;;  %3039 = vmatprep.subr.bf16.mxu1 %v3198_v4 }
 0x25d   : > { %v4312_v60 = vshrl.u32 %v1658_v13, 5  ;;  %vm5388_vm4 = vcmp.lt.s32.totalorder %v3821_v16, 0  ;;  %vm5363_vm15 = vcmp.lt.s32.totalorder %v4048_v11, 0  ;;  %3003 = vmatpush3.bf16.msra.mxu0 %v3198_v4  ;;  %3047 = vmatpush3.bf16.msra.mxu1 %v3198_v4  ;;  %vm5385_vm0 = vcmp.lt.s32.totalorder %v4205_v35, 0 }
 0x25e   : > { %v1661_v25 = vsub.s32 32, %v1660_v45  ;;  %v1663_v57 = vshll.u32 %v5418_v24, %v1660_v45  ;;  %v1666_v34 = vshll.u32 %v5419_v12, %v1660_v45  ;;  %v1669_v18 = vshll.u32 %v5420_v28, %v1660_v45 }
 0x25f   : > { %v1618_v6 = vor.u32 %v1617_v56, %v1616_v3  ;;  %v1621_v39 = vshll.u32 %v1620_v50, 23  ;;  %v1398_v42 = vadd.s32 536870912, %v1397_v32  ;;  %v1672_v59 = vshll.u32 %v5421_v27, %v1660_v45 }
 0x260   : > { %v1662_v36 = vshrl.u32 %v5418_v24, %v1661_v25  ;;  %v1664_v54 = vshrl.u32 %v5419_v12, %v1661_v25  ;;  %v1667_v8 = vshrl.u32 %v5420_v28, %v1661_v25  ;;  %v1670_v1 = vshrl.u32 %v5421_v27, %v1661_v25 }
 0x261   : > { %v1622_v55 = vor.u32 4788187, %v1621_v39  ;;  %v1625_v10 = vcvt.s32.f32 %v1618_v6  ;;  %v4325_v5 = vshrl.u32 %v1398_v42, 30  ;;  %v1673_v13 = vshrl.u32 %v5422_v15, %v1661_v25 }
 0x262   : > { %v1665_v3 = vor.u32 %v1664_v54, %v1663_v57  ;;  %v1668_v61 = vor.u32 %v1667_v8, %v1666_v34  ;;  %v1671_v56 = vor.u32 %v1670_v1, %v1669_v18  ;;  %v1675_v50 = vshll.u32 %v5422_v15, %v1660_v45 }
 0x263   : > { %5431 = vst [vmem:[#allocation24_spill] sm:$0xff] %v4325_v5  ;;  %v5432_v6 = vand.u32 2147483647, %v3877_v53  ;;  %v1623_v42 = vand.u32 2147483647, %v1622_v55  ;;  %v1400_v57 = vshll.u32 %v4325_v5, 30  ;;  %v1674_v34 = vor.u32 %v1673_v13, %v1672_v59 }
 0x264   : > { %v1676_v18 = vshrl.u32 %v5425_v20, %v1661_v25  ;;  %vm1678_vm10 = vcmp.lt.s32.totalorder %v4312_v60, 1  ;;  %vm1680_vm11 = vcmp.lt.s32.totalorder %v4312_v60, 3  ;;  %vm1681_vm14 = vcmp.lt.s32.totalorder %v4312_v60, 4 }
 0x265   : > { %vm4335_vm9 = vcmp.le.f32.partialorder %v5432_v6, 0.7853982  ;;  %v1444_v45 = vshrl.u32 %v1443_v51, 23  ;;  %v1626_v2 = vmul.f32 %v1625_v10, %v1623_v42  ;;  %v4345_v54 = vsub.s32 %v1397_v32, %v1400_v57  ;;  %v3199_v32 = vld [vmem:[%s5324_s5 + $0x10] sm:$0xff]  }
 0x266   : > { %v1677_v8 = vor.u32 %v1676_v18, %v1675_v50  ;;  %vm1679_vm1 = vcmp.lt.s32.totalorder %v4312_v60, 2  ;;  %v1682_v25 = vsel %vm1678_vm10, %v1662_v36, %v1665_v3  ;;  %v1683_v59 = vsel %vm1681_vm14, %v1671_v56, 2102212464  ;;  %3004 = vmatprep.subr.bf16.mxu0 %v3199_v32  ;;  %3040 = vmatprep.subr.bf16.mxu1 %v3199_v32 }
 0x267   : > { %v1686_v51 = vsel %vm1678_vm10, %v1665_v3, %v1668_v61  ;;  %v1687_v1 = vsel %vm1681_vm14, %v1674_v34, 920167782  ;;  %v1403_v55 = vsub.s32 0, %v4345_v54  ;;  %v1684_v10 = vsel %vm1680_vm11, %v1668_v61, %v1683_v59  ;;  %3005 = vmatpush3.bf16.msra.mxu0 %v3199_v32  ;;  %3048 = vmatpush3.bf16.msra.mxu1 %v3199_v32 }
 0x268   : > { %v1688_v36 = vsel %vm1680_vm11, %v1671_v56, %v1687_v1  ;;  %v1690_v13 = vsel %vm1678_vm10, %v1668_v61, %v1671_v56  ;;  %v1108_v3 = vand.u32 2147483647, %v4289_v21  ;;  %v1691_v6 = vsel %vm1681_vm14, %v1677_v8, 1326507024  ;;  %v3200_v8 = vld [vmem:[%s5324_s5 + $0x18] sm:$0xff]  }
 0x269   : > { %v1689_v50 = vsel %vm1679_vm1, %v1686_v51, %v1688_v36  ;;  %v2871_v4 = vadd.s32 4294967169, %v1444_v45  ;;  %v1627_v42 = vxor.u32 2147483648, %v1626_v2  ;;  %v2868_v57 = vmin.u32 %v1403_v55, %v4345_v54  ;;  %3006 = vmatprep.subr.bf16.mxu0 %v3200_v8  ;;  %3041 = vmatprep.subr.bf16.mxu1 %v3200_v8 }
 0x26a   : > { %v1692_v18 = vsel %vm1680_vm11, %v1674_v34, %v1691_v6  ;;  %v1448_v59 = vor.u32 8388608, %v4310_v41  ;;  %v1685_v21 = vsel %vm1679_vm1, %v1682_v25, %v1684_v10  ;;  %v1958_v25 = vand.u32 2139095040, %v4296_v44 }
 0x26b   : > { %v1693_v61 = vsel %vm1679_vm1, %v1690_v13, %v1692_v18  ;;  %v4380_v56 = vmul.u32.u64.low %v4303_v46, %v1689_v50  ;;  %v4381_v45 = vmul.u32.u64.high %v4303_v46, %v1689_v50, %v4380_v56  ;;  %v1405_v34 = vclz %v2868_v57  ;;  %3007 = vmatpush3.bf16.msra.mxu0 %v3200_v8  ;;  %v3201_v13 = vld [vmem:[%s5324_s5 + $0x20] sm:$0xff]   ;;  %3049 = vmatpush3.bf16.msra.mxu1 %v3200_v8 }
 0x26c   : > { %v4388_v41 = vmul.u32.u64.low %v4303_v46, %v1693_v61  ;;  %v4389_v51 = vmul.u32.u64.high %v4303_v46, %v1693_v61, %v4388_v41  ;;  %v4397_v60 = vsel %vm5388_vm4, %v1009_v29, %v4217_v17  ;;  %v4403_v1 = vsel %vm4335_vm9, %v3877_v53, %v4287_v33  ;;  %3008 = vmatprep.subr.bf16.mxu0 %v3201_v13  ;;  %3042 = vmatprep.subr.bf16.mxu1 %v3201_v13  ;;  %v3203_v29 = vld [vmem:[%s5324_s5 + $0x30] sm:$0xff]  }
 0x26d   : > { %v4407_v32 = vmul.f32 %v1110_v58, %v1108_v3  ;;  %v1450_v55 = vadd.s32 1, %v2871_v4  ;;  %v1393_v10 = vadd.s32 %v4277_v52, %v4274_v38  ;;  %v2869_v36 = vadd.s32 4294967294, %v1405_v34 }
 0x26e   : > { %v1701_v17 = vmul.u32 %v4303_v46, %v1685_v21  ;;  %v4415_v33 = vsel %vm5363_vm15, %v1627_v42, %v1626_v2  ;;  %v1704_v22 = vadd.s32 1, %v4381_v45  ;;  %v4418_v58 = vshll.u32 %v1448_v59, 8 }
 0x26f   : > { %vm1451_vm2 = vcmp.gt.s32.totalorder %v1450_v55, 0  ;;  %vm2870_vm10 = vcmp.lt.s32.totalorder %v2869_v36, 0  ;;  %vm1703_vm11 = vc.u32 %v4389_v51, %v4380_v56  ;;  %v4425_v52 = vshrl.u32 %v1958_v25, 23  ;;  %3009 = vmatpush3.bf16.msra.mxu0 %v3201_v13  ;;  %3050 = vmatpush3.bf16.msra.mxu1 %v3201_v13 }
 0x270   : > { %v1452_v38 = vsel %vm1451_vm2, %v1450_v55, 0  ;;  %v1408_v46 = vsel %vm2870_vm10, 0, %v2869_v36  ;;  %v1705_v2 = vsel %vm1703_vm11, %v1704_v22, %v4381_v45  ;;  %v3202_v45 = vld [vmem:[%s5324_s5 + $0x28] sm:$0xff]   ;;  %vm5369_vm11 = vcmp.lt.s32.totalorder %v4084_v63, 0 }
 0x271   : > { %v4428_v3 = vshrl.u32 %v1452_v38, 5  ;;  %v1454_v50 = vand.u32 31, %v1452_v38  ;;  %v1409_v6 = vsub.s32 32, %v1408_v46  ;;  %v1410_v4 = vshll.u32 %v4345_v54, %v1408_v46  ;;  %3010 = vmatprep.subr.bf16.mxu0 %v3202_v45  ;;  %3043 = vmatprep.subr.bf16.mxu1 %v3202_v45 }
 0x272   : > { %v1413_v42 = vsub.s32 4294967266, %v1408_v46  ;;  %v1706_v57 = vadd.s32 %v1705_v2, %v1701_v17  ;;  %3229 = vcosq.f32 %v4403_v1 }
 0x273   : > { %v1455_v18 = vsub.s32 32, %v1454_v50  ;;  %v1457_v59 = vshll.u32 %v5418_v24, %v1454_v50  ;;  %v1460_v21 = vshll.u32 %v5419_v12, %v1454_v50  ;;  %v1463_v61 = vshll.u32 %v5420_v28, %v1454_v50  ;;  %3011 = vmatpush3.bf16.msra.mxu0 %v3202_v45  ;;  %3051 = vmatpush3.bf16.msra.mxu1 %v3202_v45 }
 0x274   : > { %v1411_v8 = vshrl.u32 %v1393_v10, %v1409_v6  ;;  %v1414_v34 = vadd.s32 127, %v1413_v42  ;;  %v1707_v41 = vadd.s32 536870912, %v1706_v57  ;;  %v1466_v54 = vshll.u32 %v5421_v27, %v1454_v50  ;;  %3012 = vmatprep.subr.bf16.mxu0 %v3203_v29  ;;  %3044 = vmatprep.subr.bf16.mxu1 %v3203_v29 }
 0x275   : > { %v1456_v25 = vshrl.u32 %v5418_v24, %v1455_v18  ;;  %v1458_v55 = vshrl.u32 %v5419_v12, %v1455_v18  ;;  %v1461_v36 = vshrl.u32 %v5420_v28, %v1455_v18  ;;  %v1464_v17 = vshrl.u32 %v5421_v27, %v1455_v18 }
 0x276   : > { %v1412_v22 = vor.u32 %v1411_v8, %v1410_v4  ;;  %v1415_v38 = vshll.u32 %v1414_v34, 23  ;;  %v4442_v46 = vshrl.u32 %v1707_v41, 30  ;;  %v1467_v13 = vshrl.u32 %v5422_v15, %v1455_v18 }
 0x277   : > { %v1459_v10 = vor.u32 %v1458_v55, %v1457_v59  ;;  %v1462_v2 = vor.u32 %v1461_v36, %v1460_v21  ;;  %v1465_v6 = vor.u32 %v1464_v17, %v1463_v61  ;;  %v1469_v42 = vshll.u32 %v5422_v15, %v1454_v50  ;;  %3013 = vmatpush3.bf16.msra.mxu0 %v3203_v29  ;;  %v3204_v36 = vld [vmem:[%s5324_s5 + $0x38] sm:$0xff]  }
 0x278   : > { %5435 = vst [vmem:[#allocation25_spill] sm:$0xff] %v4442_v46  ;;  %v1416_v62 = vor.u32 4788187, %v1415_v38  ;;  %v1419_v5 = vcvt.s32.f32 %v1412_v22  ;;  %v1709_v4 = vshll.u32 %v4442_v46, 30  ;;  %v1468_v8 = vor.u32 %v1467_v13, %v1466_v54  ;;  %3052 = vmatpush3.bf16.msra.mxu1 %v3203_v29  ;;  %3014 = vmatprep.subr.bf16.mxu0 %v3204_v36 }
 0x279   : > { %v5436_v34 = vand.u32 2147483647, %v4048_v11  ;;  %v5437_v41 = vmov 0  ;;  %v1470_v59 = vshrl.u32 %v5425_v20, %v1455_v18  ;;  %vm1472_vm1 = vcmp.lt.s32.totalorder %v4428_v3, 1  ;;  %3045 = vmatprep.subr.bf16.mxu1 %v3204_v36 }
 0x27a   : > { %vm1473_vm2 = vcmp.lt.s32.totalorder %v4428_v3, 2  ;;  %vm1474_vm10 = vcmp.lt.s32.totalorder %v4428_v3, 3  ;;  %v1417_v50 = vand.u32 2147483647, %v1416_v62  ;;  %v4461_v21 = vsub.s32 %v1706_v57, %v1709_v4 }
 0x27b   : > { %vm4452_vm14 = vcmp.le.f32.partialorder %v5436_v34, 0.7853982  ;;  %vm1475_vm15 = vcmp.lt.s32.totalorder %v4428_v3, 4  ;;  %v1476_v61 = vsel %vm1472_vm1, %v1456_v25, %v1459_v10  ;;  %v1471_v18 = vor.u32 %v1470_v59, %v1469_v42  ;;  %3015 = vmatpush3.bf16.msra.mxu0 %v3204_v36 }
 0x27c   : > { %v5438_v41 = vsel %vm4452_vm14, 4294967295, %v5437_v41  ;;  %v1477_v45 = vsel %vm1475_vm15, %v1465_v6, 2102212464  ;;  %v1480_v54 = vsel %vm1472_vm1, %v1459_v10, %v1462_v2  ;;  %v1481_v55 = vsel %vm1475_vm15, %v1468_v8, 920167782  ;;  %3053 = vmatpush3.bf16.msra.mxu1 %v3204_v36 }
 0x27d   : > { %5439 = vst [vmem:[#allocation26_spill] sm:$0xff] %v5438_v41  ;;  %v1420_v62 = vmul.f32 %v1419_v5, %v1417_v50  ;;  %v1712_v57 = vsub.s32 0, %v4461_v21  ;;  %v1478_v17 = vsel %vm1474_vm10, %v1462_v2, %v1477_v45  ;;  %v1482_v25 = vsel %vm1474_vm10, %v1465_v6, %v1481_v55 }
 0x27e   : > { %v1483_v22 = vsel %vm1473_vm2, %v1480_v54, %v1482_v25  ;;  %v1484_v38 = vsel %vm1472_vm1, %v1462_v2, %v1465_v6  ;;  %v1485_v13 = vsel %vm1475_vm15, %v1471_v18, 1326507024  ;;  %v5440_v10 = vand.u32 2147483647, %v4296_v44 }
 0x27f   : > { %v1421_v5 = vxor.u32 2147483648, %v1420_v62  ;;  %v2880_v29 = vmin.u32 %v1712_v57, %v4461_v21  ;;  %v1479_v4 = vsel %vm1473_vm2, %v1476_v61, %v1478_v17  ;;  %v1486_v34 = vsel %vm1474_vm10, %v1468_v8, %v1485_v13 }
 0x280   : > { %v1962_v42 = vand.u32 8388607, %v5440_v10  ;;  %v1487_v59 = vsel %vm1473_vm2, %v1484_v38, %v1486_v34  ;;  %v4490_v2 = vmul.u32.u64.low %v4418_v58, %v1483_v22  ;;  %v4491_v6 = vmul.u32.u64.high %v4418_v58, %v1483_v22, %v4490_v2 }
 0x281   : > { %v2891_v50 = vadd.s32 4294967169, %v4425_v52  ;;  %v1714_v18 = vclz %v2880_v29  ;;  %v4497_v61 = vmul.u32.u64.low %v4418_v58, %v1487_v59  ;;  %v4498_v45 = vmul.u32.u64.high %v4418_v58, %v1487_v59, %v4497_v61 }
 0x282   : > { %3231 = vsinq.f32 %v4403_v1  ;;  %v1963_v8 = vor.u32 8388608, %v1962_v42  ;;  %v4506_v55 = vsel %vm4452_vm14, %v4048_v11, %v4415_v33  ;;  %v1495_v36 = vmul.u32 %v4418_v58, %v1479_v4 }
 0x283   : > { %v1965_v54 = vadd.s32 1, %v2891_v50  ;;  %v2881_v52 = vadd.s32 4294967294, %v1714_v18  ;;  %v4511_v57 = vadd.f32 %v4044_v48, %v3923_v14  ;;  %v4515_v1 = vsel %vm5369_vm11, %v1421_v5, %v1420_v62 }
 0x284   : > { %v1702_v17 = vadd.s32 %v4380_v56, %v4389_v51  ;;  %v1498_v25 = vadd.s32 1, %v4491_v6  ;;  %vm1497_vm2 = vc.u32 %v4498_v45, %v4490_v2  ;;  %v4522_v58 = vshll.u32 %v1963_v8, 8 }
 0x285   : > { %vm1966_vm15 = vcmp.gt.s32.totalorder %v1965_v54, 0  ;;  %vm2882_vm1 = vcmp.lt.s32.totalorder %v2881_v52, 0  ;;  %v5441_v50 = vand.u32 2147483647, %v4084_v63  ;;  %3233 = vcosq.f32 %v4506_v55 }
 0x286   : > { %v1967_v33 = vsel %vm1966_vm15, %v1965_v54, 0  ;;  %v1717_v22 = vsel %vm2882_vm1, 0, %v2881_v52  ;;  %v1499_v14 = vsel %vm1497_vm2, %v1498_v25, %v4491_v6  ;;  %v4542_v52 = vpop.eup %3229  ;;  %vm5386_vm15 = vcmp.lt.s32.totalorder %v3954_v47, 0 }
 0x287   : > { %v4525_v48 = vshrl.u32 %v1967_v33, 5  ;;  %v1969_v62 = vand.u32 31, %v1967_v33  ;;  %v1718_v38 = vsub.s32 32, %v1717_v22  ;;  %v1719_v13 = vshll.u32 %v4461_v21, %v1717_v22 }
 0x288   : > { %v1722_v56 = vsub.s32 4294967266, %v1717_v22  ;;  %v1500_v51 = vadd.s32 %v1499_v14, %v1495_v36  ;;  %vm4534_vm10 = vcmp.le.f32.partialorder %v5441_v50, 0.7853982  ;;  %3235 = vsinq.f32 %v4506_v55 }
 0x289   : > { %v1970_v10 = vsub.s32 32, %v1969_v62  ;;  %v1972_v42 = vshll.u32 %v5418_v24, %v1969_v62  ;;  %v1975_v5 = vshll.u32 %v5419_v12, %v1969_v62  ;;  %v1978_v29 = vshll.u32 %v5420_v28, %v1969_v62 }
 0x28a   : > { %v1720_v4 = vshrl.u32 %v1702_v17, %v1718_v38  ;;  %v1723_v34 = vadd.s32 127, %v1722_v56  ;;  %v1501_v59 = vadd.s32 536870912, %v1500_v51  ;;  %v1981_v6 = vshll.u32 %v5421_v27, %v1969_v62 }
 0x28b   : > { %v1971_v21 = vshrl.u32 %v5418_v24, %v1970_v10  ;;  %v1973_v61 = vshrl.u32 %v5419_v12, %v1970_v10  ;;  %v1976_v8 = vshrl.u32 %v5420_v28, %v1970_v10  ;;  %v1979_v54 = vshrl.u32 %v5421_v27, %v1970_v10 }
 0x28c   : > { %v1721_v36 = vor.u32 %v1720_v4, %v1719_v13  ;;  %v1724_v17 = vshll.u32 %v1723_v34, 23  ;;  %v4544_v25 = vshrl.u32 %v1501_v59, 30  ;;  %v1982_v33 = vshrl.u32 %v5422_v15, %v1970_v10  ;;  %v4547_v22 = vpop.eup %3231 }
 0x28d   : > { %v1974_v14 = vor.u32 %v1973_v61, %v1972_v42  ;;  %v1977_v38 = vor.u32 %v1976_v8, %v1975_v5  ;;  %v1980_v56 = vor.u32 %v1979_v54, %v1978_v29  ;;  %v1984_v50 = vshll.u32 %v5422_v15, %v1969_v62 }
 0x28e   : > { %5444 = vst [vmem:[#allocation27_spill] sm:$0xff] %v4544_v25  ;;  %v1725_v3 = vor.u32 4788187, %v1724_v17  ;;  %v1728_v46 = vcvt.s32.f32 %v1721_v36  ;;  %v1503_v41 = vshll.u32 %v4544_v25, 30  ;;  %v1983_v11 = vor.u32 %v1982_v33, %v1981_v6 }
 0x28f   : > { %v1985_v13 = vshrl.u32 %v5425_v20, %v1970_v10  ;;  %vm1987_vm1 = vcmp.lt.s32.totalorder %v4525_v48, 1  ;;  %vm1988_vm2 = vcmp.lt.s32.totalorder %v4525_v48, 2  ;;  %vm1989_vm11 = vcmp.lt.s32.totalorder %v4525_v48, 3 }
 0x290   : > { %v1726_v42 = vand.u32 2147483647, %v1725_v3  ;;  %v4557_v5 = vsub.s32 %v1500_v51, %v1503_v41  ;;  %vm1990_vm5 = vcmp.lt.s32.totalorder %v4525_v48, 4  ;;  %v1991_v62 = vsel %vm1987_vm1, %v1971_v21, %v1974_v14 }
 0x291   : > { %v1986_v29 = vor.u32 %v1985_v13, %v1984_v50  ;;  %v1992_v4 = vsel %vm1990_vm5, %v1980_v56, 2102212464  ;;  %v1995_v10 = vsel %vm1987_vm1, %v1974_v14, %v1977_v38  ;;  %v1996_v34 = vsel %vm1990_vm5, %v1983_v11, 920167782 }
 0x292   : > { %v1729_v59 = vmul.f32 %v1728_v46, %v1726_v42  ;;  %v1506_v6 = vsub.s32 0, %v4557_v5  ;;  %v1993_v61 = vsel %vm1989_vm11, %v1977_v38, %v1992_v4  ;;  %v1997_v41 = vsel %vm1989_vm11, %v1980_v56, %v1996_v34 }
 0x293   : > { %v1998_v3 = vsel %vm1988_vm2, %v1995_v10, %v1997_v41  ;;  %v1999_v51 = vsel %vm1987_vm1, %v1977_v38, %v1980_v56  ;;  %v2000_v21 = vsel %vm1990_vm5, %v1986_v29, 1326507024  ;;  %v1752_v8 = vand.u32 2139095040, %v4511_v57  ;;  %v3278_v10 = vld [vmem:[%s5323_s4] ss:$0 sm:$0xff] }
 0x294   : > { %v1425_v46 = vsel %vm4534_vm10, %v4084_v63, %v4515_v1  ;;  %v5445_v54 = vand.u32 2147483647, %v4205_v35  ;;  %v5446_v36 = vmov 0  ;;  %v2872_v17 = vmin.u32 %v1506_v6, %v4557_v5 }
 0x295   : > { %v1994_v33 = vsel %vm1988_vm2, %v1991_v62, %v1993_v61  ;;  %v2001_v14 = vsel %vm1989_vm11, %v1983_v11, %v2000_v21  ;;  %v1730_v38 = vxor.u32 2147483648, %v1729_v59  ;;  %v5374_v4 = vand.u32 2147483647, %v4511_v57 }
 0x296   : > { %vm4580_vm8 = vcmp.le.f32.partialorder %v5445_v54, 0.7853982  ;;  %v2002_v56 = vsel %vm1988_vm2, %v1999_v51, %v2001_v14  ;;  %v4592_v1 = vmul.u32.u64.low %v4522_v58, %v1998_v3  ;;  %v4593_v50 = vmul.u32.u64.high %v4522_v58, %v1998_v3, %v4592_v1 }
 0x297   : > { %v5447_v36 = vsel %vm4580_vm8, 4294967295, %v5446_v36  ;;  %v1508_v13 = vclz %v2872_v17  ;;  %v4597_v42 = vmul.u32.u64.low %v4522_v58, %v2002_v56  ;;  %v4598_v29 = vmul.u32.u64.high %v4522_v58, %v2002_v56, %v4597_v42 }
 0x298   : > { %5448 = vst [vmem:[#allocation28_spill] sm:$0xff] %v5447_v36  ;;  %v5449_v62 = vxor.u32 2147483648, %v4407_v32  ;;  %v1753_v48 = vshrl.u32 %v1752_v8, 23  ;;  %v4613_v34 = vadd.f32 %v3278_v10, %v4004_v0  ;;  %v2010_v61 = vmul.u32 %v4522_v58, %v1994_v33 }
 0x299   : > { %v2873_v6 = vadd.s32 4294967294, %v1508_v13  ;;  %v4618_v41 = vadd.f32 %v3278_v10, %v4109_v23  ;;  %3237 = vcosq.f32 %v1425_v46  ;;  %v2013_v3 = vadd.s32 1, %v4593_v50 }
 0x29a   : > { %v4606_v11 = vsel %vm5386_vm15, %v5449_v62, %v4407_v32  ;;  %v1731_v32 = vsel %vm5385_vm0, %v1730_v38, %v1729_v59  ;;  %v2883_v51 = vadd.s32 4294967169, %v1753_v48  ;;  %vm2012_vm11 = vc.u32 %v4598_v29, %v4592_v1 }
 0x29b   : > { %vm2874_vm5 = vcmp.lt.s32.totalorder %v2873_v6, 0  ;;  %v4627_v0 = vand.u32 8388607, %v5374_v4  ;;  %v5373_v55 = vand.u32 2147483647, %v4613_v34  ;;  %v2014_v23 = vsel %vm2012_vm11, %v2013_v3, %v4593_v50 }
 0x29c   : > { %v1511_v58 = vsel %vm2874_vm5, 0, %v2873_v6  ;;  %v1759_v21 = vadd.s32 1, %v2883_v51  ;;  %v2061_v8 = vand.u32 2139095040, %v4613_v34  ;;  %v1496_v59 = vadd.s32 %v4490_v2, %v4498_v45 }
 0x29d   : > { %v1512_v54 = vsub.s32 32, %v1511_v58  ;;  %v1516_v17 = vsub.s32 4294967266, %v1511_v58  ;;  %v2015_v33 = vadd.s32 %v2014_v23, %v2010_v61  ;;  %3239 = vsinq.f32 %v1425_v46 }
 0x29e   : > { %v4637_v14 = vsel %vm4580_vm8, %v4205_v35, %v1731_v32  ;;  %v1513_v38 = vshll.u32 %v4557_v5, %v1511_v58  ;;  %vm1760_vm1 = vcmp.gt.s32.totalorder %v1759_v21, 0  ;;  %v1757_v62 = vor.u32 8388608, %v4627_v0  ;;  %v4647_v32 = vpop.eup %3233 }
 0x29f   : > { %v1514_v56 = vshrl.u32 %v1496_v59, %v1512_v54  ;;  %v1517_v50 = vadd.s32 127, %v1516_v17  ;;  %v2016_v13 = vadd.s32 536870912, %v2015_v33  ;;  %v1761_v42 = vsel %vm1760_vm1, %v1759_v21, 0  ;;  %5451 = vst [vmem:[#allocation30_spill] sm:$0xff] %v4647_v32  ;;  %v4652_v58 = vpop.eup %3235 }
 0x2a0   : > { %v1763_v48 = vand.u32 31, %v1761_v42  ;;  %v2062_v2 = vshrl.u32 %v2061_v8, 23  ;;  %v4643_v45 = vand.u32 8388607, %v5373_v55  ;;  %v1762_v61 = vshrl.u32 %v1761_v42, 5  ;;  %5452 = vst [vmem:[#allocation31_spill] sm:$0xff] %v4652_v58 }
 0x2a1   : > { %v1515_v46 = vor.u32 %v1514_v56, %v1513_v38  ;;  %v1518_v10 = vshll.u32 %v1517_v50, 23  ;;  %v4645_v6 = vshrl.u32 %v2016_v13, 30  ;;  %vm5387_vm2 = vcmp.lt.s32.totalorder %v4245_v30, 0 }
 0x2a2   : > { %v1764_v5 = vsub.s32 32, %v1763_v48  ;;  %v1766_v3 = vshll.u32 %v5418_v24, %v1763_v48  ;;  %v1769_v51 = vshll.u32 %v5419_v12, %v1763_v48  ;;  %v1772_v0 = vshll.u32 %v5420_v28, %v1763_v48 }
 0x2a3   : > { %5450 = vst [vmem:[#allocation29_spill] sm:$0xff] %v4645_v6  ;;  %v1519_v23 = vor.u32 4788187, %v1518_v10  ;;  %v1522_v21 = vcvt.s32.f32 %v1515_v46  ;;  %v2018_v8 = vshll.u32 %v4645_v6, 30  ;;  %v1775_v59 = vshll.u32 %v5421_v27, %v1763_v48  ;;  %v4656_v54 = vpop.eup %3237 }
 0x2a4   : > { %5453 = vst [vmem:[#allocation32_spill] sm:$0xff] %v4656_v54  ;;  %v1765_v17 = vshrl.u32 %v5418_v24, %v1764_v5  ;;  %v1767_v38 = vshrl.u32 %v5419_v12, %v1764_v5  ;;  %v1770_v56 = vshrl.u32 %v5420_v28, %v1764_v5  ;;  %v1773_v50 = vshrl.u32 %v5421_v27, %v1764_v5 }
 0x2a5   : > { %v1520_v13 = vand.u32 2147483647, %v1519_v23  ;;  %v4663_v42 = vsub.s32 %v2015_v33, %v2018_v8  ;;  %v1776_v46 = vshrl.u32 %v5422_v15, %v1764_v5  ;;  %v1778_v10 = vshll.u32 %v5422_v15, %v1763_v48 }
 0x2a6   : > { %v1768_v55 = vor.u32 %v1767_v38, %v1766_v3  ;;  %v1771_v4 = vor.u32 %v1770_v56, %v1769_v51  ;;  %v1774_v6 = vor.u32 %v1773_v50, %v1772_v0  ;;  %v1779_v36 = vshrl.u32 %v5425_v20, %v1764_v5 }
 0x2a7   : > { %v1523_v35 = vmul.f32 %v1522_v21, %v1520_v13  ;;  %v2021_v32 = vsub.s32 0, %v4663_v42  ;;  %v1777_v58 = vor.u32 %v1776_v46, %v1775_v59  ;;  %vm1781_vm5 = vcmp.lt.s32.totalorder %v1762_v61, 1  ;;  %v4669_v25 = vpop.eup %3239 }
 0x2a8   : > { %v1780_v54 = vor.u32 %v1779_v36, %v1778_v10  ;;  %vm1783_vm11 = vcmp.lt.s32.totalorder %v1762_v61, 3  ;;  %vm1784_vm1 = vcmp.lt.s32.totalorder %v1762_v61, 4  ;;  %v2895_v33 = vadd.s32 4294967169, %v2062_v2 }
 0x2a9   : > { %v5454_v23 = vand.u32 2147483647, %v4245_v30  ;;  %v1524_v3 = vxor.u32 2147483648, %v1523_v35  ;;  %v2892_v5 = vmin.u32 %v2021_v32, %v4663_v42  ;;  %vm1782_vm15 = vcmp.lt.s32.totalorder %v1762_v61, 2 }
 0x2aa   : > { %v1786_v51 = vsel %vm1784_vm1, %v1774_v6, 2102212464  ;;  %v1785_v0 = vsel %vm1781_vm5, %v1765_v17, %v1768_v55  ;;  %v1789_v21 = vsel %vm1781_vm5, %v1768_v55, %v1771_v4  ;;  %v1790_v36 = vsel %vm1784_vm1, %v1777_v58, 920167782 }
 0x2ab   : > { %vm4673_vm0 = vcmp.le.f32.partialorder %v5454_v23, 0.7853982  ;;  %v1797_v8 = vshll.u32 %v1757_v62, 8  ;;  %v2023_v2 = vclz %v2892_v5  ;;  %v1787_v59 = vsel %vm1783_vm11, %v1771_v4, %v1786_v51 }
 0x2ac   : > { %v1791_v38 = vsel %vm1783_vm11, %v1774_v6, %v1790_v36  ;;  %v1793_v56 = vsel %vm1781_vm5, %v1771_v4, %v1774_v6  ;;  %v2011_v32 = vadd.s32 %v4592_v1, %v4598_v29  ;;  %v1794_v13 = vsel %vm1784_vm1, %v1780_v54, 1326507024 }
 0x2ad   : > { %v1792_v50 = vsel %vm1782_vm15, %v1789_v21, %v1791_v38  ;;  %v2066_v17 = vor.u32 8388608, %v4643_v45  ;;  %v1525_v55 = vsel %vm5387_vm2, %v1524_v3, %v1523_v35  ;;  %v2893_v62 = vadd.s32 4294967294, %v2023_v2 }
 0x2ae   : > { %v1795_v46 = vsel %vm1783_vm11, %v1777_v58, %v1794_v13  ;;  %v2068_v10 = vadd.s32 1, %v2895_v33  ;;  %v1788_v23 = vsel %vm1782_vm15, %v1785_v0, %v1787_v59  ;;  %3241 = vcosq.f32 %v4637_v14 }
 0x2af   : > { %v1796_v4 = vsel %vm1782_vm15, %v1793_v56, %v1795_v46  ;;  %v4695_v6 = vmul.u32.u64.low %v1797_v8, %v1792_v50  ;;  %v4696_v5 = vmul.u32.u64.high %v1797_v8, %v1792_v50, %v4695_v6  ;;  %vm2894_vm5 = vcmp.lt.s32.totalorder %v2893_v62, 0 }
 0x2b0   : > { %v4699_v1 = vmul.u32.u64.low %v1797_v8, %v1796_v4  ;;  %v4700_v29 = vmul.u32.u64.high %v1797_v8, %v1796_v4, %v4699_v1  ;;  %vm2069_vm1 = vcmp.gt.s32.totalorder %v2068_v10, 0  ;;  %v2026_v35 = vsel %vm2894_vm5, 0, %v2893_v62 }
 0x2b1   : > { %v2070_v45 = vsel %vm2069_vm1, %v2068_v10, 0  ;;  %v5389_v58 = vand.u32 2147483647, %v4618_v41  ;;  %v2027_v54 = vsub.s32 32, %v2026_v35  ;;  %v2028_v33 = vshll.u32 %v4663_v42, %v2026_v35 }
 0x2b2   : > { %v2031_v61 = vsub.s32 4294967266, %v2026_v35  ;;  %v1804_v3 = vmul.u32 %v1797_v8, %v1788_v23  ;;  %v4708_v51 = vsel %vm4673_vm0, %v4245_v30, %v1525_v55  ;;  %v1807_v0 = vadd.s32 1, %v4696_v5 }
 0x2b3   : > { %v2072_v21 = vand.u32 31, %v2070_v45  ;;  %v4711_v36 = vshll.u32 %v2066_v17, 8  ;;  %v2029_v2 = vshrl.u32 %v2011_v32, %v2027_v54  ;;  %vm1806_vm15 = vc.u32 %v4700_v29, %v4695_v6 }
 0x2b4   : > { %v2032_v59 = vadd.s32 127, %v2031_v61  ;;  %v2071_v38 = vshrl.u32 %v2070_v45, 5  ;;  %v1808_v42 = vsel %vm1806_vm15, %v1807_v0, %v4696_v5  ;;  %vm5394_vm11 = vcmp.lt.s32.totalorder %v4296_v44, 0 }
 0x2b5   : > { %v2073_v56 = vsub.s32 32, %v2072_v21  ;;  %v2075_v8 = vshll.u32 %v5418_v24, %v2072_v21  ;;  %v2078_v50 = vshll.u32 %v5419_v12, %v2072_v21  ;;  %v2030_v13 = vor.u32 %v2029_v2, %v2028_v33 }
 0x2b6   : > { %v2033_v55 = vshll.u32 %v2032_v59, 23  ;;  %v1809_v62 = vadd.s32 %v1808_v42, %v1804_v3  ;;  %v2081_v46 = vshll.u32 %v5420_v28, %v2072_v21  ;;  %v2084_v35 = vshll.u32 %v5421_v27, %v2072_v21 }
 0x2b7   : > { %v2074_v32 = vshrl.u32 %v5418_v24, %v2073_v56  ;;  %v2076_v17 = vshrl.u32 %v5419_v12, %v2073_v56  ;;  %v2079_v10 = vshrl.u32 %v5420_v28, %v2073_v56  ;;  %v2082_v23 = vshrl.u32 %v5421_v27, %v2073_v56 }
 0x2b8   : > { %v2034_v4 = vor.u32 4788187, %v2033_v55  ;;  %v2037_v5 = vcvt.s32.f32 %v2030_v13  ;;  %v1810_v1 = vadd.s32 536870912, %v1809_v62  ;;  %v2085_v61 = vshrl.u32 %v5422_v15, %v2073_v56  ;;  %v4736_v55 = vpop.eup %3241 }
 0x2b9   : > { %v2077_v45 = vor.u32 %v2076_v17, %v2075_v8  ;;  %v2080_v54 = vor.u32 %v2079_v10, %v2078_v50  ;;  %v2083_v33 = vor.u32 %v2082_v23, %v2081_v46  ;;  %v5457_v3 = vand.u32 2147483647, %v4296_v44 }
 0x2ba   : > { %v2035_v2 = vand.u32 2147483647, %v2034_v4  ;;  %v4732_v59 = vshrl.u32 %v1810_v1, 30  ;;  %v2087_v42 = vshll.u32 %v5422_v15, %v2072_v21  ;;  %v2088_v13 = vshrl.u32 %v5425_v20, %v2073_v56 }
 0x2bb   : > { %vm4728_vm5 = vcmp.le.f32.partialorder %v5457_v3, 0.7853982  ;;  %v2086_v8 = vor.u32 %v2085_v61, %v2084_v35  ;;  %vm2090_vm1 = vcmp.lt.s32.totalorder %v2071_v38, 1  ;;  %vm2091_vm15 = vcmp.lt.s32.totalorder %v2071_v38, 2 }
 0x2bc   : > { %vm2092_vm2 = vcmp.lt.s32.totalorder %v2071_v38, 3  ;;  %v2038_v50 = vmul.f32 %v2037_v5, %v2035_v2  ;;  %v1812_v46 = vshll.u32 %v4732_v59, 30  ;;  %v2089_v17 = vor.u32 %v2088_v13, %v2087_v42 }
 0x2bd   : > { %vm2093_vm4 = vcmp.lt.s32.totalorder %v2071_v38, 4  ;;  %v2094_v10 = vsel %vm2090_vm1, %v2074_v32, %v2077_v45  ;;  %v2098_v4 = vsel %vm2090_vm1, %v2077_v45, %v2080_v54  ;;  %v2102_v5 = vsel %vm2090_vm1, %v2080_v54, %v2083_v33 }
 0x2be   : > { %v2095_v23 = vsel %vm2093_vm4, %v2083_v33, 2102212464  ;;  %v2099_v1 = vsel %vm2093_vm4, %v2086_v8, 920167782  ;;  %v2039_v21 = vxor.u32 2147483648, %v2038_v50  ;;  %v4741_v3 = vsub.s32 %v1809_v62, %v1812_v46 }
 0x2bf   : > { %v2096_v56 = vsel %vm2092_vm2, %v2080_v54, %v2095_v23  ;;  %v2100_v35 = vsel %vm2092_vm2, %v2083_v33, %v2099_v1  ;;  %v2103_v2 = vsel %vm2093_vm4, %v2089_v17, 1326507024  ;;  %v1855_v42 = vand.u32 2139095040, %v4618_v41 }
 0x2c0   : > { %v2101_v61 = vsel %vm2091_vm15, %v2098_v4, %v2100_v35  ;;  %v2040_v32 = vsel %vm5394_vm11, %v2039_v21, %v2038_v50  ;;  %v1815_v45 = vsub.s32 0, %v4741_v3  ;;  %v2104_v13 = vsel %vm2092_vm2, %v2086_v8, %v2103_v2 }
 0x2c1   : > { %v1859_v62 = vand.u32 8388607, %v5389_v58  ;;  %v2097_v46 = vsel %vm2091_vm15, %v2094_v10, %v2096_v56  ;;  %v2105_v23 = vsel %vm2091_vm15, %v2102_v5, %v2104_v13  ;;  %3243 = vsinq.f32 %v4637_v14 }
 0x2c2   : > { %v4757_v4 = vmul.u32.u64.low %v4711_v36, %v2101_v61  ;;  %v4758_v54 = vmul.u32.u64.high %v4711_v36, %v2101_v61, %v4757_v4  ;;  %v2884_v33 = vmin.u32 %v1815_v45, %v4741_v3  ;;  %3245 = vcosq.f32 %v4708_v51 }
 0x2c3   : > { %v4763_v50 = vmul.u32.u64.low %v4711_v36, %v2105_v23  ;;  %v4764_v17 = vmul.u32.u64.high %v4711_v36, %v2105_v23, %v4763_v50  ;;  %v2043_v8 = vsel %vm4728_vm5, %v4296_v44, %v2040_v32  ;;  %v1856_v38 = vshrl.u32 %v1855_v42, 23 }
 0x2c4   : > { %v599_v10 = vsub.s32 4, %v3660_v40  ;;  %3247 = vsinq.f32 %v4708_v51  ;;  %v1805_v14 = vadd.s32 %v4695_v6, %v4700_v29  ;;  %v1817_v1 = vclz %v2884_v33 }
 0x2c5   : > { %v2113_v21 = vmul.u32 %v4711_v36, %v2097_v46  ;;  %v2116_v56 = vadd.s32 1, %v4758_v54  ;;  %v2887_v35 = vadd.s32 4294967169, %v1856_v38  ;;  %v1860_v61 = vor.u32 8388608, %v1859_v62 }
 0x2c6   : > { %v600_v5 = vsel %vm515_vm13, %v599_v10, %v3660_v40  ;;  %3249 = vcosq.f32 %v2043_v8  ;;  %v2885_v2 = vadd.s32 4294967294, %v1817_v1  ;;  %vm2115_vm4 = vc.u32 %v4764_v17, %v4757_v4 }
 0x2c7   : > { %v602_v51 = vsel %vm3995_vm3, 0, %v600_v5  ;;  %3251 = vsinq.f32 %v2043_v8  ;;  %v2117_v6 = vsel %vm2115_vm4, %v2116_v56, %v4758_v54  ;;  %v1862_v29 = vadd.s32 1, %v2887_v35 }
 0x2c8   : > { %v4783_v36 = vand.u32 3, %v602_v51  ;;  %vm2886_vm2 = vcmp.lt.s32.totalorder %v2885_v2, 0  ;;  %v2118_v42 = vadd.s32 %v2117_v6, %v2113_v21  ;;  %v609_v32 = vxor.u32 2147483648, %v4115_v26 }
 0x2c9   : > { %v612_v45 = vxor.u32 2147483648, %v4111_v19  ;;  %v1820_v40 = vsel %vm2886_vm2, 0, %v2885_v2  ;;  %vm1863_vm13 = vcmp.gt.s32.totalorder %v1862_v29, 0  ;;  %v4787_v13 = vshll.u32 %v1860_v61, 8 }
 0x2ca   : > { %v702_v62 = vsub.s32 4, %v3843_v31  ;;  %v1821_v49 = vsub.s32 32, %v1820_v40  ;;  %v1822_v46 = vshll.u32 %v4741_v3, %v1820_v40  ;;  %v1825_v23 = vsub.s32 4294967266, %v1820_v40 }
 0x2cb   : > { %v2119_v54 = vadd.s32 536870912, %v2118_v42  ;;  %v4792_v33 = vadd.s32 %v4757_v4, %v4764_v17  ;;  %v1864_v50 = vsel %vm1863_vm13, %v1862_v29, 0  ;;  %vm608_vm3 = vcmp.eq.s32.totalorder %v4783_v36, 0  ;;  %v4796_v8 = vpop.eup %3243 }
 0x2cc   : > { %vm611_vm1 = vcmp.eq.s32.totalorder %v4783_v36, 2  ;;  %v1823_v38 = vshrl.u32 %v1805_v14, %v1821_v49  ;;  %v1826_v10 = vadd.s32 127, %v1825_v23  ;;  %v4800_v21 = vshrl.u32 %v1864_v50, 5  ;;  %v4802_v56 = vpop.eup %3245 }
 0x2cd   : > { %v4798_v1 = vshrl.u32 %v2119_v54, 30  ;;  %v1866_v3 = vand.u32 31, %v1864_v50  ;;  %v610_v35 = vsel %vm608_vm3, %v4111_v19, %v609_v32  ;;  %v613_v4 = vsel %vm611_vm1, %v612_v45, %v4115_v26 }
 0x2ce   : > { %v4809_v17 = vsel %vm618_vm7, %v702_v62, %v3843_v31  ;;  %v4811_v61 = vpop.eup %3247  ;;  %v1824_v14 = vor.u32 %v1823_v38, %v1822_v46  ;;  %v1827_v5 = vshll.u32 %v1826_v10, 23  ;;  %vm1884_vm15 = vcmp.lt.s32.totalorder %v4800_v21, 1 }
 0x2cf   : > { %v2121_v2 = vshll.u32 %v4798_v1, 30  ;;  %vm5396_vm4 = vcmp.lt.s32.totalorder %v4511_v57, 0  ;;  %v1867_v51 = vsub.s32 32, %v1866_v3  ;;  %v1869_v19 = vshll.u32 %v5418_v24, %v1866_v3 }
 0x2d0   : > { %v1872_v26 = vshll.u32 %v5419_v12, %v1866_v3  ;;  %v1875_v6 = vshll.u32 %v5420_v28, %v1866_v3  ;;  %v4819_v29 = vpop.eup %3249  ;;  %v1828_v31 = vor.u32 4788187, %v1827_v5  ;;  %v1831_v32 = vcvt.s32.f32 %v1824_v14 }
 0x2d1   : > { %v4821_v45 = vsub.s32 %v2118_v42, %v2121_v2  ;;  %v1878_v40 = vshll.u32 %v5421_v27, %v1866_v3  ;;  %v4824_v62 = vpop.eup %3251  ;;  %v1868_v49 = vshrl.u32 %v5418_v24, %v1867_v51  ;;  %v1870_v46 = vshrl.u32 %v5419_v12, %v1867_v51 }
 0x2d2   : > { %v1873_v23 = vshrl.u32 %v5420_v28, %v1867_v51  ;;  %v1876_v54 = vshrl.u32 %v5421_v27, %v1867_v51  ;;  %v5460_v50 = vand.u32 2147483647, %v4511_v57  ;;  %v1829_v42 = vand.u32 2147483647, %v1828_v31 }
 0x2d3   : > { %v2124_v10 = vsub.s32 0, %v4821_v45  ;;  %v1879_v14 = vshrl.u32 %v5422_v15, %v1867_v51  ;;  %v1881_v5 = vshll.u32 %v5422_v15, %v1866_v3  ;;  %v1871_v2 = vor.u32 %v1870_v46, %v1869_v19 }
 0x2d4   : > { %vm4832_vm7 = vcmp.le.f32.partialorder %v5460_v50, 0.7853982  ;;  %v1874_v58 = vor.u32 %v1873_v23, %v1872_v26  ;;  %v1877_v12 = vor.u32 %v1876_v54, %v1875_v6  ;;  %v1882_v28 = vshrl.u32 %v5425_v20, %v1867_v51 }
 0x2d5   : > { %vm605_vm2 = vweird.f32 %v3530_v43  ;;  %v1832_v27 = vmul.f32 %v1831_v32, %v1829_v42  ;;  %v2896_v50 = vmin.u32 %v2124_v10, %v4821_v45  ;;  %v1880_v24 = vor.u32 %v1879_v14, %v1878_v40  ;;  %v5463_v42 = vld [vmem:[#allocation23_spill] sm:$0xff] }
 0x2d6   : > { %vm1885_vm13 = vcmp.lt.s32.totalorder %v4800_v21, 2  ;;  %v1883_v31 = vor.u32 %v1882_v28, %v1881_v5  ;;  %vm1886_vm3 = vcmp.lt.s32.totalorder %v4800_v21, 3  ;;  %vm1887_vm1 = vcmp.lt.s32.totalorder %v4800_v21, 4 }
 0x2d7   : > { %v1888_v3 = vsel %vm1884_vm15, %v1868_v49, %v1871_v2  ;;  %v1833_v19 = vxor.u32 2147483648, %v1832_v27  ;;  %v2126_v26 = vclz %v2896_v50  ;;  %v1889_v6 = vsel %vm1887_vm1, %v1877_v12, 2102212464 }
 0x2d8   : > { %v1892_v51 = vsel %vm1884_vm15, %v1871_v2, %v1874_v58  ;;  %v1890_v32 = vsel %vm1886_vm3, %v1874_v58, %v1889_v6  ;;  %v1893_v40 = vsel %vm1887_vm1, %v1880_v24, 920167782  ;;  %v1896_v28 = vsel %vm1884_vm15, %v1874_v58, %v1877_v12 }
 0x2d9   : > { %v1897_v46 = vsel %vm1887_vm1, %v1883_v31, 1326507024  ;;  %v1834_v23 = vsel %vm5396_vm4, %v1833_v19, %v1832_v27  ;;  %v2897_v54 = vadd.s32 4294967294, %v2126_v26  ;;  %v1894_v49 = vsel %vm1886_vm3, %v1877_v12, %v1893_v40 }
 0x2da   : > { %v712_v10 = vxor.u32 2147483648, %v5463_v42  ;;  %v1891_v14 = vsel %vm1885_vm13, %v1888_v3, %v1890_v32  ;;  %v1898_v5 = vsel %vm1886_vm3, %v1880_v24, %v1897_v46  ;;  %vm607_vm11 = vcmp.lt.s32.totalorder %v4783_v36, 2 }
 0x2db   : > { %v705_v2 = vsel %vm4027_vm6, 0, %v4809_v17  ;;  %vm2898_vm15 = vcmp.lt.s32.totalorder %v2897_v54, 0  ;;  %v1895_v27 = vsel %vm1885_vm13, %v1892_v51, %v1894_v49  ;;  %v1899_v12 = vsel %vm1885_vm13, %v1896_v28, %v1898_v5  ;;  %v5465_v51 = vld [vmem:[#allocation19_spill] sm:$0xff] }
 0x2dc   : > { %v614_v50 = vsel %vm607_vm11, %v610_v35, %v613_v4  ;;  %vm708_vm1 = vweird.f32 %v3554_v9  ;;  %v1837_v24 = vsel %vm4832_vm7, %v4511_v57, %v1834_v23  ;;  %v2129_v31 = vsel %vm2898_vm15, 0, %v2897_v54 }
 0x2dd   : > { %v4875_v36 = vmul.u32.u64.low %v4787_v13, %v1899_v12  ;;  %v4876_v3 = vmul.u32.u64.high %v4787_v13, %v1899_v12, %v4875_v36  ;;  %v2130_v17 = vsub.s32 32, %v2129_v31  ;;  %v2131_v19 = vshll.u32 %v4821_v45, %v2129_v31 }
 0x2de   : > { %v2134_v26 = vsub.s32 4294967266, %v2129_v31  ;;  %v615_v21 = vsel %vm605_vm2, nan, %v614_v50  ;;  %v4882_v35 = vmul.u32.u64.low %v4787_v13, %v1895_v27  ;;  %v4883_v4 = vmul.u32.u64.high %v4787_v13, %v1895_v27, %v4882_v35  ;;  %v5470_v50 = vld [vmem:[#allocation13_spill] sm:$0xff] }
 0x2df   : > { %v709_v6 = vand.u32 3, %v705_v2  ;;  %v715_v32 = vxor.u32 2147483648, %v5465_v51  ;;  %v2132_v40 = vshrl.u32 %v4792_v33, %v2130_v17  ;;  %v1907_v46 = vmul.u32 %v4787_v13, %v1891_v14  ;;  %v5466_v14 = vld [vmem:[#allocation16_spill] sm:$0xff] }
 0x2e0   : > { %v2135_v28 = vadd.s32 127, %v2134_v26  ;;  %3253 = vcosq.f32 %v1837_v24  ;;  %vm1909_vm6 = vc.u32 %v4876_v3, %v4882_v35  ;;  %v4891_v43 = vmul.f32 0.125, %v615_v21 }
 0x2e1   : > { %vm711_vm11 = vcmp.eq.s32.totalorder %v709_v6, 0  ;;  %v3381_v45 = vmov 0.0   ;;  %v2133_v23 = vor.u32 %v2132_v40, %v2131_v19  ;;  %vm714_vm2 = vcmp.eq.s32.totalorder %v709_v6, 2  ;;  %v5485_v40 = vld [vmem:[#allocation17_spill] sm:$0xff] }
 0x2e2   : > { %353 = vst [vmem:[#allocation3] sm:$0x1] %v3381_v45  ;;  %354 = vst [vmem:[#allocation4] sm:$0x1] %v3381_v45  ;;  %3032 = vmatprep.subr.bf16.mxu0 %v3381_v45  ;;  %v2136_v54 = vshll.u32 %v2135_v28, 23  ;;  %v713_v49 = vsel %vm711_vm11, %v5465_v51, %v712_v10  ;;  %v1910_v33 = vadd.s32 1, %v4883_v4  ;;  %v716_v13 = vsel %vm714_vm2, %v715_v32, %v5463_v42 }
 0x2e3   : > { %vm710_vm13 = vcmp.lt.s32.totalorder %v709_v6, 2  ;;  %v4897_v5 = vmul.f32 0.125, %v5466_v14  ;;  %v5467_v27 = vand.u32 2147483647, %v3821_v16  ;;  %v1011_v31 = vsub.s32 4, %v5470_v50  ;;  %v5472_v51 = vld [vmem:[#allocation11_spill] sm:$0xff] }
 0x2e4   : > { %v2137_v58 = vor.u32 4788187, %v2136_v54  ;;  %v717_v2 = vsel %vm710_vm13, %v713_v49, %v716_v13  ;;  %v2140_v10 = vcvt.s32.f32 %v2133_v23  ;;  %v1911_v36 = vsel %vm1909_vm6, %v1910_v33, %v4883_v4  ;;  %v5476_v49 = vld [vmem:[#allocation20_spill] sm:$0xff] }
 0x2e5   : > { %vm4901_vm3 = vcmp.le.f32.partialorder %v5467_v27, 0.7853982  ;;  %v718_v42 = vsel %vm708_vm1, nan, %v717_v2  ;;  %v1912_v26 = vadd.s32 %v1911_v36, %v1907_v46  ;;  %vm5471_vm15 = vcmp.lt.s32.totalorder %v3821_v16, 0 }
 0x2e6   : > { %v1013_v17 = vsel %vm4901_vm3, %v3821_v16, %v4397_v60  ;;  %v2138_v19 = vand.u32 2147483647, %v2137_v58  ;;  %v4916_v21 = vmul.f32 0.125, %v718_v42  ;;  %v1012_v6 = vsel %vm5471_vm15, %v1011_v31, %v5470_v50 }
 0x2e7   : > { %v4922_v32 = vmul.f32 0.125, %v5472_v51  ;;  %v1014_v9 = vsel %vm4901_vm3, 0, %v1012_v6  ;;  %3255 = vcosq.f32 %v1013_v17  ;;  %v5473_v4 = vand.u32 2147483647, %v3954_v47 }
 0x2e8   : > { %v2141_v60 = vmul.f32 %v2140_v10, %v2138_v19  ;;  %v1913_v28 = vadd.s32 536870912, %v1912_v26  ;;  %v2177_v46 = vpack.c.bf16 %v4916_v21, %v4891_v43  ;;  %3257 = vsinq.f32 %v1013_v17  ;;  %v5481_v10 = vld [vmem:[#allocation10_spill] sm:$0xff]  ;;  %v5482_v19 = vld [vmem:[#allocation12_spill] sm:$0xff] }
 0x2e9   : > { %vm4928_vm1 = vcmp.le.f32.partialorder %v5473_v4, 0.7853982  ;;  %v2178_v23 = vpack.c.bf16 %v4897_v5, %v4922_v32  ;;  %v4936_v54 = vand.u32 3, %v1014_v9  ;;  %v1114_v33 = vsub.s32 4, %v5476_v49 }
 0x2ea   : > { %v1116_v13 = vsel %vm4928_vm1, %v3954_v47, %v4606_v11  ;;  %v2142_v14 = vxor.u32 2147483648, %v2141_v60  ;;  %v4943_v58 = vshrl.u32 %v1913_v28, 30  ;;  %3016 = vmatprep.mubr.bf16.mxu0 %v2177_v46  ;;  %v4945_v2 = vpop.eup %3253  ;;  %v5477_v27 = vand.u32 2147483647, %v4613_v34 }
 0x2eb   : > { %3259 = vcosq.f32 %v1116_v13  ;;  %vm5395_vm11 = vcmp.lt.s32.totalorder %v4613_v34, 0  ;;  %3017 = vmatmul.mubr.bf16.vlgmr.msra.gmra.mrb[16].mxu0 %v2178_v23  ;;  %vm5480_vm2 = vcmp.lt.s32.totalorder %v3954_v47, 0  ;;  %vm3382_vm13 = vmmov 0  }
 0x2ec   : > { %3261 = vsinq.f32 %v1837_v24  ;;  %vm4949_vm6 = vcmp.le.f32.partialorder %v5477_v27, 0.7853982  ;;  %v1115_v11 = vsel %vm5480_vm2, %v1114_v33, %v5476_v49  ;;  %v2143_v50 = vsel %vm5395_vm11, %v2142_v14, %v2141_v60  ;;  %3033 = vmatpush3.bf16.msra.mxu0 %v5481_v10  ;;  %3034 = vmatprep.mubr.msk.bf16.mxu0 %vm3382_vm13, %v3381_v45  ;;  %v2541_v45 = vld [vmem:[%s5325_s6] sm:$0x1] }
 0x2ed   : > { %v1915_v31 = vshll.u32 %v4943_v58, 30  ;;  %v1117_v24 = vsel %vm4928_vm1, 0, %v1115_v11  ;;  %3263 = vsinq.f32 %v1116_v13  ;;  %v4966_v36 = vsel %vm4949_vm6, %v4613_v34, %v2143_v50 }
 0x2ee   : > { %v4970_v42 = vadd.s32 %v4882_v35, %v4876_v3  ;;  %v4972_v17 = vand.u32 3, %v1117_v24  ;;  %v1217_v6 = vsub.s32 4, %v5482_v19  ;;  %vm1020_vm1 = vcmp.eq.s32.totalorder %v4936_v54, 0  ;;  %v5483_v3 = vld [vmem:[#allocation9_spill] sm:$0xff] }
 0x2ef   : > { %v4975_v51 = vsub.s32 %v1912_v26, %v1915_v31  ;;  %vm1023_vm2 = vcmp.eq.s32.totalorder %v4936_v54, 2  ;;  %v1227_v35 = vxor.u32 2147483648, %v4255_v37  ;;  %v1230_v9 = vxor.u32 2147483648, %v4248_v7 }
 0x2f0   : > { %3265 = vsinq.f32 %v4966_v36  ;;  %vm5484_vm11 = vcmp.lt.s32.totalorder %v5483_v3, 0  ;;  %v1320_v60 = vsub.s32 4, %v5485_v40  ;;  %vm1126_vm13 = vcmp.eq.s32.totalorder %v4972_v17, 2 }
 0x2f1   : > { %v1918_v26 = vsub.s32 0, %v4975_v51  ;;  %v1218_v4 = vsel %vm5484_vm11, %v1217_v6, %v5482_v19  ;;  %v3256_v28 = vpop.eup %3255  ;;  %v2542_v49 = vpack.c.bf16 %v2541_v45, %v2541_v45  ;;  %vm5487_vm11 = vcmp.lt.s32.totalorder %v3877_v53, 0 }
 0x2f2   : > { %v1220_v23 = vsel %vm4103_vm12, 0, %v1218_v4  ;;  %v3258_v33 = vpop.eup %3257  ;;  %v1024_v14 = vxor.u32 2147483648, %v3256_v28  ;;  %v1321_v11 = vsel %vm5487_vm11, %v1320_v60, %v5485_v40  ;;  %v1330_v10 = vxor.u32 2147483648, %v4547_v22 }
 0x2f3   : > { %v2888_v13 = vmin.u32 %v1918_v26, %v4975_v51  ;;  %v1224_v27 = vand.u32 3, %v1220_v23  ;;  %v1021_v50 = vxor.u32 2147483648, %v3258_v33  ;;  %v1323_v31 = vsel %vm4335_vm9, 0, %v1321_v11 }
 0x2f4   : > { %v1333_v24 = vxor.u32 2147483648, %v4542_v52  ;;  %vm5488_vm12 = vcmask 64512   ;;  %v1025_v45 = vsel %vm1023_vm2, %v1024_v14, %v3258_v33  ;;  %vm1326_vm3 = vweird.f32 %v3877_v53 }
 0x2f5   : > { %3035 = vmatmul.mubr.msk.bf16.vlgmr.msra.gmra.mrb[20].mxu0 %vm5488_vm12, %v2542_v49  ;;  %v3260_v19 = vpop.eup %3259  ;;  %v1920_v6 = vclz %v2888_v13  ;;  %vm1225_vm15 = vcmp.lt.s32.totalorder %v1224_v27, 2  ;;  %vm1226_vm4 = vcmp.eq.s32.totalorder %v1224_v27, 0  ;;  %v1022_v39 = vsel %vm1020_vm1, %v3256_v28, %v1021_v50 }
 0x2f6   : > { %v5011_v26 = vpop.eup %3261  ;;  %v1127_v4 = vxor.u32 2147483648, %v3260_v19  ;;  %v1228_v40 = vsel %vm1226_vm4, %v4248_v7, %v1227_v35  ;;  %vm1229_vm9 = vcmp.eq.s32.totalorder %v1224_v27, 2  ;;  %vm5489_vm11 = vcmp.lt.s32.totalorder %v4936_v54, 2  ;;  %v5492_v54 = vld [vmem:[#allocation24_spill] sm:$0xff] }
 0x2f7   : > { %v3264_v60 = vpop.eup %3263  ;;  %v2889_v46 = vadd.s32 4294967294, %v1920_v6  ;;  %v1026_v23 = vsel %vm5489_vm11, %v1022_v39, %v1025_v45  ;;  %v1231_v49 = vsel %vm1229_vm9, %v1230_v9, %v4255_v37  ;;  %v1327_v33 = vand.u32 3, %v1323_v31 }
 0x2f8   : > { %vm5490_vm2 = vweird.f32 %v3821_v16  ;;  %v1124_v14 = vxor.u32 2147483648, %v3264_v60  ;;  %v1128_v11 = vsel %vm1126_vm13, %v1127_v4, %v3264_v60  ;;  %v1232_v28 = vsel %vm1225_vm15, %v1228_v40, %v1231_v49 }
 0x2f9   : > { %v1027_v13 = vsel %vm5490_vm2, nan, %v1026_v23  ;;  %vm2890_vm1 = vcmp.lt.s32.totalorder %v2889_v46, 0  ;;  %vm5491_vm4 = vweird.f32 %v5483_v3  ;;  %v1423_v50 = vsub.s32 4, %v5492_v54 }
 0x2fa   : > { %v5024_v7 = vmul.f32 0.125, %v1027_v13  ;;  %v1233_v35 = vsel %vm5491_vm4, nan, %v1232_v28  ;;  %v1923_v6 = vsel %vm2890_vm1, 0, %v2889_v46  ;;  %vm5493_vm12 = vcmp.eq.s32.totalorder %v4972_v17, 0  ;;  %v5031_v16 = vpop.eup %3265 }
 0x2fb   : > { %v1125_v37 = vsel %vm5493_vm12, %v3260_v19, %v1124_v14  ;;  %vm1328_vm9 = vcmp.lt.s32.totalorder %v1327_v33, 2  ;;  %vm1329_vm11 = vcmp.eq.s32.totalorder %v1327_v33, 0  ;;  %v1924_v9 = vsub.s32 32, %v1923_v6 }
 0x2fc   : > { %v1928_v31 = vsub.s32 4294967266, %v1923_v6  ;;  %vm5494_vm15 = vcmp.lt.s32.totalorder %v4972_v17, 2  ;;  %vm1332_vm13 = vcmp.eq.s32.totalorder %v1327_v33, 2  ;;  %v1925_v45 = vshll.u32 %v4975_v51, %v1923_v6  ;;  %v5498_v33 = vld [vmem:[#allocation27_spill] sm:$0xff] }
 0x2fd   : > { %v1129_v27 = vsel %vm5494_vm15, %v1125_v37, %v1128_v11  ;;  %vm5495_vm2 = vweird.f32 %v3954_v47  ;;  %v1331_v39 = vsel %vm1329_vm11, %v4542_v52, %v1330_v10  ;;  %v1334_v4 = vsel %vm1332_vm13, %v1333_v24, %v4547_v22  ;;  %v5497_v24 = vld [vmem:[#allocation32_spill] sm:$0xff] }
 0x2fe   : > { %v1130_v3 = vsel %vm5495_vm2, nan, %v1129_v27  ;;  %v1926_v19 = vshrl.u32 %v4970_v42, %v1924_v9  ;;  %v1929_v40 = vadd.s32 127, %v1928_v31  ;;  %v1335_v46 = vsel %vm1328_vm9, %v1331_v39, %v1334_v4  ;;  %v5503_v9 = vld [vmem:[#allocation22_spill] sm:$0xff] }
 0x2ff   : > { %v5041_v60 = vmul.f32 0.125, %v1130_v3  ;;  %v1336_v17 = vsel %vm1326_vm3, nan, %v1335_v46  ;;  %v5045_v23 = vmul.f32 0.125, %v1233_v35  ;;  %vm5496_vm1 = vcmp.lt.s32.totalorder %v4084_v63, 0 }
 0x300   : > { %v1424_v47 = vsel %vm5496_vm1, %v1423_v50, %v5492_v54  ;;  %vm1429_vm4 = vweird.f32 %v4084_v63  ;;  %v1927_v52 = vor.u32 %v1926_v19, %v1925_v45  ;;  %v1930_v51 = vshll.u32 %v1929_v40, 23  ;;  %v5504_v45 = vld [vmem:[#allocation15_spill] sm:$0xff] }
 0x301   : > { %v2179_v22 = vpack.c.bf16 %v5041_v60, %v5024_v7  ;;  %v5053_v42 = vmul.f32 0.125, %v1336_v17  ;;  %vm1854_vm12 = vcmp.lt.s32.totalorder %v4618_v41, 0  ;;  %v1426_v53 = vsel %vm4534_vm10, 0, %v1424_v47 }
 0x302   : > { %v1433_v10 = vxor.u32 2147483648, %v4669_v25  ;;  %v1436_v49 = vxor.u32 2147483648, %v5497_v24  ;;  %v1526_v13 = vsub.s32 4, %v5498_v33  ;;  %v5499_v14 = vand.u32 2147483647, %v4618_v41 }
 0x303   : > { %v1931_v28 = vor.u32 4788187, %v1930_v51  ;;  %3020 = vmatprep.mubr.bf16.mxu1 %v2179_v22  ;;  %v2180_v35 = vpack.c.bf16 %v5053_v42, %v5045_v23  ;;  %v1430_v54 = vand.u32 3, %v1426_v53  ;;  %vm1532_vm10 = vweird.f32 %v4245_v30  ;;  %v5507_v53 = vld [vmem:[#allocation31_spill] sm:$0xff] }
 0x304   : > { %vm5063_vm3 = vcmp.le.f32.partialorder %v5499_v14, 0.7853982  ;;  %v1536_v18 = vxor.u32 2147483648, %v4811_v61  ;;  %v1934_v50 = vcvt.s32.f32 %v1927_v52  ;;  %vm5502_vm9 = vcmp.lt.s32.totalorder %v4245_v30, 0 }
 0x305   : > { %v1527_v6 = vsel %vm5502_vm9, %v1526_v13, %v5498_v33  ;;  %v1539_v37 = vxor.u32 2147483648, %v4802_v56  ;;  %v1629_v31 = vsub.s32 4, %v5503_v9  ;;  %v1932_v27 = vand.u32 2147483647, %v1931_v28  ;;  %3021 = vmatmul.mubr.bf16.vlgmr.msra.gmra.mrb[0].mxu1 %v2180_v35 }
 0x306   : > { %vm1431_vm11 = vcmp.lt.s32.totalorder %v1430_v54, 2  ;;  %vm1432_vm15 = vcmp.eq.s32.totalorder %v1430_v54, 0  ;;  %vm1435_vm13 = vcmp.eq.s32.totalorder %v1430_v54, 2  ;;  %vm1635_vm2 = vweird.f32 %v5504_v45 }
 0x307   : > { %v1434_v3 = vsel %vm1432_vm15, %v5497_v24, %v1433_v10  ;;  %v1437_v39 = vsel %vm1435_vm13, %v1436_v49, %v4669_v25  ;;  %v1529_v4 = vsel %vm4673_vm0, 0, %v1527_v6  ;;  %vm5505_vm1 = vcmp.lt.s32.totalorder %v5504_v45, 0  ;;  %v5508_v25 = vld [vmem:[#allocation30_spill] sm:$0xff] }
 0x308   : > { %v1630_v19 = vsel %vm5505_vm1, %v1629_v31, %v5503_v9  ;;  %v1935_v40 = vmul.f32 %v1934_v50, %v1932_v27  ;;  %v1438_v46 = vsel %vm1431_vm11, %v1434_v3, %v1437_v39  ;;  %v1533_v17 = vand.u32 3, %v1529_v4  ;;  %v5509_v50 = vld [vmem:[#allocation25_spill] sm:$0xff] }
 0x309   : > { %v1632_v52 = vsel %vm4452_vm14, 0, %v1630_v19  ;;  %v1439_v51 = vsel %vm1429_vm4, nan, %v1438_v46  ;;  %v1639_v10 = vxor.u32 2147483648, %v5507_v53  ;;  %v1642_v24 = vxor.u32 2147483648, %v5508_v25  ;;  %v5510_v9 = vld [vmem:[#allocation21_spill] sm:$0xff] }
 0x30a   : > { %v1636_v22 = vand.u32 3, %v1632_v52  ;;  %v1936_v48 = vxor.u32 2147483648, %v1935_v40  ;;  %vm1534_vm0 = vcmp.lt.s32.totalorder %v1533_v17, 2  ;;  %vm1535_vm9 = vcmp.eq.s32.totalorder %v1533_v17, 0  ;;  %v5514_v52 = vld [vmem:[#allocation29_spill] sm:$0xff] }
 0x30b   : > { %vm1538_vm15 = vcmp.eq.s32.totalorder %v1533_v17, 2  ;;  %v1537_v49 = vsel %vm1535_vm9, %v4802_v56, %v1536_v18  ;;  %v5092_v13 = vmul.f32 0.125, %v1439_v51  ;;  %v1732_v6 = vsub.s32 4, %v5509_v50 }
 0x30c   : > { %v1540_v33 = vsel %vm1538_vm15, %v1539_v37, %v4811_v61  ;;  %vm1637_vm11 = vcmp.lt.s32.totalorder %v1636_v22, 2  ;;  %v1937_v63 = vsel %vm1854_vm12, %v1936_v48, %v1935_v40  ;;  %vm1638_vm14 = vcmp.eq.s32.totalorder %v1636_v22, 0 }
 0x30d   : > { %v1541_v14 = vsel %vm1534_vm0, %v1537_v49, %v1540_v33  ;;  %vm1641_vm4 = vcmp.eq.s32.totalorder %v1636_v22, 2  ;;  %v1940_v28 = vsel %vm5063_vm3, %v4618_v41, %v1937_v63  ;;  %v1640_v56 = vsel %vm1638_vm14, %v5508_v25, %v1639_v10 }
 0x30e   : > { %v1542_v35 = vsel %vm1532_vm10, nan, %v1541_v14  ;;  %v1643_v61 = vsel %vm1641_vm4, %v1642_v24, %v5507_v53  ;;  %3267 = vcosq.f32 %v1940_v28  ;;  %vm5511_vm10 = vcmp.lt.s32.totalorder %v5510_v9, 0 }
 0x30f   : > { %v5103_v54 = vmul.f32 0.125, %v1542_v35  ;;  %v1644_v18 = vsel %vm1637_vm11, %v1640_v56, %v1643_v61  ;;  %3269 = vsinq.f32 %v1940_v28  ;;  %v1733_v31 = vsel %vm5511_vm10, %v1732_v6, %v5509_v50 }
 0x310   : > { %v1645_v37 = vsel %vm1635_vm2, nan, %v1644_v18  ;;  %3271 = vcosq.f32 %v4966_v36  ;;  %vm1738_vm13 = vweird.f32 %v5510_v9  ;;  %v1735_v3 = vsel %vm4580_vm8, 0, %v1733_v31 }
 0x311   : > { %v2181_v30 = vpack.c.bf16 %v5103_v54, %v5092_v13  ;;  %v1742_v39 = vxor.u32 2147483648, %v4796_v8  ;;  %v1745_v4 = vxor.u32 2147483648, %v4736_v55  ;;  %v1835_v45 = vsub.s32 4, %v4732_v59 }
 0x312   : > { %v1739_v36 = vand.u32 3, %v1735_v3  ;;  %v5120_v19 = vmul.f32 0.125, %v1645_v37  ;;  %vm1841_vm2 = vweird.f32 %v4511_v57  ;;  %v1938_v40 = vsub.s32 4, %v4943_v58 }
 0x313   : > { %3024 = vmatprep.mubr.bf16.mxu1 %v2181_v30  ;;  %vm5513_vm1 = vcmp.lt.s32.totalorder %v4511_v57, 0  ;;  %v1845_v17 = vxor.u32 2147483648, %v5011_v26  ;;  %v1848_v47 = vxor.u32 2147483648, %v4945_v2  ;;  %v2041_v51 = vsub.s32 4, %v5514_v52 }
 0x314   : > { %v1836_v46 = vsel %vm5513_vm1, %v1835_v45, %v4732_v59  ;;  %vm1740_vm8 = vcmp.lt.s32.totalorder %v1739_v36, 2  ;;  %vm1741_vm0 = vcmp.eq.s32.totalorder %v1739_v36, 0  ;;  %vm1744_vm9 = vcmp.eq.s32.totalorder %v1739_v36, 2 }
 0x315   : > { %v1838_v22 = vsel %vm4832_vm7, 0, %v1836_v46  ;;  %v1743_v53 = vsel %vm1741_vm0, %v4736_v55, %v1742_v39  ;;  %v1746_v10 = vsel %vm1744_vm9, %v1745_v4, %v4796_v8  ;;  %v1939_v59 = vsel %vm1854_vm12, %v1938_v40, %v4943_v58 }
 0x316   : > { %v1842_v25 = vand.u32 3, %v1838_v22  ;;  %v1747_v24 = vsel %vm1740_vm8, %v1743_v53, %v1746_v10  ;;  %v1941_v48 = vsel %vm5063_vm3, 0, %v1939_v59  ;;  %vm1944_vm15 = vweird.f32 %v4618_v41  ;;  %v3281_v10 = vld [vmem:[%s3490_s21 + $0x8] sm:$0xff] }
 0x317   : > { %vm5515_vm11 = vcmp.lt.s32.totalorder %v4296_v44, 0  ;;  %v1748_v55 = vsel %vm1738_vm13, nan, %v1747_v24  ;;  %v1945_v33 = vand.u32 3, %v1941_v48  ;;  %v2144_v56 = vsub.s32 4, %v4798_v1  ;;  %v3284_v59 = vld [vmem:[%s3490_s21 + $0x28] sm:$0xff]  ;;  %v3285_v24 = vld [vmem:[%s3490_s21 + $0x30] sm:$0xff] }
 0x318   : > { %v2042_v38 = vsel %vm5515_vm11, %v2041_v51, %v5514_v52  ;;  %vm1843_vm7 = vcmp.lt.s32.totalorder %v1842_v25, 2  ;;  %vm1844_vm14 = vcmp.eq.s32.totalorder %v1842_v25, 0  ;;  %vm1847_vm4 = vcmp.eq.s32.totalorder %v1842_v25, 2  ;;  %v3268_v8 = vpop.eup %3267  ;;  %v3280_v52 = vld [vmem:[%s3490_s21 + $0x10] sm:$0xff]  ;;  %v3286_v48 = vld [vmem:[%s3490_s21 + $0x38] sm:$0xff] }
 0x319   : > { %v5145_v49 = vmul.f32 0.125, %v1748_v55  ;;  %v1846_v58 = vsel %vm1844_vm14, %v4945_v2, %v1845_v17  ;;  %v1849_v11 = vsel %vm1847_vm4, %v1848_v47, %v5011_v26  ;;  %v3270_v63 = vpop.eup %3269  ;;  %v1951_v28 = vxor.u32 2147483648, %v3268_v8  ;;  %v3279_v47 = vld [vmem:[%s3490_s21] sm:$0xff]  ;;  %v3288_v55 = vld [vmem:[%s3490_s21 + $0x48] sm:$0xff] }
 0x31a   : > { %v1850_v14 = vsel %vm1843_vm7, %v1846_v58, %v1849_v11  ;;  %v2044_v35 = vsel %vm4728_vm5, 0, %v2042_v38  ;;  %v3272_v61 = vpop.eup %3271  ;;  %v2051_v2 = vxor.u32 2147483648, %v4824_v62  ;;  %v2054_v26 = vxor.u32 2147483648, %v4819_v29  ;;  %v3287_v38 = vld [vmem:[%s3490_s21 + $0x40] sm:$0xff]  ;;  %v3290_v58 = vld [vmem:[%s3490_s21 + $0x58] sm:$0xff] }
 0x31b   : > { %v2182_v18 = vpack.c.bf16 %v5145_v49, %v5120_v19  ;;  %v1851_v50 = vsel %vm1841_vm2, nan, %v1850_v14  ;;  %vm1946_vm12 = vcmp.lt.s32.totalorder %v1945_v33, 2  ;;  %v1948_v6 = vxor.u32 2147483648, %v3270_v63  ;;  %v3291_v11 = vld [vmem:[%s3490_s21 + $0x60] sm:$0xff]  ;;  %v3294_v14 = vld [vmem:[%s3490_s21 + $0x78] sm:$0xff] }
 0x31c   : > { %vm1950_vm3 = vcmp.eq.s32.totalorder %v1945_v33, 2  ;;  %v2048_v37 = vand.u32 3, %v2044_v35  ;;  %vm1947_vm10 = vcmp.eq.s32.totalorder %v1945_v33, 0  ;;  %vm5516_vm5 = vcmp.lt.s32.totalorder %v4613_v34, 0  ;;  %v3292_v33 = vld [vmem:[%s3490_s21 + $0x68] sm:$0xff] }
 0x31d   : > { %3025 = vmatmul.mubr.bf16.gmra.mrb[4].mxu1 %v2182_v18  ;;  %v1952_v0 = vsel %vm1950_vm3, %v1951_v28, %v3270_v63  ;;  %v2145_v30 = vsel %vm5516_vm5, %v2144_v56, %v4798_v1  ;;  %v2154_v9 = vxor.u32 2147483648, %v5031_v16  ;;  %v1949_v31 = vsel %vm1947_vm10, %v3268_v8, %v1948_v6  ;;  %v3289_v8 = vld [vmem:[%s3490_s21 + $0x50] sm:$0xff]  ;;  %v2917_v28 = vld [vmem:[%s5203_s16] sm:$0xff]   ;;  %v2948_v35 = vld [vmem:[%s5203_s16 + $0x8] sm:$0xff]  }
 0x31e   : > { %vm2049_vm13 = vcmp.lt.s32.totalorder %v2048_v37, 2  ;;  %vm2050_vm2 = vcmp.eq.s32.totalorder %v2048_v37, 0  ;;  %vm2053_vm1 = vcmp.eq.s32.totalorder %v2048_v37, 2  ;;  %v1953_v57 = vsel %vm1946_vm12, %v1949_v31, %v1952_v0  ;;  %v3293_v63 = vld [vmem:[%s3490_s21 + $0x70] sm:$0xff] }
 0x31f   : > { %v2052_v27 = vsel %vm2050_vm2, %v4819_v29, %v2051_v2  ;;  %v2055_v3 = vsel %vm2053_vm1, %v2054_v26, %v4824_v62  ;;  %v2147_v39 = vsel %vm4949_vm6, 0, %v2145_v30  ;;  %v1954_v4 = vsel %vm1944_vm15, nan, %v1953_v57  ;;  %v2949_v26 = vld [vmem:[%s5203_s16 + $0x10] sm:$0xff]  }
 0x320   : > { %v2056_v45 = vsel %vm2049_vm13, %v2052_v27, %v2055_v3  ;;  %v2151_v1 = vand.u32 3, %v2147_v39  ;;  %v2157_v36 = vxor.u32 2147483648, %v3272_v61  ;;  %v5168_v40 = vmul.f32 0.125, %v1851_v50  ;;  %v2950_v27 = vld [vmem:[%s5203_s16 + $0x18] sm:$0xff]  }
 0x321   : > { %v5170_v46 = vmul.f32 0.125, %v1954_v4  ;;  %vm2047_vm8 = vweird.f32 %v4296_v44  ;;  %v3383_v62 = vmov 8   ;;  %vm2150_vm15 = vweird.f32 %v4613_v34  ;;  %v3283_v34 = vld [vmem:[%s3490_s21 + $0x20] sm:$0xff] }
 0x322   : > { %v2057_v29 = vsel %vm2047_vm8, nan, %v2056_v45  ;;  %vm2153_vm0 = vcmp.eq.s32.totalorder %v2151_v1, 0  ;;  %vm2156_vm9 = vcmp.eq.s32.totalorder %v2151_v1, 2  ;;  %3195 = vset.pattern.permute.xlu0 %v3383_v62  ;;  %3196 = vset.pattern.permute.xlu1 %v3383_v62  ;;  %vm2152_vm6 = vcmp.lt.s32.totalorder %v2151_v1, 2 }
 0x323   : > { %v2183_v41 = vpack.c.bf16 %v5170_v46, %v5168_v40  ;;  %v2155_v12 = vsel %vm2153_vm0, %v3272_v61, %v2154_v9  ;;  %v2158_v17 = vsel %vm2156_vm9, %v2157_v36, %v5031_v16  ;;  %2421 = vperm.xlu0 %3195, %v3279_v47   ;;  %2431 = vperm.xlu1 %3196, %v3280_v52   ;;  %v5179_v22 = vmul.f32 0.125, %v2057_v29  ;;  %v3282_v16 = vld [vmem:[%s3490_s21 + $0x18] sm:$0xff]  ;;  %s3299_s21 = sshll.u32 %s3384_s29, 4  ;;  %s3300_s21 = int_to_ptr.vmem [resolvable:$false] %s3299_s21 }
 0x324   : > { %v2159_v44 = vsel %vm2152_vm6, %v2155_v12, %v2158_v17  ;;  %v2918_v56 = vunpack.c.l.bf16 %v2917_v28  ;;  %v2922_v50 = vunpack.c.l.bf16 %v2948_v35  ;;  %v2919_v2 = vunpack.c.h.bf16 %v2917_v28  ;;  %s3301_s19 = scalar_lea.vmem %s3300_s21, 256  ;;  %p3302_p1 = scmp.lt.s32.totalorder %s5274_s24, %s3300_s21 }
 0x325   : > { %3028 = vmatprep.mubr.bf16.mxu1 %v2183_v41  ;;  %v2160_v51 = vsel %vm2150_vm15, nan, %v2159_v44  ;;  %v2923_v37 = vunpack.c.h.bf16 %v2948_v35  ;;  %v2926_v57 = vunpack.c.l.bf16 %v2949_v26  ;;  %v2927_v4 = vunpack.c.h.bf16 %v2949_v26  ;;  %v2951_v41 = vld [vmem:[%s5203_s16 + $0x20] sm:$0xff]   ;;  %p3303_p2 = scmp.lt.s32.totalorder %s3301_s19, %s3295_s17 }
 0x326   : > { %v5181_v53 = vmul.f32 0.125, %v2160_v51  ;;  %v2930_v62 = vunpack.c.l.bf16 %v2950_v27  ;;  %v2931_v47 = vunpack.c.h.bf16 %v2950_v27  ;;  %vm2697_vm1 = vcmask 1040384  }
 0x327   : > { %2426 = vperm.xlu0 %3195, %v3281_v10   ;;  %2436 = vperm.xlu1 %3196, %v3282_v16   ;;  %v2934_v16 = vunpack.c.l.bf16 %v2951_v41  ;;  %p3304_p3 = por %p3303_p2, %p3302_p1 }
 0x328   : > { %v2184_v25 = vpack.c.bf16 %v5181_v53, %v5179_v22 }
 0x329   : > { %p3305_p5 = pnand %p3304_p3, %p3298_p0 }
 0x32a   : > { %3029 = vmatmul.mubr.bf16.gmra.mrb[8].mxu1 %v2184_v25  ;;  %v2952_v25 = vld [vmem:[%s5203_s16 + $0x28] sm:$0xff]  }
 0x32b   : > { %2441 = vperm.xlu0 %3195, %v3283_v34   ;;  %2446 = vperm.xlu1 %3196, %v3284_v59  }
 0x32f   : > { %2451 = vperm.xlu0 %3195, %v3285_v24   ;;  %2456 = vperm.xlu1 %3196, %v3286_v48   ;;  %v2935_v24 = vunpack.c.h.bf16 %v2951_v41 }
 0x333   : > { %2461 = vperm.xlu0 %3195, %v3287_v38   ;;  %2466 = vperm.xlu1 %3196, %v3288_v55  }
 0x337   : > { %2471 = vperm.xlu0 %3195, %v3289_v8   ;;  %2476 = vperm.xlu1 %3196, %v3290_v58   ;;  %v2938_v58 = vunpack.c.l.bf16 %v2952_v25 }
 0x33b   : > { %2481 = vperm.xlu0 %3195, %v3291_v11   ;;  %2486 = vperm.xlu1 %3196, %v3292_v33   ;;  %v2953_v11 = vld [vmem:[%s5203_s16 + $0x30] sm:$0xff]  }
 0x33f   : > { %2491 = vperm.xlu0 %3195, %v3293_v63   ;;  %2496 = vperm.xlu1 %3196, %v3294_v14   ;;  %v2939_v14 = vunpack.c.h.bf16 %v2952_v25 }
 0x3a2   : > { %v2422_v61 = vpop.permute.xlu0 %2421  ;;  %v2432_v18 = vpop.permute.xlu1 %2431 }
 0x3a3   : > { %v2499_v6 = vmul.f32 %v2918_v56, %v2422_v61  ;;  %v2501_v9 = vmul.f32 %v2922_v50, %v2432_v18  ;;  %v2942_v18 = vunpack.c.l.bf16 %v2953_v11  ;;  %v2954_v50 = vld [vmem:[%s5203_s16 + $0x38] sm:$0xff]   ;;  %s2724_s16 = scalar_lea.sflag [#allocation7], %s309_s18 }
 0x3a6   : > { %v2427_v0 = vpop.permute.xlu0 %2426  ;;  %v2437_v30 = vpop.permute.xlu1 %2436 }
 0x3a7   : > { %v2500_v31 = vmul.f32 %v2919_v2, %v2427_v0  ;;  %v2502_v39 = vmul.f32 %v2923_v37, %v2437_v30 }
 0x3a9   : > { %v2515_v3 = vadd.f32 %v2500_v31, %v2499_v6  ;;  %v2943_v6 = vunpack.c.h.bf16 %v2953_v11  ;;  %v2946_v31 = vunpack.c.l.bf16 %v2954_v50 }
 0x3aa   : > { %v2442_v45 = vpop.permute.xlu0 %2441  ;;  %v2447_v1 = vpop.permute.xlu1 %2446 }
 0x3ab   : > { %v2516_v36 = vadd.f32 %v2515_v3, %v2501_v9  ;;  %v2503_v29 = vmul.f32 %v2926_v57, %v2442_v45  ;;  %v2504_v17 = vmul.f32 %v2927_v4, %v2447_v1  ;;  %v2947_v3 = vunpack.c.h.bf16 %v2954_v50 }
 0x3ad   : > { %v2517_v12 = vadd.f32 %v2516_v36, %v2502_v39 }
 0x3ae   : > { %v2452_v52 = vpop.permute.xlu0 %2451  ;;  %v2457_v44 = vpop.permute.xlu1 %2456 }
 0x3af   : > { %v2518_v51 = vadd.f32 %v2517_v12, %v2503_v29  ;;  %v2505_v10 = vmul.f32 %v2930_v62, %v2452_v52  ;;  %v2506_v59 = vmul.f32 %v2931_v47, %v2457_v44 }
 0x3b1   : > { %v2519_v34 = vadd.f32 %v2518_v51, %v2504_v17 }
 0x3b2   : > { %v2462_v48 = vpop.permute.xlu0 %2461  ;;  %v2467_v38 = vpop.permute.xlu1 %2466 }
 0x3b3   : > { %v2520_v55 = vadd.f32 %v2519_v34, %v2505_v10  ;;  %v2507_v8 = vmul.f32 %v2934_v16, %v2462_v48  ;;  %v2508_v63 = vmul.f32 %v2935_v24, %v2467_v38  ;;  %v2544_v34 = vld [vmem:[%s5323_s4] sm:$0x1] }
 0x3b5   : > { %v2521_v33 = vadd.f32 %v2520_v55, %v2506_v59 }
 0x3b6   : > { %v2472_v28 = vpop.permute.xlu0 %2471  ;;  %v2477_v35 = vpop.permute.xlu1 %2476 }
 0x3b7   : > { %v2522_v56 = vadd.f32 %v2521_v33, %v2507_v8  ;;  %v2509_v61 = vmul.f32 %v2938_v58, %v2472_v28  ;;  %v2510_v26 = vmul.f32 %v2939_v14, %v2477_v35  ;;  %v2418_v35 = vld [vmem:[#allocation3] sm:$0x1] }
 0x3b9   : > { %v2523_v2 = vadd.f32 %v2522_v56, %v2508_v63 }
 0x3ba   : > { %v2482_v37 = vpop.permute.xlu0 %2481  ;;  %v2487_v0 = vpop.permute.xlu1 %2486 }
 0x3bb   : > { %v2524_v30 = vadd.f32 %v2523_v2, %v2509_v61  ;;  %v2511_v9 = vmul.f32 %v2942_v18, %v2482_v37  ;;  %v2512_v27 = vmul.f32 %v2943_v6, %v2487_v0 }
 0x3bd   : > { %v2525_v57 = vadd.f32 %v2524_v30, %v2510_v26 }
 0x3be   : > { %v2492_v39 = vpop.permute.xlu0 %2491  ;;  %v2497_v4 = vpop.permute.xlu1 %2496 }
 0x3bf   : > { %v2526_v45 = vadd.f32 %v2525_v57, %v2511_v9  ;;  %v2513_v1 = vmul.f32 %v2946_v31, %v2492_v39  ;;  %v2514_v29 = vmul.f32 %v2947_v3, %v2497_v4  ;;  %v3018_v62 = vpop.f32.mrb[16].mxu0  ;;  %v5517_v9 = vmov 683565275  }
 0x3c0   : > { %v2283_v12 = vpop.f32.mrb[17].mxu0  ;;  %v2349_v16 = vmul.f32 %v3018_v62, %v4922_v32  ;;  %v5518_v57 = vmov 2475754826  }
 0x3c1   : > { %v2527_v36 = vadd.f32 %v2526_v45, %v2512_v27  ;;  %v3019_v17 = vpop.f32.mrb[18].mxu0  ;;  %v2347_v44 = vmul.f32 %v2283_v12, %v4891_v43  ;;  %v5519_v45 = vmov 2131351028  }
 0x3c2   : > { %v2286_v52 = vpop.f32.mrb[19].mxu0  ;;  %v2350_v24 = vmul.f32 %v3019_v17, %v4897_v5 }
 0x3c3   : > { %v2528_v41 = vadd.f32 %v2527_v36, %v2513_v1  ;;  %v2348_v51 = vmul.f32 %v2286_v52, %v4916_v21 }
 0x3c5   : > { %v2529_v47 = vadd.f32 %v2528_v41, %v2514_v29  ;;  %v2363_v25 = vadd.f32 %v2348_v51, %v2347_v44  ;;  %v5520_v29 = vmov 2102212464  }
 0x3c7   : > { %v2530_v10 = vrot.slane %v2529_v47, 4  ;;  %v2364_v48 = vadd.f32 %v2363_v25, %v2349_v16 }
 0x3c8   : > { %v2585_v38 = vpop.f32.mrb[20].mxu0 }
 0x3c9   : > { %v2531_v59 = vadd.f32 %v2530_v10, %v2529_v47  ;;  %v5220_v8 = vadd.f32 %v2585_v38, %v2544_v34  ;;  %v3036_v58 = vpop.f32.mrb[21].mxu0  ;;  %v2365_v43 = vadd.f32 %v2364_v48, %v2350_v24 }
 0x3ca   : > { %v2588_v11 = vpop.f32.mrb[22].mxu0 }
 0x3cb   : > { %v2532_v55 = vrot.slane %v2531_v59, 2  ;;  %v2594_v33 = vand.u32 2139095040, %v5220_v8  ;;  %v3037_v32 = vpop.f32.mrb[23].mxu0  ;;  %v2591_v63 = vand.u32 2147483647, %v5220_v8  ;;  %vm2593_vm5 = vcmp.lt.s32.totalorder %v5220_v8, 0 }
 0x3cc   : > { %vm2683_vm9 = vweird.f32 %v5220_v8 }
 0x3cd   : > { %v2533_v21 = vadd.f32 %v2532_v55, %v2531_v59  ;;  %v2595_v28 = vshrl.u32 %v2594_v33, 23  ;;  %v2598_v5 = vand.u32 8388607, %v2591_v63  ;;  %vm2592_vm13 = vcmp.le.f32.partialorder %v2591_v63, 0.7853982 }
 0x3cf   : > { %v2534_v14 = vrot.slane %v2533_v21, 1  ;;  %v2908_v61 = vadd.s32 4294967169, %v2595_v28  ;;  %v2599_v2 = vor.u32 8388608, %v2598_v5 }
 0x3d1   : > { %v2535_v56 = vadd.f32 %v2534_v14, %v2533_v21  ;;  %v2601_v50 = vadd.s32 1, %v2908_v61  ;;  %v2639_v3 = vshll.u32 %v2599_v2, 8 }
 0x3d3   : > { %v2536_v18 = vadd.f32 %v2535_v56, %v2418_v35  ;;  %vm2602_vm11 = vcmp.gt.s32.totalorder %v2601_v50, 0 }
 0x3d4   : > { %v2603_v26 = vsel %vm2602_vm11, %v2601_v50, 0 }
 0x3d5   : > { %2537 = vst [vmem:[#allocation3] sm:$0x1] %v2536_v18  ;;  %v2605_v6 = vand.u32 31, %v2603_v26  ;;  %v2604_v0 = vshrl.u32 %v2603_v26, 5 }
 0x3d7   : > { %v2606_v30 = vsub.s32 32, %v2605_v6  ;;  %v2608_v31 = vshll.u32 %v5517_v9, %v2605_v6  ;;  %v2611_v27 = vshll.u32 %v5518_v57, %v2605_v6  ;;  %v2614_v36 = vshll.u32 %v5519_v45, %v2605_v6 }
 0x3d8   : > { %v3022_v37 = vpop.f32.mrb[0].mxu1  ;;  %v2617_v12 = vshll.u32 %v5520_v29, %v2605_v6  ;;  %v2620_v47 = vshll.u32 %v5422_v15, %v2605_v6  ;;  %vm2623_vm7 = vcmp.lt.s32.totalorder %v2604_v0, 1  ;;  %vm2626_vm14 = vcmp.lt.s32.totalorder %v2604_v0, 4 }
 0x3d9   : > { %v2299_v39 = vpop.f32.mrb[1].mxu1  ;;  %v2609_v4 = vshrl.u32 %v5518_v57, %v2606_v30  ;;  %v2612_v1 = vshrl.u32 %v5519_v45, %v2606_v30  ;;  %v2615_v62 = vshrl.u32 %v5520_v29, %v2606_v30  ;;  %v2618_v17 = vshrl.u32 %v5422_v15, %v2606_v30 }
 0x3da   : > { %v3023_v41 = vpop.f32.mrb[2].mxu1  ;;  %v2621_v52 = vshrl.u32 %v5425_v20, %v2606_v30  ;;  %v2351_v59 = vmul.f32 %v2299_v39, %v5024_v7  ;;  %v2607_v24 = vshrl.u32 %v5517_v9, %v2606_v30  ;;  %vm2625_vm4 = vcmp.lt.s32.totalorder %v2604_v0, 3 }
 0x3db   : > { %v2302_v44 = vpop.f32.mrb[3].mxu1  ;;  %v2610_v51 = vor.u32 %v2609_v4, %v2608_v31  ;;  %v2613_v10 = vor.u32 %v2612_v1, %v2611_v27  ;;  %v2616_v16 = vor.u32 %v2615_v62, %v2614_v36  ;;  %v2619_v25 = vor.u32 %v2618_v17, %v2617_v12 }
 0x3dc   : > { %v2622_v34 = vor.u32 %v2621_v52, %v2620_v47  ;;  %v2366_v58 = vadd.f32 %v2365_v43, %v2351_v59  ;;  %vm2624_vm12 = vcmp.lt.s32.totalorder %v2604_v0, 2  ;;  %v2352_v33 = vmul.f32 %v2302_v44, %v5041_v60 }
 0x3dd   : > { %v2628_v48 = vsel %vm2626_vm14, %v2616_v16, 2102212464  ;;  %v2631_v38 = vsel %vm2623_vm7, %v2610_v51, %v2613_v10  ;;  %v2635_v55 = vsel %vm2623_vm7, %v2613_v10, %v2616_v16  ;;  %v2632_v15 = vsel %vm2626_vm14, %v2619_v25, 920167782 }
 0x3de   : > { %v2636_v20 = vsel %vm2626_vm14, %v2622_v34, 1326507024  ;;  %v2633_v11 = vsel %vm2625_vm4, %v2616_v16, %v2632_v15  ;;  %v2627_v32 = vsel %vm2623_vm7, %v2607_v24, %v2610_v51  ;;  %v2629_v14 = vsel %vm2625_vm4, %v2613_v10, %v2628_v48 }
 0x3df   : > { %v2637_v21 = vsel %vm2625_vm4, %v2619_v25, %v2636_v20  ;;  %v2634_v7 = vsel %vm2624_vm12, %v2631_v38, %v2633_v11  ;;  %v2353_v18 = vmul.f32 %v3022_v37, %v5045_v23  ;;  %v2367_v50 = vadd.f32 %v2366_v58, %v2352_v33 }
 0x3e0   : > { %v2638_v28 = vsel %vm2624_vm12, %v2635_v55, %v2637_v21  ;;  %v5245_v61 = vmul.u32.u64.low %v2639_v3, %v2634_v7  ;;  %v5246_v5 = vmul.u32.u64.high %v2639_v3, %v2634_v7, %v5245_v61  ;;  %v2630_v43 = vsel %vm2624_vm12, %v2627_v32, %v2629_v14 }
 0x3e1   : > { %v5242_v35 = vmul.u32.u64.low %v2639_v3, %v2638_v28  ;;  %v5243_v56 = vmul.u32.u64.high %v2639_v3, %v2638_v28, %v5242_v35  ;;  %v2354_v2 = vmul.f32 %v3023_v41, %v5053_v42  ;;  %v2368_v26 = vadd.f32 %v2367_v50, %v2353_v18 }
 0x3e2   : > { %v2649_v60 = vadd.s32 1, %v5246_v5  ;;  %v2646_v6 = vmul.u32 %v2639_v3, %v2630_v43 }
 0x3e3   : > { %vm2648_vm3 = vc.u32 %v5243_v56, %v5245_v61  ;;  %v2369_v0 = vadd.f32 %v2368_v26, %v2354_v2  ;;  %v2647_v16 = vadd.s32 %v5245_v61, %v5243_v56  ;;  %v2346_v2 = vld [vmem:[#allocation4] sm:$0x1] }
 0x3e4   : > { %v2650_v30 = vsel %vm2648_vm3, %v2649_v60, %v5246_v5 }
 0x3e5   : > { %v2651_v9 = vadd.s32 %v2650_v30, %v2646_v6 }
 0x3e7   : > { %v2652_v31 = vadd.s32 536870912, %v2651_v9 }
 0x3e9   : > { %v2653_v57 = vshrl.u32 %v2652_v31, 30 }
 0x3eb   : > { %v2654_v39 = vshll.u32 %v2653_v57, 30 }
 0x3ed   : > { %v2655_v45 = vsub.s32 %v2651_v9, %v2654_v39 }
 0x3ef   : > { %v2657_v29 = vsub.s32 0, %v2655_v45 }
 0x3f0   : > { %v3026_v27 = vpop.f32.mrb[4].mxu1 }
 0x3f1   : > { %v2315_v4 = vpop.f32.mrb[5].mxu1  ;;  %v2357_v3 = vmul.f32 %v3026_v27, %v5120_v19  ;;  %v2909_v41 = vmin.u32 %v2657_v29, %v2655_v45 }
 0x3f2   : > { %v2355_v23 = vmul.f32 %v2315_v4, %v5092_v13  ;;  %v3027_v37 = vpop.f32.mrb[6].mxu1 }
 0x3f3   : > { %v2318_v42 = vpop.f32.mrb[7].mxu1  ;;  %v2358_v12 = vmul.f32 %v3027_v37, %v5145_v49  ;;  %v2659_v47 = vclz %v2909_v41 }
 0x3f4   : > { %v2370_v1 = vadd.f32 %v2369_v0, %v2355_v23  ;;  %v2356_v36 = vmul.f32 %v2318_v42, %v5103_v54  ;;  %v2695_v42 = vld [vmem:[#allocation3] sm:$0x1] }
 0x3f5   : > { %v2910_v44 = vadd.s32 4294967294, %v2659_v47 }
 0x3f6   : > { %v2371_v62 = vadd.f32 %v2370_v1, %v2356_v36 }
 0x3f7   : > { %vm2911_vm10 = vcmp.lt.s32.totalorder %v2910_v44, 0 }
 0x3f8   : > { %v2372_v17 = vadd.f32 %v2371_v62, %v2357_v3  ;;  %v2662_v13 = vsel %vm2911_vm10, 0, %v2910_v44 }
 0x3f9   : > { %v2663_v25 = vsub.s32 32, %v2662_v13  ;;  %v2667_v34 = vsub.s32 4294967266, %v2662_v13  ;;  %v2664_v19 = vshll.u32 %v2655_v45, %v2662_v13 }
 0x3fa   : > { %v2373_v52 = vadd.f32 %v2372_v17, %v2358_v12 }
 0x3fb   : > { %v2665_v48 = vshrl.u32 %v2647_v16, %v2663_v25  ;;  %v2668_v38 = vadd.s32 127, %v2667_v34 }
 0x3fd   : > { %v3030_v51 = vpop.f32.mrb[8].mxu1  ;;  %v2666_v15 = vor.u32 %v2665_v48, %v2664_v19  ;;  %v2669_v20 = vshll.u32 %v2668_v38, 23 }
 0x3fe   : > { %v2331_v10 = vpop.f32.mrb[9].mxu1  ;;  %v2361_v58 = vmul.f32 %v3030_v51, %v5179_v22  ;;  %v2677_v22 = vsub.s32 4, %v2653_v57 }
 0x3ff   : > { %v2359_v54 = vmul.f32 %v2331_v10, %v5168_v40  ;;  %v3031_v59 = vpop.f32.mrb[10].mxu1  ;;  %v2670_v21 = vor.u32 4788187, %v2669_v20  ;;  %v2673_v7 = vcvt.s32.f32 %v2666_v15 }
 0x400   : > { %v2334_v24 = vpop.f32.mrb[11].mxu1  ;;  %v2362_v33 = vmul.f32 %v3031_v59, %v5181_v53  ;;  %v2678_v43 = vsel %vm2593_vm5, %v2677_v22, %v2653_v57 }
 0x401   : > { %v2374_v49 = vadd.f32 %v2373_v52, %v2359_v54  ;;  %v2360_v55 = vmul.f32 %v2334_v24, %v5170_v46  ;;  %v2671_v14 = vand.u32 2147483647, %v2670_v21  ;;  %v2680_v60 = vsel %vm2592_vm13, 0, %v2678_v43 }
 0x402   : > { %v2684_v0 = vand.u32 3, %v2680_v60 }
 0x403   : > { %v2375_v11 = vadd.f32 %v2374_v49, %v2360_v55  ;;  %v2674_v28 = vmul.f32 %v2673_v7, %v2671_v14 }
 0x404   : > { %vm2689_vm2 = vcmp.eq.s32.totalorder %v2684_v0, 2  ;;  %vm2686_vm8 = vcmp.eq.s32.totalorder %v2684_v0, 0  ;;  %vm2685_vm0 = vcmp.lt.s32.totalorder %v2684_v0, 2 }
 0x405   : > { %v2376_v32 = vadd.f32 %v2375_v11, %v2361_v58  ;;  %v2675_v56 = vxor.u32 2147483648, %v2674_v28 }
 0x407   : > { %v2377_v40 = vadd.f32 %v2376_v32, %v2362_v33  ;;  %v2676_v46 = vsel %vm2593_vm5, %v2675_v56, %v2674_v28 }
 0x408   : > { %v2679_v18 = vsel %vm2592_vm13, %v5220_v8, %v2676_v46 }
 0x409   : > { %v2378_v35 = vrot.slane %v2377_v40, 4  ;;  %3273 = vcosq.f32 %v2679_v18 }
 0x40a   : > { %3275 = vsinq.f32 %v2679_v18 }
 0x40b   : > { %v2379_v61 = vadd.f32 %v2378_v35, %v2377_v40 }
 0x40d   : > { %v2380_v5 = vrot.slane %v2379_v61, 2 }
 0x40f   : > { %v2381_v53 = vadd.f32 %v2380_v5, %v2379_v61 }
 0x411   : > { %v2382_v50 = vrot.slane %v2381_v53, 1 }
 0x413   : > { %v2383_v26 = vadd.f32 %v2382_v50, %v2381_v53  ;;  %v3274_v30 = vpop.eup %3273 }
 0x414   : > { %v3276_v9 = vpop.eup %3275  ;;  %v2690_v31 = vxor.u32 2147483648, %v3274_v30 }
 0x415   : > { %v2384_v6 = vadd.f32 %v2383_v26, %v2346_v2  ;;  %v2687_v63 = vxor.u32 2147483648, %v3276_v9 }
 0x416   : > { %v2691_v27 = vsel %vm2689_vm2, %v2690_v31, %v3276_v9 }
 0x417   : > { %2385 = vst [vmem:[#allocation4] sm:$0x1] %v2384_v6  ;;  %v2688_v39 = vsel %vm2686_vm8, %v3274_v30, %v2687_v63 }
 0x418   : > { %v2692_v57 = vsel %vm2685_vm0, %v2688_v39, %v2691_v27 }
 0x419   : > { %v2693_v37 = vsel %vm2683_vm9, nan, %v2692_v57 }
 0x41a   : > { %v2694_v45 = vmul.f32 0.125, %v2693_v37 }
 0x41c   : > { %v2696_v1 = vmul.f32 %v2695_v42, %v2694_v45 }
 0x41e   : > { %v2708_v4 = vld [vmem:[#allocation4] sm:$0x1]  ;;  %v2698_v36 = vsel %vm2697_vm1, %v2696_v1, 0.0 }
 0x41f   : > { %v2709_v23 = vsel %vm2697_vm1, %v2708_v4, 0.0  ;;  %2699 = vadd.xlane.f32.xlu0 %v2698_v36 }
 0x420   : > { %2710 = vadd.xlane.f32.xlu1 %v2709_v23 }
 0x4ac   : > { %v2700_v12 = vpop.xlane.xlu0 %2699 }
 0x4ad   : > { %v2711_v29 = vpop.xlane.xlu1 %2710  ;;  %v2701_v17 = vrot.slane %v2700_v12, 4 }
 0x4ae   : > { %v2712_v3 = vrot.slane %v2711_v29, 4 }
 0x4af   : > { %v2702_v47 = vadd.f32 %v2701_v17, %v2700_v12 }
 0x4b0   : > { %v2713_v62 = vadd.f32 %v2712_v3, %v2711_v29 }
 0x4b1   : > { %v2703_v8 = vrot.slane %v2702_v47, 2 }
 0x4b2   : > { %v2714_v41 = vrot.slane %v2713_v62, 2 }
 0x4b3   : > { %v2704_v44 = vadd.f32 %v2703_v8, %v2702_v47 }
 0x4b4   : > { %v2715_v52 = vadd.f32 %v2714_v41, %v2713_v62 }
 0x4b5   : > { %v2705_v13 = vrot.slane %v2704_v44, 1 }
 0x4b6   : > { %v2716_v51 = vrot.slane %v2715_v52, 1 }
 0x4b7   : > { %v2706_v10 = vadd.f32 %v2705_v13, %v2704_v44 }
 0x4b8   : > { %v2717_v16 = vadd.f32 %v2716_v51, %v2715_v52 }
 0x4b9   : > { %3127 = vpush %v2706_v10 }
 0x4ba   : > { %3129 = vpush %v2717_v16 }
 0x4ea   : > { %s3128_s22 = spop %3127 }
 0x4eb   : > { %s3130_s25 = spop %3129 }
 0x4ec   : > { %s2719_s0 = sadd.f32 %s3130_s25, %s3128_s22 }
 0x4ee   : > { %v2720_v25 = vstv %s2719_s0 }
 0x4ef   : > { %2722 = vst [vmem:[%s311_s23] sm:$0xff] %v2720_v25 }
 0x4f0   : > { %3308 = shalt.err (!%p3305_p5)
}
 0x4f1   : > { %s3309_s18 = scalar_lea.hbm %s5272_s13, 128  ;;  %s3313_s23 = scalar_lea.hbm %s5326_s7, 256 }
 0x4f2   : > { %p3310_p6 = scmp.ne.s32.totalorder %s5272_s13, %s3309_s18  ;;  %p3314_p10 = scmp.lt.u32.totalorder %s5272_s13, %s5326_s7 }
 0x4f3   : > { %p3315_p11 = scmp.lt.u32.totalorder %s3313_s23, %s3309_s18  ;;  %p3317_p13 = scmp.lt.u32.totalorder %s3309_s18, %s5272_s13 }
 0x4f4   : > { %p3311_p7 = pnand %p3310_p6, %p3468_p4 }
 0x4f5   : > { %p3316_p12 = por %p3315_p11, %p3314_p10 }
 0x4f6   : > { %p3312_p9 = pneg %p3311_p7 }
 0x4f7   : > { %p3318_p0 = por %p3317_p13, %p3316_p12 }
 0x4f9   : > { %p3319_p1 = pnand %p3318_p0, %p3312_p9 }
 0x4fb   : > { %3322 = shalt.err (!%p3319_p1)
}
 0x4fc   : > { %3131 = dma.vmem_to_hbm [thread:$0]  (%p3468_p4), %s5274_s24, 128, %s5272_s13, %s2724_s16  }
 0x4fd PF: > { %p3137_p2 = scmp.ge.s32.totalorder %s3373_s8, 2  ;;  %s2749_s9 = sand.u32 1, %s3353_s26  }
 0x4fe   : > { %s2750_s11 = scalar_lea.sflag [#allocation7], %s2749_s9 }
 0x4ff   : > { %p3134_p3 = pnand %p3137_p2, %p3475_p8 }
 0x501   : > { %3348 = dma.done.wait (!%p3134_p3), %s2750_s11, 128  }
 0x502   : > { %3350 = vsyncadd (!%p3134_p3), %s2750_s11, 4294967168  ;;  %s21_s8 = sadd.s32 1, %s3373_s8   ;;  %s5521_s26 = smov %s3357_s27 }
 0x503   : > { %p18_p5 = scmp.ge.s32.totalorder %s21_s8, 4   ;;  %s5522_s27 = smov %s3361_s28 }
 0x504   : > { %s5523_s28 = smov %s3481_s15  ;;  %s5524_s29 = smov %s3369_s30 }
 0x505   : > { %s5525_s30 = smov %s5527_s10  ;;  %20 = sbr.rel (!%p18_p5) target bundleno = 6 (0x6), region = 94 }
 0x50c   :  { %2755 = vsyncpa [#allocation7], 1 }
 0x50d   :  { %2757 = vsyncpa [#allocation7 + $0x1], 1 }

// kernel: tpu_custom_call.1
= control target key start
LH: loop header
LB: loop body
LE: loop exit
PB: predicated region body
PF: predicated region fallthrough
CT: control target
= control target key end

     0   :  { %s5319_s0 = inlined_call_operand.<no memory space> [shape: f32[1,1], index: 0, kind: input, shape index: {}]   ;;  %s5320_s1 = inlined_call_operand.vmem [shape: f32[256,9], index: 1, kind: input, shape index: {}]   ;;  %s5321_s2 = inlined_call_operand.vmem [shape: bf16[256,128], index: 2, kind: input, shape index: {}]   ;;  %s5322_s3 = inlined_call_operand.vmem [shape: f32[8,128], index: 3, kind: input, shape index: {}]   ;;  %s5323_s4 = inlined_call_operand.vmem [shape: f32[1,128], index: 4, kind: input, shape index: {}]   ;;  %s5324_s5 = inlined_call_operand.vmem [shape: bf16[128,128], index: 5, kind: input, shape index: {}]   ;;  %s5325_s6 = inlined_call_operand.vmem [shape: f32[1,8], index: 6, kind: input, shape index: {}]   ;;  %s5326_s7 = inlined_call_operand.hbm [shape: f32[2,8,128], index: 7, kind: output, shape index: {}]  }
   0x1   :  { %12 = sst [smem:[#allocation5]] %s5319_s0 }
   0x2   :  { %13 = vsyncpa [#allocation7], 0 }
   0x3   :  { %15 = vsyncpa [#allocation7 + $0x1], 0  ;;  %s3428_s26 = smov 0   ;;  %s3430_s27 = smov 0  }
   0x4   :  { %s3432_s28 = smov 0   ;;  %s3434_s29 = smov 0  }
   0x5   :  { %s3436_s30 = smov 0   ;;  %s3438_s8 = smov 0  }
   0x6 LB: > { %s2816_s0 = sadd.s32 4294967295, %s3373_s8   ;;  %s2817_s9 = sadd.s32 4294967294, %s3373_s8   ;;  %s3373_s8 = sphi %s3438_s8, %s21_s8   ;;  %s3369_s30 = sphi %s3436_s30, %s5525_s30   ;;  %s3365_s29 = sphi %s3434_s29, %s5524_s29   ;;  %s3361_s28 = sphi %s3432_s28, %s5523_s28   ;;  %s3357_s27 = sphi %s3430_s27, %s5522_s27   ;;  %s3353_s26 = sphi %s3428_s26, %s5521_s26  }
   0x7   : > { %s33_s10 = sadd.s32 1, %s3369_s30  ;;  %s201_s11 = sadd.s32 1, %s3361_s28 }
   0x8   : > { %p35_p0 = scmp.ge.s32.totalorder %s33_s10, 2  ;;  %p211_p1 = scmp.ne.s32.totalorder %s3361_s28, %s3357_s27 }
   0x9   : > { %p212_p2 = scmp.eq.s32.totalorder %s2816_s0, 1  ;;  %p217_p3 = scmp.ne.s32.totalorder %s3357_s27, %s3353_s26 }
   0xa   : > { %s5527_s10 = smov (%p35_p0, %s33_s10), 0  ;;  %p218_p5 = scmp.eq.s32.totalorder %s2817_s9, 1 }
   0xb   : > { %p3468_p4 = por %p212_p2, %p211_p1  ;;  %s198_s13 = ssub.s32 %s3369_s30, %s5527_s10 }
   0xc   : > { %p2820_p6 = scmp.ge.s32.totalorder %s3373_s8, 1  ;;  %p199_p7 = scmp.eq.s32.totalorder %s198_s13, 0 }
   0xd   : > { %p3475_p8 = por %p218_p5, %p217_p3  ;;  %p273_p9 = scmp.lt.s32.totalorder %s3373_s8, 3 }
   0xe   : > { %s3481_s15 = scalar_select %p199_p7, %s3361_s28, %s201_s11  }
   0xf   : > { %p274_p10 = pnand %p2820_p6, %p273_p9 }
  0x11   : > { %277 = sbr.rel (%p274_p10) target bundleno = 1277 (0x4fd), region = 48 }
  0x18   : > { %s333_s16 = sld [smem:[#allocation5]]  ;;  %s2822_s17 = sshll.u32 %s3365_s29, 4  ;;  %vm5370_vm0 = vcmask 64512   ;;  %v338_v12 = vld [vmem:[%s5322_s3] sm:$0xff]  ;;  %vm412_vm3 = vcmask 1043456  }
  0x19   : > { %p314_p11 = scmp.lt.s32.totalorder %s2822_s17, 31  ;;  %v3524_v39 = vld [vmem:[%s5323_s4] ss:$0 sm:$0xff]  ;;  %s2913_s20 = sshll.u32 %s3365_s29, 7 }
  0x1a   : > { %s5272_s13 = scalar_lea.hbm %s5326_s7, %s2913_s20  ;;  %s3384_s29 = smov [#allocation6]  }
  0x1b   : > { %s5529_s17 = smov (!%p314_p11, %s2822_s17), 31 }
  0x1c   : > { %s2823_s18 = sshll.u32 %s5529_s17, 3  ;;  %s2825_s9 = sshll.u32 %s5529_s17, 2 }
  0x1d   : > { %s3490_s21 = scalar_lea.vmem %s5320_s1, %s2823_s18  ;;  %s309_s18 = sand.u32 1, %s3357_s27  }
  0x1e   : > { %v334_v0 = vstv %s333_s16  ;;  %v355_v3 = vld [vmem:[%s3490_s21] sm:$0xff]  ;;  %v356_v4 = vld [vmem:[%s3490_s21 + $0x8] sm:$0xff]  ;;  %v357_v16 = vld [vmem:[%s3490_s21 + $0x10] sm:$0xff]  ;;  %s5203_s16 = scalar_lea.vmem %s5321_s2, %s2825_s9  ;;  %s2821_s19 = sshll.u32 %s309_s18, 3 }
  0x1f   : > { %v335_v1 = vmul.f32 1.442695, %v334_v0  ;;  %v371_v5 = vpack.c.bf16 %v356_v4, %v355_v3  ;;  %v358_v17 = vld [vmem:[%s3490_s21 + $0x18] sm:$0xff]  ;;  %v359_v18 = vld [vmem:[%s3490_s21 + $0x20] sm:$0xff]  ;;  %v360_v19 = vld [vmem:[%s3490_s21 + $0x28] sm:$0xff] }
  0x20   : > { %v372_v22 = vpack.c.bf16 %v358_v17, %v357_v16  ;;  %v373_v23 = vpack.c.bf16 %v360_v19, %v359_v18  ;;  %v361_v24 = vld [vmem:[%s3490_s21 + $0x30] sm:$0xff]  ;;  %v362_v25 = vld [vmem:[%s3490_s21 + $0x38] sm:$0xff]  ;;  %v363_v26 = vld [vmem:[%s3490_s21 + $0x40] sm:$0xff]  ;;  %v5335_v19 = vmov 2475754826  }
  0x21   : > { %3205 = vpow2.f32 %v335_v1  ;;  %2984 = vmatprep.mubr.msk.bf16.mxu0 %vm5370_vm0, %v371_v5  ;;  %v364_v27 = vld [vmem:[%s3490_s21 + $0x48] sm:$0xff]  ;;  %v374_v28 = vpack.c.bf16 %v362_v25, %v361_v24  ;;  %v365_v30 = vld [vmem:[%s3490_s21 + $0x50] sm:$0xff]  ;;  %v366_v31 = vld [vmem:[%s3490_s21 + $0x58] sm:$0xff]  ;;  %v5339_v25 = vmov 920167782  }
  0x22   : > { %v375_v29 = vpack.c.bf16 %v364_v27, %v363_v26  ;;  %v367_v32 = vld [vmem:[%s3490_s21 + $0x60] sm:$0xff]  ;;  %v368_v33 = vld [vmem:[%s3490_s21 + $0x68] sm:$0xff]  ;;  %v376_v34 = vpack.c.bf16 %v366_v31, %v365_v30  ;;  %v369_v36 = vld [vmem:[%s3490_s21 + $0x70] sm:$0xff] }
  0x23   : > { %v377_v35 = vpack.c.bf16 %v368_v33, %v367_v32  ;;  %v370_v37 = vld [vmem:[%s3490_s21 + $0x78] sm:$0xff]  ;;  %v5337_v32 = vmov 1326507024  }
  0x24   : > { %v378_v38 = vpack.c.bf16 %v370_v37, %v369_v36 }
  0x2b   : > { %v3206_v2 = vpop.eup %3205 }
  0x2c   : > { %3055 = vpush %v3206_v2 }
  0x5d   : > { %s3056_s22 = spop %3055 }
  0x5e   : > { %s339_s23 = smul.f32 2.0, %s3056_s22 }
  0x60   : > { %v340_v6 = vstv %s339_s23  ;;  %s311_s23 = scalar_lea.vmem [#allocation6], %s2821_s19 }
  0x61   : > { %3207 = vrsqrt.f32 %v340_v6  ;;  %vm343_vm1 = vcmp.eq.f32.partialorder %v340_v6, inf  ;;  %v346_v9 = vand.u32 2147483648, %v340_v6  ;;  %vm345_vm2 = vcmp.eq.f32.partialorder %v340_v6, 0.0  ;;  %s2737_s24 = sshll.u32 %s311_s23, 4  ;;  %s5274_s24 = int_to_ptr.vmem [resolvable:$true] %s2737_s24 }
  0x62   : > { %s3295_s17 = scalar_lea.vmem %s5274_s24, 128 }
  0x63   : > { %p3296_p12 = scmp.ne.s32.totalorder %s5274_s24, %s3295_s17 }
  0x65   : > { %p3297_p13 = pnand %p3296_p12, %p3468_p4 }
  0x67   : > { %p3298_p0 = pneg %p3297_p13 }
  0x6b   : > { %v3208_v7 = vpop.eup %3207 }
  0x6c   : > { %v342_v8 = vmul.f32 %v3208_v7, %v340_v6 }
  0x6e   : > { %v344_v10 = vsel %vm343_vm1, %v340_v6, %v342_v8 }
  0x6f   : > { %v347_v11 = vsel %vm345_vm2, %v346_v9, %v344_v10 }
  0x70   : > { %3057 = vpush %v347_v11 }
  0xa1   : > { %s3058_s0 = spop %3057 }
  0xa2   : > { %v349_v13 = vstv %s3058_s0 }
  0xa3   : > { %v350_v14 = vmul.f32 %v349_v13, %v338_v12 }
  0xa5   : > { %v351_v15 = vpack.c.bf16 %v350_v14, %v350_v14 }
  0xa7   : > { %352 = vst [vmem:[#allocation2] sm:$0xf] %v351_v15  ;;  %v5341_v15 = vmov 683565275  }
  0xae   : > { %v379_v20 = vld [vmem:[#allocation2] sm:$0xf] }
  0xaf   : > { %3054 = vmatprep.subr.msk.bf16.mxu0 %vm412_vm3, %v379_v20  ;;  %v414_v21 = vsel %vm412_vm3, %v379_v20, 0 }
  0xb0   : > { %2983 = vmatpush3.bf16.msra.mxu0 %v414_v21  ;;  %v5331_v21 = vmov 2131351028  }
  0xb3   : > { %2985 = vmatmul.mubr.msk.bf16.vlgmr.msra.gmra.mrb[0].mxu0 %vm5370_vm0, %v372_v22 }
  0xb4   : > { %2988 = vmatprep.mubr.msk.bf16.mxu0 %vm5370_vm0, %v373_v23  ;;  %v5333_v23 = vmov 2102212464  }
  0xbb   : > { %2989 = vmatmul.mubr.msk.bf16.gmra.mrb[4].mxu0 %vm5370_vm0, %v374_v28 }
  0xbc   : > { %2992 = vmatprep.mubr.msk.bf16.mxu0 %vm5370_vm0, %v375_v29 }
  0xc3   : > { %2993 = vmatmul.mubr.msk.bf16.gmra.mrb[8].mxu0 %vm5370_vm0, %v376_v34 }
  0xc4   : > { %2996 = vmatprep.mubr.msk.bf16.mxu0 %vm5370_vm0, %v377_v35 }
  0xcb   : > { %2997 = vmatmul.mubr.msk.bf16.gmra.mrb[12].mxu0 %vm5370_vm0, %v378_v38 }
 0x186   : > { %v2986_v40 = vpop.f32.mrb[0].mxu0 }
 0x187   : > { %v3527_v41 = vadd.f32 %v2986_v40, %v3524_v39  ;;  %v450_v42 = vpop.f32.mrb[1].mxu0 }
 0x188   : > { %v3530_v43 = vadd.f32 %v3524_v39, %v450_v42  ;;  %v2987_v44 = vpop.f32.mrb[2].mxu0 }
 0x189   : > { %v719_v45 = vand.u32 2147483647, %v3527_v41  ;;  %v722_v46 = vand.u32 2139095040, %v3527_v41  ;;  %v453_v47 = vpop.f32.mrb[3].mxu0  ;;  %v3537_v50 = vadd.f32 %v2987_v44, %v3524_v39 }
 0x18a   : > { %v513_v48 = vand.u32 2147483647, %v3530_v43  ;;  %v516_v49 = vand.u32 2139095040, %v3530_v43  ;;  %v3554_v9 = vadd.f32 %v3524_v39, %v453_v47 }
 0x18b   : > { %v723_v51 = vshrl.u32 %v722_v46, 23  ;;  %v726_v52 = vand.u32 8388607, %v719_v45  ;;  %v825_v56 = vand.u32 2139095040, %v3537_v50  ;;  %v822_v1 = vand.u32 2147483647, %v3537_v50 }
 0x18c   : > { %v517_v53 = vshrl.u32 %v516_v49, 23  ;;  %v520_v54 = vand.u32 8388607, %v513_v48 }
 0x18d   : > { %v2843_v55 = vadd.s32 4294967169, %v723_v51  ;;  %v826_v60 = vshrl.u32 %v825_v56, 23  ;;  %v727_v62 = vor.u32 8388608, %v726_v52  ;;  %v3562_v12 = vand.u32 8388607, %v822_v1 }
 0x18e   : > { %v2835_v57 = vadd.s32 4294967169, %v517_v53  ;;  %v3544_v58 = vpop.f32.mrb[4].mxu0  ;;  %v521_v63 = vor.u32 8388608, %v520_v54 }
 0x18f   : > { %v729_v59 = vadd.s32 1, %v2843_v55  ;;  %v3546_v61 = vpop.f32.mrb[5].mxu0  ;;  %v2847_v2 = vadd.s32 4294967169, %v826_v60  ;;  %v3556_v10 = vshll.u32 %v727_v62, 8 }
 0x190   : > { %v523_v0 = vadd.s32 1, %v2835_v57  ;;  %v3549_v3 = vpop.f32.mrb[6].mxu0  ;;  %v3558_v11 = vshll.u32 %v521_v63, 8 }
 0x191   : > { %vm730_vm4 = vcmp.gt.s32.totalorder %v729_v59, 0  ;;  %v3551_v5 = vpop.f32.mrb[7].mxu0  ;;  %v3564_v13 = vadd.s32 1, %v2847_v2 }
 0x192   : > { %v731_v4 = vsel %vm730_vm4, %v729_v59, 0  ;;  %vm524_vm5 = vcmp.gt.s32.totalorder %v523_v0, 0 }
 0x193   : > { %v732_v6 = vshrl.u32 %v731_v4, 5  ;;  %v733_v7 = vand.u32 31, %v731_v4  ;;  %v525_v8 = vsel %vm524_vm5, %v523_v0, 0  ;;  %vm833_vm15 = vcmp.gt.s32.totalorder %v3564_v13, 0 }
 0x194   : > { %v3567_v17 = vshrl.u32 %v525_v8, 5  ;;  %v527_v18 = vand.u32 31, %v525_v8 }
 0x195   : > { %v734_v14 = vsub.s32 32, %v733_v7  ;;  %v736_v16 = vshll.u32 %v5341_v15, %v733_v7  ;;  %v739_v20 = vshll.u32 %v5335_v19, %v733_v7  ;;  %v742_v22 = vshll.u32 %v5331_v21, %v733_v7 }
 0x196   : > { %v745_v24 = vshll.u32 %v5333_v23, %v733_v7  ;;  %v748_v26 = vshll.u32 %v5339_v25, %v733_v7  ;;  %vm751_vm6 = vcmp.lt.s32.totalorder %v732_v6, 1  ;;  %vm752_vm7 = vcmp.lt.s32.totalorder %v732_v6, 2  ;;  %v3579_v42 = vpop.f32.mrb[8].mxu0 }
 0x197   : > { %v737_v27 = vshrl.u32 %v5335_v19, %v734_v14  ;;  %v740_v28 = vshrl.u32 %v5331_v21, %v734_v14  ;;  %v743_v29 = vshrl.u32 %v5333_v23, %v734_v14  ;;  %v735_v30 = vshrl.u32 %v5341_v15, %v734_v14 }
 0x198   : > { %v746_v31 = vshrl.u32 %v5339_v25, %v734_v14  ;;  %v749_v33 = vshrl.u32 %v5337_v32, %v734_v14  ;;  %v528_v37 = vsub.s32 32, %v527_v18  ;;  %vm753_vm8 = vcmp.lt.s32.totalorder %v732_v6, 3 }
 0x199   : > { %v738_v34 = vor.u32 %v737_v27, %v736_v16  ;;  %v741_v35 = vor.u32 %v740_v28, %v739_v20  ;;  %v744_v36 = vor.u32 %v743_v29, %v742_v22  ;;  %vm754_vm9 = vcmp.lt.s32.totalorder %v732_v6, 4 }
 0x19a   : > { %v747_v38 = vor.u32 %v746_v31, %v745_v24  ;;  %v750_v40 = vor.u32 %v749_v33, %v748_v26  ;;  %v530_v54 = vshll.u32 %v5341_v15, %v527_v18  ;;  %v531_v57 = vshrl.u32 %v5335_v19, %v528_v37 }
 0x19b   : > { %v755_v44 = vsel %vm751_vm6, %v735_v30, %v738_v34  ;;  %v756_v46 = vsel %vm754_vm9, %v744_v36, 2102212464  ;;  %v759_v47 = vsel %vm751_vm6, %v738_v34, %v741_v35  ;;  %v763_v49 = vsel %vm751_vm6, %v741_v35, %v744_v36 }
 0x19c   : > { %v757_v51 = vsel %vm753_vm8, %v741_v35, %v756_v46  ;;  %v760_v52 = vsel %vm754_vm9, %v747_v38, 920167782  ;;  %v764_v53 = vsel %vm754_vm9, %v750_v40, 1326507024  ;;  %v533_v59 = vshll.u32 %v5335_v19, %v527_v18 }
 0x19d   : > { %v761_v55 = vsel %vm753_vm8, %v744_v36, %v760_v52  ;;  %v765_v56 = vsel %vm753_vm8, %v747_v38, %v764_v53  ;;  %v758_v60 = vsel %vm752_vm7, %v755_v44, %v757_v51  ;;  %v534_v0 = vshrl.u32 %v5331_v21, %v528_v37 }
 0x19e   : > { %v762_v62 = vsel %vm752_vm7, %v759_v47, %v761_v55  ;;  %v766_v63 = vsel %vm752_vm7, %v763_v49, %v765_v56  ;;  %v532_v14 = vor.u32 %v531_v57, %v530_v54  ;;  %v536_v20 = vshll.u32 %v5331_v21, %v527_v18 }
 0x19f   : > { %v3592_v2 = vmul.u32.u64.low %v3556_v10, %v766_v63  ;;  %v3593_v4 = vmul.u32.u64.high %v3556_v10, %v766_v63, %v3592_v2  ;;  %v3596_v7 = vmul.u32.u64.low %v3556_v10, %v762_v62  ;;  %v3597_v8 = vmul.u32.u64.high %v3556_v10, %v762_v62, %v3596_v7  ;;  %v3632_v62 = vpop.f32.mrb[9].mxu0 }
 0x1a0   : > { %v535_v16 = vor.u32 %v534_v0, %v533_v59  ;;  %v537_v22 = vshrl.u32 %v5333_v23, %v528_v37  ;;  %v529_v6 = vshrl.u32 %v5341_v15, %v528_v37  ;;  %v539_v24 = vshll.u32 %v5333_v23, %v527_v18 }
 0x1a1   : > { %v540_v26 = vshrl.u32 %v5339_v25, %v528_v37  ;;  %v543_v27 = vshrl.u32 %v5337_v32, %v528_v37  ;;  %v774_v28 = vmul.u32 %v3556_v10, %v758_v60  ;;  %v542_v30 = vshll.u32 %v5339_v25, %v527_v18 }
 0x1a2   : > { %v538_v29 = vor.u32 %v537_v22, %v536_v20  ;;  %vm545_vm10 = vcmp.lt.s32.totalorder %v3567_v17, 1  ;;  %vm776_vm11 = vc.u32 %v3593_v4, %v3596_v7  ;;  %v777_v31 = vadd.s32 1, %v3597_v8 }
 0x1a3   : > { %v541_v33 = vor.u32 %v540_v26, %v539_v24  ;;  %vm546_vm12 = vcmp.lt.s32.totalorder %v3567_v17, 2  ;;  %v544_v34 = vor.u32 %v543_v27, %v542_v30  ;;  %vm547_vm13 = vcmp.lt.s32.totalorder %v3567_v17, 3 }
 0x1a4   : > { %vm548_vm14 = vcmp.lt.s32.totalorder %v3567_v17, 4  ;;  %v553_v35 = vsel %vm545_vm10, %v532_v14, %v535_v16  ;;  %v778_v10 = vsel %vm776_vm11, %v777_v31, %v3597_v8  ;;  %v557_v37 = vsel %vm545_vm10, %v535_v16, %v538_v29 }
 0x1a5   : > { %v550_v36 = vsel %vm548_vm14, %v538_v29, 2102212464  ;;  %v554_v18 = vsel %vm548_vm14, %v541_v33, 920167782  ;;  %v779_v38 = vadd.s32 %v778_v10, %v774_v28  ;;  %v549_v40 = vsel %vm545_vm10, %v529_v6, %v532_v14 }
 0x1a6   : > { %v555_v44 = vsel %vm547_vm13, %v538_v29, %v554_v18  ;;  %v558_v46 = vsel %vm548_vm14, %v544_v34, 1326507024  ;;  %v551_v47 = vsel %vm547_vm13, %v535_v16, %v550_v36  ;;  %v834_v59 = vsel %vm833_vm15, %v3564_v13, 0 }
 0x1a7   : > { %v556_v49 = vsel %vm546_vm12, %v553_v35, %v555_v44  ;;  %v559_v51 = vsel %vm547_vm13, %v541_v33, %v558_v46  ;;  %v780_v52 = vadd.s32 536870912, %v779_v38  ;;  %v619_v60 = vand.u32 2139095040, %v3554_v9 }
 0x1a8   : > { %v560_v53 = vsel %vm546_vm12, %v557_v37, %v559_v51  ;;  %v3622_v54 = vmul.u32.u64.low %v3558_v11, %v556_v49  ;;  %v3623_v55 = vmul.u32.u64.high %v3558_v11, %v556_v49, %v3622_v54  ;;  %v552_v0 = vsel %vm546_vm12, %v549_v40, %v551_v47 }
 0x1a9   : > { %v3627_v56 = vmul.u32.u64.low %v3558_v11, %v560_v53  ;;  %v3628_v57 = vmul.u32.u64.high %v3558_v11, %v560_v53, %v3627_v56  ;;  %v3634_v63 = vshrl.u32 %v780_v52, 30  ;;  %v830_v2 = vor.u32 8388608, %v3562_v12 }
 0x1aa   : > { %v836_v8 = vand.u32 31, %v834_v59  ;;  %v571_v16 = vadd.s32 1, %v3623_v55  ;;  %v568_v22 = vmul.u32 %v3558_v11, %v552_v0  ;;  %v620_v13 = vshrl.u32 %v619_v60, 23 }
 0x1ab   : > { %v782_v14 = vshll.u32 %v3634_v63, 30  ;;  %vm570_vm1 = vc.u32 %v3628_v57, %v3622_v54  ;;  %v3647_v17 = vshll.u32 %v830_v2, 8  ;;  %v835_v12 = vshrl.u32 %v834_v59, 5 }
 0x1ac   : > { %v837_v20 = vsub.s32 32, %v836_v8  ;;  %v572_v24 = vsel %vm570_vm1, %v571_v16, %v3623_v55  ;;  %v839_v11 = vshll.u32 %v5341_v15, %v836_v8  ;;  %v842_v30 = vshll.u32 %v5335_v19, %v836_v8 }
 0x1ad   : > { %v3644_v6 = vsub.s32 %v779_v38, %v782_v14  ;;  %v573_v26 = vadd.s32 %v572_v24, %v568_v22  ;;  %v775_v33 = vadd.s32 %v3596_v7, %v3593_v4  ;;  %v845_v35 = vshll.u32 %v5331_v21, %v836_v8 }
 0x1ae   : > { %v840_v27 = vshrl.u32 %v5335_v19, %v837_v20  ;;  %v843_v28 = vshrl.u32 %v5331_v21, %v837_v20  ;;  %v846_v31 = vshrl.u32 %v5333_v23, %v837_v20  ;;  %v2839_v10 = vadd.s32 4294967169, %v620_v13 }
 0x1af   : > { %v785_v29 = vsub.s32 0, %v3644_v6  ;;  %v574_v34 = vadd.s32 536870912, %v573_v26  ;;  %v838_v18 = vshrl.u32 %v5341_v15, %v837_v20  ;;  %v848_v46 = vshll.u32 %v5333_v23, %v836_v8 }
 0x1b0   : > { %v841_v37 = vor.u32 %v840_v27, %v839_v11  ;;  %v844_v38 = vor.u32 %v843_v28, %v842_v30  ;;  %v847_v44 = vor.u32 %v846_v31, %v845_v35  ;;  %v849_v47 = vshrl.u32 %v5339_v25, %v837_v20 }
 0x1b1   : > { %v2844_v36 = vmin.u32 %v785_v29, %v3644_v6  ;;  %v3660_v40 = vshrl.u32 %v574_v34, 30  ;;  %v851_v4 = vshll.u32 %v5339_v25, %v836_v8  ;;  %v852_v7 = vshrl.u32 %v5337_v32, %v837_v20 }
 0x1b2   : > { %vm854_vm2 = vcmp.lt.s32.totalorder %v835_v12, 1  ;;  %v850_v52 = vor.u32 %v849_v47, %v848_v46  ;;  %vm855_vm4 = vcmp.lt.s32.totalorder %v835_v12, 2  ;;  %vm857_vm5 = vcmp.lt.s32.totalorder %v835_v12, 4 }
 0x1b3   : > { %v787_v49 = vclz %v2844_v36  ;;  %v576_v51 = vshll.u32 %v3660_v40, 30  ;;  %v853_v55 = vor.u32 %v852_v7, %v851_v4  ;;  %vm856_vm6 = vcmp.lt.s32.totalorder %v835_v12, 3 }
 0x1b4   : > { %v859_v56 = vsel %vm857_vm5, %v847_v44, 2102212464  ;;  %v858_v60 = vsel %vm854_vm2, %v838_v18, %v841_v37  ;;  %v862_v0 = vsel %vm854_vm2, %v841_v37, %v844_v38  ;;  %v863_v2 = vsel %vm857_vm5, %v850_v52, 920167782 }
 0x1b5   : > { %v2845_v53 = vadd.s32 4294967294, %v787_v49  ;;  %v3668_v59 = vsub.s32 %v573_v26, %v576_v51  ;;  %v860_v8 = vsel %vm856_vm6, %v844_v38, %v859_v56  ;;  %v864_v14 = vsel %vm856_vm6, %v847_v44, %v863_v2 }
 0x1b6   : > { %v866_v16 = vsel %vm854_vm2, %v844_v38, %v847_v44  ;;  %v865_v13 = vsel %vm855_vm4, %v862_v0, %v864_v14  ;;  %v867_v24 = vsel %vm857_vm5, %v853_v55, 1326507024  ;;  %v616_v44 = vand.u32 2147483647, %v3554_v9 }
 0x1b7   : > { %vm2846_vm7 = vcmp.lt.s32.totalorder %v2845_v53, 0  ;;  %v579_v22 = vsub.s32 0, %v3668_v59  ;;  %v868_v29 = vsel %vm856_vm6, %v850_v52, %v867_v24  ;;  %v626_v46 = vadd.s32 1, %v2839_v10 }
 0x1b8   : > { %v790_v20 = vsel %vm2846_vm7, 0, %v2845_v53  ;;  %v869_v30 = vsel %vm855_vm4, %v866_v16, %v868_v29  ;;  %v3684_v31 = vmul.u32.u64.low %v3647_v17, %v865_v13  ;;  %v3685_v34 = vmul.u32.u64.high %v3647_v17, %v865_v13, %v3684_v31 }
 0x1b9   : > { %v791_v26 = vsub.s32 32, %v790_v20  ;;  %v792_v27 = vshll.u32 %v3644_v6, %v790_v20  ;;  %v795_v28 = vsub.s32 4294967266, %v790_v20  ;;  %v2836_v11 = vmin.u32 %v579_v22, %v3668_v59  ;;  %v2543_v22 = vld [vmem:[#allocation2] sm:$0xf] }
 0x1ba   : > { %v3689_v18 = vmul.u32.u64.low %v3647_v17, %v869_v30  ;;  %v3690_v37 = vmul.u32.u64.high %v3647_v17, %v869_v30, %v3689_v18  ;;  %v861_v6 = vsel %vm855_vm4, %v858_v60, %v860_v8  ;;  %v805_v4 = vsub.s32 4, %v3634_v63 }
 0x1bb   : > { %v793_v35 = vshrl.u32 %v775_v33, %v791_v26  ;;  %v796_v36 = vadd.s32 127, %v795_v28  ;;  %v581_v38 = vclz %v2836_v11  ;;  %v880_v51 = vadd.s32 1, %v3685_v34  ;;  %v3696_v33 = vpop.f32.mrb[10].mxu0 }
 0x1bc   : > { %vm627_vm8 = vcmp.gt.s32.totalorder %v626_v46, 0  ;;  %vm721_vm9 = vcmp.lt.s32.totalorder %v3527_v41, 0  ;;  %v877_v53 = vmul.u32 %v3647_v17, %v861_v6  ;;  %vm879_vm10 = vc.u32 %v3690_v37, %v3684_v31 }
 0x1bd   : > { %v794_v47 = vor.u32 %v793_v35, %v792_v27  ;;  %v797_v49 = vshll.u32 %v796_v36, 23  ;;  %v2837_v7 = vadd.s32 4294967294, %v581_v38  ;;  %v881_v12 = vsel %vm879_vm10, %v880_v51, %v3685_v34 }
 0x1be   : > { %v623_v10 = vand.u32 8388607, %v616_v44  ;;  %v628_v55 = vsel %vm627_vm8, %v626_v46, 0  ;;  %v806_v0 = vsel %vm721_vm9, %v805_v4, %v3634_v63  ;;  %v882_v2 = vadd.s32 %v881_v12, %v877_v53 }
 0x1bf   : > { %v798_v52 = vor.u32 4788187, %v797_v49  ;;  %vm2838_vm11 = vcmp.lt.s32.totalorder %v2837_v7, 0  ;;  %v801_v60 = vcvt.s32.f32 %v794_v47  ;;  %v630_v8 = vand.u32 31, %v628_v55 }
 0x1c0   : > { %vm3710_vm12 = vcmp.le.f32.partialorder %v719_v45, 0.7853982  ;;  %v584_v16 = vsel %vm2838_vm11, 0, %v2837_v7  ;;  %v883_v20 = vadd.s32 536870912, %v882_v2  ;;  %v624_v24 = vor.u32 8388608, %v623_v10 }
 0x1c1   : > { %v799_v56 = vand.u32 2147483647, %v798_v52  ;;  %v808_v13 = vsel %vm3710_vm12, 0, %v806_v0  ;;  %v631_v63 = vsub.s32 32, %v630_v8  ;;  %v589_v28 = vsub.s32 4294967266, %v584_v16 }
 0x1c2   : > { %v3716_v27 = vshrl.u32 %v883_v20, 30  ;;  %v3720_v29 = vadd.f32 %v3544_v58, %v3524_v39  ;;  %v3723_v45 = vsel %vm412_vm3, %v2543_v22, 0  ;;  %v3727_v30 = vand.u32 3, %v808_v13 }
 0x1c3   : > { %v802_v14 = vmul.f32 %v801_v60, %v799_v56  ;;  %5402 = vst [vmem:[#allocation10_spill] sm:$0xff] %v3723_v45  ;;  %v569_v34 = vadd.s32 %v3622_v54, %v3628_v57  ;;  %v3735_v18 = vshrl.u32 %v628_v55, 5  ;;  %v3737_v58 = vshll.u32 %v624_v24, 8 }
 0x1c4   : > { %5401 = vst [vmem:[#allocation9_spill] sm:$0xff] %v3720_v29  ;;  %v885_v35 = vshll.u32 %v3716_v27, 30  ;;  %v1131_v38 = vand.u32 2147483647, %v3720_v29  ;;  %v585_v6 = vsub.s32 32, %v584_v16  ;;  %v637_v47 = vshrl.u32 %v5331_v21, %v631_v63 }
 0x1c5   : > { %v803_v26 = vxor.u32 2147483648, %v802_v14  ;;  %v590_v54 = vadd.s32 127, %v589_v28  ;;  %v634_v57 = vshrl.u32 %v5335_v19, %v631_v63  ;;  %v640_v49 = vshrl.u32 %v5333_v23, %v631_v63 }
 0x1c6   : > { %v3740_v46 = vsub.s32 %v882_v2, %v885_v35  ;;  %v636_v7 = vshll.u32 %v5335_v19, %v630_v8  ;;  %v639_v51 = vshll.u32 %v5331_v21, %v630_v8  ;;  %v643_v52 = vshrl.u32 %v5339_v25, %v631_v63 }
 0x1c7   : > { %v804_v11 = vsel %vm721_vm9, %v803_v26, %v802_v14  ;;  %v633_v53 = vshll.u32 %v5341_v15, %v630_v8  ;;  %v642_v12 = vshll.u32 %v5333_v23, %v630_v8  ;;  %v645_v10 = vshll.u32 %v5339_v25, %v630_v8 }
 0x1c8   : > { %v807_v36 = vsel %vm3710_vm12, %v3527_v41, %v804_v11  ;;  %v888_v4 = vsub.s32 0, %v3740_v46  ;;  %v646_v55 = vshrl.u32 %v5337_v32, %v631_v63  ;;  %vm817_vm3 = vcmp.eq.s32.totalorder %v3727_v30, 2 }
 0x1c9   : > { %3209 = vcosq.f32 %v807_v36  ;;  %v587_v56 = vshrl.u32 %v569_v34, %v585_v6  ;;  %v638_v0 = vor.u32 %v637_v47, %v636_v7  ;;  %v641_v2 = vor.u32 %v640_v49, %v639_v51 }
 0x1ca   : > { %3211 = vsinq.f32 %v807_v36  ;;  %v2848_v60 = vmin.u32 %v888_v4, %v3740_v46  ;;  %vm814_vm13 = vcmp.eq.s32.totalorder %v3727_v30, 0  ;;  %v635_v17 = vor.u32 %v634_v57, %v633_v53  ;;  %v3779_v36 = vpop.f32.mrb[11].mxu0 }
 0x1cb   : > { %v644_v14 = vor.u32 %v643_v52, %v642_v12  ;;  %v647_v20 = vor.u32 %v646_v55, %v645_v10  ;;  %v1134_v22 = vand.u32 2139095040, %v3720_v29  ;;  %vm813_vm14 = vcmp.lt.s32.totalorder %v3727_v30, 2 }
 0x1cc   : > { %v586_v8 = vshll.u32 %v3668_v59, %v584_v16  ;;  %v591_v13 = vshll.u32 %v590_v54, 23  ;;  %v890_v24 = vclz %v2848_v60  ;;  %vm651_vm15 = vcmp.lt.s32.totalorder %v3735_v18, 4 }
 0x1cd   : > { %vm811_vm1 = vweird.f32 %v3527_v41  ;;  %v878_v26 = vadd.s32 %v3684_v31, %v3690_v37  ;;  %vm648_vm2 = vcmp.lt.s32.totalorder %v3735_v18, 1  ;;  %vm649_vm4 = vcmp.lt.s32.totalorder %v3735_v18, 2 }
 0x1ce   : > { %v657_v28 = vsel %vm651_vm15, %v644_v14, 920167782  ;;  %v3767_v11 = vor.u32 %v587_v56, %v586_v8  ;;  %v2849_v34 = vadd.s32 4294967294, %v890_v24  ;;  %vm650_vm5 = vcmp.lt.s32.totalorder %v3735_v18, 3 }
 0x1cf   : > { %v660_v59 = vsel %vm648_vm2, %v638_v0, %v641_v2  ;;  %v632_v16 = vshrl.u32 %v5341_v15, %v631_v63  ;;  %v656_v31 = vsel %vm648_vm2, %v635_v17, %v638_v0  ;;  %v658_v37 = vsel %vm650_vm5, %v641_v2, %v657_v28 }
 0x1d0   : > { %v661_v35 = vsel %vm651_vm15, %v647_v20, 1326507024  ;;  %v3781_v47 = vor.u32 4788187, %v591_v13  ;;  %vm2850_vm6 = vcmp.lt.s32.totalorder %v2849_v34, 0  ;;  %v1135_v51 = vshrl.u32 %v1134_v22, 23 }
 0x1d1   : > { %v653_v54 = vsel %vm651_vm15, %v641_v2, 2102212464  ;;  %v662_v63 = vsel %vm650_vm5, %v644_v14, %v661_v35  ;;  %v893_v4 = vsel %vm2850_vm6, 0, %v2849_v34  ;;  %v659_v10 = vsel %vm649_vm4, %v656_v31, %v658_v37 }
 0x1d2   : > { %v663_v7 = vsel %vm649_vm4, %v660_v59, %v662_v63  ;;  %v894_v53 = vsub.s32 32, %v893_v4  ;;  %v898_v12 = vsub.s32 4294967266, %v893_v4  ;;  %v2859_v2 = vadd.s32 4294967169, %v1135_v51 }
 0x1d3   : > { %v3210_v6 = vpop.eup %3209  ;;  %v3794_v56 = vmul.u32.u64.low %v3737_v58, %v663_v7  ;;  %v3795_v60 = vmul.u32.u64.high %v3737_v58, %v663_v7, %v3794_v56  ;;  %v652_v22 = vsel %vm648_vm2, %v632_v16, %v635_v17  ;;  %v654_v8 = vsel %vm650_vm5, %v638_v0, %v653_v54 }
 0x1d4   : > { %v3212_v57 = vpop.eup %3211  ;;  %v818_v49 = vxor.u32 2147483648, %v3210_v6  ;;  %v899_v20 = vadd.s32 127, %v898_v12  ;;  %v3806_v24 = vmul.u32.u64.low %v3737_v58, %v659_v10  ;;  %v3807_v28 = vmul.u32.u64.high %v3737_v58, %v659_v10, %v3806_v24 }
 0x1d5   : > { %v815_v52 = vxor.u32 2147483648, %v3212_v57  ;;  %v1141_v34 = vadd.s32 1, %v2859_v2  ;;  %v896_v31 = vshrl.u32 %v878_v26, %v894_v53  ;;  %v1138_v17 = vand.u32 8388607, %v1131_v38 }
 0x1d6   : > { %v819_v55 = vsel %vm817_vm3, %v818_v49, %v3212_v57  ;;  %v900_v37 = vshll.u32 %v899_v20, 23  ;;  %v908_v0 = vsub.s32 4, %v3716_v27  ;;  %v655_v30 = vsel %vm649_vm4, %v652_v22, %v654_v8 }
 0x1d7   : > { %v816_v14 = vsel %vm814_vm13, %v3210_v6, %v815_v52  ;;  %vm1142_vm7 = vcmp.gt.s32.totalorder %v1141_v34, 0  ;;  %v3821_v16 = vadd.f32 %v3524_v39, %v3546_v61  ;;  %v595_v35 = vcvt.s32.f32 %v3767_v11 }
 0x1d8   : > { %v820_v13 = vsel %vm813_vm14, %v816_v14, %v819_v55  ;;  %v895_v41 = vshll.u32 %v3740_v46, %v893_v4  ;;  %vm673_vm8 = vc.u32 %v3795_v60, %v3806_v24  ;;  %v1143_v26 = vsel %vm1142_vm7, %v1141_v34, 0 }
 0x1d9   : > { %v3812_v59 = vsel %vm811_vm1, nan, %v820_v13  ;;  %v593_v6 = vand.u32 2147483647, %v3781_v47  ;;  %v901_v54 = vor.u32 4788187, %v900_v37  ;;  %v674_v63 = vadd.s32 1, %v3807_v28 }
 0x1da   : > { %5403 = vst [vmem:[#allocation11_spill] sm:$0xff] %v3812_v59  ;;  %v1145_v18 = vand.u32 31, %v1143_v26  ;;  %v897_v57 = vor.u32 %v896_v31, %v895_v41  ;;  %v671_v49 = vmul.u32 %v3737_v58, %v655_v30  ;;  %v1139_v7 = vor.u32 8388608, %v1138_v17 }
 0x1db   : > { %v5327_v61 = vand.u32 2147483647, %v3821_v16  ;;  %v675_v11 = vsel %vm673_vm8, %v674_v63, %v3807_v28  ;;  %v1144_v53 = vshrl.u32 %v1143_v26, 5  ;;  %v902_v10 = vand.u32 2147483647, %v901_v54 }
 0x1dc   : > { %v1146_v51 = vsub.s32 32, %v1145_v18  ;;  %v1148_v46 = vshll.u32 %v5341_v15, %v1145_v18  ;;  %v1151_v4 = vshll.u32 %v5335_v19, %v1145_v18  ;;  %v676_v52 = vadd.s32 %v675_v11, %v671_v49 }
 0x1dd   : > { %v1154_v47 = vshll.u32 %v5331_v21, %v1145_v18  ;;  %v1157_v12 = vshll.u32 %v5333_v23, %v1145_v18  ;;  %v904_v2 = vcvt.s32.f32 %v897_v57  ;;  %v1160_v22 = vshll.u32 %v5339_v25, %v1145_v18 }
 0x1de   : > { %v1149_v55 = vshrl.u32 %v5335_v19, %v1146_v51  ;;  %v1152_v58 = vshrl.u32 %v5331_v21, %v1146_v51  ;;  %v1155_v56 = vshrl.u32 %v5333_v23, %v1146_v51  ;;  %v677_v14 = vadd.s32 536870912, %v676_v52 }
 0x1df   : > { %v1158_v20 = vshrl.u32 %v5339_v25, %v1146_v51  ;;  %v1147_v8 = vshrl.u32 %v5341_v15, %v1146_v51  ;;  %v1161_v34 = vshrl.u32 %v5337_v32, %v1146_v51  ;;  %vm1163_vm9 = vcmp.lt.s32.totalorder %v1144_v53, 1 }
 0x1e0   : > { %v1150_v13 = vor.u32 %v1149_v55, %v1148_v46  ;;  %v1153_v28 = vor.u32 %v1152_v58, %v1151_v4  ;;  %v3843_v31 = vshrl.u32 %v677_v14, 30  ;;  %v1156_v37 = vor.u32 %v1155_v56, %v1154_v47 }
 0x1e1   : > { %v1159_v17 = vor.u32 %v1158_v20, %v1157_v12  ;;  %v905_v30 = vmul.f32 %v904_v2, %v902_v10  ;;  %v1162_v41 = vor.u32 %v1161_v34, %v1160_v22  ;;  %vm1165_vm10 = vcmp.lt.s32.totalorder %v1144_v53, 3 }
 0x1e2   : > { %v928_v26 = vand.u32 2139095040, %v3821_v16  ;;  %v679_v54 = vshll.u32 %v3843_v31, 30  ;;  %vm1164_vm11 = vcmp.lt.s32.totalorder %v1144_v53, 2  ;;  %vm1166_vm12 = vcmp.lt.s32.totalorder %v1144_v53, 4 }
 0x1e3   : > { %v1179_v63 = vshll.u32 %v1139_v7, 8  ;;  %v1167_v18 = vsel %vm1163_vm9, %v1147_v8, %v1150_v13  ;;  %v1168_v57 = vsel %vm1166_vm12, %v1156_v37, 2102212464  ;;  %v1171_v49 = vsel %vm1163_vm9, %v1150_v13, %v1153_v28  ;;  %v3863_v13 = vpop.f32.mrb[12].mxu0 }
 0x1e4   : > { %v1172_v11 = vsel %vm1166_vm12, %v1159_v17, 920167782  ;;  %v3849_v51 = vsub.s32 %v676_v52, %v679_v54  ;;  %v1169_v46 = vsel %vm1165_vm10, %v1153_v28, %v1168_v57  ;;  %v1175_v47 = vsel %vm1163_vm9, %v1153_v28, %v1156_v37 }
 0x1e5   : > { %v1173_v4 = vsel %vm1165_vm10, %v1156_v37, %v1172_v11  ;;  %v906_v12 = vxor.u32 2147483648, %v905_v30  ;;  %v1176_v55 = vsel %vm1166_vm12, %v1162_v41, 1326507024  ;;  %v929_v58 = vshrl.u32 %v928_v26, 23 }
 0x1e6   : > { %v1174_v10 = vsel %vm1164_vm11, %v1171_v49, %v1173_v4  ;;  %v682_v7 = vsub.s32 0, %v3849_v51  ;;  %v1177_v56 = vsel %vm1165_vm10, %v1159_v17, %v1176_v55  ;;  %v596_v52 = vmul.f32 %v595_v35, %v593_v6 }
 0x1e7   : > { %v3857_v2 = vmul.u32.u64.low %v1179_v63, %v1174_v10  ;;  %v3858_v14 = vmul.u32.u64.high %v1179_v63, %v1174_v10, %v3857_v2  ;;  %v1170_v20 = vsel %vm1164_vm11, %v1167_v18, %v1169_v46  ;;  %v1178_v22 = vsel %vm1164_vm11, %v1175_v47, %v1177_v56 }
 0x1e8   : > { %v2851_v8 = vadd.s32 4294967169, %v929_v58  ;;  %vm824_vm3 = vcmp.lt.s32.totalorder %v3537_v50, 0  ;;  %v2840_v28 = vmin.u32 %v682_v7, %v3849_v51  ;;  %v932_v35 = vand.u32 8388607, %v5327_v61 }
 0x1e9   : > { %v3867_v34 = vmul.u32.u64.low %v1179_v63, %v1178_v22  ;;  %v3868_v37 = vmul.u32.u64.high %v1179_v63, %v1178_v22, %v3867_v34  ;;  %v909_v17 = vsel %vm824_vm3, %v908_v0, %v3716_v27  ;;  %v3877_v53 = vadd.f32 %v3549_v3, %v3524_v39 }
 0x1ea   : > { %v935_v6 = vadd.s32 1, %v2851_v8  ;;  %v907_v41 = vsel %vm824_vm3, %v906_v12, %v905_v30  ;;  %v684_v26 = vclz %v2840_v28  ;;  %v1186_v54 = vmul.u32 %v1179_v63, %v1170_v20 }
 0x1eb   : > { %v1189_v18 = vadd.s32 1, %v3858_v14  ;;  %vm515_vm13 = vcmp.lt.s32.totalorder %v3530_v43, 0  ;;  %v597_v57 = vxor.u32 2147483648, %v596_v52  ;;  %vm823_vm14 = vcmp.le.f32.partialorder %v822_v1, 0.7853982 }
 0x1ec   : > { %vm936_vm15 = vcmp.gt.s32.totalorder %v935_v6, 0  ;;  %v911_v27 = vsel %vm823_vm14, 0, %v909_v17  ;;  %v2841_v0 = vadd.s32 4294967294, %v684_v26  ;;  %vm1188_vm1 = vc.u32 %v3868_v37, %v3857_v2 }
 0x1ed   : > { %v937_v49 = vsel %vm936_vm15, %v935_v6, 0  ;;  %v910_v3 = vsel %vm823_vm14, %v3537_v50, %v907_v41  ;;  %v1190_v30 = vsel %vm1188_vm1, %v1189_v18, %v3858_v14  ;;  %v933_v63 = vor.u32 8388608, %v932_v35 }
 0x1ee   : > { %v939_v11 = vand.u32 31, %v937_v49  ;;  %vm2842_vm2 = vcmp.lt.s32.totalorder %v2841_v0, 0  ;;  %v1191_v46 = vadd.s32 %v1190_v30, %v1186_v54  ;;  %v5328_v4 = vand.u32 2147483647, %v3877_v53 }
 0x1ef   : > { %v1237_v47 = vand.u32 2139095040, %v3877_v53  ;;  %v3891_v1 = vsel %vm515_vm13, %v597_v57, %v596_v52  ;;  %v3893_v12 = vand.u32 3, %v911_v27  ;;  %v3895_v10 = vsel %vm2842_vm2, 0, %v2841_v0 }
 0x1f0   : > { %v940_v55 = vsub.s32 32, %v939_v11  ;;  %3213 = vcosq.f32 %v910_v3  ;;  %v672_v58 = vadd.s32 %v3806_v24, %v3795_v60  ;;  %v692_v7 = vsub.s32 4294967266, %v3895_v10 }
 0x1f1   : > { %v942_v56 = vshll.u32 %v5341_v15, %v939_v11  ;;  %3215 = vsinq.f32 %v910_v3  ;;  %v1192_v14 = vadd.s32 536870912, %v1191_v46  ;;  %v3902_v22 = vshll.u32 %v933_v63, 8 }
 0x1f2   : > { %v943_v20 = vshrl.u32 %v5335_v19, %v940_v55  ;;  %v938_v52 = vshrl.u32 %v937_v49, 5  ;;  %v945_v8 = vshll.u32 %v5335_v19, %v939_v11  ;;  %v1238_v28 = vshrl.u32 %v1237_v47, 23 }
 0x1f3   : > { %v3907_v34 = vand.u32 8388607, %v5328_v4  ;;  %v693_v17 = vadd.s32 127, %v692_v7  ;;  %v3909_v60 = vshrl.u32 %v1192_v14, 30  ;;  %v946_v24 = vshrl.u32 %v5331_v21, %v940_v55  ;;  %v3923_v14 = vpop.f32.mrb[13].mxu0 }
 0x1f4   : > { %v948_v35 = vshll.u32 %v5331_v21, %v939_v11  ;;  %v941_v6 = vshrl.u32 %v5341_v15, %v940_v55  ;;  %v944_v41 = vor.u32 %v943_v20, %v942_v56  ;;  %v949_v26 = vshrl.u32 %v5333_v23, %v940_v55 }
 0x1f5   : > { %5404 = vst [vmem:[#allocation12_spill] sm:$0xff] %v3909_v60  ;;  %v951_v54 = vshll.u32 %v5333_v23, %v939_v11  ;;  %v1194_v18 = vshll.u32 %v3909_v60, 30  ;;  %v947_v57 = vor.u32 %v946_v24, %v945_v8  ;;  %v952_v27 = vshrl.u32 %v5339_v25, %v940_v55 }
 0x1f6   : > { %v954_v0 = vshll.u32 %v5339_v25, %v939_v11  ;;  %v688_v49 = vsub.s32 32, %v3895_v10  ;;  %v950_v3 = vor.u32 %v949_v26, %v948_v35  ;;  %v955_v30 = vshrl.u32 %v5337_v32, %v940_v55 }
 0x1f7   : > { %v2863_v63 = vadd.s32 4294967169, %v1238_v28  ;;  %v694_v47 = vshll.u32 %v693_v17, 23  ;;  %v3921_v7 = vsub.s32 %v1191_v46, %v1194_v18  ;;  %v953_v56 = vor.u32 %v952_v27, %v951_v54 }
 0x1f8   : > { %vm957_vm4 = vcmp.lt.s32.totalorder %v938_v52, 1  ;;  %v956_v20 = vor.u32 %v955_v30, %v954_v0  ;;  %vm958_vm5 = vcmp.lt.s32.totalorder %v938_v52, 2  ;;  %vm959_vm6 = vcmp.lt.s32.totalorder %v938_v52, 3 }
 0x1f9   : > { %vm960_vm7 = vcmp.lt.s32.totalorder %v938_v52, 4  ;;  %v1197_v8 = vsub.s32 0, %v3921_v7  ;;  %v961_v11 = vsel %vm957_vm4, %v941_v6, %v944_v41  ;;  %v965_v55 = vsel %vm957_vm4, %v944_v41, %v947_v57 }
 0x1fa   : > { %v962_v24 = vsel %vm960_vm7, %v950_v3, 2102212464  ;;  %v3214_v28 = vpop.eup %3213  ;;  %vm917_vm8 = vcmp.eq.s32.totalorder %v3893_v12, 0  ;;  %vm920_vm9 = vcmp.eq.s32.totalorder %v3893_v12, 2  ;;  %v690_v46 = vshrl.u32 %v672_v58, %v688_v49 }
 0x1fb   : > { %v963_v17 = vsel %vm959_vm6, %v947_v57, %v962_v24  ;;  %v966_v35 = vsel %vm960_vm7, %v953_v56, 920167782  ;;  %v969_v26 = vsel %vm957_vm4, %v947_v57, %v950_v3  ;;  %v3216_v54 = vpop.eup %3215  ;;  %v689_v6 = vshll.u32 %v3849_v51, %v3895_v10 }
 0x1fc   : > { %v2860_v18 = vmin.u32 %v1197_v8, %v3921_v7  ;;  %v967_v41 = vsel %vm959_vm6, %v950_v3, %v966_v35  ;;  %v970_v27 = vsel %vm960_vm7, %v956_v20, 1326507024  ;;  %v695_v0 = vor.u32 4788187, %v694_v47 }
 0x1fd   : > { %v964_v30 = vsel %vm958_vm5, %v961_v11, %v963_v17  ;;  %v968_v58 = vsel %vm958_vm5, %v965_v55, %v967_v41  ;;  %v971_v49 = vsel %vm959_vm6, %v953_v56, %v970_v27  ;;  %v691_v51 = vor.u32 %v690_v46, %v689_v6 }
 0x1fe   : > { %v1199_v24 = vclz %v2860_v18  ;;  %v972_v57 = vsel %vm958_vm5, %v969_v26, %v971_v49  ;;  %v3944_v61 = vmul.u32.u64.low %v3902_v22, %v968_v58  ;;  %v3945_v4 = vmul.u32.u64.high %v3902_v22, %v968_v58, %v3944_v61 }
 0x1ff   : > { %v3949_v10 = vmul.u32.u64.low %v3902_v22, %v972_v57  ;;  %v3950_v3 = vmul.u32.u64.high %v3902_v22, %v972_v57, %v3949_v10  ;;  %v3954_v47 = vadd.f32 %v3524_v39, %v3551_v5  ;;  %v918_v20 = vxor.u32 2147483648, %v3216_v54 }
 0x200   : > { %v921_v8 = vxor.u32 2147483648, %v3214_v28  ;;  %v2861_v56 = vadd.s32 4294967294, %v1199_v24  ;;  %v1244_v11 = vadd.s32 1, %v2863_v63  ;;  %v696_v52 = vand.u32 2147483647, %v695_v0 }
 0x201   : > { %v1187_v55 = vadd.s32 %v3857_v2, %v3868_v37  ;;  %v980_v17 = vmul.u32 %v3902_v22, %v964_v30  ;;  %v5329_v46 = vand.u32 2147483647, %v3954_v47  ;;  %v983_v35 = vadd.s32 1, %v3945_v4 }
 0x202   : > { %vm2862_vm10 = vcmp.lt.s32.totalorder %v2861_v56, 0  ;;  %v1242_v26 = vor.u32 8388608, %v3907_v34  ;;  %vm1245_vm11 = vcmp.gt.s32.totalorder %v1244_v11, 0  ;;  %v698_v39 = vcvt.s32.f32 %v691_v51 }
 0x203   : > { %v1202_v5 = vsel %vm2862_vm10, 0, %v2861_v56  ;;  %vm982_vm12 = vc.u32 %v3950_v3, %v3944_v61  ;;  %v1246_v63 = vsel %vm1245_vm11, %v1244_v11, 0  ;;  %v3966_v6 = vsel %vm917_vm8, %v3214_v28, %v918_v20 }
 0x204   : > { %v3970_v2 = vsel %vm920_vm9, %v921_v8, %v3216_v54  ;;  %v1207_v37 = vsub.s32 4294967266, %v1202_v5  ;;  %v984_v22 = vsel %vm982_vm12, %v983_v35, %v3945_v4  ;;  %v3973_v18 = vmul.f32 %v698_v39, %v696_v52 }
 0x205   : > { %v1203_v34 = vsub.s32 32, %v1202_v5  ;;  %v985_v41 = vadd.s32 %v984_v22, %v980_v17  ;;  %v1248_v27 = vand.u32 31, %v1246_v63  ;;  %v1204_v0 = vshll.u32 %v3921_v7, %v1202_v5 }
 0x206   : > { %v1208_v30 = vadd.s32 127, %v1207_v37  ;;  %v3976_v58 = vshll.u32 %v1242_v26, 8  ;;  %v1031_v28 = vand.u32 2139095040, %v3954_v47  ;;  %v1247_v4 = vshrl.u32 %v1246_v63, 5 }
 0x207   : > { %v986_v49 = vadd.s32 536870912, %v985_v41  ;;  %v1249_v24 = vsub.s32 32, %v1248_v27  ;;  %v1251_v54 = vshll.u32 %v5341_v15, %v1248_v27  ;;  %v1254_v57 = vshll.u32 %v5335_v19, %v1248_v27 }
 0x208   : > { %v1209_v51 = vshll.u32 %v1208_v30, 23  ;;  %v1257_v10 = vshll.u32 %v5331_v21, %v1248_v27  ;;  %v1260_v20 = vshll.u32 %v5333_v23, %v1248_v27  ;;  %v1205_v8 = vshrl.u32 %v1187_v55, %v1203_v34 }
 0x209   : > { %v3983_v56 = vshrl.u32 %v986_v49, 30  ;;  %v1252_v7 = vshrl.u32 %v5335_v19, %v1249_v24  ;;  %v1255_v11 = vshrl.u32 %v5331_v21, %v1249_v24  ;;  %v1258_v17 = vshrl.u32 %v5333_v23, %v1249_v24 }
 0x20a   : > { %v1210_v52 = vor.u32 4788187, %v1209_v51  ;;  %v1261_v35 = vshrl.u32 %v5339_v25, %v1249_v24  ;;  %v1032_v26 = vshrl.u32 %v1031_v28, 23  ;;  %v1263_v37 = vshll.u32 %v5339_v25, %v1248_v27 }
 0x20b   : > { %5405 = vst [vmem:[#allocation13_spill] sm:$0xff] %v3983_v56  ;;  %v988_v39 = vshll.u32 %v3983_v56, 30  ;;  %v1253_v5 = vor.u32 %v1252_v7, %v1251_v54  ;;  %v1256_v63 = vor.u32 %v1255_v11, %v1254_v57  ;;  %v1250_v55 = vshrl.u32 %v5341_v15, %v1249_v24 }
 0x20c   : > { %v1259_v22 = vor.u32 %v1258_v17, %v1257_v10  ;;  %v1262_v34 = vor.u32 %v1261_v35, %v1260_v20  ;;  %v1264_v30 = vshrl.u32 %v5337_v32, %v1249_v24  ;;  %vm3995_vm3 = vcmp.le.f32.partialorder %v513_v48, 0.7853982 }
 0x20d   : > { %v1206_v51 = vor.u32 %v1205_v8, %v1204_v0  ;;  %v3999_v28 = vsub.s32 %v985_v41, %v988_v39  ;;  %vm1266_vm14 = vcmp.lt.s32.totalorder %v1247_v4, 1  ;;  %vm1268_vm15 = vcmp.lt.s32.totalorder %v1247_v4, 3  ;;  %v4004_v0 = vpop.f32.mrb[14].mxu0 }
 0x20e   : > { %v1211_v54 = vand.u32 2147483647, %v1210_v52  ;;  %v1265_v57 = vor.u32 %v1264_v30, %v1263_v37  ;;  %vm1267_vm1 = vcmp.lt.s32.totalorder %v1247_v4, 2  ;;  %vm1269_vm2 = vcmp.lt.s32.totalorder %v1247_v4, 4 }
 0x20f   : > { %v991_v27 = vsub.s32 0, %v3999_v28  ;;  %v1271_v10 = vsel %vm1269_vm2, %v1259_v22, 2102212464  ;;  %v1274_v20 = vsel %vm1266_vm14, %v1253_v5, %v1256_v63  ;;  %v1275_v24 = vsel %vm1269_vm2, %v1262_v34, 920167782 }
 0x210   : > { %v1270_v7 = vsel %vm1266_vm14, %v1250_v55, %v1253_v5  ;;  %v1272_v48 = vsel %vm1268_vm15, %v1256_v63, %v1271_v10  ;;  %v1276_v11 = vsel %vm1268_vm15, %v1259_v22, %v1275_v24  ;;  %v1278_v17 = vsel %vm1266_vm14, %v1256_v63, %v1259_v22 }
 0x211   : > { %vm914_vm4 = vweird.f32 %v3537_v50  ;;  %v1213_v41 = vcvt.s32.f32 %v1206_v51  ;;  %v2852_v8 = vmin.u32 %v991_v27, %v3999_v28  ;;  %v1277_v52 = vsel %vm1267_vm1, %v1274_v20, %v1276_v11 }
 0x212   : > { %v1279_v35 = vsel %vm1269_vm2, %v1265_v57, 1326507024  ;;  %v700_v39 = vxor.u32 2147483648, %v3973_v18  ;;  %v4012_v5 = vmul.u32.u64.low %v3976_v58, %v1277_v52  ;;  %v4013_v55 = vmul.u32.u64.high %v3976_v58, %v1277_v52, %v4012_v5 }
 0x213   : > { %v1280_v37 = vsel %vm1268_vm15, %v1262_v34, %v1279_v35  ;;  %v1214_v63 = vmul.f32 %v1213_v41, %v1211_v54  ;;  %v993_v22 = vclz %v2852_v8  ;;  %v1273_v30 = vsel %vm1267_vm1, %v1270_v7, %v1272_v48  ;;  %v4044_v48 = vld [vmem:[%s5323_s4] ss:$0 sm:$0xff] }
 0x214   : > { %v1281_v51 = vsel %vm1267_vm1, %v1278_v17, %v1280_v37  ;;  %v2855_v57 = vadd.s32 4294967169, %v1032_v26  ;;  %v1035_v20 = vand.u32 8388607, %v5329_v46  ;;  %vm916_vm5 = vcmp.lt.s32.totalorder %v3893_v12, 2 }
 0x215   : > { %v4019_v27 = vmul.u32.u64.low %v3976_v58, %v1281_v51  ;;  %v4020_v10 = vmul.u32.u64.high %v3976_v58, %v1281_v51, %v4019_v27  ;;  %vm4027_vm6 = vcmp.le.f32.partialorder %v616_v44, 0.7853982  ;;  %v5408_v34 = vmov 0 }
 0x216   : > { %v5409_v34 = vsel %vm4027_vm6, 4294967295, %v5408_v34  ;;  %vm618_vm7 = vcmp.lt.s32.totalorder %v3554_v9, 0  ;;  %v2853_v4 = vadd.s32 4294967294, %v993_v22  ;;  %v601_v54 = vsel %vm3995_vm3, %v3530_v43, %v3891_v1 }
 0x217   : > { %5410 = vst [vmem:[#allocation14_spill] sm:$0xff] %v5409_v34  ;;  %v1289_v26 = vmul.u32 %v3976_v58, %v1273_v30  ;;  %v1292_v24 = vadd.s32 1, %v4013_v55  ;;  %v1038_v7 = vadd.s32 1, %v2855_v57  ;;  %v923_v12 = vsel %vm916_vm5, %v3966_v6, %v3970_v2 }
 0x218   : > { %vm5372_vm8 = vcmp.lt.s32.totalorder %v3720_v29, 0  ;;  %v1215_v44 = vxor.u32 2147483648, %v1214_v63  ;;  %v4048_v11 = vadd.f32 %v4044_v48, %v3579_v42  ;;  %v701_v1 = vsel %vm618_vm7, %v700_v39, %v3973_v18 }
 0x219   : > { %vm1291_vm9 = vc.u32 %v4020_v10, %v4012_v5  ;;  %v1036_v6 = vor.u32 8388608, %v1035_v20  ;;  %vm1039_vm10 = vcmp.gt.s32.totalorder %v1038_v7, 0  ;;  %3217 = vcosq.f32 %v601_v54 }
 0x21a   : > { %5411 = vst [vmem:[#allocation15_spill] sm:$0xff] %v4048_v11  ;;  %vm2854_vm11 = vcmp.lt.s32.totalorder %v2853_v4, 0  ;;  %v1293_v2 = vsel %vm1291_vm9, %v1292_v24, %v4013_v55  ;;  %v5330_v58 = vand.u32 2147483647, %v4048_v11  ;;  %3219 = vsinq.f32 %v601_v54 }
 0x21b   : > { %v4059_v42 = vsel %vm914_vm4, nan, %v923_v12  ;;  %v1294_v17 = vadd.s32 %v1293_v2, %v1289_v26  ;;  %v1040_v41 = vsel %vm1039_vm10, %v1038_v7, 0  ;;  %v4064_v18 = vsel %vm4027_vm6, %v3554_v9, %v701_v1 }
 0x21c   : > { %5412 = vst [vmem:[#allocation16_spill] sm:$0xff] %v4059_v42  ;;  %v4068_v8 = vsel %vm5372_vm8, %v1215_v44, %v1214_v63  ;;  %v981_v52 = vadd.s32 %v3944_v61, %v3950_v3  ;;  %v1042_v35 = vand.u32 31, %v1040_v41  ;;  %v4072_v39 = vsel %vm2854_vm11, 0, %v2853_v4 }
 0x21d   : > { %v1295_v50 = vadd.s32 536870912, %v1294_v17  ;;  %v4074_v37 = vshll.u32 %v1036_v6, 8  ;;  %v1546_v55 = vand.u32 2139095040, %v4048_v11  ;;  %v4080_v51 = vand.u32 8388607, %v5330_v58 }
 0x21e   : > { %v1043_v22 = vsub.s32 32, %v1042_v35  ;;  %v1045_v30 = vshll.u32 %v5341_v15, %v1042_v35  ;;  %v4084_v63 = vadd.f32 %v4044_v48, %v3632_v62  ;;  %v1048_v3 = vshll.u32 %v5335_v19, %v1042_v35 }
 0x21f   : > { %v4086_v61 = vshrl.u32 %v1295_v50, 30  ;;  %v1051_v27 = vshll.u32 %v5331_v21, %v1042_v35  ;;  %v1054_v57 = vshll.u32 %v5333_v23, %v1042_v35  ;;  %v997_v20 = vsub.s32 32, %v4072_v39 }
 0x220   : > { %v1041_v54 = vshrl.u32 %v1040_v41, 5  ;;  %v1046_v26 = vshrl.u32 %v5335_v19, %v1043_v22  ;;  %v1049_v62 = vshrl.u32 %v5331_v21, %v1043_v22  ;;  %v1052_v7 = vshrl.u32 %v5333_v23, %v1043_v22  ;;  %v4109_v23 = vpop.f32.mrb[15].mxu0 }
 0x221   : > { %5413 = vst [vmem:[#allocation17_spill] sm:$0xff] %v4086_v61  ;;  %v1297_v24 = vshll.u32 %v4086_v61, 30  ;;  %v1055_v12 = vshrl.u32 %v5339_v25, %v1043_v22  ;;  %v1057_v1 = vshll.u32 %v5339_v25, %v1042_v35  ;;  %v1058_v6 = vshrl.u32 %v5337_v32, %v1043_v22 }
 0x222   : > { %v1047_v44 = vor.u32 %v1046_v26, %v1045_v30  ;;  %v1547_v2 = vshrl.u32 %v1546_v55, 23  ;;  %vm4103_vm12 = vcmp.le.f32.partialorder %v1131_v38, 0.7853982  ;;  %v5414_v41 = vmov 0 }
 0x223   : > { %v5415_v41 = vsel %vm4103_vm12, 4294967295, %v5414_v41  ;;  %v4107_v50 = vsub.s32 %v1294_v17, %v1297_v24  ;;  %v1050_v46 = vor.u32 %v1049_v62, %v1048_v3  ;;  %v1053_v58 = vor.u32 %v1052_v7, %v1051_v27  ;;  %v4111_v19 = vpop.eup %3217 }
 0x224   : > { %5416 = vst [vmem:[#allocation18_spill] sm:$0xff] %v5415_v41  ;;  %v1056_v21 = vor.u32 %v1055_v12, %v1054_v57  ;;  %v1001_v35 = vsub.s32 4294967266, %v4072_v39  ;;  %v1044_v30 = vshrl.u32 %v5341_v15, %v1043_v22  ;;  %v1059_v55 = vor.u32 %v1058_v6, %v1057_v1  ;;  %v4115_v26 = vpop.eup %3219 }
 0x225   : > { %vm1060_vm14 = vcmp.lt.s32.totalorder %v1041_v54, 1  ;;  %v1300_v38 = vsub.s32 0, %v4107_v50  ;;  %vm1061_vm15 = vcmp.lt.s32.totalorder %v1041_v54, 2  ;;  %vm1062_vm1 = vcmp.lt.s32.totalorder %v1041_v54, 3 }
 0x226   : > { %vm1063_vm2 = vcmp.lt.s32.totalorder %v1041_v54, 4  ;;  %v1068_v3 = vsel %vm1060_vm14, %v1047_v44, %v1050_v46  ;;  %v2875_v57 = vadd.s32 4294967169, %v1547_v2  ;;  %v1072_v7 = vsel %vm1060_vm14, %v1050_v46, %v1053_v58 }
 0x227   : > { %v1065_v17 = vsel %vm1063_vm2, %v1053_v58, 2102212464  ;;  %v1069_v27 = vsel %vm1063_vm2, %v1056_v21, 920167782  ;;  %v2864_v24 = vmin.u32 %v1300_v38, %v4107_v50  ;;  %v1551_v12 = vor.u32 8388608, %v4080_v51 }
 0x228   : > { %v1070_v62 = vsel %vm1062_vm1, %v1053_v58, %v1069_v27  ;;  %v1064_v22 = vsel %vm1060_vm14, %v1044_v30, %v1047_v44  ;;  %v1066_v1 = vsel %vm1062_vm1, %v1050_v46, %v1065_v17  ;;  %v1073_v32 = vsel %vm1063_vm2, %v1059_v55, 1326507024 }
 0x229   : > { %v1071_v6 = vsel %vm1061_vm15, %v1068_v3, %v1070_v62  ;;  %v1302_v25 = vclz %v2864_v24  ;;  %v1074_v15 = vsel %vm1062_vm1, %v1056_v21, %v1073_v32  ;;  %v999_v60 = vshrl.u32 %v981_v52, %v997_v20 }
 0x22a   : > { %v4122_v4 = vmul.u32.u64.low %v4074_v37, %v1071_v6  ;;  %v4123_v61 = vmul.u32.u64.high %v4074_v37, %v1071_v6, %v4122_v4  ;;  %v4126_v2 = vadd.s32 127, %v1001_v35  ;;  %v1075_v38 = vsel %vm1061_vm15, %v1072_v7, %v1074_v15 }
 0x22b   : > { %v1553_v58 = vadd.s32 1, %v2875_v57  ;;  %v2865_v27 = vadd.s32 4294967294, %v1302_v25  ;;  %v1067_v51 = vsel %vm1061_vm15, %v1064_v22, %v1066_v1  ;;  %3221 = vcosq.f32 %v4064_v18 }
 0x22c   : > { %v4131_v46 = vmul.u32.u64.low %v4074_v37, %v1075_v38  ;;  %v4132_v44 = vmul.u32.u64.high %v4074_v37, %v1075_v38, %v4131_v46  ;;  %v4139_v21 = vsel %vm4103_vm12, %v3720_v29, %v4068_v8  ;;  %v1290_v32 = vadd.s32 %v4012_v5, %v4020_v10 }
 0x22d   : > { %vm1554_vm4 = vcmp.gt.s32.totalorder %v1553_v58, 0  ;;  %vm2866_vm5 = vcmp.lt.s32.totalorder %v2865_v27, 0  ;;  %v1086_v15 = vadd.s32 1, %v4123_v61  ;;  %v4144_v52 = vshll.u32 %v1551_v12, 8 }
 0x22e   : > { %v1555_v25 = vsel %vm1554_vm4, %v1553_v58, 0  ;;  %v1305_v20 = vsel %vm2866_vm5, 0, %v2865_v27  ;;  %v1083_v54 = vmul.u32 %v4074_v37, %v1067_v51  ;;  %v5417_v8 = vshll.u32 %v3999_v28, %v4072_v39 }
 0x22f   : > { %v1557_v35 = vand.u32 31, %v1555_v25  ;;  %v1003_v5 = vshll.u32 %v4126_v2, 23  ;;  %v1310_v10 = vsub.s32 4294967266, %v1305_v20  ;;  %v1340_v17 = vand.u32 2139095040, %v4084_v63 }
 0x230   : > { %v4151_v55 = vor.u32 %v999_v60, %v5417_v8  ;;  %v1306_v3 = vsub.s32 32, %v1305_v20  ;;  %vm1085_vm9 = vc.u32 %v4132_v44, %v4122_v4  ;;  %v5418_v24 = vmov 683565275  }
 0x231   : > { %v1558_v57 = vsub.s32 32, %v1557_v35  ;;  %v1560_v37 = vshll.u32 %v5418_v24, %v1557_v35  ;;  %v1311_v62 = vadd.s32 127, %v1310_v10  ;;  %v1087_v7 = vsel %vm1085_vm9, %v1086_v15, %v4123_v61 }
 0x232   : > { %v5419_v12 = vmov 2475754826   ;;  %v5420_v28 = vmov 2131351028   ;;  %v1088_v39 = vadd.s32 %v1087_v7, %v1083_v54  ;;  %v1556_v1 = vshrl.u32 %v1555_v25, 5 }
 0x233   : > { %v1563_v22 = vshll.u32 %v5419_v12, %v1557_v35  ;;  %v1566_v60 = vshll.u32 %v5420_v28, %v1557_v35  ;;  %v1561_v6 = vshrl.u32 %v5419_v12, %v1558_v57  ;;  %v1564_v2 = vshrl.u32 %v5420_v28, %v1558_v57 }
 0x234   : > { %v1307_v38 = vshll.u32 %v4107_v50, %v1305_v20  ;;  %v1312_v58 = vshll.u32 %v1311_v62, 23  ;;  %v5421_v27 = vmov 2102212464   ;;  %v1308_v8 = vshrl.u32 %v1290_v32, %v1306_v3 }
 0x235   : > { %v1567_v51 = vshrl.u32 %v5421_v27, %v1558_v57  ;;  %v1569_v46 = vshll.u32 %v5421_v27, %v1557_v35  ;;  %v1089_v10 = vadd.s32 536870912, %v1088_v39  ;;  %v1559_v61 = vshrl.u32 %v5418_v24, %v1558_v57  ;;  %v4169_v29 = vpop.eup %3221 }
 0x236   : > { %v5422_v15 = vmov 920167782   ;;  %v1562_v41 = vor.u32 %v1561_v6, %v1560_v37  ;;  %v1565_v54 = vor.u32 %v1564_v2, %v1563_v22  ;;  %5423 = vst [vmem:[#allocation19_spill] sm:$0xff] %v4169_v29  ;;  %v5425_v20 = vmov 1326507024  }
 0x237   : > { %v1570_v30 = vshrl.u32 %v5422_v15, %v1558_v57  ;;  %v1568_v25 = vor.u32 %v1567_v51, %v1566_v60  ;;  %v1572_v7 = vshll.u32 %v5422_v15, %v1557_v35  ;;  %v4171_v45 = vshrl.u32 %v1089_v10, 30 }
 0x238   : > { %v1573_v62 = vshrl.u32 %v5425_v20, %v1558_v57  ;;  %vm1575_vm10 = vcmp.lt.s32.totalorder %v1556_v1, 1  ;;  %v1313_v59 = vor.u32 4788187, %v1312_v58  ;;  %vm1577_vm11 = vcmp.lt.s32.totalorder %v1556_v1, 3 }
 0x239   : > { %5424 = vst [vmem:[#allocation20_spill] sm:$0xff] %v4171_v45  ;;  %v1571_v50 = vor.u32 %v1570_v30, %v1569_v46  ;;  %vm1578_vm14 = vcmp.lt.s32.totalorder %v1556_v1, 4  ;;  %v1341_v32 = vshrl.u32 %v1340_v17, 23  ;;  %v1091_v3 = vshll.u32 %v4171_v45, 30 }
 0x23a   : > { %v1574_v56 = vor.u32 %v1573_v62, %v1572_v7  ;;  %vm1576_vm15 = vcmp.lt.s32.totalorder %v1556_v1, 2  ;;  %v1580_v37 = vsel %vm1578_vm14, %v1568_v25, 2102212464  ;;  %v1309_v22 = vor.u32 %v1308_v8, %v1307_v38 }
 0x23b   : > { %v1579_v35 = vsel %vm1575_vm10, %v1559_v61, %v1562_v41  ;;  %v1583_v60 = vsel %vm1575_vm10, %v1562_v41, %v1565_v54  ;;  %v1584_v30 = vsel %vm1578_vm14, %v1571_v50, 920167782  ;;  %v4179_v6 = vsub.s32 %v1088_v39, %v1091_v3 }
 0x23c   : > { %v1581_v57 = vsel %vm1577_vm11, %v1565_v54, %v1580_v37  ;;  %v1585_v2 = vsel %vm1577_vm11, %v1568_v25, %v1584_v30  ;;  %v1587_v17 = vsel %vm1575_vm10, %v1565_v54, %v1568_v25  ;;  %v1004_v58 = vor.u32 4788187, %v1003_v5 }
 0x23d   : > { %v1314_v51 = vand.u32 2147483647, %v1313_v59  ;;  %v1586_v46 = vsel %vm1576_vm15, %v1583_v60, %v1585_v2  ;;  %v1588_v38 = vsel %vm1578_vm14, %v1574_v56, 1326507024  ;;  %v1094_v8 = vsub.s32 0, %v4179_v6 }
 0x23e   : > { %v1589_v41 = vsel %vm1577_vm11, %v1571_v50, %v1588_v38  ;;  %v4189_v10 = vmul.u32.u64.low %v4144_v52, %v1586_v46  ;;  %v4190_v39 = vmul.u32.u64.high %v4144_v52, %v1586_v46, %v4189_v10  ;;  %v1582_v61 = vsel %vm1576_vm15, %v1579_v35, %v1581_v57 }
 0x23f   : > { %v1590_v7 = vsel %vm1576_vm15, %v1587_v17, %v1589_v41  ;;  %v2867_v54 = vadd.s32 4294967169, %v1341_v32  ;;  %v5426_v59 = vand.u32 2147483647, %v4084_v63  ;;  %v1316_v25 = vcvt.s32.f32 %v1309_v22 }
 0x240   : > { %v2856_v56 = vmin.u32 %v1094_v8, %v4179_v6  ;;  %v4199_v62 = vmul.u32.u64.low %v4144_v52, %v1590_v7  ;;  %v4200_v3 = vmul.u32.u64.high %v4144_v52, %v1590_v7, %v4199_v62  ;;  %3223 = vsinq.f32 %v4064_v18 }
 0x241   : > { %v1344_v5 = vand.u32 8388607, %v5426_v59  ;;  %v1005_v50 = vand.u32 2147483647, %v1004_v58  ;;  %v1347_v37 = vadd.s32 1, %v2867_v54  ;;  %v4205_v35 = vadd.f32 %v4044_v48, %v3696_v33 }
 0x242   : > { %v4207_v1 = vmul.f32 %v1316_v25, %v1314_v51  ;;  %v1096_v32 = vclz %v2856_v56  ;;  %v1598_v60 = vmul.u32 %v4144_v52, %v1582_v61  ;;  %v1601_v22 = vadd.s32 1, %v4190_v39 }
 0x243   : > { %5427 = vst [vmem:[#allocation21_spill] sm:$0xff] %v4205_v35  ;;  %3225 = vcosq.f32 %v4139_v21  ;;  %v1007_v30 = vcvt.s32.f32 %v4151_v55  ;;  %v1345_v57 = vor.u32 8388608, %v1344_v5  ;;  %vm1348_vm1 = vcmp.gt.s32.totalorder %v1347_v37, 0 }
 0x244   : > { %v2857_v18 = vadd.s32 4294967294, %v1096_v32  ;;  %vm1600_vm2 = vc.u32 %v4200_v3, %v4189_v10  ;;  %v1349_v2 = vsel %vm1348_vm1, %v1347_v37, 0  ;;  %v5352_v33 = vand.u32 2147483647, %v4205_v35 }
 0x245   : > { %3227 = vsinq.f32 %v4139_v21  ;;  %v4217_v17 = vmul.f32 %v1007_v30, %v1005_v50  ;;  %v1602_v52 = vsel %vm1600_vm2, %v1601_v22, %v4190_v39  ;;  %v1351_v58 = vand.u32 31, %v1349_v2 }
 0x246   : > { %v1084_v55 = vadd.s32 %v4122_v4, %v4132_v44  ;;  %vm2858_vm4 = vcmp.lt.s32.totalorder %v2857_v18, 0  ;;  %v1603_v46 = vadd.s32 %v1602_v52, %v1598_v60  ;;  %v4223_v41 = vshll.u32 %v1345_v57, 8 }
 0x247   : > { %v1099_v38 = vsel %vm2858_vm4, 0, %v2857_v18  ;;  %v1352_v8 = vsub.s32 32, %v1351_v58  ;;  %v1649_v61 = vand.u32 2139095040, %v4205_v35  ;;  %v1354_v21 = vshll.u32 %v5418_v24, %v1351_v58 }
 0x248   : > { %v1604_v7 = vadd.s32 536870912, %v1603_v46  ;;  %v1357_v54 = vshll.u32 %v5419_v12, %v1351_v58  ;;  %v4230_v39 = vand.u32 8388607, %v5352_v33  ;;  %v1350_v59 = vshrl.u32 %v1349_v2, 5 }
 0x249   : > { %v1355_v4 = vshrl.u32 %v5419_v12, %v1352_v8  ;;  %v1358_v44 = vshrl.u32 %v5420_v28, %v1352_v8  ;;  %v1360_v5 = vshll.u32 %v5420_v28, %v1351_v58  ;;  %v1100_v25 = vsub.s32 32, %v1099_v38 }
 0x24a   : > { %v1104_v56 = vsub.s32 4294967266, %v1099_v38  ;;  %v4235_v62 = vshrl.u32 %v1604_v7, 30  ;;  %v1361_v50 = vshrl.u32 %v5421_v27, %v1352_v8  ;;  %v4238_v37 = vpop.eup %3223  ;;  %v1353_v32 = vshrl.u32 %v5418_v24, %v1352_v8 }
 0x24b   : > { %5429 = vst [vmem:[#allocation23_spill] sm:$0xff] %v4238_v37  ;;  %v1363_v60 = vshll.u32 %v5421_v27, %v1351_v58  ;;  %v1364_v22 = vshrl.u32 %v5422_v15, %v1352_v8  ;;  %v4245_v30 = vadd.f32 %v4044_v48, %v3779_v36  ;;  %v1356_v18 = vor.u32 %v1355_v4, %v1354_v21 }
 0x24c   : > { %5428 = vst [vmem:[#allocation22_spill] sm:$0xff] %v4235_v62  ;;  %v1606_v57 = vshll.u32 %v4235_v62, 30  ;;  %v1359_v2 = vor.u32 %v1358_v44, %v1357_v54  ;;  %v1362_v52 = vor.u32 %v1361_v50, %v1360_v5  ;;  %vm5371_vm5 = vcmp.lt.s32.totalorder %v3877_v53, 0 }
 0x24d   : > { %v4248_v7 = vpop.eup %3225  ;;  %v1365_v33 = vor.u32 %v1364_v22, %v1363_v60  ;;  %v1366_v51 = vshll.u32 %v5422_v15, %v1351_v58  ;;  %v1367_v45 = vshrl.u32 %v5425_v20, %v1352_v8  ;;  %vm1369_vm9 = vcmp.lt.s32.totalorder %v1350_v59, 1 }
 0x24e   : > { %v1102_v42 = vshrl.u32 %v1084_v55, %v1100_v25  ;;  %v1105_v29 = vadd.s32 127, %v1104_v56  ;;  %v4253_v34 = vsub.s32 %v1603_v46, %v1606_v57  ;;  %v1650_v36 = vshrl.u32 %v1649_v61, 23 }
 0x24f   : > { %v4255_v37 = vpop.eup %3227  ;;  %v1368_v21 = vor.u32 %v1367_v45, %v1366_v51  ;;  %vm1370_vm10 = vcmp.lt.s32.totalorder %v1350_v59, 2  ;;  %vm1371_vm11 = vcmp.lt.s32.totalorder %v1350_v59, 3  ;;  %vm1372_vm14 = vcmp.lt.s32.totalorder %v1350_v59, 4 }
 0x250   : > { %v1609_v54 = vsub.s32 0, %v4253_v34  ;;  %v1373_v4 = vsel %vm1369_vm9, %v1353_v32, %v1356_v18  ;;  %v1374_v44 = vsel %vm1372_vm14, %v1362_v52, 2102212464  ;;  %v1377_v58 = vsel %vm1369_vm9, %v1356_v18, %v1359_v2 }
 0x251   : > { %v1375_v8 = vsel %vm1371_vm11, %v1359_v2, %v1374_v44  ;;  %v1378_v55 = vsel %vm1372_vm14, %v1365_v33, 920167782  ;;  %v1381_v46 = vsel %vm1369_vm9, %v1359_v2, %v1362_v52  ;;  %v1382_v5 = vsel %vm1372_vm14, %v1368_v21, 1326507024 }
 0x252   : > { %v1101_v61 = vshll.u32 %v4179_v6, %v1099_v38  ;;  %v2876_v45 = vmin.u32 %v1609_v54, %v4253_v34  ;;  %v1379_v51 = vsel %vm1371_vm11, %v1362_v52, %v1378_v55  ;;  %v1654_v25 = vor.u32 8388608, %v4230_v39 }
 0x253   : > { %v1106_v56 = vshll.u32 %v1105_v29, 23  ;;  %v1380_v50 = vsel %vm1370_vm10, %v1377_v58, %v1379_v51  ;;  %v1383_v32 = vsel %vm1371_vm11, %v1365_v33, %v1382_v5  ;;  %v2879_v60 = vadd.s32 4294967169, %v1650_v36 }
 0x254   : > { %v4268_v22 = vor.u32 %v1102_v42, %v1101_v61  ;;  %v1611_v57 = vclz %v2876_v45  ;;  %v1376_v18 = vsel %vm1370_vm10, %v1373_v4, %v1375_v8  ;;  %v1384_v2 = vsel %vm1370_vm10, %v1381_v46, %v1383_v32 }
 0x255   : > { %v4273_v6 = vmul.u32.u64.low %v4223_v41, %v1384_v2  ;;  %v4274_v38 = vmul.u32.u64.high %v4223_v41, %v1384_v2, %v4273_v6  ;;  %v4277_v52 = vmul.u32.u64.low %v4223_v41, %v1380_v50  ;;  %v4278_v39 = vmul.u32.u64.high %v4223_v41, %v1380_v50, %v4277_v52  ;;  %v3197_v2 = vld [vmem:[%s5324_s5] sm:$0xff]  }
 0x256   : > { %v1009_v29 = vxor.u32 2147483648, %v4217_v17  ;;  %v5430_v42 = vxor.u32 2147483648, %v4207_v1  ;;  %v2877_v59 = vadd.s32 4294967294, %v1611_v57  ;;  %v1656_v36 = vadd.s32 1, %v2879_v60  ;;  %3000 = vmatprep.subr.bf16.mxu0 %v3197_v2  ;;  %3038 = vmatprep.subr.bf16.mxu1 %v3197_v2 }
 0x257   : > { %v4289_v21 = vor.u32 4788187, %v1106_v56  ;;  %v1599_v54 = vadd.s32 %v4189_v10, %v4200_v3  ;;  %v5358_v4 = vand.u32 2147483647, %v4245_v30  ;;  %v4296_v44 = vadd.f32 %v4044_v48, %v3863_v13  ;;  %3001 = vmatpush3.bf16.msra.mxu0 %v3197_v2  ;;  %3046 = vmatpush3.bf16.msra.mxu1 %v3197_v2 }
 0x258   : > { %v4287_v33 = vsel %vm5371_vm5, %v5430_v42, %v4207_v1  ;;  %v1110_v58 = vcvt.s32.f32 %v4268_v22  ;;  %vm2878_vm15 = vcmp.lt.s32.totalorder %v2877_v59, 0  ;;  %v1392_v8 = vmul.u32 %v4223_v41, %v1376_v18 }
 0x259   : > { %vm1657_vm1 = vcmp.gt.s32.totalorder %v1656_v36, 0  ;;  %v1614_v1 = vsel %vm2878_vm15, 0, %v2877_v59  ;;  %vm1394_vm2 = vc.u32 %v4274_v38, %v4277_v52  ;;  %v1395_v55 = vadd.s32 1, %v4278_v39 }
 0x25a   : > { %v4303_v46 = vshll.u32 %v1654_v25, 8  ;;  %v1615_v10 = vsub.s32 32, %v1614_v1  ;;  %v1616_v3 = vshll.u32 %v4253_v34, %v1614_v1  ;;  %v1619_v5 = vsub.s32 4294967266, %v1614_v1 }
 0x25b   : > { %v1658_v13 = vsel %vm1657_vm1, %v1656_v36, 0  ;;  %v1396_v61 = vsel %vm1394_vm2, %v1395_v55, %v4278_v39  ;;  %v1443_v51 = vand.u32 2139095040, %v4245_v30  ;;  %v4310_v41 = vand.u32 8388607, %v5358_v4  ;;  %v3198_v4 = vld [vmem:[%s5324_s5 + $0x8] sm:$0xff]  }
 0x25c   : > { %v1660_v45 = vand.u32 31, %v1658_v13  ;;  %v1617_v56 = vshrl.u32 %v1599_v54, %v1615_v10  ;;  %v1620_v50 = vadd.s32 127, %v1619_v5  ;;  %v1397_v32 = vadd.s32 %v1396_v61, %v1392_v8  ;;  %3002 = vmatprep.subr.bf16.mxu0 %v3198_v4  ;;  %3039 = vmatprep.subr.bf16.mxu1 %v3198_v4 }
 0x25d   : > { %v4312_v60 = vshrl.u32 %v1658_v13, 5  ;;  %vm5388_vm4 = vcmp.lt.s32.totalorder %v3821_v16, 0  ;;  %vm5363_vm15 = vcmp.lt.s32.totalorder %v4048_v11, 0  ;;  %3003 = vmatpush3.bf16.msra.mxu0 %v3198_v4  ;;  %3047 = vmatpush3.bf16.msra.mxu1 %v3198_v4  ;;  %vm5385_vm0 = vcmp.lt.s32.totalorder %v4205_v35, 0 }
 0x25e   : > { %v1661_v25 = vsub.s32 32, %v1660_v45  ;;  %v1663_v57 = vshll.u32 %v5418_v24, %v1660_v45  ;;  %v1666_v34 = vshll.u32 %v5419_v12, %v1660_v45  ;;  %v1669_v18 = vshll.u32 %v5420_v28, %v1660_v45 }
 0x25f   : > { %v1618_v6 = vor.u32 %v1617_v56, %v1616_v3  ;;  %v1621_v39 = vshll.u32 %v1620_v50, 23  ;;  %v1398_v42 = vadd.s32 536870912, %v1397_v32  ;;  %v1672_v59 = vshll.u32 %v5421_v27, %v1660_v45 }
 0x260   : > { %v1662_v36 = vshrl.u32 %v5418_v24, %v1661_v25  ;;  %v1664_v54 = vshrl.u32 %v5419_v12, %v1661_v25  ;;  %v1667_v8 = vshrl.u32 %v5420_v28, %v1661_v25  ;;  %v1670_v1 = vshrl.u32 %v5421_v27, %v1661_v25 }
 0x261   : > { %v1622_v55 = vor.u32 4788187, %v1621_v39  ;;  %v1625_v10 = vcvt.s32.f32 %v1618_v6  ;;  %v4325_v5 = vshrl.u32 %v1398_v42, 30  ;;  %v1673_v13 = vshrl.u32 %v5422_v15, %v1661_v25 }
 0x262   : > { %v1665_v3 = vor.u32 %v1664_v54, %v1663_v57  ;;  %v1668_v61 = vor.u32 %v1667_v8, %v1666_v34  ;;  %v1671_v56 = vor.u32 %v1670_v1, %v1669_v18  ;;  %v1675_v50 = vshll.u32 %v5422_v15, %v1660_v45 }
 0x263   : > { %5431 = vst [vmem:[#allocation24_spill] sm:$0xff] %v4325_v5  ;;  %v5432_v6 = vand.u32 2147483647, %v3877_v53  ;;  %v1623_v42 = vand.u32 2147483647, %v1622_v55  ;;  %v1400_v57 = vshll.u32 %v4325_v5, 30  ;;  %v1674_v34 = vor.u32 %v1673_v13, %v1672_v59 }
 0x264   : > { %v1676_v18 = vshrl.u32 %v5425_v20, %v1661_v25  ;;  %vm1678_vm10 = vcmp.lt.s32.totalorder %v4312_v60, 1  ;;  %vm1680_vm11 = vcmp.lt.s32.totalorder %v4312_v60, 3  ;;  %vm1681_vm14 = vcmp.lt.s32.totalorder %v4312_v60, 4 }
 0x265   : > { %vm4335_vm9 = vcmp.le.f32.partialorder %v5432_v6, 0.7853982  ;;  %v1444_v45 = vshrl.u32 %v1443_v51, 23  ;;  %v1626_v2 = vmul.f32 %v1625_v10, %v1623_v42  ;;  %v4345_v54 = vsub.s32 %v1397_v32, %v1400_v57  ;;  %v3199_v32 = vld [vmem:[%s5324_s5 + $0x10] sm:$0xff]  }
 0x266   : > { %v1677_v8 = vor.u32 %v1676_v18, %v1675_v50  ;;  %vm1679_vm1 = vcmp.lt.s32.totalorder %v4312_v60, 2  ;;  %v1682_v25 = vsel %vm1678_vm10, %v1662_v36, %v1665_v3  ;;  %v1683_v59 = vsel %vm1681_vm14, %v1671_v56, 2102212464  ;;  %3004 = vmatprep.subr.bf16.mxu0 %v3199_v32  ;;  %3040 = vmatprep.subr.bf16.mxu1 %v3199_v32 }
 0x267   : > { %v1686_v51 = vsel %vm1678_vm10, %v1665_v3, %v1668_v61  ;;  %v1687_v1 = vsel %vm1681_vm14, %v1674_v34, 920167782  ;;  %v1403_v55 = vsub.s32 0, %v4345_v54  ;;  %v1684_v10 = vsel %vm1680_vm11, %v1668_v61, %v1683_v59  ;;  %3005 = vmatpush3.bf16.msra.mxu0 %v3199_v32  ;;  %3048 = vmatpush3.bf16.msra.mxu1 %v3199_v32 }
 0x268   : > { %v1688_v36 = vsel %vm1680_vm11, %v1671_v56, %v1687_v1  ;;  %v1690_v13 = vsel %vm1678_vm10, %v1668_v61, %v1671_v56  ;;  %v1108_v3 = vand.u32 2147483647, %v4289_v21  ;;  %v1691_v6 = vsel %vm1681_vm14, %v1677_v8, 1326507024  ;;  %v3200_v8 = vld [vmem:[%s5324_s5 + $0x18] sm:$0xff]  }
 0x269   : > { %v1689_v50 = vsel %vm1679_vm1, %v1686_v51, %v1688_v36  ;;  %v2871_v4 = vadd.s32 4294967169, %v1444_v45  ;;  %v1627_v42 = vxor.u32 2147483648, %v1626_v2  ;;  %v2868_v57 = vmin.u32 %v1403_v55, %v4345_v54  ;;  %3006 = vmatprep.subr.bf16.mxu0 %v3200_v8  ;;  %3041 = vmatprep.subr.bf16.mxu1 %v3200_v8 }
 0x26a   : > { %v1692_v18 = vsel %vm1680_vm11, %v1674_v34, %v1691_v6  ;;  %v1448_v59 = vor.u32 8388608, %v4310_v41  ;;  %v1685_v21 = vsel %vm1679_vm1, %v1682_v25, %v1684_v10  ;;  %v1958_v25 = vand.u32 2139095040, %v4296_v44 }
 0x26b   : > { %v1693_v61 = vsel %vm1679_vm1, %v1690_v13, %v1692_v18  ;;  %v4380_v56 = vmul.u32.u64.low %v4303_v46, %v1689_v50  ;;  %v4381_v45 = vmul.u32.u64.high %v4303_v46, %v1689_v50, %v4380_v56  ;;  %v1405_v34 = vclz %v2868_v57  ;;  %3007 = vmatpush3.bf16.msra.mxu0 %v3200_v8  ;;  %v3201_v13 = vld [vmem:[%s5324_s5 + $0x20] sm:$0xff]   ;;  %3049 = vmatpush3.bf16.msra.mxu1 %v3200_v8 }
 0x26c   : > { %v4388_v41 = vmul.u32.u64.low %v4303_v46, %v1693_v61  ;;  %v4389_v51 = vmul.u32.u64.high %v4303_v46, %v1693_v61, %v4388_v41  ;;  %v4397_v60 = vsel %vm5388_vm4, %v1009_v29, %v4217_v17  ;;  %v4403_v1 = vsel %vm4335_vm9, %v3877_v53, %v4287_v33  ;;  %3008 = vmatprep.subr.bf16.mxu0 %v3201_v13  ;;  %3042 = vmatprep.subr.bf16.mxu1 %v3201_v13  ;;  %v3203_v29 = vld [vmem:[%s5324_s5 + $0x30] sm:$0xff]  }
 0x26d   : > { %v4407_v32 = vmul.f32 %v1110_v58, %v1108_v3  ;;  %v1450_v55 = vadd.s32 1, %v2871_v4  ;;  %v1393_v10 = vadd.s32 %v4277_v52, %v4274_v38  ;;  %v2869_v36 = vadd.s32 4294967294, %v1405_v34 }
 0x26e   : > { %v1701_v17 = vmul.u32 %v4303_v46, %v1685_v21  ;;  %v4415_v33 = vsel %vm5363_vm15, %v1627_v42, %v1626_v2  ;;  %v1704_v22 = vadd.s32 1, %v4381_v45  ;;  %v4418_v58 = vshll.u32 %v1448_v59, 8 }
 0x26f   : > { %vm1451_vm2 = vcmp.gt.s32.totalorder %v1450_v55, 0  ;;  %vm2870_vm10 = vcmp.lt.s32.totalorder %v2869_v36, 0  ;;  %vm1703_vm11 = vc.u32 %v4389_v51, %v4380_v56  ;;  %v4425_v52 = vshrl.u32 %v1958_v25, 23  ;;  %3009 = vmatpush3.bf16.msra.mxu0 %v3201_v13  ;;  %3050 = vmatpush3.bf16.msra.mxu1 %v3201_v13 }
 0x270   : > { %v1452_v38 = vsel %vm1451_vm2, %v1450_v55, 0  ;;  %v1408_v46 = vsel %vm2870_vm10, 0, %v2869_v36  ;;  %v1705_v2 = vsel %vm1703_vm11, %v1704_v22, %v4381_v45  ;;  %v3202_v45 = vld [vmem:[%s5324_s5 + $0x28] sm:$0xff]   ;;  %vm5369_vm11 = vcmp.lt.s32.totalorder %v4084_v63, 0 }
 0x271   : > { %v4428_v3 = vshrl.u32 %v1452_v38, 5  ;;  %v1454_v50 = vand.u32 31, %v1452_v38  ;;  %v1409_v6 = vsub.s32 32, %v1408_v46  ;;  %v1410_v4 = vshll.u32 %v4345_v54, %v1408_v46  ;;  %3010 = vmatprep.subr.bf16.mxu0 %v3202_v45  ;;  %3043 = vmatprep.subr.bf16.mxu1 %v3202_v45 }
 0x272   : > { %v1413_v42 = vsub.s32 4294967266, %v1408_v46  ;;  %v1706_v57 = vadd.s32 %v1705_v2, %v1701_v17  ;;  %3229 = vcosq.f32 %v4403_v1 }
 0x273   : > { %v1455_v18 = vsub.s32 32, %v1454_v50  ;;  %v1457_v59 = vshll.u32 %v5418_v24, %v1454_v50  ;;  %v1460_v21 = vshll.u32 %v5419_v12, %v1454_v50  ;;  %v1463_v61 = vshll.u32 %v5420_v28, %v1454_v50  ;;  %3011 = vmatpush3.bf16.msra.mxu0 %v3202_v45  ;;  %3051 = vmatpush3.bf16.msra.mxu1 %v3202_v45 }
 0x274   : > { %v1411_v8 = vshrl.u32 %v1393_v10, %v1409_v6  ;;  %v1414_v34 = vadd.s32 127, %v1413_v42  ;;  %v1707_v41 = vadd.s32 536870912, %v1706_v57  ;;  %v1466_v54 = vshll.u32 %v5421_v27, %v1454_v50  ;;  %3012 = vmatprep.subr.bf16.mxu0 %v3203_v29  ;;  %3044 = vmatprep.subr.bf16.mxu1 %v3203_v29 }
 0x275   : > { %v1456_v25 = vshrl.u32 %v5418_v24, %v1455_v18  ;;  %v1458_v55 = vshrl.u32 %v5419_v12, %v1455_v18  ;;  %v1461_v36 = vshrl.u32 %v5420_v28, %v1455_v18  ;;  %v1464_v17 = vshrl.u32 %v5421_v27, %v1455_v18 }
 0x276   : > { %v1412_v22 = vor.u32 %v1411_v8, %v1410_v4  ;;  %v1415_v38 = vshll.u32 %v1414_v34, 23  ;;  %v4442_v46 = vshrl.u32 %v1707_v41, 30  ;;  %v1467_v13 = vshrl.u32 %v5422_v15, %v1455_v18 }
 0x277   : > { %v1459_v10 = vor.u32 %v1458_v55, %v1457_v59  ;;  %v1462_v2 = vor.u32 %v1461_v36, %v1460_v21  ;;  %v1465_v6 = vor.u32 %v1464_v17, %v1463_v61  ;;  %v1469_v42 = vshll.u32 %v5422_v15, %v1454_v50  ;;  %3013 = vmatpush3.bf16.msra.mxu0 %v3203_v29  ;;  %v3204_v36 = vld [vmem:[%s5324_s5 + $0x38] sm:$0xff]  }
 0x278   : > { %5435 = vst [vmem:[#allocation25_spill] sm:$0xff] %v4442_v46  ;;  %v1416_v62 = vor.u32 4788187, %v1415_v38  ;;  %v1419_v5 = vcvt.s32.f32 %v1412_v22  ;;  %v1709_v4 = vshll.u32 %v4442_v46, 30  ;;  %v1468_v8 = vor.u32 %v1467_v13, %v1466_v54  ;;  %3052 = vmatpush3.bf16.msra.mxu1 %v3203_v29  ;;  %3014 = vmatprep.subr.bf16.mxu0 %v3204_v36 }
 0x279   : > { %v5436_v34 = vand.u32 2147483647, %v4048_v11  ;;  %v5437_v41 = vmov 0  ;;  %v1470_v59 = vshrl.u32 %v5425_v20, %v1455_v18  ;;  %vm1472_vm1 = vcmp.lt.s32.totalorder %v4428_v3, 1  ;;  %3045 = vmatprep.subr.bf16.mxu1 %v3204_v36 }
 0x27a   : > { %vm1473_vm2 = vcmp.lt.s32.totalorder %v4428_v3, 2  ;;  %vm1474_vm10 = vcmp.lt.s32.totalorder %v4428_v3, 3  ;;  %v1417_v50 = vand.u32 2147483647, %v1416_v62  ;;  %v4461_v21 = vsub.s32 %v1706_v57, %v1709_v4 }
 0x27b   : > { %vm4452_vm14 = vcmp.le.f32.partialorder %v5436_v34, 0.7853982  ;;  %vm1475_vm15 = vcmp.lt.s32.totalorder %v4428_v3, 4  ;;  %v1476_v61 = vsel %vm1472_vm1, %v1456_v25, %v1459_v10  ;;  %v1471_v18 = vor.u32 %v1470_v59, %v1469_v42  ;;  %3015 = vmatpush3.bf16.msra.mxu0 %v3204_v36 }
 0x27c   : > { %v5438_v41 = vsel %vm4452_vm14, 4294967295, %v5437_v41  ;;  %v1477_v45 = vsel %vm1475_vm15, %v1465_v6, 2102212464  ;;  %v1480_v54 = vsel %vm1472_vm1, %v1459_v10, %v1462_v2  ;;  %v1481_v55 = vsel %vm1475_vm15, %v1468_v8, 920167782  ;;  %3053 = vmatpush3.bf16.msra.mxu1 %v3204_v36 }
 0x27d   : > { %5439 = vst [vmem:[#allocation26_spill] sm:$0xff] %v5438_v41  ;;  %v1420_v62 = vmul.f32 %v1419_v5, %v1417_v50  ;;  %v1712_v57 = vsub.s32 0, %v4461_v21  ;;  %v1478_v17 = vsel %vm1474_vm10, %v1462_v2, %v1477_v45  ;;  %v1482_v25 = vsel %vm1474_vm10, %v1465_v6, %v1481_v55 }
 0x27e   : > { %v1483_v22 = vsel %vm1473_vm2, %v1480_v54, %v1482_v25  ;;  %v1484_v38 = vsel %vm1472_vm1, %v1462_v2, %v1465_v6  ;;  %v1485_v13 = vsel %vm1475_vm15, %v1471_v18, 1326507024  ;;  %v5440_v10 = vand.u32 2147483647, %v4296_v44 }
 0x27f   : > { %v1421_v5 = vxor.u32 2147483648, %v1420_v62  ;;  %v2880_v29 = vmin.u32 %v1712_v57, %v4461_v21  ;;  %v1479_v4 = vsel %vm1473_vm2, %v1476_v61, %v1478_v17  ;;  %v1486_v34 = vsel %vm1474_vm10, %v1468_v8, %v1485_v13 }
 0x280   : > { %v1962_v42 = vand.u32 8388607, %v5440_v10  ;;  %v1487_v59 = vsel %vm1473_vm2, %v1484_v38, %v1486_v34  ;;  %v4490_v2 = vmul.u32.u64.low %v4418_v58, %v1483_v22  ;;  %v4491_v6 = vmul.u32.u64.high %v4418_v58, %v1483_v22, %v4490_v2 }
 0x281   : > { %v2891_v50 = vadd.s32 4294967169, %v4425_v52  ;;  %v1714_v18 = vclz %v2880_v29  ;;  %v4497_v61 = vmul.u32.u64.low %v4418_v58, %v1487_v59  ;;  %v4498_v45 = vmul.u32.u64.high %v4418_v58, %v1487_v59, %v4497_v61 }
 0x282   : > { %3231 = vsinq.f32 %v4403_v1  ;;  %v1963_v8 = vor.u32 8388608, %v1962_v42  ;;  %v4506_v55 = vsel %vm4452_vm14, %v4048_v11, %v4415_v33  ;;  %v1495_v36 = vmul.u32 %v4418_v58, %v1479_v4 }
 0x283   : > { %v1965_v54 = vadd.s32 1, %v2891_v50  ;;  %v2881_v52 = vadd.s32 4294967294, %v1714_v18  ;;  %v4511_v57 = vadd.f32 %v4044_v48, %v3923_v14  ;;  %v4515_v1 = vsel %vm5369_vm11, %v1421_v5, %v1420_v62 }
 0x284   : > { %v1702_v17 = vadd.s32 %v4380_v56, %v4389_v51  ;;  %v1498_v25 = vadd.s32 1, %v4491_v6  ;;  %vm1497_vm2 = vc.u32 %v4498_v45, %v4490_v2  ;;  %v4522_v58 = vshll.u32 %v1963_v8, 8 }
 0x285   : > { %vm1966_vm15 = vcmp.gt.s32.totalorder %v1965_v54, 0  ;;  %vm2882_vm1 = vcmp.lt.s32.totalorder %v2881_v52, 0  ;;  %v5441_v50 = vand.u32 2147483647, %v4084_v63  ;;  %3233 = vcosq.f32 %v4506_v55 }
 0x286   : > { %v1967_v33 = vsel %vm1966_vm15, %v1965_v54, 0  ;;  %v1717_v22 = vsel %vm2882_vm1, 0, %v2881_v52  ;;  %v1499_v14 = vsel %vm1497_vm2, %v1498_v25, %v4491_v6  ;;  %v4542_v52 = vpop.eup %3229  ;;  %vm5386_vm15 = vcmp.lt.s32.totalorder %v3954_v47, 0 }
 0x287   : > { %v4525_v48 = vshrl.u32 %v1967_v33, 5  ;;  %v1969_v62 = vand.u32 31, %v1967_v33  ;;  %v1718_v38 = vsub.s32 32, %v1717_v22  ;;  %v1719_v13 = vshll.u32 %v4461_v21, %v1717_v22 }
 0x288   : > { %v1722_v56 = vsub.s32 4294967266, %v1717_v22  ;;  %v1500_v51 = vadd.s32 %v1499_v14, %v1495_v36  ;;  %vm4534_vm10 = vcmp.le.f32.partialorder %v5441_v50, 0.7853982  ;;  %3235 = vsinq.f32 %v4506_v55 }
 0x289   : > { %v1970_v10 = vsub.s32 32, %v1969_v62  ;;  %v1972_v42 = vshll.u32 %v5418_v24, %v1969_v62  ;;  %v1975_v5 = vshll.u32 %v5419_v12, %v1969_v62  ;;  %v1978_v29 = vshll.u32 %v5420_v28, %v1969_v62 }
 0x28a   : > { %v1720_v4 = vshrl.u32 %v1702_v17, %v1718_v38  ;;  %v1723_v34 = vadd.s32 127, %v1722_v56  ;;  %v1501_v59 = vadd.s32 536870912, %v1500_v51  ;;  %v1981_v6 = vshll.u32 %v5421_v27, %v1969_v62 }
 0x28b   : > { %v1971_v21 = vshrl.u32 %v5418_v24, %v1970_v10  ;;  %v1973_v61 = vshrl.u32 %v5419_v12, %v1970_v10  ;;  %v1976_v8 = vshrl.u32 %v5420_v28, %v1970_v10  ;;  %v1979_v54 = vshrl.u32 %v5421_v27, %v1970_v10 }
 0x28c   : > { %v1721_v36 = vor.u32 %v1720_v4, %v1719_v13  ;;  %v1724_v17 = vshll.u32 %v1723_v34, 23  ;;  %v4544_v25 = vshrl.u32 %v1501_v59, 30  ;;  %v1982_v33 = vshrl.u32 %v5422_v15, %v1970_v10  ;;  %v4547_v22 = vpop.eup %3231 }
 0x28d   : > { %v1974_v14 = vor.u32 %v1973_v61, %v1972_v42  ;;  %v1977_v38 = vor.u32 %v1976_v8, %v1975_v5  ;;  %v1980_v56 = vor.u32 %v1979_v54, %v1978_v29  ;;  %v1984_v50 = vshll.u32 %v5422_v15, %v1969_v62 }
 0x28e   : > { %5444 = vst [vmem:[#allocation27_spill] sm:$0xff] %v4544_v25  ;;  %v1725_v3 = vor.u32 4788187, %v1724_v17  ;;  %v1728_v46 = vcvt.s32.f32 %v1721_v36  ;;  %v1503_v41 = vshll.u32 %v4544_v25, 30  ;;  %v1983_v11 = vor.u32 %v1982_v33, %v1981_v6 }
 0x28f   : > { %v1985_v13 = vshrl.u32 %v5425_v20, %v1970_v10  ;;  %vm1987_vm1 = vcmp.lt.s32.totalorder %v4525_v48, 1  ;;  %vm1988_vm2 = vcmp.lt.s32.totalorder %v4525_v48, 2  ;;  %vm1989_vm11 = vcmp.lt.s32.totalorder %v4525_v48, 3 }
 0x290   : > { %v1726_v42 = vand.u32 2147483647, %v1725_v3  ;;  %v4557_v5 = vsub.s32 %v1500_v51, %v1503_v41  ;;  %vm1990_vm5 = vcmp.lt.s32.totalorder %v4525_v48, 4  ;;  %v1991_v62 = vsel %vm1987_vm1, %v1971_v21, %v1974_v14 }
 0x291   : > { %v1986_v29 = vor.u32 %v1985_v13, %v1984_v50  ;;  %v1992_v4 = vsel %vm1990_vm5, %v1980_v56, 2102212464  ;;  %v1995_v10 = vsel %vm1987_vm1, %v1974_v14, %v1977_v38  ;;  %v1996_v34 = vsel %vm1990_vm5, %v1983_v11, 920167782 }
 0x292   : > { %v1729_v59 = vmul.f32 %v1728_v46, %v1726_v42  ;;  %v1506_v6 = vsub.s32 0, %v4557_v5  ;;  %v1993_v61 = vsel %vm1989_vm11, %v1977_v38, %v1992_v4  ;;  %v1997_v41 = vsel %vm1989_vm11, %v1980_v56, %v1996_v34 }
 0x293   : > { %v1998_v3 = vsel %vm1988_vm2, %v1995_v10, %v1997_v41  ;;  %v1999_v51 = vsel %vm1987_vm1, %v1977_v38, %v1980_v56  ;;  %v2000_v21 = vsel %vm1990_vm5, %v1986_v29, 1326507024  ;;  %v1752_v8 = vand.u32 2139095040, %v4511_v57  ;;  %v3278_v10 = vld [vmem:[%s5323_s4] ss:$0 sm:$0xff] }
 0x294   : > { %v1425_v46 = vsel %vm4534_vm10, %v4084_v63, %v4515_v1  ;;  %v5445_v54 = vand.u32 2147483647, %v4205_v35  ;;  %v5446_v36 = vmov 0  ;;  %v2872_v17 = vmin.u32 %v1506_v6, %v4557_v5 }
 0x295   : > { %v1994_v33 = vsel %vm1988_vm2, %v1991_v62, %v1993_v61  ;;  %v2001_v14 = vsel %vm1989_vm11, %v1983_v11, %v2000_v21  ;;  %v1730_v38 = vxor.u32 2147483648, %v1729_v59  ;;  %v5374_v4 = vand.u32 2147483647, %v4511_v57 }
 0x296   : > { %vm4580_vm8 = vcmp.le.f32.partialorder %v5445_v54, 0.7853982  ;;  %v2002_v56 = vsel %vm1988_vm2, %v1999_v51, %v2001_v14  ;;  %v4592_v1 = vmul.u32.u64.low %v4522_v58, %v1998_v3  ;;  %v4593_v50 = vmul.u32.u64.high %v4522_v58, %v1998_v3, %v4592_v1 }
 0x297   : > { %v5447_v36 = vsel %vm4580_vm8, 4294967295, %v5446_v36  ;;  %v1508_v13 = vclz %v2872_v17  ;;  %v4597_v42 = vmul.u32.u64.low %v4522_v58, %v2002_v56  ;;  %v4598_v29 = vmul.u32.u64.high %v4522_v58, %v2002_v56, %v4597_v42 }
 0x298   : > { %5448 = vst [vmem:[#allocation28_spill] sm:$0xff] %v5447_v36  ;;  %v5449_v62 = vxor.u32 2147483648, %v4407_v32  ;;  %v1753_v48 = vshrl.u32 %v1752_v8, 23  ;;  %v4613_v34 = vadd.f32 %v3278_v10, %v4004_v0  ;;  %v2010_v61 = vmul.u32 %v4522_v58, %v1994_v33 }
 0x299   : > { %v2873_v6 = vadd.s32 4294967294, %v1508_v13  ;;  %v4618_v41 = vadd.f32 %v3278_v10, %v4109_v23  ;;  %3237 = vcosq.f32 %v1425_v46  ;;  %v2013_v3 = vadd.s32 1, %v4593_v50 }
 0x29a   : > { %v4606_v11 = vsel %vm5386_vm15, %v5449_v62, %v4407_v32  ;;  %v1731_v32 = vsel %vm5385_vm0, %v1730_v38, %v1729_v59  ;;  %v2883_v51 = vadd.s32 4294967169, %v1753_v48  ;;  %vm2012_vm11 = vc.u32 %v4598_v29, %v4592_v1 }
 0x29b   : > { %vm2874_vm5 = vcmp.lt.s32.totalorder %v2873_v6, 0  ;;  %v4627_v0 = vand.u32 8388607, %v5374_v4  ;;  %v5373_v55 = vand.u32 2147483647, %v4613_v34  ;;  %v2014_v23 = vsel %vm2012_vm11, %v2013_v3, %v4593_v50 }
 0x29c   : > { %v1511_v58 = vsel %vm2874_vm5, 0, %v2873_v6  ;;  %v1759_v21 = vadd.s32 1, %v2883_v51  ;;  %v2061_v8 = vand.u32 2139095040, %v4613_v34  ;;  %v1496_v59 = vadd.s32 %v4490_v2, %v4498_v45 }
 0x29d   : > { %v1512_v54 = vsub.s32 32, %v1511_v58  ;;  %v1516_v17 = vsub.s32 4294967266, %v1511_v58  ;;  %v2015_v33 = vadd.s32 %v2014_v23, %v2010_v61  ;;  %3239 = vsinq.f32 %v1425_v46 }
 0x29e   : > { %v4637_v14 = vsel %vm4580_vm8, %v4205_v35, %v1731_v32  ;;  %v1513_v38 = vshll.u32 %v4557_v5, %v1511_v58  ;;  %vm1760_vm1 = vcmp.gt.s32.totalorder %v1759_v21, 0  ;;  %v1757_v62 = vor.u32 8388608, %v4627_v0  ;;  %v4647_v32 = vpop.eup %3233 }
 0x29f   : > { %v1514_v56 = vshrl.u32 %v1496_v59, %v1512_v54  ;;  %v1517_v50 = vadd.s32 127, %v1516_v17  ;;  %v2016_v13 = vadd.s32 536870912, %v2015_v33  ;;  %v1761_v42 = vsel %vm1760_vm1, %v1759_v21, 0  ;;  %5451 = vst [vmem:[#allocation30_spill] sm:$0xff] %v4647_v32  ;;  %v4652_v58 = vpop.eup %3235 }
 0x2a0   : > { %v1763_v48 = vand.u32 31, %v1761_v42  ;;  %v2062_v2 = vshrl.u32 %v2061_v8, 23  ;;  %v4643_v45 = vand.u32 8388607, %v5373_v55  ;;  %v1762_v61 = vshrl.u32 %v1761_v42, 5  ;;  %5452 = vst [vmem:[#allocation31_spill] sm:$0xff] %v4652_v58 }
 0x2a1   : > { %v1515_v46 = vor.u32 %v1514_v56, %v1513_v38  ;;  %v1518_v10 = vshll.u32 %v1517_v50, 23  ;;  %v4645_v6 = vshrl.u32 %v2016_v13, 30  ;;  %vm5387_vm2 = vcmp.lt.s32.totalorder %v4245_v30, 0 }
 0x2a2   : > { %v1764_v5 = vsub.s32 32, %v1763_v48  ;;  %v1766_v3 = vshll.u32 %v5418_v24, %v1763_v48  ;;  %v1769_v51 = vshll.u32 %v5419_v12, %v1763_v48  ;;  %v1772_v0 = vshll.u32 %v5420_v28, %v1763_v48 }
 0x2a3   : > { %5450 = vst [vmem:[#allocation29_spill] sm:$0xff] %v4645_v6  ;;  %v1519_v23 = vor.u32 4788187, %v1518_v10  ;;  %v1522_v21 = vcvt.s32.f32 %v1515_v46  ;;  %v2018_v8 = vshll.u32 %v4645_v6, 30  ;;  %v1775_v59 = vshll.u32 %v5421_v27, %v1763_v48  ;;  %v4656_v54 = vpop.eup %3237 }
 0x2a4   : > { %5453 = vst [vmem:[#allocation32_spill] sm:$0xff] %v4656_v54  ;;  %v1765_v17 = vshrl.u32 %v5418_v24, %v1764_v5  ;;  %v1767_v38 = vshrl.u32 %v5419_v12, %v1764_v5  ;;  %v1770_v56 = vshrl.u32 %v5420_v28, %v1764_v5  ;;  %v1773_v50 = vshrl.u32 %v5421_v27, %v1764_v5 }
 0x2a5   : > { %v1520_v13 = vand.u32 2147483647, %v1519_v23  ;;  %v4663_v42 = vsub.s32 %v2015_v33, %v2018_v8  ;;  %v1776_v46 = vshrl.u32 %v5422_v15, %v1764_v5  ;;  %v1778_v10 = vshll.u32 %v5422_v15, %v1763_v48 }
 0x2a6   : > { %v1768_v55 = vor.u32 %v1767_v38, %v1766_v3  ;;  %v1771_v4 = vor.u32 %v1770_v56, %v1769_v51  ;;  %v1774_v6 = vor.u32 %v1773_v50, %v1772_v0  ;;  %v1779_v36 = vshrl.u32 %v5425_v20, %v1764_v5 }
 0x2a7   : > { %v1523_v35 = vmul.f32 %v1522_v21, %v1520_v13  ;;  %v2021_v32 = vsub.s32 0, %v4663_v42  ;;  %v1777_v58 = vor.u32 %v1776_v46, %v1775_v59  ;;  %vm1781_vm5 = vcmp.lt.s32.totalorder %v1762_v61, 1  ;;  %v4669_v25 = vpop.eup %3239 }
 0x2a8   : > { %v1780_v54 = vor.u32 %v1779_v36, %v1778_v10  ;;  %vm1783_vm11 = vcmp.lt.s32.totalorder %v1762_v61, 3  ;;  %vm1784_vm1 = vcmp.lt.s32.totalorder %v1762_v61, 4  ;;  %v2895_v33 = vadd.s32 4294967169, %v2062_v2 }
 0x2a9   : > { %v5454_v23 = vand.u32 2147483647, %v4245_v30  ;;  %v1524_v3 = vxor.u32 2147483648, %v1523_v35  ;;  %v2892_v5 = vmin.u32 %v2021_v32, %v4663_v42  ;;  %vm1782_vm15 = vcmp.lt.s32.totalorder %v1762_v61, 2 }
 0x2aa   : > { %v1786_v51 = vsel %vm1784_vm1, %v1774_v6, 2102212464  ;;  %v1785_v0 = vsel %vm1781_vm5, %v1765_v17, %v1768_v55  ;;  %v1789_v21 = vsel %vm1781_vm5, %v1768_v55, %v1771_v4  ;;  %v1790_v36 = vsel %vm1784_vm1, %v1777_v58, 920167782 }
 0x2ab   : > { %vm4673_vm0 = vcmp.le.f32.partialorder %v5454_v23, 0.7853982  ;;  %v1797_v8 = vshll.u32 %v1757_v62, 8  ;;  %v2023_v2 = vclz %v2892_v5  ;;  %v1787_v59 = vsel %vm1783_vm11, %v1771_v4, %v1786_v51 }
 0x2ac   : > { %v1791_v38 = vsel %vm1783_vm11, %v1774_v6, %v1790_v36  ;;  %v1793_v56 = vsel %vm1781_vm5, %v1771_v4, %v1774_v6  ;;  %v2011_v32 = vadd.s32 %v4592_v1, %v4598_v29  ;;  %v1794_v13 = vsel %vm1784_vm1, %v1780_v54, 1326507024 }
 0x2ad   : > { %v1792_v50 = vsel %vm1782_vm15, %v1789_v21, %v1791_v38  ;;  %v2066_v17 = vor.u32 8388608, %v4643_v45  ;;  %v1525_v55 = vsel %vm5387_vm2, %v1524_v3, %v1523_v35  ;;  %v2893_v62 = vadd.s32 4294967294, %v2023_v2 }
 0x2ae   : > { %v1795_v46 = vsel %vm1783_vm11, %v1777_v58, %v1794_v13  ;;  %v2068_v10 = vadd.s32 1, %v2895_v33  ;;  %v1788_v23 = vsel %vm1782_vm15, %v1785_v0, %v1787_v59  ;;  %3241 = vcosq.f32 %v4637_v14 }
 0x2af   : > { %v1796_v4 = vsel %vm1782_vm15, %v1793_v56, %v1795_v46  ;;  %v4695_v6 = vmul.u32.u64.low %v1797_v8, %v1792_v50  ;;  %v4696_v5 = vmul.u32.u64.high %v1797_v8, %v1792_v50, %v4695_v6  ;;  %vm2894_vm5 = vcmp.lt.s32.totalorder %v2893_v62, 0 }
 0x2b0   : > { %v4699_v1 = vmul.u32.u64.low %v1797_v8, %v1796_v4  ;;  %v4700_v29 = vmul.u32.u64.high %v1797_v8, %v1796_v4, %v4699_v1  ;;  %vm2069_vm1 = vcmp.gt.s32.totalorder %v2068_v10, 0  ;;  %v2026_v35 = vsel %vm2894_vm5, 0, %v2893_v62 }
 0x2b1   : > { %v2070_v45 = vsel %vm2069_vm1, %v2068_v10, 0  ;;  %v5389_v58 = vand.u32 2147483647, %v4618_v41  ;;  %v2027_v54 = vsub.s32 32, %v2026_v35  ;;  %v2028_v33 = vshll.u32 %v4663_v42, %v2026_v35 }
 0x2b2   : > { %v2031_v61 = vsub.s32 4294967266, %v2026_v35  ;;  %v1804_v3 = vmul.u32 %v1797_v8, %v1788_v23  ;;  %v4708_v51 = vsel %vm4673_vm0, %v4245_v30, %v1525_v55  ;;  %v1807_v0 = vadd.s32 1, %v4696_v5 }
 0x2b3   : > { %v2072_v21 = vand.u32 31, %v2070_v45  ;;  %v4711_v36 = vshll.u32 %v2066_v17, 8  ;;  %v2029_v2 = vshrl.u32 %v2011_v32, %v2027_v54  ;;  %vm1806_vm15 = vc.u32 %v4700_v29, %v4695_v6 }
 0x2b4   : > { %v2032_v59 = vadd.s32 127, %v2031_v61  ;;  %v2071_v38 = vshrl.u32 %v2070_v45, 5  ;;  %v1808_v42 = vsel %vm1806_vm15, %v1807_v0, %v4696_v5  ;;  %vm5394_vm11 = vcmp.lt.s32.totalorder %v4296_v44, 0 }
 0x2b5   : > { %v2073_v56 = vsub.s32 32, %v2072_v21  ;;  %v2075_v8 = vshll.u32 %v5418_v24, %v2072_v21  ;;  %v2078_v50 = vshll.u32 %v5419_v12, %v2072_v21  ;;  %v2030_v13 = vor.u32 %v2029_v2, %v2028_v33 }
 0x2b6   : > { %v2033_v55 = vshll.u32 %v2032_v59, 23  ;;  %v1809_v62 = vadd.s32 %v1808_v42, %v1804_v3  ;;  %v2081_v46 = vshll.u32 %v5420_v28, %v2072_v21  ;;  %v2084_v35 = vshll.u32 %v5421_v27, %v2072_v21 }
 0x2b7   : > { %v2074_v32 = vshrl.u32 %v5418_v24, %v2073_v56  ;;  %v2076_v17 = vshrl.u32 %v5419_v12, %v2073_v56  ;;  %v2079_v10 = vshrl.u32 %v5420_v28, %v2073_v56  ;;  %v2082_v23 = vshrl.u32 %v5421_v27, %v2073_v56 }
 0x2b8   : > { %v2034_v4 = vor.u32 4788187, %v2033_v55  ;;  %v2037_v5 = vcvt.s32.f32 %v2030_v13  ;;  %v1810_v1 = vadd.s32 536870912, %v1809_v62  ;;  %v2085_v61 = vshrl.u32 %v5422_v15, %v2073_v56  ;;  %v4736_v55 = vpop.eup %3241 }
 0x2b9   : > { %v2077_v45 = vor.u32 %v2076_v17, %v2075_v8  ;;  %v2080_v54 = vor.u32 %v2079_v10, %v2078_v50  ;;  %v2083_v33 = vor.u32 %v2082_v23, %v2081_v46  ;;  %v5457_v3 = vand.u32 2147483647, %v4296_v44 }
 0x2ba   : > { %v2035_v2 = vand.u32 2147483647, %v2034_v4  ;;  %v4732_v59 = vshrl.u32 %v1810_v1, 30  ;;  %v2087_v42 = vshll.u32 %v5422_v15, %v2072_v21  ;;  %v2088_v13 = vshrl.u32 %v5425_v20, %v2073_v56 }
 0x2bb   : > { %vm4728_vm5 = vcmp.le.f32.partialorder %v5457_v3, 0.7853982  ;;  %v2086_v8 = vor.u32 %v2085_v61, %v2084_v35  ;;  %vm2090_vm1 = vcmp.lt.s32.totalorder %v2071_v38, 1  ;;  %vm2091_vm15 = vcmp.lt.s32.totalorder %v2071_v38, 2 }
 0x2bc   : > { %vm2092_vm2 = vcmp.lt.s32.totalorder %v2071_v38, 3  ;;  %v2038_v50 = vmul.f32 %v2037_v5, %v2035_v2  ;;  %v1812_v46 = vshll.u32 %v4732_v59, 30  ;;  %v2089_v17 = vor.u32 %v2088_v13, %v2087_v42 }
 0x2bd   : > { %vm2093_vm4 = vcmp.lt.s32.totalorder %v2071_v38, 4  ;;  %v2094_v10 = vsel %vm2090_vm1, %v2074_v32, %v2077_v45  ;;  %v2098_v4 = vsel %vm2090_vm1, %v2077_v45, %v2080_v54  ;;  %v2102_v5 = vsel %vm2090_vm1, %v2080_v54, %v2083_v33 }
 0x2be   : > { %v2095_v23 = vsel %vm2093_vm4, %v2083_v33, 2102212464  ;;  %v2099_v1 = vsel %vm2093_vm4, %v2086_v8, 920167782  ;;  %v2039_v21 = vxor.u32 2147483648, %v2038_v50  ;;  %v4741_v3 = vsub.s32 %v1809_v62, %v1812_v46 }
 0x2bf   : > { %v2096_v56 = vsel %vm2092_vm2, %v2080_v54, %v2095_v23  ;;  %v2100_v35 = vsel %vm2092_vm2, %v2083_v33, %v2099_v1  ;;  %v2103_v2 = vsel %vm2093_vm4, %v2089_v17, 1326507024  ;;  %v1855_v42 = vand.u32 2139095040, %v4618_v41 }
 0x2c0   : > { %v2101_v61 = vsel %vm2091_vm15, %v2098_v4, %v2100_v35  ;;  %v2040_v32 = vsel %vm5394_vm11, %v2039_v21, %v2038_v50  ;;  %v1815_v45 = vsub.s32 0, %v4741_v3  ;;  %v2104_v13 = vsel %vm2092_vm2, %v2086_v8, %v2103_v2 }
 0x2c1   : > { %v1859_v62 = vand.u32 8388607, %v5389_v58  ;;  %v2097_v46 = vsel %vm2091_vm15, %v2094_v10, %v2096_v56  ;;  %v2105_v23 = vsel %vm2091_vm15, %v2102_v5, %v2104_v13  ;;  %3243 = vsinq.f32 %v4637_v14 }
 0x2c2   : > { %v4757_v4 = vmul.u32.u64.low %v4711_v36, %v2101_v61  ;;  %v4758_v54 = vmul.u32.u64.high %v4711_v36, %v2101_v61, %v4757_v4  ;;  %v2884_v33 = vmin.u32 %v1815_v45, %v4741_v3  ;;  %3245 = vcosq.f32 %v4708_v51 }
 0x2c3   : > { %v4763_v50 = vmul.u32.u64.low %v4711_v36, %v2105_v23  ;;  %v4764_v17 = vmul.u32.u64.high %v4711_v36, %v2105_v23, %v4763_v50  ;;  %v2043_v8 = vsel %vm4728_vm5, %v4296_v44, %v2040_v32  ;;  %v1856_v38 = vshrl.u32 %v1855_v42, 23 }
 0x2c4   : > { %v599_v10 = vsub.s32 4, %v3660_v40  ;;  %3247 = vsinq.f32 %v4708_v51  ;;  %v1805_v14 = vadd.s32 %v4695_v6, %v4700_v29  ;;  %v1817_v1 = vclz %v2884_v33 }
 0x2c5   : > { %v2113_v21 = vmul.u32 %v4711_v36, %v2097_v46  ;;  %v2116_v56 = vadd.s32 1, %v4758_v54  ;;  %v2887_v35 = vadd.s32 4294967169, %v1856_v38  ;;  %v1860_v61 = vor.u32 8388608, %v1859_v62 }
 0x2c6   : > { %v600_v5 = vsel %vm515_vm13, %v599_v10, %v3660_v40  ;;  %3249 = vcosq.f32 %v2043_v8  ;;  %v2885_v2 = vadd.s32 4294967294, %v1817_v1  ;;  %vm2115_vm4 = vc.u32 %v4764_v17, %v4757_v4 }
 0x2c7   : > { %v602_v51 = vsel %vm3995_vm3, 0, %v600_v5  ;;  %3251 = vsinq.f32 %v2043_v8  ;;  %v2117_v6 = vsel %vm2115_vm4, %v2116_v56, %v4758_v54  ;;  %v1862_v29 = vadd.s32 1, %v2887_v35 }
 0x2c8   : > { %v4783_v36 = vand.u32 3, %v602_v51  ;;  %vm2886_vm2 = vcmp.lt.s32.totalorder %v2885_v2, 0  ;;  %v2118_v42 = vadd.s32 %v2117_v6, %v2113_v21  ;;  %v609_v32 = vxor.u32 2147483648, %v4115_v26 }
 0x2c9   : > { %v612_v45 = vxor.u32 2147483648, %v4111_v19  ;;  %v1820_v40 = vsel %vm2886_vm2, 0, %v2885_v2  ;;  %vm1863_vm13 = vcmp.gt.s32.totalorder %v1862_v29, 0  ;;  %v4787_v13 = vshll.u32 %v1860_v61, 8 }
 0x2ca   : > { %v702_v62 = vsub.s32 4, %v3843_v31  ;;  %v1821_v49 = vsub.s32 32, %v1820_v40  ;;  %v1822_v46 = vshll.u32 %v4741_v3, %v1820_v40  ;;  %v1825_v23 = vsub.s32 4294967266, %v1820_v40 }
 0x2cb   : > { %v2119_v54 = vadd.s32 536870912, %v2118_v42  ;;  %v4792_v33 = vadd.s32 %v4757_v4, %v4764_v17  ;;  %v1864_v50 = vsel %vm1863_vm13, %v1862_v29, 0  ;;  %vm608_vm3 = vcmp.eq.s32.totalorder %v4783_v36, 0  ;;  %v4796_v8 = vpop.eup %3243 }
 0x2cc   : > { %vm611_vm1 = vcmp.eq.s32.totalorder %v4783_v36, 2  ;;  %v1823_v38 = vshrl.u32 %v1805_v14, %v1821_v49  ;;  %v1826_v10 = vadd.s32 127, %v1825_v23  ;;  %v4800_v21 = vshrl.u32 %v1864_v50, 5  ;;  %v4802_v56 = vpop.eup %3245 }
 0x2cd   : > { %v4798_v1 = vshrl.u32 %v2119_v54, 30  ;;  %v1866_v3 = vand.u32 31, %v1864_v50  ;;  %v610_v35 = vsel %vm608_vm3, %v4111_v19, %v609_v32  ;;  %v613_v4 = vsel %vm611_vm1, %v612_v45, %v4115_v26 }
 0x2ce   : > { %v4809_v17 = vsel %vm618_vm7, %v702_v62, %v3843_v31  ;;  %v4811_v61 = vpop.eup %3247  ;;  %v1824_v14 = vor.u32 %v1823_v38, %v1822_v46  ;;  %v1827_v5 = vshll.u32 %v1826_v10, 23  ;;  %vm1884_vm15 = vcmp.lt.s32.totalorder %v4800_v21, 1 }
 0x2cf   : > { %v2121_v2 = vshll.u32 %v4798_v1, 30  ;;  %vm5396_vm4 = vcmp.lt.s32.totalorder %v4511_v57, 0  ;;  %v1867_v51 = vsub.s32 32, %v1866_v3  ;;  %v1869_v19 = vshll.u32 %v5418_v24, %v1866_v3 }
 0x2d0   : > { %v1872_v26 = vshll.u32 %v5419_v12, %v1866_v3  ;;  %v1875_v6 = vshll.u32 %v5420_v28, %v1866_v3  ;;  %v4819_v29 = vpop.eup %3249  ;;  %v1828_v31 = vor.u32 4788187, %v1827_v5  ;;  %v1831_v32 = vcvt.s32.f32 %v1824_v14 }
 0x2d1   : > { %v4821_v45 = vsub.s32 %v2118_v42, %v2121_v2  ;;  %v1878_v40 = vshll.u32 %v5421_v27, %v1866_v3  ;;  %v4824_v62 = vpop.eup %3251  ;;  %v1868_v49 = vshrl.u32 %v5418_v24, %v1867_v51  ;;  %v1870_v46 = vshrl.u32 %v5419_v12, %v1867_v51 }
 0x2d2   : > { %v1873_v23 = vshrl.u32 %v5420_v28, %v1867_v51  ;;  %v1876_v54 = vshrl.u32 %v5421_v27, %v1867_v51  ;;  %v5460_v50 = vand.u32 2147483647, %v4511_v57  ;;  %v1829_v42 = vand.u32 2147483647, %v1828_v31 }
 0x2d3   : > { %v2124_v10 = vsub.s32 0, %v4821_v45  ;;  %v1879_v14 = vshrl.u32 %v5422_v15, %v1867_v51  ;;  %v1881_v5 = vshll.u32 %v5422_v15, %v1866_v3  ;;  %v1871_v2 = vor.u32 %v1870_v46, %v1869_v19 }
 0x2d4   : > { %vm4832_vm7 = vcmp.le.f32.partialorder %v5460_v50, 0.7853982  ;;  %v1874_v58 = vor.u32 %v1873_v23, %v1872_v26  ;;  %v1877_v12 = vor.u32 %v1876_v54, %v1875_v6  ;;  %v1882_v28 = vshrl.u32 %v5425_v20, %v1867_v51 }
 0x2d5   : > { %vm605_vm2 = vweird.f32 %v3530_v43  ;;  %v1832_v27 = vmul.f32 %v1831_v32, %v1829_v42  ;;  %v2896_v50 = vmin.u32 %v2124_v10, %v4821_v45  ;;  %v1880_v24 = vor.u32 %v1879_v14, %v1878_v40  ;;  %v5463_v42 = vld [vmem:[#allocation23_spill] sm:$0xff] }
 0x2d6   : > { %vm1885_vm13 = vcmp.lt.s32.totalorder %v4800_v21, 2  ;;  %v1883_v31 = vor.u32 %v1882_v28, %v1881_v5  ;;  %vm1886_vm3 = vcmp.lt.s32.totalorder %v4800_v21, 3  ;;  %vm1887_vm1 = vcmp.lt.s32.totalorder %v4800_v21, 4 }
 0x2d7   : > { %v1888_v3 = vsel %vm1884_vm15, %v1868_v49, %v1871_v2  ;;  %v1833_v19 = vxor.u32 2147483648, %v1832_v27  ;;  %v2126_v26 = vclz %v2896_v50  ;;  %v1889_v6 = vsel %vm1887_vm1, %v1877_v12, 2102212464 }
 0x2d8   : > { %v1892_v51 = vsel %vm1884_vm15, %v1871_v2, %v1874_v58  ;;  %v1890_v32 = vsel %vm1886_vm3, %v1874_v58, %v1889_v6  ;;  %v1893_v40 = vsel %vm1887_vm1, %v1880_v24, 920167782  ;;  %v1896_v28 = vsel %vm1884_vm15, %v1874_v58, %v1877_v12 }
 0x2d9   : > { %v1897_v46 = vsel %vm1887_vm1, %v1883_v31, 1326507024  ;;  %v1834_v23 = vsel %vm5396_vm4, %v1833_v19, %v1832_v27  ;;  %v2897_v54 = vadd.s32 4294967294, %v2126_v26  ;;  %v1894_v49 = vsel %vm1886_vm3, %v1877_v12, %v1893_v40 }
 0x2da   : > { %v712_v10 = vxor.u32 2147483648, %v5463_v42  ;;  %v1891_v14 = vsel %vm1885_vm13, %v1888_v3, %v1890_v32  ;;  %v1898_v5 = vsel %vm1886_vm3, %v1880_v24, %v1897_v46  ;;  %vm607_vm11 = vcmp.lt.s32.totalorder %v4783_v36, 2 }
 0x2db   : > { %v705_v2 = vsel %vm4027_vm6, 0, %v4809_v17  ;;  %vm2898_vm15 = vcmp.lt.s32.totalorder %v2897_v54, 0  ;;  %v1895_v27 = vsel %vm1885_vm13, %v1892_v51, %v1894_v49  ;;  %v1899_v12 = vsel %vm1885_vm13, %v1896_v28, %v1898_v5  ;;  %v5465_v51 = vld [vmem:[#allocation19_spill] sm:$0xff] }
 0x2dc   : > { %v614_v50 = vsel %vm607_vm11, %v610_v35, %v613_v4  ;;  %vm708_vm1 = vweird.f32 %v3554_v9  ;;  %v1837_v24 = vsel %vm4832_vm7, %v4511_v57, %v1834_v23  ;;  %v2129_v31 = vsel %vm2898_vm15, 0, %v2897_v54 }
 0x2dd   : > { %v4875_v36 = vmul.u32.u64.low %v4787_v13, %v1899_v12  ;;  %v4876_v3 = vmul.u32.u64.high %v4787_v13, %v1899_v12, %v4875_v36  ;;  %v2130_v17 = vsub.s32 32, %v2129_v31  ;;  %v2131_v19 = vshll.u32 %v4821_v45, %v2129_v31 }
 0x2de   : > { %v2134_v26 = vsub.s32 4294967266, %v2129_v31  ;;  %v615_v21 = vsel %vm605_vm2, nan, %v614_v50  ;;  %v4882_v35 = vmul.u32.u64.low %v4787_v13, %v1895_v27  ;;  %v4883_v4 = vmul.u32.u64.high %v4787_v13, %v1895_v27, %v4882_v35  ;;  %v5470_v50 = vld [vmem:[#allocation13_spill] sm:$0xff] }
 0x2df   : > { %v709_v6 = vand.u32 3, %v705_v2  ;;  %v715_v32 = vxor.u32 2147483648, %v5465_v51  ;;  %v2132_v40 = vshrl.u32 %v4792_v33, %v2130_v17  ;;  %v1907_v46 = vmul.u32 %v4787_v13, %v1891_v14  ;;  %v5466_v14 = vld [vmem:[#allocation16_spill] sm:$0xff] }
 0x2e0   : > { %v2135_v28 = vadd.s32 127, %v2134_v26  ;;  %3253 = vcosq.f32 %v1837_v24  ;;  %vm1909_vm6 = vc.u32 %v4876_v3, %v4882_v35  ;;  %v4891_v43 = vmul.f32 0.125, %v615_v21 }
 0x2e1   : > { %vm711_vm11 = vcmp.eq.s32.totalorder %v709_v6, 0  ;;  %v3381_v45 = vmov 0.0   ;;  %v2133_v23 = vor.u32 %v2132_v40, %v2131_v19  ;;  %vm714_vm2 = vcmp.eq.s32.totalorder %v709_v6, 2  ;;  %v5485_v40 = vld [vmem:[#allocation17_spill] sm:$0xff] }
 0x2e2   : > { %353 = vst [vmem:[#allocation3] sm:$0x1] %v3381_v45  ;;  %354 = vst [vmem:[#allocation4] sm:$0x1] %v3381_v45  ;;  %3032 = vmatprep.subr.bf16.mxu0 %v3381_v45  ;;  %v2136_v54 = vshll.u32 %v2135_v28, 23  ;;  %v713_v49 = vsel %vm711_vm11, %v5465_v51, %v712_v10  ;;  %v1910_v33 = vadd.s32 1, %v4883_v4  ;;  %v716_v13 = vsel %vm714_vm2, %v715_v32, %v5463_v42 }
 0x2e3   : > { %vm710_vm13 = vcmp.lt.s32.totalorder %v709_v6, 2  ;;  %v4897_v5 = vmul.f32 0.125, %v5466_v14  ;;  %v5467_v27 = vand.u32 2147483647, %v3821_v16  ;;  %v1011_v31 = vsub.s32 4, %v5470_v50  ;;  %v5472_v51 = vld [vmem:[#allocation11_spill] sm:$0xff] }
 0x2e4   : > { %v2137_v58 = vor.u32 4788187, %v2136_v54  ;;  %v717_v2 = vsel %vm710_vm13, %v713_v49, %v716_v13  ;;  %v2140_v10 = vcvt.s32.f32 %v2133_v23  ;;  %v1911_v36 = vsel %vm1909_vm6, %v1910_v33, %v4883_v4  ;;  %v5476_v49 = vld [vmem:[#allocation20_spill] sm:$0xff] }
 0x2e5   : > { %vm4901_vm3 = vcmp.le.f32.partialorder %v5467_v27, 0.7853982  ;;  %v718_v42 = vsel %vm708_vm1, nan, %v717_v2  ;;  %v1912_v26 = vadd.s32 %v1911_v36, %v1907_v46  ;;  %vm5471_vm15 = vcmp.lt.s32.totalorder %v3821_v16, 0 }
 0x2e6   : > { %v1013_v17 = vsel %vm4901_vm3, %v3821_v16, %v4397_v60  ;;  %v2138_v19 = vand.u32 2147483647, %v2137_v58  ;;  %v4916_v21 = vmul.f32 0.125, %v718_v42  ;;  %v1012_v6 = vsel %vm5471_vm15, %v1011_v31, %v5470_v50 }
 0x2e7   : > { %v4922_v32 = vmul.f32 0.125, %v5472_v51  ;;  %v1014_v9 = vsel %vm4901_vm3, 0, %v1012_v6  ;;  %3255 = vcosq.f32 %v1013_v17  ;;  %v5473_v4 = vand.u32 2147483647, %v3954_v47 }
 0x2e8   : > { %v2141_v60 = vmul.f32 %v2140_v10, %v2138_v19  ;;  %v1913_v28 = vadd.s32 536870912, %v1912_v26  ;;  %v2177_v46 = vpack.c.bf16 %v4916_v21, %v4891_v43  ;;  %3257 = vsinq.f32 %v1013_v17  ;;  %v5481_v10 = vld [vmem:[#allocation10_spill] sm:$0xff]  ;;  %v5482_v19 = vld [vmem:[#allocation12_spill] sm:$0xff] }
 0x2e9   : > { %vm4928_vm1 = vcmp.le.f32.partialorder %v5473_v4, 0.7853982  ;;  %v2178_v23 = vpack.c.bf16 %v4897_v5, %v4922_v32  ;;  %v4936_v54 = vand.u32 3, %v1014_v9  ;;  %v1114_v33 = vsub.s32 4, %v5476_v49 }
 0x2ea   : > { %v1116_v13 = vsel %vm4928_vm1, %v3954_v47, %v4606_v11  ;;  %v2142_v14 = vxor.u32 2147483648, %v2141_v60  ;;  %v4943_v58 = vshrl.u32 %v1913_v28, 30  ;;  %3016 = vmatprep.mubr.bf16.mxu0 %v2177_v46  ;;  %v4945_v2 = vpop.eup %3253  ;;  %v5477_v27 = vand.u32 2147483647, %v4613_v34 }
 0x2eb   : > { %3259 = vcosq.f32 %v1116_v13  ;;  %vm5395_vm11 = vcmp.lt.s32.totalorder %v4613_v34, 0  ;;  %3017 = vmatmul.mubr.bf16.vlgmr.msra.gmra.mrb[16].mxu0 %v2178_v23  ;;  %vm5480_vm2 = vcmp.lt.s32.totalorder %v3954_v47, 0  ;;  %vm3382_vm13 = vmmov 0  }
 0x2ec   : > { %3261 = vsinq.f32 %v1837_v24  ;;  %vm4949_vm6 = vcmp.le.f32.partialorder %v5477_v27, 0.7853982  ;;  %v1115_v11 = vsel %vm5480_vm2, %v1114_v33, %v5476_v49  ;;  %v2143_v50 = vsel %vm5395_vm11, %v2142_v14, %v2141_v60  ;;  %3033 = vmatpush3.bf16.msra.mxu0 %v5481_v10  ;;  %3034 = vmatprep.mubr.msk.bf16.mxu0 %vm3382_vm13, %v3381_v45  ;;  %v2541_v45 = vld [vmem:[%s5325_s6] sm:$0x1] }
 0x2ed   : > { %v1915_v31 = vshll.u32 %v4943_v58, 30  ;;  %v1117_v24 = vsel %vm4928_vm1, 0, %v1115_v11  ;;  %3263 = vsinq.f32 %v1116_v13  ;;  %v4966_v36 = vsel %vm4949_vm6, %v4613_v34, %v2143_v50 }
 0x2ee   : > { %v4970_v42 = vadd.s32 %v4882_v35, %v4876_v3  ;;  %v4972_v17 = vand.u32 3, %v1117_v24  ;;  %v1217_v6 = vsub.s32 4, %v5482_v19  ;;  %vm1020_vm1 = vcmp.eq.s32.totalorder %v4936_v54, 0  ;;  %v5483_v3 = vld [vmem:[#allocation9_spill] sm:$0xff] }
 0x2ef   : > { %v4975_v51 = vsub.s32 %v1912_v26, %v1915_v31  ;;  %vm1023_vm2 = vcmp.eq.s32.totalorder %v4936_v54, 2  ;;  %v1227_v35 = vxor.u32 2147483648, %v4255_v37  ;;  %v1230_v9 = vxor.u32 2147483648, %v4248_v7 }
 0x2f0   : > { %3265 = vsinq.f32 %v4966_v36  ;;  %vm5484_vm11 = vcmp.lt.s32.totalorder %v5483_v3, 0  ;;  %v1320_v60 = vsub.s32 4, %v5485_v40  ;;  %vm1126_vm13 = vcmp.eq.s32.totalorder %v4972_v17, 2 }
 0x2f1   : > { %v1918_v26 = vsub.s32 0, %v4975_v51  ;;  %v1218_v4 = vsel %vm5484_vm11, %v1217_v6, %v5482_v19  ;;  %v3256_v28 = vpop.eup %3255  ;;  %v2542_v49 = vpack.c.bf16 %v2541_v45, %v2541_v45  ;;  %vm5487_vm11 = vcmp.lt.s32.totalorder %v3877_v53, 0 }
 0x2f2   : > { %v1220_v23 = vsel %vm4103_vm12, 0, %v1218_v4  ;;  %v3258_v33 = vpop.eup %3257  ;;  %v1024_v14 = vxor.u32 2147483648, %v3256_v28  ;;  %v1321_v11 = vsel %vm5487_vm11, %v1320_v60, %v5485_v40  ;;  %v1330_v10 = vxor.u32 2147483648, %v4547_v22 }
 0x2f3   : > { %v2888_v13 = vmin.u32 %v1918_v26, %v4975_v51  ;;  %v1224_v27 = vand.u32 3, %v1220_v23  ;;  %v1021_v50 = vxor.u32 2147483648, %v3258_v33  ;;  %v1323_v31 = vsel %vm4335_vm9, 0, %v1321_v11 }
 0x2f4   : > { %v1333_v24 = vxor.u32 2147483648, %v4542_v52  ;;  %vm5488_vm12 = vcmask 64512   ;;  %v1025_v45 = vsel %vm1023_vm2, %v1024_v14, %v3258_v33  ;;  %vm1326_vm3 = vweird.f32 %v3877_v53 }
 0x2f5   : > { %3035 = vmatmul.mubr.msk.bf16.vlgmr.msra.gmra.mrb[20].mxu0 %vm5488_vm12, %v2542_v49  ;;  %v3260_v19 = vpop.eup %3259  ;;  %v1920_v6 = vclz %v2888_v13  ;;  %vm1225_vm15 = vcmp.lt.s32.totalorder %v1224_v27, 2  ;;  %vm1226_vm4 = vcmp.eq.s32.totalorder %v1224_v27, 0  ;;  %v1022_v39 = vsel %vm1020_vm1, %v3256_v28, %v1021_v50 }
 0x2f6   : > { %v5011_v26 = vpop.eup %3261  ;;  %v1127_v4 = vxor.u32 2147483648, %v3260_v19  ;;  %v1228_v40 = vsel %vm1226_vm4, %v4248_v7, %v1227_v35  ;;  %vm1229_vm9 = vcmp.eq.s32.totalorder %v1224_v27, 2  ;;  %vm5489_vm11 = vcmp.lt.s32.totalorder %v4936_v54, 2  ;;  %v5492_v54 = vld [vmem:[#allocation24_spill] sm:$0xff] }
 0x2f7   : > { %v3264_v60 = vpop.eup %3263  ;;  %v2889_v46 = vadd.s32 4294967294, %v1920_v6  ;;  %v1026_v23 = vsel %vm5489_vm11, %v1022_v39, %v1025_v45  ;;  %v1231_v49 = vsel %vm1229_vm9, %v1230_v9, %v4255_v37  ;;  %v1327_v33 = vand.u32 3, %v1323_v31 }
 0x2f8   : > { %vm5490_vm2 = vweird.f32 %v3821_v16  ;;  %v1124_v14 = vxor.u32 2147483648, %v3264_v60  ;;  %v1128_v11 = vsel %vm1126_vm13, %v1127_v4, %v3264_v60  ;;  %v1232_v28 = vsel %vm1225_vm15, %v1228_v40, %v1231_v49 }
 0x2f9   : > { %v1027_v13 = vsel %vm5490_vm2, nan, %v1026_v23  ;;  %vm2890_vm1 = vcmp.lt.s32.totalorder %v2889_v46, 0  ;;  %vm5491_vm4 = vweird.f32 %v5483_v3  ;;  %v1423_v50 = vsub.s32 4, %v5492_v54 }
 0x2fa   : > { %v5024_v7 = vmul.f32 0.125, %v1027_v13  ;;  %v1233_v35 = vsel %vm5491_vm4, nan, %v1232_v28  ;;  %v1923_v6 = vsel %vm2890_vm1, 0, %v2889_v46  ;;  %vm5493_vm12 = vcmp.eq.s32.totalorder %v4972_v17, 0  ;;  %v5031_v16 = vpop.eup %3265 }
 0x2fb   : > { %v1125_v37 = vsel %vm5493_vm12, %v3260_v19, %v1124_v14  ;;  %vm1328_vm9 = vcmp.lt.s32.totalorder %v1327_v33, 2  ;;  %vm1329_vm11 = vcmp.eq.s32.totalorder %v1327_v33, 0  ;;  %v1924_v9 = vsub.s32 32, %v1923_v6 }
 0x2fc   : > { %v1928_v31 = vsub.s32 4294967266, %v1923_v6  ;;  %vm5494_vm15 = vcmp.lt.s32.totalorder %v4972_v17, 2  ;;  %vm1332_vm13 = vcmp.eq.s32.totalorder %v1327_v33, 2  ;;  %v1925_v45 = vshll.u32 %v4975_v51, %v1923_v6  ;;  %v5498_v33 = vld [vmem:[#allocation27_spill] sm:$0xff] }
 0x2fd   : > { %v1129_v27 = vsel %vm5494_vm15, %v1125_v37, %v1128_v11  ;;  %vm5495_vm2 = vweird.f32 %v3954_v47  ;;  %v1331_v39 = vsel %vm1329_vm11, %v4542_v52, %v1330_v10  ;;  %v1334_v4 = vsel %vm1332_vm13, %v1333_v24, %v4547_v22  ;;  %v5497_v24 = vld [vmem:[#allocation32_spill] sm:$0xff] }
 0x2fe   : > { %v1130_v3 = vsel %vm5495_vm2, nan, %v1129_v27  ;;  %v1926_v19 = vshrl.u32 %v4970_v42, %v1924_v9  ;;  %v1929_v40 = vadd.s32 127, %v1928_v31  ;;  %v1335_v46 = vsel %vm1328_vm9, %v1331_v39, %v1334_v4  ;;  %v5503_v9 = vld [vmem:[#allocation22_spill] sm:$0xff] }
 0x2ff   : > { %v5041_v60 = vmul.f32 0.125, %v1130_v3  ;;  %v1336_v17 = vsel %vm1326_vm3, nan, %v1335_v46  ;;  %v5045_v23 = vmul.f32 0.125, %v1233_v35  ;;  %vm5496_vm1 = vcmp.lt.s32.totalorder %v4084_v63, 0 }
 0x300   : > { %v1424_v47 = vsel %vm5496_vm1, %v1423_v50, %v5492_v54  ;;  %vm1429_vm4 = vweird.f32 %v4084_v63  ;;  %v1927_v52 = vor.u32 %v1926_v19, %v1925_v45  ;;  %v1930_v51 = vshll.u32 %v1929_v40, 23  ;;  %v5504_v45 = vld [vmem:[#allocation15_spill] sm:$0xff] }
 0x301   : > { %v2179_v22 = vpack.c.bf16 %v5041_v60, %v5024_v7  ;;  %v5053_v42 = vmul.f32 0.125, %v1336_v17  ;;  %vm1854_vm12 = vcmp.lt.s32.totalorder %v4618_v41, 0  ;;  %v1426_v53 = vsel %vm4534_vm10, 0, %v1424_v47 }
 0x302   : > { %v1433_v10 = vxor.u32 2147483648, %v4669_v25  ;;  %v1436_v49 = vxor.u32 2147483648, %v5497_v24  ;;  %v1526_v13 = vsub.s32 4, %v5498_v33  ;;  %v5499_v14 = vand.u32 2147483647, %v4618_v41 }
 0x303   : > { %v1931_v28 = vor.u32 4788187, %v1930_v51  ;;  %3020 = vmatprep.mubr.bf16.mxu1 %v2179_v22  ;;  %v2180_v35 = vpack.c.bf16 %v5053_v42, %v5045_v23  ;;  %v1430_v54 = vand.u32 3, %v1426_v53  ;;  %vm1532_vm10 = vweird.f32 %v4245_v30  ;;  %v5507_v53 = vld [vmem:[#allocation31_spill] sm:$0xff] }
 0x304   : > { %vm5063_vm3 = vcmp.le.f32.partialorder %v5499_v14, 0.7853982  ;;  %v1536_v18 = vxor.u32 2147483648, %v4811_v61  ;;  %v1934_v50 = vcvt.s32.f32 %v1927_v52  ;;  %vm5502_vm9 = vcmp.lt.s32.totalorder %v4245_v30, 0 }
 0x305   : > { %v1527_v6 = vsel %vm5502_vm9, %v1526_v13, %v5498_v33  ;;  %v1539_v37 = vxor.u32 2147483648, %v4802_v56  ;;  %v1629_v31 = vsub.s32 4, %v5503_v9  ;;  %v1932_v27 = vand.u32 2147483647, %v1931_v28  ;;  %3021 = vmatmul.mubr.bf16.vlgmr.msra.gmra.mrb[0].mxu1 %v2180_v35 }
 0x306   : > { %vm1431_vm11 = vcmp.lt.s32.totalorder %v1430_v54, 2  ;;  %vm1432_vm15 = vcmp.eq.s32.totalorder %v1430_v54, 0  ;;  %vm1435_vm13 = vcmp.eq.s32.totalorder %v1430_v54, 2  ;;  %vm1635_vm2 = vweird.f32 %v5504_v45 }
 0x307   : > { %v1434_v3 = vsel %vm1432_vm15, %v5497_v24, %v1433_v10  ;;  %v1437_v39 = vsel %vm1435_vm13, %v1436_v49, %v4669_v25  ;;  %v1529_v4 = vsel %vm4673_vm0, 0, %v1527_v6  ;;  %vm5505_vm1 = vcmp.lt.s32.totalorder %v5504_v45, 0  ;;  %v5508_v25 = vld [vmem:[#allocation30_spill] sm:$0xff] }
 0x308   : > { %v1630_v19 = vsel %vm5505_vm1, %v1629_v31, %v5503_v9  ;;  %v1935_v40 = vmul.f32 %v1934_v50, %v1932_v27  ;;  %v1438_v46 = vsel %vm1431_vm11, %v1434_v3, %v1437_v39  ;;  %v1533_v17 = vand.u32 3, %v1529_v4  ;;  %v5509_v50 = vld [vmem:[#allocation25_spill] sm:$0xff] }
 0x309   : > { %v1632_v52 = vsel %vm4452_vm14, 0, %v1630_v19  ;;  %v1439_v51 = vsel %vm1429_vm4, nan, %v1438_v46  ;;  %v1639_v10 = vxor.u32 2147483648, %v5507_v53  ;;  %v1642_v24 = vxor.u32 2147483648, %v5508_v25  ;;  %v5510_v9 = vld [vmem:[#allocation21_spill] sm:$0xff] }
 0x30a   : > { %v1636_v22 = vand.u32 3, %v1632_v52  ;;  %v1936_v48 = vxor.u32 2147483648, %v1935_v40  ;;  %vm1534_vm0 = vcmp.lt.s32.totalorder %v1533_v17, 2  ;;  %vm1535_vm9 = vcmp.eq.s32.totalorder %v1533_v17, 0  ;;  %v5514_v52 = vld [vmem:[#allocation29_spill] sm:$0xff] }
 0x30b   : > { %vm1538_vm15 = vcmp.eq.s32.totalorder %v1533_v17, 2  ;;  %v1537_v49 = vsel %vm1535_vm9, %v4802_v56, %v1536_v18  ;;  %v5092_v13 = vmul.f32 0.125, %v1439_v51  ;;  %v1732_v6 = vsub.s32 4, %v5509_v50 }
 0x30c   : > { %v1540_v33 = vsel %vm1538_vm15, %v1539_v37, %v4811_v61  ;;  %vm1637_vm11 = vcmp.lt.s32.totalorder %v1636_v22, 2  ;;  %v1937_v63 = vsel %vm1854_vm12, %v1936_v48, %v1935_v40  ;;  %vm1638_vm14 = vcmp.eq.s32.totalorder %v1636_v22, 0 }
 0x30d   : > { %v1541_v14 = vsel %vm1534_vm0, %v1537_v49, %v1540_v33  ;;  %vm1641_vm4 = vcmp.eq.s32.totalorder %v1636_v22, 2  ;;  %v1940_v28 = vsel %vm5063_vm3, %v4618_v41, %v1937_v63  ;;  %v1640_v56 = vsel %vm1638_vm14, %v5508_v25, %v1639_v10 }
 0x30e   : > { %v1542_v35 = vsel %vm1532_vm10, nan, %v1541_v14  ;;  %v1643_v61 = vsel %vm1641_vm4, %v1642_v24, %v5507_v53  ;;  %3267 = vcosq.f32 %v1940_v28  ;;  %vm5511_vm10 = vcmp.lt.s32.totalorder %v5510_v9, 0 }
 0x30f   : > { %v5103_v54 = vmul.f32 0.125, %v1542_v35  ;;  %v1644_v18 = vsel %vm1637_vm11, %v1640_v56, %v1643_v61  ;;  %3269 = vsinq.f32 %v1940_v28  ;;  %v1733_v31 = vsel %vm5511_vm10, %v1732_v6, %v5509_v50 }
 0x310   : > { %v1645_v37 = vsel %vm1635_vm2, nan, %v1644_v18  ;;  %3271 = vcosq.f32 %v4966_v36  ;;  %vm1738_vm13 = vweird.f32 %v5510_v9  ;;  %v1735_v3 = vsel %vm4580_vm8, 0, %v1733_v31 }
 0x311   : > { %v2181_v30 = vpack.c.bf16 %v5103_v54, %v5092_v13  ;;  %v1742_v39 = vxor.u32 2147483648, %v4796_v8  ;;  %v1745_v4 = vxor.u32 2147483648, %v4736_v55  ;;  %v1835_v45 = vsub.s32 4, %v4732_v59 }
 0x312   : > { %v1739_v36 = vand.u32 3, %v1735_v3  ;;  %v5120_v19 = vmul.f32 0.125, %v1645_v37  ;;  %vm1841_vm2 = vweird.f32 %v4511_v57  ;;  %v1938_v40 = vsub.s32 4, %v4943_v58 }
 0x313   : > { %3024 = vmatprep.mubr.bf16.mxu1 %v2181_v30  ;;  %vm5513_vm1 = vcmp.lt.s32.totalorder %v4511_v57, 0  ;;  %v1845_v17 = vxor.u32 2147483648, %v5011_v26  ;;  %v1848_v47 = vxor.u32 2147483648, %v4945_v2  ;;  %v2041_v51 = vsub.s32 4, %v5514_v52 }
 0x314   : > { %v1836_v46 = vsel %vm5513_vm1, %v1835_v45, %v4732_v59  ;;  %vm1740_vm8 = vcmp.lt.s32.totalorder %v1739_v36, 2  ;;  %vm1741_vm0 = vcmp.eq.s32.totalorder %v1739_v36, 0  ;;  %vm1744_vm9 = vcmp.eq.s32.totalorder %v1739_v36, 2 }
 0x315   : > { %v1838_v22 = vsel %vm4832_vm7, 0, %v1836_v46  ;;  %v1743_v53 = vsel %vm1741_vm0, %v4736_v55, %v1742_v39  ;;  %v1746_v10 = vsel %vm1744_vm9, %v1745_v4, %v4796_v8  ;;  %v1939_v59 = vsel %vm1854_vm12, %v1938_v40, %v4943_v58 }
 0x316   : > { %v1842_v25 = vand.u32 3, %v1838_v22  ;;  %v1747_v24 = vsel %vm1740_vm8, %v1743_v53, %v1746_v10  ;;  %v1941_v48 = vsel %vm5063_vm3, 0, %v1939_v59  ;;  %vm1944_vm15 = vweird.f32 %v4618_v41  ;;  %v3281_v10 = vld [vmem:[%s3490_s21 + $0x8] sm:$0xff] }
 0x317   : > { %vm5515_vm11 = vcmp.lt.s32.totalorder %v4296_v44, 0  ;;  %v1748_v55 = vsel %vm1738_vm13, nan, %v1747_v24  ;;  %v1945_v33 = vand.u32 3, %v1941_v48  ;;  %v2144_v56 = vsub.s32 4, %v4798_v1  ;;  %v3284_v59 = vld [vmem:[%s3490_s21 + $0x28] sm:$0xff]  ;;  %v3285_v24 = vld [vmem:[%s3490_s21 + $0x30] sm:$0xff] }
 0x318   : > { %v2042_v38 = vsel %vm5515_vm11, %v2041_v51, %v5514_v52  ;;  %vm1843_vm7 = vcmp.lt.s32.totalorder %v1842_v25, 2  ;;  %vm1844_vm14 = vcmp.eq.s32.totalorder %v1842_v25, 0  ;;  %vm1847_vm4 = vcmp.eq.s32.totalorder %v1842_v25, 2  ;;  %v3268_v8 = vpop.eup %3267  ;;  %v3280_v52 = vld [vmem:[%s3490_s21 + $0x10] sm:$0xff]  ;;  %v3286_v48 = vld [vmem:[%s3490_s21 + $0x38] sm:$0xff] }
 0x319   : > { %v5145_v49 = vmul.f32 0.125, %v1748_v55  ;;  %v1846_v58 = vsel %vm1844_vm14, %v4945_v2, %v1845_v17  ;;  %v1849_v11 = vsel %vm1847_vm4, %v1848_v47, %v5011_v26  ;;  %v3270_v63 = vpop.eup %3269  ;;  %v1951_v28 = vxor.u32 2147483648, %v3268_v8  ;;  %v3279_v47 = vld [vmem:[%s3490_s21] sm:$0xff]  ;;  %v3288_v55 = vld [vmem:[%s3490_s21 + $0x48] sm:$0xff] }
 0x31a   : > { %v1850_v14 = vsel %vm1843_vm7, %v1846_v58, %v1849_v11  ;;  %v2044_v35 = vsel %vm4728_vm5, 0, %v2042_v38  ;;  %v3272_v61 = vpop.eup %3271  ;;  %v2051_v2 = vxor.u32 2147483648, %v4824_v62  ;;  %v2054_v26 = vxor.u32 2147483648, %v4819_v29  ;;  %v3287_v38 = vld [vmem:[%s3490_s21 + $0x40] sm:$0xff]  ;;  %v3290_v58 = vld [vmem:[%s3490_s21 + $0x58] sm:$0xff] }
 0x31b   : > { %v2182_v18 = vpack.c.bf16 %v5145_v49, %v5120_v19  ;;  %v1851_v50 = vsel %vm1841_vm2, nan, %v1850_v14  ;;  %vm1946_vm12 = vcmp.lt.s32.totalorder %v1945_v33, 2  ;;  %v1948_v6 = vxor.u32 2147483648, %v3270_v63  ;;  %v3291_v11 = vld [vmem:[%s3490_s21 + $0x60] sm:$0xff]  ;;  %v3294_v14 = vld [vmem:[%s3490_s21 + $0x78] sm:$0xff] }
 0x31c   : > { %vm1950_vm3 = vcmp.eq.s32.totalorder %v1945_v33, 2  ;;  %v2048_v37 = vand.u32 3, %v2044_v35  ;;  %vm1947_vm10 = vcmp.eq.s32.totalorder %v1945_v33, 0  ;;  %vm5516_vm5 = vcmp.lt.s32.totalorder %v4613_v34, 0  ;;  %v3292_v33 = vld [vmem:[%s3490_s21 + $0x68] sm:$0xff] }
 0x31d   : > { %3025 = vmatmul.mubr.bf16.gmra.mrb[4].mxu1 %v2182_v18  ;;  %v1952_v0 = vsel %vm1950_vm3, %v1951_v28, %v3270_v63  ;;  %v2145_v30 = vsel %vm5516_vm5, %v2144_v56, %v4798_v1  ;;  %v2154_v9 = vxor.u32 2147483648, %v5031_v16  ;;  %v1949_v31 = vsel %vm1947_vm10, %v3268_v8, %v1948_v6  ;;  %v3289_v8 = vld [vmem:[%s3490_s21 + $0x50] sm:$0xff]  ;;  %v2917_v28 = vld [vmem:[%s5203_s16] sm:$0xff]   ;;  %v2948_v35 = vld [vmem:[%s5203_s16 + $0x8] sm:$0xff]  }
 0x31e   : > { %vm2049_vm13 = vcmp.lt.s32.totalorder %v2048_v37, 2  ;;  %vm2050_vm2 = vcmp.eq.s32.totalorder %v2048_v37, 0  ;;  %vm2053_vm1 = vcmp.eq.s32.totalorder %v2048_v37, 2  ;;  %v1953_v57 = vsel %vm1946_vm12, %v1949_v31, %v1952_v0  ;;  %v3293_v63 = vld [vmem:[%s3490_s21 + $0x70] sm:$0xff] }
 0x31f   : > { %v2052_v27 = vsel %vm2050_vm2, %v4819_v29, %v2051_v2  ;;  %v2055_v3 = vsel %vm2053_vm1, %v2054_v26, %v4824_v62  ;;  %v2147_v39 = vsel %vm4949_vm6, 0, %v2145_v30  ;;  %v1954_v4 = vsel %vm1944_vm15, nan, %v1953_v57  ;;  %v2949_v26 = vld [vmem:[%s5203_s16 + $0x10] sm:$0xff]  }
 0x320   : > { %v2056_v45 = vsel %vm2049_vm13, %v2052_v27, %v2055_v3  ;;  %v2151_v1 = vand.u32 3, %v2147_v39  ;;  %v2157_v36 = vxor.u32 2147483648, %v3272_v61  ;;  %v5168_v40 = vmul.f32 0.125, %v1851_v50  ;;  %v2950_v27 = vld [vmem:[%s5203_s16 + $0x18] sm:$0xff]  }
 0x321   : > { %v5170_v46 = vmul.f32 0.125, %v1954_v4  ;;  %vm2047_vm8 = vweird.f32 %v4296_v44  ;;  %v3383_v62 = vmov 8   ;;  %vm2150_vm15 = vweird.f32 %v4613_v34  ;;  %v3283_v34 = vld [vmem:[%s3490_s21 + $0x20] sm:$0xff] }
 0x322   : > { %v2057_v29 = vsel %vm2047_vm8, nan, %v2056_v45  ;;  %vm2153_vm0 = vcmp.eq.s32.totalorder %v2151_v1, 0  ;;  %vm2156_vm9 = vcmp.eq.s32.totalorder %v2151_v1, 2  ;;  %3195 = vset.pattern.permute.xlu0 %v3383_v62  ;;  %3196 = vset.pattern.permute.xlu1 %v3383_v62  ;;  %vm2152_vm6 = vcmp.lt.s32.totalorder %v2151_v1, 2 }
 0x323   : > { %v2183_v41 = vpack.c.bf16 %v5170_v46, %v5168_v40  ;;  %v2155_v12 = vsel %vm2153_vm0, %v3272_v61, %v2154_v9  ;;  %v2158_v17 = vsel %vm2156_vm9, %v2157_v36, %v5031_v16  ;;  %2421 = vperm.xlu0 %3195, %v3279_v47   ;;  %2431 = vperm.xlu1 %3196, %v3280_v52   ;;  %v5179_v22 = vmul.f32 0.125, %v2057_v29  ;;  %v3282_v16 = vld [vmem:[%s3490_s21 + $0x18] sm:$0xff]  ;;  %s3299_s21 = sshll.u32 %s3384_s29, 4  ;;  %s3300_s21 = int_to_ptr.vmem [resolvable:$false] %s3299_s21 }
 0x324   : > { %v2159_v44 = vsel %vm2152_vm6, %v2155_v12, %v2158_v17  ;;  %v2918_v56 = vunpack.c.l.bf16 %v2917_v28  ;;  %v2922_v50 = vunpack.c.l.bf16 %v2948_v35  ;;  %v2919_v2 = vunpack.c.h.bf16 %v2917_v28  ;;  %s3301_s19 = scalar_lea.vmem %s3300_s21, 256  ;;  %p3302_p1 = scmp.lt.s32.totalorder %s5274_s24, %s3300_s21 }
 0x325   : > { %3028 = vmatprep.mubr.bf16.mxu1 %v2183_v41  ;;  %v2160_v51 = vsel %vm2150_vm15, nan, %v2159_v44  ;;  %v2923_v37 = vunpack.c.h.bf16 %v2948_v35  ;;  %v2926_v57 = vunpack.c.l.bf16 %v2949_v26  ;;  %v2927_v4 = vunpack.c.h.bf16 %v2949_v26  ;;  %v2951_v41 = vld [vmem:[%s5203_s16 + $0x20] sm:$0xff]   ;;  %p3303_p2 = scmp.lt.s32.totalorder %s3301_s19, %s3295_s17 }
 0x326   : > { %v5181_v53 = vmul.f32 0.125, %v2160_v51  ;;  %v2930_v62 = vunpack.c.l.bf16 %v2950_v27  ;;  %v2931_v47 = vunpack.c.h.bf16 %v2950_v27  ;;  %vm2697_vm1 = vcmask 1040384  }
 0x327   : > { %2426 = vperm.xlu0 %3195, %v3281_v10   ;;  %2436 = vperm.xlu1 %3196, %v3282_v16   ;;  %v2934_v16 = vunpack.c.l.bf16 %v2951_v41  ;;  %p3304_p3 = por %p3303_p2, %p3302_p1 }
 0x328   : > { %v2184_v25 = vpack.c.bf16 %v5181_v53, %v5179_v22 }
 0x329   : > { %p3305_p5 = pnand %p3304_p3, %p3298_p0 }
 0x32a   : > { %3029 = vmatmul.mubr.bf16.gmra.mrb[8].mxu1 %v2184_v25  ;;  %v2952_v25 = vld [vmem:[%s5203_s16 + $0x28] sm:$0xff]  }
 0x32b   : > { %2441 = vperm.xlu0 %3195, %v3283_v34   ;;  %2446 = vperm.xlu1 %3196, %v3284_v59  }
 0x32f   : > { %2451 = vperm.xlu0 %3195, %v3285_v24   ;;  %2456 = vperm.xlu1 %3196, %v3286_v48   ;;  %v2935_v24 = vunpack.c.h.bf16 %v2951_v41 }
 0x333   : > { %2461 = vperm.xlu0 %3195, %v3287_v38   ;;  %2466 = vperm.xlu1 %3196, %v3288_v55  }
 0x337   : > { %2471 = vperm.xlu0 %3195, %v3289_v8   ;;  %2476 = vperm.xlu1 %3196, %v3290_v58   ;;  %v2938_v58 = vunpack.c.l.bf16 %v2952_v25 }
 0x33b   : > { %2481 = vperm.xlu0 %3195, %v3291_v11   ;;  %2486 = vperm.xlu1 %3196, %v3292_v33   ;;  %v2953_v11 = vld [vmem:[%s5203_s16 + $0x30] sm:$0xff]  }
 0x33f   : > { %2491 = vperm.xlu0 %3195, %v3293_v63   ;;  %2496 = vperm.xlu1 %3196, %v3294_v14   ;;  %v2939_v14 = vunpack.c.h.bf16 %v2952_v25 }
 0x3a2   : > { %v2422_v61 = vpop.permute.xlu0 %2421  ;;  %v2432_v18 = vpop.permute.xlu1 %2431 }
 0x3a3   : > { %v2499_v6 = vmul.f32 %v2918_v56, %v2422_v61  ;;  %v2501_v9 = vmul.f32 %v2922_v50, %v2432_v18  ;;  %v2942_v18 = vunpack.c.l.bf16 %v2953_v11  ;;  %v2954_v50 = vld [vmem:[%s5203_s16 + $0x38] sm:$0xff]   ;;  %s2724_s16 = scalar_lea.sflag [#allocation7], %s309_s18 }
 0x3a6   : > { %v2427_v0 = vpop.permute.xlu0 %2426  ;;  %v2437_v30 = vpop.permute.xlu1 %2436 }
 0x3a7   : > { %v2500_v31 = vmul.f32 %v2919_v2, %v2427_v0  ;;  %v2502_v39 = vmul.f32 %v2923_v37, %v2437_v30 }
 0x3a9   : > { %v2515_v3 = vadd.f32 %v2500_v31, %v2499_v6  ;;  %v2943_v6 = vunpack.c.h.bf16 %v2953_v11  ;;  %v2946_v31 = vunpack.c.l.bf16 %v2954_v50 }
 0x3aa   : > { %v2442_v45 = vpop.permute.xlu0 %2441  ;;  %v2447_v1 = vpop.permute.xlu1 %2446 }
 0x3ab   : > { %v2516_v36 = vadd.f32 %v2515_v3, %v2501_v9  ;;  %v2503_v29 = vmul.f32 %v2926_v57, %v2442_v45  ;;  %v2504_v17 = vmul.f32 %v2927_v4, %v2447_v1  ;;  %v2947_v3 = vunpack.c.h.bf16 %v2954_v50 }
 0x3ad   : > { %v2517_v12 = vadd.f32 %v2516_v36, %v2502_v39 }
 0x3ae   : > { %v2452_v52 = vpop.permute.xlu0 %2451  ;;  %v2457_v44 = vpop.permute.xlu1 %2456 }
 0x3af   : > { %v2518_v51 = vadd.f32 %v2517_v12, %v2503_v29  ;;  %v2505_v10 = vmul.f32 %v2930_v62, %v2452_v52  ;;  %v2506_v59 = vmul.f32 %v2931_v47, %v2457_v44 }
 0x3b1   : > { %v2519_v34 = vadd.f32 %v2518_v51, %v2504_v17 }
 0x3b2   : > { %v2462_v48 = vpop.permute.xlu0 %2461  ;;  %v2467_v38 = vpop.permute.xlu1 %2466 }
 0x3b3   : > { %v2520_v55 = vadd.f32 %v2519_v34, %v2505_v10  ;;  %v2507_v8 = vmul.f32 %v2934_v16, %v2462_v48  ;;  %v2508_v63 = vmul.f32 %v2935_v24, %v2467_v38  ;;  %v2544_v34 = vld [vmem:[%s5323_s4] sm:$0x1] }
 0x3b5   : > { %v2521_v33 = vadd.f32 %v2520_v55, %v2506_v59 }
 0x3b6   : > { %v2472_v28 = vpop.permute.xlu0 %2471  ;;  %v2477_v35 = vpop.permute.xlu1 %2476 }
 0x3b7   : > { %v2522_v56 = vadd.f32 %v2521_v33, %v2507_v8  ;;  %v2509_v61 = vmul.f32 %v2938_v58, %v2472_v28  ;;  %v2510_v26 = vmul.f32 %v2939_v14, %v2477_v35  ;;  %v2418_v35 = vld [vmem:[#allocation3] sm:$0x1] }
 0x3b9   : > { %v2523_v2 = vadd.f32 %v2522_v56, %v2508_v63 }
 0x3ba   : > { %v2482_v37 = vpop.permute.xlu0 %2481  ;;  %v2487_v0 = vpop.permute.xlu1 %2486 }
 0x3bb   : > { %v2524_v30 = vadd.f32 %v2523_v2, %v2509_v61  ;;  %v2511_v9 = vmul.f32 %v2942_v18, %v2482_v37  ;;  %v2512_v27 = vmul.f32 %v2943_v6, %v2487_v0 }
 0x3bd   : > { %v2525_v57 = vadd.f32 %v2524_v30, %v2510_v26 }
 0x3be   : > { %v2492_v39 = vpop.permute.xlu0 %2491  ;;  %v2497_v4 = vpop.permute.xlu1 %2496 }
 0x3bf   : > { %v2526_v45 = vadd.f32 %v2525_v57, %v2511_v9  ;;  %v2513_v1 = vmul.f32 %v2946_v31, %v2492_v39  ;;  %v2514_v29 = vmul.f32 %v2947_v3, %v2497_v4  ;;  %v3018_v62 = vpop.f32.mrb[16].mxu0  ;;  %v5517_v9 = vmov 683565275  }
 0x3c0   : > { %v2283_v12 = vpop.f32.mrb[17].mxu0  ;;  %v2349_v16 = vmul.f32 %v3018_v62, %v4922_v32  ;;  %v5518_v57 = vmov 2475754826  }
 0x3c1   : > { %v2527_v36 = vadd.f32 %v2526_v45, %v2512_v27  ;;  %v3019_v17 = vpop.f32.mrb[18].mxu0  ;;  %v2347_v44 = vmul.f32 %v2283_v12, %v4891_v43  ;;  %v5519_v45 = vmov 2131351028  }
 0x3c2   : > { %v2286_v52 = vpop.f32.mrb[19].mxu0  ;;  %v2350_v24 = vmul.f32 %v3019_v17, %v4897_v5 }
 0x3c3   : > { %v2528_v41 = vadd.f32 %v2527_v36, %v2513_v1  ;;  %v2348_v51 = vmul.f32 %v2286_v52, %v4916_v21 }
 0x3c5   : > { %v2529_v47 = vadd.f32 %v2528_v41, %v2514_v29  ;;  %v2363_v25 = vadd.f32 %v2348_v51, %v2347_v44  ;;  %v5520_v29 = vmov 2102212464  }
 0x3c7   : > { %v2530_v10 = vrot.slane %v2529_v47, 4  ;;  %v2364_v48 = vadd.f32 %v2363_v25, %v2349_v16 }
 0x3c8   : > { %v2585_v38 = vpop.f32.mrb[20].mxu0 }
 0x3c9   : > { %v2531_v59 = vadd.f32 %v2530_v10, %v2529_v47  ;;  %v5220_v8 = vadd.f32 %v2585_v38, %v2544_v34  ;;  %v3036_v58 = vpop.f32.mrb[21].mxu0  ;;  %v2365_v43 = vadd.f32 %v2364_v48, %v2350_v24 }
 0x3ca   : > { %v2588_v11 = vpop.f32.mrb[22].mxu0 }
 0x3cb   : > { %v2532_v55 = vrot.slane %v2531_v59, 2  ;;  %v2594_v33 = vand.u32 2139095040, %v5220_v8  ;;  %v3037_v32 = vpop.f32.mrb[23].mxu0  ;;  %v2591_v63 = vand.u32 2147483647, %v5220_v8  ;;  %vm2593_vm5 = vcmp.lt.s32.totalorder %v5220_v8, 0 }
 0x3cc   : > { %vm2683_vm9 = vweird.f32 %v5220_v8 }
 0x3cd   : > { %v2533_v21 = vadd.f32 %v2532_v55, %v2531_v59  ;;  %v2595_v28 = vshrl.u32 %v2594_v33, 23  ;;  %v2598_v5 = vand.u32 8388607, %v2591_v63  ;;  %vm2592_vm13 = vcmp.le.f32.partialorder %v2591_v63, 0.7853982 }
 0x3cf   : > { %v2534_v14 = vrot.slane %v2533_v21, 1  ;;  %v2908_v61 = vadd.s32 4294967169, %v2595_v28  ;;  %v2599_v2 = vor.u32 8388608, %v2598_v5 }
 0x3d1   : > { %v2535_v56 = vadd.f32 %v2534_v14, %v2533_v21  ;;  %v2601_v50 = vadd.s32 1, %v2908_v61  ;;  %v2639_v3 = vshll.u32 %v2599_v2, 8 }
 0x3d3   : > { %v2536_v18 = vadd.f32 %v2535_v56, %v2418_v35  ;;  %vm2602_vm11 = vcmp.gt.s32.totalorder %v2601_v50, 0 }
 0x3d4   : > { %v2603_v26 = vsel %vm2602_vm11, %v2601_v50, 0 }
 0x3d5   : > { %2537 = vst [vmem:[#allocation3] sm:$0x1] %v2536_v18  ;;  %v2605_v6 = vand.u32 31, %v2603_v26  ;;  %v2604_v0 = vshrl.u32 %v2603_v26, 5 }
 0x3d7   : > { %v2606_v30 = vsub.s32 32, %v2605_v6  ;;  %v2608_v31 = vshll.u32 %v5517_v9, %v2605_v6  ;;  %v2611_v27 = vshll.u32 %v5518_v57, %v2605_v6  ;;  %v2614_v36 = vshll.u32 %v5519_v45, %v2605_v6 }
 0x3d8   : > { %v3022_v37 = vpop.f32.mrb[0].mxu1  ;;  %v2617_v12 = vshll.u32 %v5520_v29, %v2605_v6  ;;  %v2620_v47 = vshll.u32 %v5422_v15, %v2605_v6  ;;  %vm2623_vm7 = vcmp.lt.s32.totalorder %v2604_v0, 1  ;;  %vm2626_vm14 = vcmp.lt.s32.totalorder %v2604_v0, 4 }
 0x3d9   : > { %v2299_v39 = vpop.f32.mrb[1].mxu1  ;;  %v2609_v4 = vshrl.u32 %v5518_v57, %v2606_v30  ;;  %v2612_v1 = vshrl.u32 %v5519_v45, %v2606_v30  ;;  %v2615_v62 = vshrl.u32 %v5520_v29, %v2606_v30  ;;  %v2618_v17 = vshrl.u32 %v5422_v15, %v2606_v30 }
 0x3da   : > { %v3023_v41 = vpop.f32.mrb[2].mxu1  ;;  %v2621_v52 = vshrl.u32 %v5425_v20, %v2606_v30  ;;  %v2351_v59 = vmul.f32 %v2299_v39, %v5024_v7  ;;  %v2607_v24 = vshrl.u32 %v5517_v9, %v2606_v30  ;;  %vm2625_vm4 = vcmp.lt.s32.totalorder %v2604_v0, 3 }
 0x3db   : > { %v2302_v44 = vpop.f32.mrb[3].mxu1  ;;  %v2610_v51 = vor.u32 %v2609_v4, %v2608_v31  ;;  %v2613_v10 = vor.u32 %v2612_v1, %v2611_v27  ;;  %v2616_v16 = vor.u32 %v2615_v62, %v2614_v36  ;;  %v2619_v25 = vor.u32 %v2618_v17, %v2617_v12 }
 0x3dc   : > { %v2622_v34 = vor.u32 %v2621_v52, %v2620_v47  ;;  %v2366_v58 = vadd.f32 %v2365_v43, %v2351_v59  ;;  %vm2624_vm12 = vcmp.lt.s32.totalorder %v2604_v0, 2  ;;  %v2352_v33 = vmul.f32 %v2302_v44, %v5041_v60 }
 0x3dd   : > { %v2628_v48 = vsel %vm2626_vm14, %v2616_v16, 2102212464  ;;  %v2631_v38 = vsel %vm2623_vm7, %v2610_v51, %v2613_v10  ;;  %v2635_v55 = vsel %vm2623_vm7, %v2613_v10, %v2616_v16  ;;  %v2632_v15 = vsel %vm2626_vm14, %v2619_v25, 920167782 }
 0x3de   : > { %v2636_v20 = vsel %vm2626_vm14, %v2622_v34, 1326507024  ;;  %v2633_v11 = vsel %vm2625_vm4, %v2616_v16, %v2632_v15  ;;  %v2627_v32 = vsel %vm2623_vm7, %v2607_v24, %v2610_v51  ;;  %v2629_v14 = vsel %vm2625_vm4, %v2613_v10, %v2628_v48 }
 0x3df   : > { %v2637_v21 = vsel %vm2625_vm4, %v2619_v25, %v2636_v20  ;;  %v2634_v7 = vsel %vm2624_vm12, %v2631_v38, %v2633_v11  ;;  %v2353_v18 = vmul.f32 %v3022_v37, %v5045_v23  ;;  %v2367_v50 = vadd.f32 %v2366_v58, %v2352_v33 }
 0x3e0   : > { %v2638_v28 = vsel %vm2624_vm12, %v2635_v55, %v2637_v21  ;;  %v5245_v61 = vmul.u32.u64.low %v2639_v3, %v2634_v7  ;;  %v5246_v5 = vmul.u32.u64.high %v2639_v3, %v2634_v7, %v5245_v61  ;;  %v2630_v43 = vsel %vm2624_vm12, %v2627_v32, %v2629_v14 }
 0x3e1   : > { %v5242_v35 = vmul.u32.u64.low %v2639_v3, %v2638_v28  ;;  %v5243_v56 = vmul.u32.u64.high %v2639_v3, %v2638_v28, %v5242_v35  ;;  %v2354_v2 = vmul.f32 %v3023_v41, %v5053_v42  ;;  %v2368_v26 = vadd.f32 %v2367_v50, %v2353_v18 }
 0x3e2   : > { %v2649_v60 = vadd.s32 1, %v5246_v5  ;;  %v2646_v6 = vmul.u32 %v2639_v3, %v2630_v43 }
 0x3e3   : > { %vm2648_vm3 = vc.u32 %v5243_v56, %v5245_v61  ;;  %v2369_v0 = vadd.f32 %v2368_v26, %v2354_v2  ;;  %v2647_v16 = vadd.s32 %v5245_v61, %v5243_v56  ;;  %v2346_v2 = vld [vmem:[#allocation4] sm:$0x1] }
 0x3e4   : > { %v2650_v30 = vsel %vm2648_vm3, %v2649_v60, %v5246_v5 }
 0x3e5   : > { %v2651_v9 = vadd.s32 %v2650_v30, %v2646_v6 }
 0x3e7   : > { %v2652_v31 = vadd.s32 536870912, %v2651_v9 }
 0x3e9   : > { %v2653_v57 = vshrl.u32 %v2652_v31, 30 }
 0x3eb   : > { %v2654_v39 = vshll.u32 %v2653_v57, 30 }
 0x3ed   : > { %v2655_v45 = vsub.s32 %v2651_v9, %v2654_v39 }
 0x3ef   : > { %v2657_v29 = vsub.s32 0, %v2655_v45 }
 0x3f0   : > { %v3026_v27 = vpop.f32.mrb[4].mxu1 }
 0x3f1   : > { %v2315_v4 = vpop.f32.mrb[5].mxu1  ;;  %v2357_v3 = vmul.f32 %v3026_v27, %v5120_v19  ;;  %v2909_v41 = vmin.u32 %v2657_v29, %v2655_v45 }
 0x3f2   : > { %v2355_v23 = vmul.f32 %v2315_v4, %v5092_v13  ;;  %v3027_v37 = vpop.f32.mrb[6].mxu1 }
 0x3f3   : > { %v2318_v42 = vpop.f32.mrb[7].mxu1  ;;  %v2358_v12 = vmul.f32 %v3027_v37, %v5145_v49  ;;  %v2659_v47 = vclz %v2909_v41 }
 0x3f4   : > { %v2370_v1 = vadd.f32 %v2369_v0, %v2355_v23  ;;  %v2356_v36 = vmul.f32 %v2318_v42, %v5103_v54  ;;  %v2695_v42 = vld [vmem:[#allocation3] sm:$0x1] }
 0x3f5   : > { %v2910_v44 = vadd.s32 4294967294, %v2659_v47 }
 0x3f6   : > { %v2371_v62 = vadd.f32 %v2370_v1, %v2356_v36 }
 0x3f7   : > { %vm2911_vm10 = vcmp.lt.s32.totalorder %v2910_v44, 0 }
 0x3f8   : > { %v2372_v17 = vadd.f32 %v2371_v62, %v2357_v3  ;;  %v2662_v13 = vsel %vm2911_vm10, 0, %v2910_v44 }
 0x3f9   : > { %v2663_v25 = vsub.s32 32, %v2662_v13  ;;  %v2667_v34 = vsub.s32 4294967266, %v2662_v13  ;;  %v2664_v19 = vshll.u32 %v2655_v45, %v2662_v13 }
 0x3fa   : > { %v2373_v52 = vadd.f32 %v2372_v17, %v2358_v12 }
 0x3fb   : > { %v2665_v48 = vshrl.u32 %v2647_v16, %v2663_v25  ;;  %v2668_v38 = vadd.s32 127, %v2667_v34 }
 0x3fd   : > { %v3030_v51 = vpop.f32.mrb[8].mxu1  ;;  %v2666_v15 = vor.u32 %v2665_v48, %v2664_v19  ;;  %v2669_v20 = vshll.u32 %v2668_v38, 23 }
 0x3fe   : > { %v2331_v10 = vpop.f32.mrb[9].mxu1  ;;  %v2361_v58 = vmul.f32 %v3030_v51, %v5179_v22  ;;  %v2677_v22 = vsub.s32 4, %v2653_v57 }
 0x3ff   : > { %v2359_v54 = vmul.f32 %v2331_v10, %v5168_v40  ;;  %v3031_v59 = vpop.f32.mrb[10].mxu1  ;;  %v2670_v21 = vor.u32 4788187, %v2669_v20  ;;  %v2673_v7 = vcvt.s32.f32 %v2666_v15 }
 0x400   : > { %v2334_v24 = vpop.f32.mrb[11].mxu1  ;;  %v2362_v33 = vmul.f32 %v3031_v59, %v5181_v53  ;;  %v2678_v43 = vsel %vm2593_vm5, %v2677_v22, %v2653_v57 }
 0x401   : > { %v2374_v49 = vadd.f32 %v2373_v52, %v2359_v54  ;;  %v2360_v55 = vmul.f32 %v2334_v24, %v5170_v46  ;;  %v2671_v14 = vand.u32 2147483647, %v2670_v21  ;;  %v2680_v60 = vsel %vm2592_vm13, 0, %v2678_v43 }
 0x402   : > { %v2684_v0 = vand.u32 3, %v2680_v60 }
 0x403   : > { %v2375_v11 = vadd.f32 %v2374_v49, %v2360_v55  ;;  %v2674_v28 = vmul.f32 %v2673_v7, %v2671_v14 }
 0x404   : > { %vm2689_vm2 = vcmp.eq.s32.totalorder %v2684_v0, 2  ;;  %vm2686_vm8 = vcmp.eq.s32.totalorder %v2684_v0, 0  ;;  %vm2685_vm0 = vcmp.lt.s32.totalorder %v2684_v0, 2 }
 0x405   : > { %v2376_v32 = vadd.f32 %v2375_v11, %v2361_v58  ;;  %v2675_v56 = vxor.u32 2147483648, %v2674_v28 }
 0x407   : > { %v2377_v40 = vadd.f32 %v2376_v32, %v2362_v33  ;;  %v2676_v46 = vsel %vm2593_vm5, %v2675_v56, %v2674_v28 }
 0x408   : > { %v2679_v18 = vsel %vm2592_vm13, %v5220_v8, %v2676_v46 }
 0x409   : > { %v2378_v35 = vrot.slane %v2377_v40, 4  ;;  %3273 = vcosq.f32 %v2679_v18 }
 0x40a   : > { %3275 = vsinq.f32 %v2679_v18 }
 0x40b   : > { %v2379_v61 = vadd.f32 %v2378_v35, %v2377_v40 }
 0x40d   : > { %v2380_v5 = vrot.slane %v2379_v61, 2 }
 0x40f   : > { %v2381_v53 = vadd.f32 %v2380_v5, %v2379_v61 }
 0x411   : > { %v2382_v50 = vrot.slane %v2381_v53, 1 }
 0x413   : > { %v2383_v26 = vadd.f32 %v2382_v50, %v2381_v53  ;;  %v3274_v30 = vpop.eup %3273 }
 0x414   : > { %v3276_v9 = vpop.eup %3275  ;;  %v2690_v31 = vxor.u32 2147483648, %v3274_v30 }
 0x415   : > { %v2384_v6 = vadd.f32 %v2383_v26, %v2346_v2  ;;  %v2687_v63 = vxor.u32 2147483648, %v3276_v9 }
 0x416   : > { %v2691_v27 = vsel %vm2689_vm2, %v2690_v31, %v3276_v9 }
 0x417   : > { %2385 = vst [vmem:[#allocation4] sm:$0x1] %v2384_v6  ;;  %v2688_v39 = vsel %vm2686_vm8, %v3274_v30, %v2687_v63 }
 0x418   : > { %v2692_v57 = vsel %vm2685_vm0, %v2688_v39, %v2691_v27 }
 0x419   : > { %v2693_v37 = vsel %vm2683_vm9, nan, %v2692_v57 }
 0x41a   : > { %v2694_v45 = vmul.f32 0.125, %v2693_v37 }
 0x41c   : > { %v2696_v1 = vmul.f32 %v2695_v42, %v2694_v45 }
 0x41e   : > { %v2708_v4 = vld [vmem:[#allocation4] sm:$0x1]  ;;  %v2698_v36 = vsel %vm2697_vm1, %v2696_v1, 0.0 }
 0x41f   : > { %v2709_v23 = vsel %vm2697_vm1, %v2708_v4, 0.0  ;;  %2699 = vadd.xlane.f32.xlu0 %v2698_v36 }
 0x420   : > { %2710 = vadd.xlane.f32.xlu1 %v2709_v23 }
 0x4ac   : > { %v2700_v12 = vpop.xlane.xlu0 %2699 }
 0x4ad   : > { %v2711_v29 = vpop.xlane.xlu1 %2710  ;;  %v2701_v17 = vrot.slane %v2700_v12, 4 }
 0x4ae   : > { %v2712_v3 = vrot.slane %v2711_v29, 4 }
 0x4af   : > { %v2702_v47 = vadd.f32 %v2701_v17, %v2700_v12 }
 0x4b0   : > { %v2713_v62 = vadd.f32 %v2712_v3, %v2711_v29 }
 0x4b1   : > { %v2703_v8 = vrot.slane %v2702_v47, 2 }
 0x4b2   : > { %v2714_v41 = vrot.slane %v2713_v62, 2 }
 0x4b3   : > { %v2704_v44 = vadd.f32 %v2703_v8, %v2702_v47 }
 0x4b4   : > { %v2715_v52 = vadd.f32 %v2714_v41, %v2713_v62 }
 0x4b5   : > { %v2705_v13 = vrot.slane %v2704_v44, 1 }
 0x4b6   : > { %v2716_v51 = vrot.slane %v2715_v52, 1 }
 0x4b7   : > { %v2706_v10 = vadd.f32 %v2705_v13, %v2704_v44 }
 0x4b8   : > { %v2717_v16 = vadd.f32 %v2716_v51, %v2715_v52 }
 0x4b9   : > { %3127 = vpush %v2706_v10 }
 0x4ba   : > { %3129 = vpush %v2717_v16 }
 0x4ea   : > { %s3128_s22 = spop %3127 }
 0x4eb   : > { %s3130_s25 = spop %3129 }
 0x4ec   : > { %s2719_s0 = sadd.f32 %s3130_s25, %s3128_s22 }
 0x4ee   : > { %v2720_v25 = vstv %s2719_s0 }
 0x4ef   : > { %2722 = vst [vmem:[%s311_s23] sm:$0xff] %v2720_v25 }
 0x4f0   : > { %3308 = shalt.err (!%p3305_p5)
}
 0x4f1   : > { %s3309_s18 = scalar_lea.hbm %s5272_s13, 128  ;;  %s3313_s23 = scalar_lea.hbm %s5326_s7, 256 }
 0x4f2   : > { %p3310_p6 = scmp.ne.s32.totalorder %s5272_s13, %s3309_s18  ;;  %p3314_p10 = scmp.lt.u32.totalorder %s5272_s13, %s5326_s7 }
 0x4f3   : > { %p3315_p11 = scmp.lt.u32.totalorder %s3313_s23, %s3309_s18  ;;  %p3317_p13 = scmp.lt.u32.totalorder %s3309_s18, %s5272_s13 }
 0x4f4   : > { %p3311_p7 = pnand %p3310_p6, %p3468_p4 }
 0x4f5   : > { %p3316_p12 = por %p3315_p11, %p3314_p10 }
 0x4f6   : > { %p3312_p9 = pneg %p3311_p7 }
 0x4f7   : > { %p3318_p0 = por %p3317_p13, %p3316_p12 }
 0x4f9   : > { %p3319_p1 = pnand %p3318_p0, %p3312_p9 }
 0x4fb   : > { %3322 = shalt.err (!%p3319_p1)
}
 0x4fc   : > { %3131 = dma.vmem_to_hbm [thread:$0]  (%p3468_p4), %s5274_s24, 128, %s5272_s13, %s2724_s16  }
 0x4fd PF: > { %p3137_p2 = scmp.ge.s32.totalorder %s3373_s8, 2  ;;  %s2749_s9 = sand.u32 1, %s3353_s26  }
 0x4fe   : > { %s2750_s11 = scalar_lea.sflag [#allocation7], %s2749_s9 }
 0x4ff   : > { %p3134_p3 = pnand %p3137_p2, %p3475_p8 }
 0x501   : > { %3348 = dma.done.wait (!%p3134_p3), %s2750_s11, 128  }
 0x502   : > { %3350 = vsyncadd (!%p3134_p3), %s2750_s11, 4294967168  ;;  %s21_s8 = sadd.s32 1, %s3373_s8   ;;  %s5521_s26 = smov %s3357_s27 }
 0x503   : > { %p18_p5 = scmp.ge.s32.totalorder %s21_s8, 4   ;;  %s5522_s27 = smov %s3361_s28 }
 0x504   : > { %s5523_s28 = smov %s3481_s15  ;;  %s5524_s29 = smov %s3369_s30 }
 0x505   : > { %s5525_s30 = smov %s5527_s10  ;;  %20 = sbr.rel (!%p18_p5) target bundleno = 6 (0x6), region = 94 }
 0x50c   :  { %2755 = vsyncpa [#allocation7], 1 }
 0x50d   :  { %2757 = vsyncpa [#allocation7 + $0x1], 1 }

</bundles_post_ra>
